<compile_context>
chip_gen: v5e
topology: v5e:2x2
jax: 0.10.0
libtpu: 0.0.40
codegen_flags: <defaults>
</compile_context>

<pallas_src>
import jax
import jax.numpy as jnp
from jax.experimental import pallas as pl
from jax.experimental.pallas import tpu as pltpu


# ----------------------------------------------------------------------------
# Fused decoder kernel: L bidirectional LSTM layers + final Linear, one call.
# ----------------------------------------------------------------------------
def _build_decoder_kernel(num_layers, T, Bp, H):
    def kernel(*refs):
        # in refs:  x, [wih_f, whh_f, b_f, wih_b, whh_b, b_b] * L, w_lin, b_lin
        # out refs: o
        # scratch:  xpf (T*Bp,4H), xpb (T*Bp,4H), seqf (T*Bp,H), seqb (T*Bp,H)
        x_ref = refs[0]
        pos = 1
        layers = []
        for _ in range(num_layers):
            layers.append(refs[pos:pos + 6])
            pos += 6
        wlin_ref, blin_ref = refs[pos], refs[pos + 1]
        o_ref = refs[pos + 2]
        xpf_ref, xpb_ref, seqf_ref, seqb_ref = refs[pos + 3:pos + 7]

        def lstm_step(gates, c_prev):
            # PyTorch gate order: i, f, g, o  (gates: (Bp, 4H))
            i = jax.nn.sigmoid(gates[:, 0 * H:1 * H])
            f = jax.nn.sigmoid(gates[:, 1 * H:2 * H])
            g = jnp.tanh(gates[:, 2 * H:3 * H])
            o = jax.nn.sigmoid(gates[:, 3 * H:4 * H])
            c = f * c_prev + i * g
            h = o * jnp.tanh(c)
            return h, c

        for li, (wih_f, whh_f, b_f, wih_b, whh_b, b_b) in enumerate(layers):
            # Batched input projections for every timestep (bias folded in),
            # one (or two, for the split bidi input) MXU matmuls per direction.
            if li == 0:
                xin = x_ref[...]                           # (T*Bp, D_in)
                xpf_ref[...] = jnp.dot(
                    xin, wih_f[...],
                    preferred_element_type=jnp.float32) + b_f[...]
                xpb_ref[...] = jnp.dot(
                    xin, wih_b[...],
                    preferred_element_type=jnp.float32) + b_b[...]
            else:
                # Previous layer output kept as two (T*Bp, H) halves; apply the
                # corresponding row-halves of W_ih (aligned ref slices) instead
                # of materialising a concatenated (T*Bp, 2H) buffer.
                sf = seqf_ref[...]
                sb = seqb_ref[...]
                xpf_ref[...] = (
                    jnp.dot(sf, wih_f[0:H, :],
                            preferred_element_type=jnp.float32)
                    + jnp.dot(sb, wih_f[H:2 * H, :],
                              preferred_element_type=jnp.float32)
                    + b_f[...])
                xpb_ref[...] = (
                    jnp.dot(sf, wih_b[0:H, :],
                            preferred_element_type=jnp.float32)
                    + jnp.dot(sb, wih_b[H:2 * H, :],
                              preferred_element_type=jnp.float32)
                    + b_b[...])

            whh_f_v = whh_f[...]                           # keep weights resident
            whh_b_v = whh_b[...]

            # Forward (t = 0..T-1) and backward (t = T-1..0) recurrences,
            # statically unrolled and interleaved (independent chains).
            hf = jnp.zeros((Bp, H), jnp.float32)
            cf = jnp.zeros((Bp, H), jnp.float32)
            hb = jnp.zeros((Bp, H), jnp.float32)
            cb = jnp.zeros((Bp, H), jnp.float32)
            for s in range(T):
                tf = s
                tb = T - 1 - s

                gf = xpf_ref[tf * Bp:(tf + 1) * Bp, :] + jnp.dot(
                    hf, whh_f_v, preferred_element_type=jnp.float32)
                hf, cf = lstm_step(gf, cf)
                seqf_ref[tf * Bp:(tf + 1) * Bp, :] = hf

                gb = xpb_ref[tb * Bp:(tb + 1) * Bp, :] + jnp.dot(
                    hb, whh_b_v, preferred_element_type=jnp.float32)
                hb, cb = lstm_step(gb, cb)
                seqb_ref[tb * Bp:(tb + 1) * Bp, :] = hb

        # Final linear projection over the full sequence, single store to HBM.
        o_ref[...] = (
            jnp.dot(seqf_ref[...], wlin_ref[0:H, :],
                    preferred_element_type=jnp.float32)
            + jnp.dot(seqb_ref[...], wlin_ref[H:2 * H, :],
                      preferred_element_type=jnp.float32)
            + blin_ref[...])

    return kernel


def rnn_decoder_forward(x_tbd, params):
    """x_tbd: (T, B, input_size) float32 -> (T, B, num_outputs)."""
    T, B, D = x_tbd.shape
    H = params["lstm"][0]["fwd"][1].shape[0]
    O = params["linear"]["w"].shape[1]
    L = len(params["lstm"])

    # Pad batch to a sublane multiple so every per-timestep VMEM slab is
    # (8k, lanes)-aligned inside the kernel.
    Bp = ((B + 7) // 8) * 8
    x_p = jnp.zeros((T, Bp, D), jnp.float32).at[:, :B, :].set(
        x_tbd.astype(jnp.float32))
    x2 = x_p.reshape(T * Bp, D)                            # contiguous reshape

    inputs = [x2]
    in_specs = [pl.BlockSpec((T * Bp, D), lambda i: (0, 0))]
    for layer in params["lstm"]:
        for direction in ("fwd", "bwd"):
            wih, whh, b = layer[direction]
            inputs += [wih, whh, b]
            in_specs += [
                pl.BlockSpec(wih.shape, lambda i: (0, 0)),
                pl.BlockSpec(whh.shape, lambda i: (0, 0)),
                pl.BlockSpec(b.shape, lambda i: (0, 0)),
            ]
    inputs += [params["linear"]["w"], params["linear"]["b"]]
    in_specs += [
        pl.BlockSpec(params["linear"]["w"].shape, lambda i: (0, 0)),
        pl.BlockSpec(params["linear"]["b"].shape, lambda i: (0, 0)),
    ]

    kernel = _build_decoder_kernel(L, T, Bp, H)

    out = pl.pallas_call(
        kernel,
        out_shape=jax.ShapeDtypeStruct((T * Bp, O), jnp.float32),
        grid_spec=pltpu.PrefetchScalarGridSpec(
            num_scalar_prefetch=0,
            grid=(1,),
            in_specs=in_specs,
            out_specs=pl.BlockSpec((T * Bp, O), lambda i: (0, 0)),
            scratch_shapes=[
                pltpu.VMEM((T * Bp, 4 * H), jnp.float32),  # fwd input projection
                pltpu.VMEM((T * Bp, 4 * H), jnp.float32),  # bwd input projection
                pltpu.VMEM((T * Bp, H), jnp.float32),      # fwd hidden sequence
                pltpu.VMEM((T * Bp, H), jnp.float32),      # bwd hidden sequence
            ],
        ),
        compiler_params=pltpu.CompilerParams(
            dimension_semantics=("arbitrary",)),
    )(*inputs)

    return out.reshape(T, Bp, O)[:, :B, :]


# ----------------------------------------------------------------------------
# Pure-JAX reference (same math) for a correctness check.
# ----------------------------------------------------------------------------
def rnn_decoder_reference(x_tbd, params):
    def lstm_dir(x, wih, whh, b, reverse):
        Hn = whh.shape[0]
        xs = x[::-1] if reverse else x

        def step(carry, xt):
            h, c = carry
            gates = xt @ wih + h @ whh + b
            i = jax.nn.sigmoid(gates[:, 0 * Hn:1 * Hn])
            f = jax.nn.sigmoid(gates[:, 1 * Hn:2 * Hn])
            g = jnp.tanh(gates[:, 2 * Hn:3 * Hn])
            o = jax.nn.sigmoid(gates[:, 3 * Hn:4 * Hn])
            c = f * c + i * g
            h = o * jnp.tanh(c)
            return (h, c), h

        Bn = x.shape[1]
        init = (jnp.zeros((Bn, Hn), jnp.float32),
                jnp.zeros((Bn, Hn), jnp.float32))
        _, hs = jax.lax.scan(step, init, xs)
        return hs[::-1] if reverse else hs

    h = x_tbd.astype(jnp.float32)
    for layer in params["lstm"]:
        hf = lstm_dir(h, *layer["fwd"], reverse=False)
        hb = lstm_dir(h, *layer["bwd"], reverse=True)
        h = jnp.concatenate([hf, hb], axis=-1)
    T, B, F = h.shape
    y = h.reshape(T * B, F) @ params["linear"]["w"] + params["linear"]["b"]
    return y.reshape(T, B, -1)


# ----------------------------------------------------------------------------
# Deterministic synthetic parameters (module __init__ shapes, pre-transposed).
# ----------------------------------------------------------------------------
def init_params(key, input_size, rnn_hidden_size, rnn_num_layers, num_outputs):
    keys = iter(jax.random.split(key, 64))

    def rnd(shape, scale=0.1):
        return scale * jax.random.normal(next(keys), shape, jnp.float32)

    lstm = []
    d = input_size
    for _ in range(rnn_num_layers):
        layer = {}
        for direction in ("fwd", "bwd"):
            layer[direction] = (
                rnd((d, 4 * rnn_hidden_size)),                 # W_ih^T
                rnd((rnn_hidden_size, 4 * rnn_hidden_size)),   # W_hh^T
                rnd((1, 4 * rnn_hidden_size)),                 # b_ih + b_hh
            )
        lstm.append(layer)
        d = 2 * rnn_hidden_size                                # bidirectional concat

    lin = dict(w=rnd((2 * rnn_hidden_size, num_outputs)),
               b=rnd((1, num_outputs)))
    return dict(lstm=lstm, linear=lin)


if __name__ == "__main__":
    # RNNDecoder(input_size=16, num_outputs=10, rnn_hidden_size=32,
    #            rnn_num_layers=2, bidirectional=True, dropout_p=0.0)
    key = jax.random.PRNGKey(0)
    kx, kp = jax.random.split(key)

    T, B, D, H, L, O = 16, 2, 16, 32, 2, 10
    x = jax.random.normal(kx, (T, B, D), jnp.float32)          # (seq, batch, feat)
    params = init_params(kp, input_size=D, rnn_hidden_size=H,
                         rnn_num_layers=L, num_outputs=O)

    out = rnn_decoder_forward(x, params)
    out = jax.block_until_ready(out)

    assert out.shape == (T, B, O), out.shape
    assert bool(jnp.all(jnp.isfinite(out)))

    ref = rnn_decoder_reference(x, params)
    assert bool(jnp.allclose(out, ref, rtol=1e-2, atol=1e-2)), \
        float(jnp.max(jnp.abs(out - ref)))

    print("KERNEL_OK")
</pallas_src>

<mosaic_0001>
module attributes {stable_mosaic.version = 11 : i64} {
  func.func @kernel(%arg0: i32, %arg1: memref<128x16xf32, #tpu.memory_space<vmem>>, %arg2: memref<16x128xf32, #tpu.memory_space<vmem>>, %arg3: memref<32x128xf32, #tpu.memory_space<vmem>>, %arg4: memref<1x128xf32, #tpu.memory_space<vmem>>, %arg5: memref<16x128xf32, #tpu.memory_space<vmem>>, %arg6: memref<32x128xf32, #tpu.memory_space<vmem>>, %arg7: memref<1x128xf32, #tpu.memory_space<vmem>>, %arg8: memref<64x128xf32, #tpu.memory_space<vmem>>, %arg9: memref<32x128xf32, #tpu.memory_space<vmem>>, %arg10: memref<1x128xf32, #tpu.memory_space<vmem>>, %arg11: memref<64x128xf32, #tpu.memory_space<vmem>>, %arg12: memref<32x128xf32, #tpu.memory_space<vmem>>, %arg13: memref<1x128xf32, #tpu.memory_space<vmem>>, %arg14: memref<64x10xf32, #tpu.memory_space<vmem>>, %arg15: memref<1x10xf32, #tpu.memory_space<vmem>>, %arg16: memref<128x10xf32, #tpu.memory_space<vmem>>, %arg17: memref<128x128xf32, #tpu.memory_space<vmem>>, %arg18: memref<128x128xf32, #tpu.memory_space<vmem>>, %arg19: memref<128x32xf32, #tpu.memory_space<vmem>>, %arg20: memref<128x32xf32, #tpu.memory_space<vmem>>) attributes {dimension_semantics = [#tpu.dimension_semantics<arbitrary>], iteration_bounds = array<i64: 1>, scalar_prefetch = 0 : i64, scratch_operands = 4 : i64, tpu.core_type = #tpu.core_type<tc>, window_params = [{pipeline_mode = #tpu.pipeline_mode<synchronous>, transform_indices = @transform_0, window_bounds = array<i64: 128, 16>}, {pipeline_mode = #tpu.pipeline_mode<synchronous>, transform_indices = @transform_1, window_bounds = array<i64: 16, 128>}, {pipeline_mode = #tpu.pipeline_mode<synchronous>, transform_indices = @transform_2, window_bounds = array<i64: 32, 128>}, {pipeline_mode = #tpu.pipeline_mode<synchronous>, transform_indices = @transform_3, window_bounds = array<i64: 1, 128>}, {pipeline_mode = #tpu.pipeline_mode<synchronous>, transform_indices = @transform_4, window_bounds = array<i64: 16, 128>}, {pipeline_mode = #tpu.pipeline_mode<synchronous>, transform_indices = @transform_5, window_bounds = array<i64: 32, 128>}, {pipeline_mode = #tpu.pipeline_mode<synchronous>, transform_indices = @transform_6, window_bounds = array<i64: 1, 128>}, {pipeline_mode = #tpu.pipeline_mode<synchronous>, transform_indices = @transform_7, window_bounds = array<i64: 64, 128>}, {pipeline_mode = #tpu.pipeline_mode<synchronous>, transform_indices = @transform_8, window_bounds = array<i64: 32, 128>}, {pipeline_mode = #tpu.pipeline_mode<synchronous>, transform_indices = @transform_9, window_bounds = array<i64: 1, 128>}, {pipeline_mode = #tpu.pipeline_mode<synchronous>, transform_indices = @transform_10, window_bounds = array<i64: 64, 128>}, {pipeline_mode = #tpu.pipeline_mode<synchronous>, transform_indices = @transform_11, window_bounds = array<i64: 32, 128>}, {pipeline_mode = #tpu.pipeline_mode<synchronous>, transform_indices = @transform_12, window_bounds = array<i64: 1, 128>}, {pipeline_mode = #tpu.pipeline_mode<synchronous>, transform_indices = @transform_13, window_bounds = array<i64: 64, 10>}, {pipeline_mode = #tpu.pipeline_mode<synchronous>, transform_indices = @transform_14, window_bounds = array<i64: 1, 10>}, {pipeline_mode = #tpu.pipeline_mode<synchronous>, transform_indices = @transform_15, window_bounds = array<i64: 128, 10>}]} {
    %c0 = arith.constant 0 : index
    %c0_0 = arith.constant 0 : index
    %0 = vector.load %arg1[%c0, %c0_0] : memref<128x16xf32, #tpu.memory_space<vmem>>, vector<128x16xf32>
    %c0_1 = arith.constant 0 : index
    %c0_2 = arith.constant 0 : index
    %1 = vector.load %arg2[%c0_1, %c0_2] : memref<16x128xf32, #tpu.memory_space<vmem>>, vector<16x128xf32>
    %cst = arith.constant dense<0.000000e+00> : vector<128x128xf32>
    %2 = tpu.matmul %0, %1, %cst {dimension_numbers = #tpu.dot_dimension_numbers<[1], [0], [0], [1], [0, 0, 1, 1], [], []>} : vector<128x16xf32>, vector<16x128xf32>, vector<128x128xf32> -> vector<128x128xf32>
    %c0_3 = arith.constant 0 : index
    %c0_4 = arith.constant 0 : index
    %3 = vector.load %arg4[%c0_3, %c0_4] : memref<1x128xf32, #tpu.memory_space<vmem>>, vector<1x128xf32>
    %4 = vector.broadcast %3 : vector<1x128xf32> to vector<128x128xf32>
    %5 = arith.addf %2, %4 : vector<128x128xf32>
    %c0_5 = arith.constant 0 : index
    %c0_6 = arith.constant 0 : index
    %6 = vector.load %arg17[%c0_5, %c0_6] : memref<128x128xf32, #tpu.memory_space<vmem>>, vector<128x128xf32>
    tpu.vector_store %arg17[%c0_5, %c0_6], %5 {strides = array<i32>} : memref<128x128xf32, #tpu.memory_space<vmem>>, vector<128x128xf32>,
    %c0_7 = arith.constant 0 : index
    %c0_8 = arith.constant 0 : index
    %7 = vector.load %arg5[%c0_7, %c0_8] : memref<16x128xf32, #tpu.memory_space<vmem>>, vector<16x128xf32>
    %cst_9 = arith.constant dense<0.000000e+00> : vector<128x128xf32>
    %8 = tpu.matmul %0, %7, %cst_9 {dimension_numbers = #tpu.dot_dimension_numbers<[1], [0], [0], [1], [0, 0, 1, 1], [], []>} : vector<128x16xf32>, vector<16x128xf32>, vector<128x128xf32> -> vector<128x128xf32>
    %c0_10 = arith.constant 0 : index
    %c0_11 = arith.constant 0 : index
    %9 = vector.load %arg7[%c0_10, %c0_11] : memref<1x128xf32, #tpu.memory_space<vmem>>, vector<1x128xf32>
    %10 = vector.broadcast %9 : vector<1x128xf32> to vector<128x128xf32>
    %11 = arith.addf %8, %10 : vector<128x128xf32>
    %c0_12 = arith.constant 0 : index
    %c0_13 = arith.constant 0 : index
    %12 = vector.load %arg18[%c0_12, %c0_13] : memref<128x128xf32, #tpu.memory_space<vmem>>, vector<128x128xf32>
    tpu.vector_store %arg18[%c0_12, %c0_13], %11 {strides = array<i32>} : memref<128x128xf32, #tpu.memory_space<vmem>>, vector<128x128xf32>,
    %c0_14 = arith.constant 0 : index
    %c0_15 = arith.constant 0 : index
    %13 = vector.load %arg3[%c0_14, %c0_15] : memref<32x128xf32, #tpu.memory_space<vmem>>, vector<32x128xf32>
    %c0_16 = arith.constant 0 : index
    %c0_17 = arith.constant 0 : index
    %14 = vector.load %arg6[%c0_16, %c0_17] : memref<32x128xf32, #tpu.memory_space<vmem>>, vector<32x128xf32>
    %cst_18 = arith.constant 0.000000e+00 : f32
    %15 = vector.broadcast %cst_18 : f32 to vector<8x32xf32>
    %cst_19 = arith.constant 0.000000e+00 : f32
    %16 = vector.broadcast %cst_19 : f32 to vector<8x32xf32>
    %cst_20 = arith.constant 0.000000e+00 : f32
    %17 = vector.broadcast %cst_20 : f32 to vector<8x32xf32>
    %cst_21 = arith.constant 0.000000e+00 : f32
    %18 = vector.broadcast %cst_21 : f32 to vector<8x32xf32>
    %c0_22 = arith.constant 0 : index
    %c0_23 = arith.constant 0 : index
    %19 = vector.load %arg17[%c0_22, %c0_23] : memref<128x128xf32, #tpu.memory_space<vmem>>, vector<8x128xf32>
    %cst_24 = arith.constant dense<0.000000e+00> : vector<8x128xf32>
    %20 = tpu.matmul %15, %13, %cst_24 {dimension_numbers = #tpu.dot_dimension_numbers<[1], [0], [0], [1], [0, 0, 1, 1], [], []>} : vector<8x32xf32>, vector<32x128xf32>, vector<8x128xf32> -> vector<8x128xf32>
    %21 = arith.addf %19, %20 : vector<8x128xf32>
    %22 = vector.extract_strided_slice %21 {offsets = [0, 0], sizes = [8, 32], strides = [1, 1]} : vector<8x128xf32> to vector<8x32xf32>
    %23 = arith.negf %22 : vector<8x32xf32>
    %24 = math.exp %23 : vector<8x32xf32>
    %cst_25 = arith.constant 1.000000e+00 : f32
    %25 = vector.broadcast %cst_25 : f32 to vector<8x32xf32>
    %26 = arith.addf %25, %24 : vector<8x32xf32>
    %27 = arith.divf %25, %26 : vector<8x32xf32>
    %28 = vector.extract_strided_slice %21 {offsets = [0, 32], sizes = [8, 32], strides = [1, 1]} : vector<8x128xf32> to vector<8x32xf32>
    %29 = arith.negf %28 : vector<8x32xf32>
    %30 = math.exp %29 : vector<8x32xf32>
    %cst_26 = arith.constant 1.000000e+00 : f32
    %31 = vector.broadcast %cst_26 : f32 to vector<8x32xf32>
    %32 = arith.addf %31, %30 : vector<8x32xf32>
    %33 = arith.divf %31, %32 : vector<8x32xf32>
    %34 = vector.extract_strided_slice %21 {offsets = [0, 64], sizes = [8, 32], strides = [1, 1]} : vector<8x128xf32> to vector<8x32xf32>
    %35 = math.tanh %34 : vector<8x32xf32>
    %36 = vector.extract_strided_slice %21 {offsets = [0, 96], sizes = [8, 32], strides = [1, 1]} : vector<8x128xf32> to vector<8x32xf32>
    %37 = arith.negf %36 : vector<8x32xf32>
    %38 = math.exp %37 : vector<8x32xf32>
    %cst_27 = arith.constant 1.000000e+00 : f32
    %39 = vector.broadcast %cst_27 : f32 to vector<8x32xf32>
    %40 = arith.addf %39, %38 : vector<8x32xf32>
    %41 = arith.divf %39, %40 : vector<8x32xf32>
    %42 = arith.mulf %33, %16 : vector<8x32xf32>
    %43 = arith.mulf %27, %35 : vector<8x32xf32>
    %44 = arith.addf %42, %43 : vector<8x32xf32>
    %45 = math.tanh %44 : vector<8x32xf32>
    %46 = arith.mulf %41, %45 : vector<8x32xf32>
    %c0_28 = arith.constant 0 : index
    %c0_29 = arith.constant 0 : index
    %47 = vector.load %arg19[%c0_28, %c0_29] : memref<128x32xf32, #tpu.memory_space<vmem>>, vector<8x32xf32>
    tpu.vector_store %arg19[%c0_28, %c0_29], %46 {strides = array<i32>} : memref<128x32xf32, #tpu.memory_space<vmem>>, vector<8x32xf32>,
    %c120 = arith.constant 120 : index
    %c0_30 = arith.constant 0 : index
    %48 = vector.load %arg18[%c120, %c0_30] : memref<128x128xf32, #tpu.memory_space<vmem>>, vector<8x128xf32>
    %cst_31 = arith.constant dense<0.000000e+00> : vector<8x128xf32>
    %49 = tpu.matmul %17, %14, %cst_31 {dimension_numbers = #tpu.dot_dimension_numbers<[1], [0], [0], [1], [0, 0, 1, 1], [], []>} : vector<8x32xf32>, vector<32x128xf32>, vector<8x128xf32> -> vector<8x128xf32>
    %50 = arith.addf %48, %49 : vector<8x128xf32>
    %51 = vector.extract_strided_slice %50 {offsets = [0, 0], sizes = [8, 32], strides = [1, 1]} : vector<8x128xf32> to vector<8x32xf32>
    %52 = arith.negf %51 : vector<8x32xf32>
    %53 = math.exp %52 : vector<8x32xf32>
    %cst_32 = arith.constant 1.000000e+00 : f32
    %54 = vector.broadcast %cst_32 : f32 to vector<8x32xf32>
    %55 = arith.addf %54, %53 : vector<8x32xf32>
    %56 = arith.divf %54, %55 : vector<8x32xf32>
    %57 = vector.extract_strided_slice %50 {offsets = [0, 32], sizes = [8, 32], strides = [1, 1]} : vector<8x128xf32> to vector<8x32xf32>
    %58 = arith.negf %57 : vector<8x32xf32>
    %59 = math.exp %58 : vector<8x32xf32>
    %cst_33 = arith.constant 1.000000e+00 : f32
    %60 = vector.broadcast %cst_33 : f32 to vector<8x32xf32>
    %61 = arith.addf %60, %59 : vector<8x32xf32>
    %62 = arith.divf %60, %61 : vector<8x32xf32>
    %63 = vector.extract_strided_slice %50 {offsets = [0, 64], sizes = [8, 32], strides = [1, 1]} : vector<8x128xf32> to vector<8x32xf32>
    %64 = math.tanh %63 : vector<8x32xf32>
    %65 = vector.extract_strided_slice %50 {offsets = [0, 96], sizes = [8, 32], strides = [1, 1]} : vector<8x128xf32> to vector<8x32xf32>
    %66 = arith.negf %65 : vector<8x32xf32>
    %67 = math.exp %66 : vector<8x32xf32>
    %cst_34 = arith.constant 1.000000e+00 : f32
    %68 = vector.broadcast %cst_34 : f32 to vector<8x32xf32>
    %69 = arith.addf %68, %67 : vector<8x32xf32>
    %70 = arith.divf %68, %69 : vector<8x32xf32>
    %71 = arith.mulf %62, %18 : vector<8x32xf32>
    %72 = arith.mulf %56, %64 : vector<8x32xf32>
    %73 = arith.addf %71, %72 : vector<8x32xf32>
    %74 = math.tanh %73 : vector<8x32xf32>
    %75 = arith.mulf %70, %74 : vector<8x32xf32>
    %c120_35 = arith.constant 120 : index
    %c0_36 = arith.constant 0 : index
    %76 = vector.load %arg20[%c120_35, %c0_36] : memref<128x32xf32, #tpu.memory_space<vmem>>, vector<8x32xf32>
    tpu.vector_store %arg20[%c120_35, %c0_36], %75 {strides = array<i32>} : memref<128x32xf32, #tpu.memory_space<vmem>>, vector<8x32xf32>,
    %c8 = arith.constant 8 : index
    %c0_37 = arith.constant 0 : index
    %77 = vector.load %arg17[%c8, %c0_37] : memref<128x128xf32, #tpu.memory_space<vmem>>, vector<8x128xf32>
    %cst_38 = arith.constant dense<0.000000e+00> : vector<8x128xf32>
    %78 = tpu.matmul %46, %13, %cst_38 {dimension_numbers = #tpu.dot_dimension_numbers<[1], [0], [0], [1], [0, 0, 1, 1], [], []>} : vector<8x32xf32>, vector<32x128xf32>, vector<8x128xf32> -> vector<8x128xf32>
    %79 = arith.addf %77, %78 : vector<8x128xf32>
    %80 = vector.extract_strided_slice %79 {offsets = [0, 0], sizes = [8, 32], strides = [1, 1]} : vector<8x128xf32> to vector<8x32xf32>
    %81 = arith.negf %80 : vector<8x32xf32>
    %82 = math.exp %81 : vector<8x32xf32>
    %cst_39 = arith.constant 1.000000e+00 : f32
    %83 = vector.broadcast %cst_39 : f32 to vector<8x32xf32>
    %84 = arith.addf %83, %82 : vector<8x32xf32>
    %85 = arith.divf %83, %84 : vector<8x32xf32>
    %86 = vector.extract_strided_slice %79 {offsets = [0, 32], sizes = [8, 32], strides = [1, 1]} : vector<8x128xf32> to vector<8x32xf32>
    %87 = arith.negf %86 : vector<8x32xf32>
    %88 = math.exp %87 : vector<8x32xf32>
    %cst_40 = arith.constant 1.000000e+00 : f32
    %89 = vector.broadcast %cst_40 : f32 to vector<8x32xf32>
    %90 = arith.addf %89, %88 : vector<8x32xf32>
    %91 = arith.divf %89, %90 : vector<8x32xf32>
    %92 = vector.extract_strided_slice %79 {offsets = [0, 64], sizes = [8, 32], strides = [1, 1]} : vector<8x128xf32> to vector<8x32xf32>
    %93 = math.tanh %92 : vector<8x32xf32>
    %94 = vector.extract_strided_slice %79 {offsets = [0, 96], sizes = [8, 32], strides = [1, 1]} : vector<8x128xf32> to vector<8x32xf32>
    %95 = arith.negf %94 : vector<8x32xf32>
    %96 = math.exp %95 : vector<8x32xf32>
    %cst_41 = arith.constant 1.000000e+00 : f32
    %97 = vector.broadcast %cst_41 : f32 to vector<8x32xf32>
    %98 = arith.addf %97, %96 : vector<8x32xf32>
    %99 = arith.divf %97, %98 : vector<8x32xf32>
    %100 = arith.mulf %91, %44 : vector<8x32xf32>
    %101 = arith.mulf %85, %93 : vector<8x32xf32>
    %102 = arith.addf %100, %101 : vector<8x32xf32>
    %103 = math.tanh %102 : vector<8x32xf32>
    %104 = arith.mulf %99, %103 : vector<8x32xf32>
    %c8_42 = arith.constant 8 : index
    %c0_43 = arith.constant 0 : index
    %105 = vector.load %arg19[%c8_42, %c0_43] : memref<128x32xf32, #tpu.memory_space<vmem>>, vector<8x32xf32>
    tpu.vector_store %arg19[%c8_42, %c0_43], %104 {strides = array<i32>} : memref<128x32xf32, #tpu.memory_space<vmem>>, vector<8x32xf32>,
    %c112 = arith.constant 112 : index
    %c0_44 = arith.constant 0 : index
    %106 = vector.load %arg18[%c112, %c0_44] : memref<128x128xf32, #tpu.memory_space<vmem>>, vector<8x128xf32>
    %cst_45 = arith.constant dense<0.000000e+00> : vector<8x128xf32>
    %107 = tpu.matmul %75, %14, %cst_45 {dimension_numbers = #tpu.dot_dimension_numbers<[1], [0], [0], [1], [0, 0, 1, 1], [], []>} : vector<8x32xf32>, vector<32x128xf32>, vector<8x128xf32> -> vector<8x128xf32>
    %108 = arith.addf %106, %107 : vector<8x128xf32>
    %109 = vector.extract_strided_slice %108 {offsets = [0, 0], sizes = [8, 32], strides = [1, 1]} : vector<8x128xf32> to vector<8x32xf32>
    %110 = arith.negf %109 : vector<8x32xf32>
    %111 = math.exp %110 : vector<8x32xf32>
    %cst_46 = arith.constant 1.000000e+00 : f32
    %112 = vector.broadcast %cst_46 : f32 to vector<8x32xf32>
    %113 = arith.addf %112, %111 : vector<8x32xf32>
    %114 = arith.divf %112, %113 : vector<8x32xf32>
    %115 = vector.extract_strided_slice %108 {offsets = [0, 32], sizes = [8, 32], strides = [1, 1]} : vector<8x128xf32> to vector<8x32xf32>
    %116 = arith.negf %115 : vector<8x32xf32>
    %117 = math.exp %116 : vector<8x32xf32>
    %cst_47 = arith.constant 1.000000e+00 : f32
    %118 = vector.broadcast %cst_47 : f32 to vector<8x32xf32>
    %119 = arith.addf %118, %117 : vector<8x32xf32>
    %120 = arith.divf %118, %119 : vector<8x32xf32>
    %121 = vector.extract_strided_slice %108 {offsets = [0, 64], sizes = [8, 32], strides = [1, 1]} : vector<8x128xf32> to vector<8x32xf32>
    %122 = math.tanh %121 : vector<8x32xf32>
    %123 = vector.extract_strided_slice %108 {offsets = [0, 96], sizes = [8, 32], strides = [1, 1]} : vector<8x128xf32> to vector<8x32xf32>
    %124 = arith.negf %123 : vector<8x32xf32>
    %125 = math.exp %124 : vector<8x32xf32>
    %cst_48 = arith.constant 1.000000e+00 : f32
    %126 = vector.broadcast %cst_48 : f32 to vector<8x32xf32>
    %127 = arith.addf %126, %125 : vector<8x32xf32>
    %128 = arith.divf %126, %127 : vector<8x32xf32>
    %129 = arith.mulf %120, %73 : vector<8x32xf32>
    %130 = arith.mulf %114, %122 : vector<8x32xf32>
    %131 = arith.addf %129, %130 : vector<8x32xf32>
    %132 = math.tanh %131 : vector<8x32xf32>
    %133 = arith.mulf %128, %132 : vector<8x32xf32>
    %c112_49 = arith.constant 112 : index
    %c0_50 = arith.constant 0 : index
    %134 = vector.load %arg20[%c112_49, %c0_50] : memref<128x32xf32, #tpu.memory_space<vmem>>, vector<8x32xf32>
    tpu.vector_store %arg20[%c112_49, %c0_50], %133 {strides = array<i32>} : memref<128x32xf32, #tpu.memory_space<vmem>>, vector<8x32xf32>,
    %c16 = arith.constant 16 : index
    %c0_51 = arith.constant 0 : index
    %135 = vector.load %arg17[%c16, %c0_51] : memref<128x128xf32, #tpu.memory_space<vmem>>, vector<8x128xf32>
    %cst_52 = arith.constant dense<0.000000e+00> : vector<8x128xf32>
    %136 = tpu.matmul %104, %13, %cst_52 {dimension_numbers = #tpu.dot_dimension_numbers<[1], [0], [0], [1], [0, 0, 1, 1], [], []>} : vector<8x32xf32>, vector<32x128xf32>, vector<8x128xf32> -> vector<8x128xf32>
    %137 = arith.addf %135, %136 : vector<8x128xf32>
    %138 = vector.extract_strided_slice %137 {offsets = [0, 0], sizes = [8, 32], strides = [1, 1]} : vector<8x128xf32> to vector<8x32xf32>
    %139 = arith.negf %138 : vector<8x32xf32>
    %140 = math.exp %139 : vector<8x32xf32>
    %cst_53 = arith.constant 1.000000e+00 : f32
    %141 = vector.broadcast %cst_53 : f32 to vector<8x32xf32>
    %142 = arith.addf %141, %140 : vector<8x32xf32>
    %143 = arith.divf %141, %142 : vector<8x32xf32>
    %144 = vector.extract_strided_slice %137 {offsets = [0, 32], sizes = [8, 32], strides = [1, 1]} : vector<8x128xf32> to vector<8x32xf32>
    %145 = arith.negf %144 : vector<8x32xf32>
    %146 = math.exp %145 : vector<8x32xf32>
    %cst_54 = arith.constant 1.000000e+00 : f32
    %147 = vector.broadcast %cst_54 : f32 to vector<8x32xf32>
    %148 = arith.addf %147, %146 : vector<8x32xf32>
    %149 = arith.divf %147, %148 : vector<8x32xf32>
    %150 = vector.extract_strided_slice %137 {offsets = [0, 64], sizes = [8, 32], strides = [1, 1]} : vector<8x128xf32> to vector<8x32xf32>
    %151 = math.tanh %150 : vector<8x32xf32>
    %152 = vector.extract_strided_slice %137 {offsets = [0, 96], sizes = [8, 32], strides = [1, 1]} : vector<8x128xf32> to vector<8x32xf32>
    %153 = arith.negf %152 : vector<8x32xf32>
    %154 = math.exp %153 : vector<8x32xf32>
    %cst_55 = arith.constant 1.000000e+00 : f32
    %155 = vector.broadcast %cst_55 : f32 to vector<8x32xf32>
    %156 = arith.addf %155, %154 : vector<8x32xf32>
    %157 = arith.divf %155, %156 : vector<8x32xf32>
    %158 = arith.mulf %149, %102 : vector<8x32xf32>
    %159 = arith.mulf %143, %151 : vector<8x32xf32>
    %160 = arith.addf %158, %159 : vector<8x32xf32>
    %161 = math.tanh %160 : vector<8x32xf32>
    %162 = arith.mulf %157, %161 : vector<8x32xf32>
    %c16_56 = arith.constant 16 : index
    %c0_57 = arith.constant 0 : index
    %163 = vector.load %arg19[%c16_56, %c0_57] : memref<128x32xf32, #tpu.memory_space<vmem>>, vector<8x32xf32>
    tpu.vector_store %arg19[%c16_56, %c0_57], %162 {strides = array<i32>} : memref<128x32xf32, #tpu.memory_space<vmem>>, vector<8x32xf32>,
    %c104 = arith.constant 104 : index
    %c0_58 = arith.constant 0 : index
    %164 = vector.load %arg18[%c104, %c0_58] : memref<128x128xf32, #tpu.memory_space<vmem>>, vector<8x128xf32>
    %cst_59 = arith.constant dense<0.000000e+00> : vector<8x128xf32>
    %165 = tpu.matmul %133, %14, %cst_59 {dimension_numbers = #tpu.dot_dimension_numbers<[1], [0], [0], [1], [0, 0, 1, 1], [], []>} : vector<8x32xf32>, vector<32x128xf32>, vector<8x128xf32> -> vector<8x128xf32>
    %166 = arith.addf %164, %165 : vector<8x128xf32>
    %167 = vector.extract_strided_slice %166 {offsets = [0, 0], sizes = [8, 32], strides = [1, 1]} : vector<8x128xf32> to vector<8x32xf32>
    %168 = arith.negf %167 : vector<8x32xf32>
    %169 = math.exp %168 : vector<8x32xf32>
    %cst_60 = arith.constant 1.000000e+00 : f32
    %170 = vector.broadcast %cst_60 : f32 to vector<8x32xf32>
    %171 = arith.addf %170, %169 : vector<8x32xf32>
    %172 = arith.divf %170, %171 : vector<8x32xf32>
    %173 = vector.extract_strided_slice %166 {offsets = [0, 32], sizes = [8, 32], strides = [1, 1]} : vector<8x128xf32> to vector<8x32xf32>
    %174 = arith.negf %173 : vector<8x32xf32>
    %175 = math.exp %174 : vector<8x32xf32>
    %cst_61 = arith.constant 1.000000e+00 : f32
    %176 = vector.broadcast %cst_61 : f32 to vector<8x32xf32>
    %177 = arith.addf %176, %175 : vector<8x32xf32>
    %178 = arith.divf %176, %177 : vector<8x32xf32>
    %179 = vector.extract_strided_slice %166 {offsets = [0, 64], sizes = [8, 32], strides = [1, 1]} : vector<8x128xf32> to vector<8x32xf32>
    %180 = math.tanh %179 : vector<8x32xf32>
    %181 = vector.extract_strided_slice %166 {offsets = [0, 96], sizes = [8, 32], strides = [1, 1]} : vector<8x128xf32> to vector<8x32xf32>
    %182 = arith.negf %181 : vector<8x32xf32>
    %183 = math.exp %182 : vector<8x32xf32>
    %cst_62 = arith.constant 1.000000e+00 : f32
    %184 = vector.broadcast %cst_62 : f32 to vector<8x32xf32>
    %185 = arith.addf %184, %183 : vector<8x32xf32>
    %186 = arith.divf %184, %185 : vector<8x32xf32>
    %187 = arith.mulf %178, %131 : vector<8x32xf32>
    %188 = arith.mulf %172, %180 : vector<8x32xf32>
    %189 = arith.addf %187, %188 : vector<8x32xf32>
    %190 = math.tanh %189 : vector<8x32xf32>
    %191 = arith.mulf %186, %190 : vector<8x32xf32>
    %c104_63 = arith.constant 104 : index
    %c0_64 = arith.constant 0 : index
    %192 = vector.load %arg20[%c104_63, %c0_64] : memref<128x32xf32, #tpu.memory_space<vmem>>, vector<8x32xf32>
    tpu.vector_store %arg20[%c104_63, %c0_64], %191 {strides = array<i32>} : memref<128x32xf32, #tpu.memory_space<vmem>>, vector<8x32xf32>,
    %c24 = arith.constant 24 : index
    %c0_65 = arith.constant 0 : index
    %193 = vector.load %arg17[%c24, %c0_65] : memref<128x128xf32, #tpu.memory_space<vmem>>, vector<8x128xf32>
    %cst_66 = arith.constant dense<0.000000e+00> : vector<8x128xf32>
    %194 = tpu.matmul %162, %13, %cst_66 {dimension_numbers = #tpu.dot_dimension_numbers<[1], [0], [0], [1], [0, 0, 1, 1], [], []>} : vector<8x32xf32>, vector<32x128xf32>, vector<8x128xf32> -> vector<8x128xf32>
    %195 = arith.addf %193, %194 : vector<8x128xf32>
    %196 = vector.extract_strided_slice %195 {offsets = [0, 0], sizes = [8, 32], strides = [1, 1]} : vector<8x128xf32> to vector<8x32xf32>
    %197 = arith.negf %196 : vector<8x32xf32>
    %198 = math.exp %197 : vector<8x32xf32>
    %cst_67 = arith.constant 1.000000e+00 : f32
    %199 = vector.broadcast %cst_67 : f32 to vector<8x32xf32>
    %200 = arith.addf %199, %198 : vector<8x32xf32>
    %201 = arith.divf %199, %200 : vector<8x32xf32>
    %202 = vector.extract_strided_slice %195 {offsets = [0, 32], sizes = [8, 32], strides = [1, 1]} : vector<8x128xf32> to vector<8x32xf32>
    %203 = arith.negf %202 : vector<8x32xf32>
    %204 = math.exp %203 : vector<8x32xf32>
    %cst_68 = arith.constant 1.000000e+00 : f32
    %205 = vector.broadcast %cst_68 : f32 to vector<8x32xf32>
    %206 = arith.addf %205, %204 : vector<8x32xf32>
    %207 = arith.divf %205, %206 : vector<8x32xf32>
    %208 = vector.extract_strided_slice %195 {offsets = [0, 64], sizes = [8, 32], strides = [1, 1]} : vector<8x128xf32> to vector<8x32xf32>
    %209 = math.tanh %208 : vector<8x32xf32>
    %210 = vector.extract_strided_slice %195 {offsets = [0, 96], sizes = [8, 32], strides = [1, 1]} : vector<8x128xf32> to vector<8x32xf32>
    %211 = arith.negf %210 : vector<8x32xf32>
    %212 = math.exp %211 : vector<8x32xf32>
    %cst_69 = arith.constant 1.000000e+00 : f32
    %213 = vector.broadcast %cst_69 : f32 to vector<8x32xf32>
    %214 = arith.addf %213, %212 : vector<8x32xf32>
    %215 = arith.divf %213, %214 : vector<8x32xf32>
    %216 = arith.mulf %207, %160 : vector<8x32xf32>
    %217 = arith.mulf %201, %209 : vector<8x32xf32>
    %218 = arith.addf %216, %217 : vector<8x32xf32>
    %219 = math.tanh %218 : vector<8x32xf32>
    %220 = arith.mulf %215, %219 : vector<8x32xf32>
    %c24_70 = arith.constant 24 : index
    %c0_71 = arith.constant 0 : index
    %221 = vector.load %arg19[%c24_70, %c0_71] : memref<128x32xf32, #tpu.memory_space<vmem>>, vector<8x32xf32>
    tpu.vector_store %arg19[%c24_70, %c0_71], %220 {strides = array<i32>} : memref<128x32xf32, #tpu.memory_space<vmem>>, vector<8x32xf32>,
    %c96 = arith.constant 96 : index
    %c0_72 = arith.constant 0 : index
    %222 = vector.load %arg18[%c96, %c0_72] : memref<128x128xf32, #tpu.memory_space<vmem>>, vector<8x128xf32>
    %cst_73 = arith.constant dense<0.000000e+00> : vector<8x128xf32>
    %223 = tpu.matmul %191, %14, %cst_73 {dimension_numbers = #tpu.dot_dimension_numbers<[1], [0], [0], [1], [0, 0, 1, 1], [], []>} : vector<8x32xf32>, vector<32x128xf32>, vector<8x128xf32> -> vector<8x128xf32>
    %224 = arith.addf %222, %223 : vector<8x128xf32>
    %225 = vector.extract_strided_slice %224 {offsets = [0, 0], sizes = [8, 32], strides = [1, 1]} : vector<8x128xf32> to vector<8x32xf32>
    %226 = arith.negf %225 : vector<8x32xf32>
    %227 = math.exp %226 : vector<8x32xf32>
    %cst_74 = arith.constant 1.000000e+00 : f32
    %228 = vector.broadcast %cst_74 : f32 to vector<8x32xf32>
    %229 = arith.addf %228, %227 : vector<8x32xf32>
    %230 = arith.divf %228, %229 : vector<8x32xf32>
    %231 = vector.extract_strided_slice %224 {offsets = [0, 32], sizes = [8, 32], strides = [1, 1]} : vector<8x128xf32> to vector<8x32xf32>
    %232 = arith.negf %231 : vector<8x32xf32>
    %233 = math.exp %232 : vector<8x32xf32>
    %cst_75 = arith.constant 1.000000e+00 : f32
    %234 = vector.broadcast %cst_75 : f32 to vector<8x32xf32>
    %235 = arith.addf %234, %233 : vector<8x32xf32>
    %236 = arith.divf %234, %235 : vector<8x32xf32>
    %237 = vector.extract_strided_slice %224 {offsets = [0, 64], sizes = [8, 32], strides = [1, 1]} : vector<8x128xf32> to vector<8x32xf32>
    %238 = math.tanh %237 : vector<8x32xf32>
    %239 = vector.extract_strided_slice %224 {offsets = [0, 96], sizes = [8, 32], strides = [1, 1]} : vector<8x128xf32> to vector<8x32xf32>
    %240 = arith.negf %239 : vector<8x32xf32>
    %241 = math.exp %240 : vector<8x32xf32>
    %cst_76 = arith.constant 1.000000e+00 : f32
    %242 = vector.broadcast %cst_76 : f32 to vector<8x32xf32>
    %243 = arith.addf %242, %241 : vector<8x32xf32>
    %244 = arith.divf %242, %243 : vector<8x32xf32>
    %245 = arith.mulf %236, %189 : vector<8x32xf32>
    %246 = arith.mulf %230, %238 : vector<8x32xf32>
    %247 = arith.addf %245, %246 : vector<8x32xf32>
    %248 = math.tanh %247 : vector<8x32xf32>
    %249 = arith.mulf %244, %248 : vector<8x32xf32>
    %c96_77 = arith.constant 96 : index
    %c0_78 = arith.constant 0 : index
    %250 = vector.load %arg20[%c96_77, %c0_78] : memref<128x32xf32, #tpu.memory_space<vmem>>, vector<8x32xf32>
    tpu.vector_store %arg20[%c96_77, %c0_78], %249 {strides = array<i32>} : memref<128x32xf32, #tpu.memory_space<vmem>>, vector<8x32xf32>,
    %c32 = arith.constant 32 : index
    %c0_79 = arith.constant 0 : index
    %251 = vector.load %arg17[%c32, %c0_79] : memref<128x128xf32, #tpu.memory_space<vmem>>, vector<8x128xf32>
    %cst_80 = arith.constant dense<0.000000e+00> : vector<8x128xf32>
    %252 = tpu.matmul %220, %13, %cst_80 {dimension_numbers = #tpu.dot_dimension_numbers<[1], [0], [0], [1], [0, 0, 1, 1], [], []>} : vector<8x32xf32>, vector<32x128xf32>, vector<8x128xf32> -> vector<8x128xf32>
    %253 = arith.addf %251, %252 : vector<8x128xf32>
    %254 = vector.extract_strided_slice %253 {offsets = [0, 0], sizes = [8, 32], strides = [1, 1]} : vector<8x128xf32> to vector<8x32xf32>
    %255 = arith.negf %254 : vector<8x32xf32>
    %256 = math.exp %255 : vector<8x32xf32>
    %cst_81 = arith.constant 1.000000e+00 : f32
    %257 = vector.broadcast %cst_81 : f32 to vector<8x32xf32>
    %258 = arith.addf %257, %256 : vector<8x32xf32>
    %259 = arith.divf %257, %258 : vector<8x32xf32>
    %260 = vector.extract_strided_slice %253 {offsets = [0, 32], sizes = [8, 32], strides = [1, 1]} : vector<8x128xf32> to vector<8x32xf32>
    %261 = arith.negf %260 : vector<8x32xf32>
    %262 = math.exp %261 : vector<8x32xf32>
    %cst_82 = arith.constant 1.000000e+00 : f32
    %263 = vector.broadcast %cst_82 : f32 to vector<8x32xf32>
    %264 = arith.addf %263, %262 : vector<8x32xf32>
    %265 = arith.divf %263, %264 : vector<8x32xf32>
    %266 = vector.extract_strided_slice %253 {offsets = [0, 64], sizes = [8, 32], strides = [1, 1]} : vector<8x128xf32> to vector<8x32xf32>
    %267 = math.tanh %266 : vector<8x32xf32>
    %268 = vector.extract_strided_slice %253 {offsets = [0, 96], sizes = [8, 32], strides = [1, 1]} : vector<8x128xf32> to vector<8x32xf32>
    %269 = arith.negf %268 : vector<8x32xf32>
    %270 = math.exp %269 : vector<8x32xf32>
    %cst_83 = arith.constant 1.000000e+00 : f32
    %271 = vector.broadcast %cst_83 : f32 to vector<8x32xf32>
    %272 = arith.addf %271, %270 : vector<8x32xf32>
    %273 = arith.divf %271, %272 : vector<8x32xf32>
    %274 = arith.mulf %265, %218 : vector<8x32xf32>
    %275 = arith.mulf %259, %267 : vector<8x32xf32>
    %276 = arith.addf %274, %275 : vector<8x32xf32>
    %277 = math.tanh %276 : vector<8x32xf32>
    %278 = arith.mulf %273, %277 : vector<8x32xf32>
    %c32_84 = arith.constant 32 : index
    %c0_85 = arith.constant 0 : index
    %279 = vector.load %arg19[%c32_84, %c0_85] : memref<128x32xf32, #tpu.memory_space<vmem>>, vector<8x32xf32>
    tpu.vector_store %arg19[%c32_84, %c0_85], %278 {strides = array<i32>} : memref<128x32xf32, #tpu.memory_space<vmem>>, vector<8x32xf32>,
    %c88 = arith.constant 88 : index
    %c0_86 = arith.constant 0 : index
    %280 = vector.load %arg18[%c88, %c0_86] : memref<128x128xf32, #tpu.memory_space<vmem>>, vector<8x128xf32>
    %cst_87 = arith.constant dense<0.000000e+00> : vector<8x128xf32>
    %281 = tpu.matmul %249, %14, %cst_87 {dimension_numbers = #tpu.dot_dimension_numbers<[1], [0], [0], [1], [0, 0, 1, 1], [], []>} : vector<8x32xf32>, vector<32x128xf32>, vector<8x128xf32> -> vector<8x128xf32>
    %282 = arith.addf %280, %281 : vector<8x128xf32>
    %283 = vector.extract_strided_slice %282 {offsets = [0, 0], sizes = [8, 32], strides = [1, 1]} : vector<8x128xf32> to vector<8x32xf32>
    %284 = arith.negf %283 : vector<8x32xf32>
    %285 = math.exp %284 : vector<8x32xf32>
    %cst_88 = arith.constant 1.000000e+00 : f32
    %286 = vector.broadcast %cst_88 : f32 to vector<8x32xf32>
    %287 = arith.addf %286, %285 : vector<8x32xf32>
    %288 = arith.divf %286, %287 : vector<8x32xf32>
    %289 = vector.extract_strided_slice %282 {offsets = [0, 32], sizes = [8, 32], strides = [1, 1]} : vector<8x128xf32> to vector<8x32xf32>
    %290 = arith.negf %289 : vector<8x32xf32>
    %291 = math.exp %290 : vector<8x32xf32>
    %cst_89 = arith.constant 1.000000e+00 : f32
    %292 = vector.broadcast %cst_89 : f32 to vector<8x32xf32>
    %293 = arith.addf %292, %291 : vector<8x32xf32>
    %294 = arith.divf %292, %293 : vector<8x32xf32>
    %295 = vector.extract_strided_slice %282 {offsets = [0, 64], sizes = [8, 32], strides = [1, 1]} : vector<8x128xf32> to vector<8x32xf32>
    %296 = math.tanh %295 : vector<8x32xf32>
    %297 = vector.extract_strided_slice %282 {offsets = [0, 96], sizes = [8, 32], strides = [1, 1]} : vector<8x128xf32> to vector<8x32xf32>
    %298 = arith.negf %297 : vector<8x32xf32>
    %299 = math.exp %298 : vector<8x32xf32>
    %cst_90 = arith.constant 1.000000e+00 : f32
    %300 = vector.broadcast %cst_90 : f32 to vector<8x32xf32>
    %301 = arith.addf %300, %299 : vector<8x32xf32>
    %302 = arith.divf %300, %301 : vector<8x32xf32>
    %303 = arith.mulf %294, %247 : vector<8x32xf32>
    %304 = arith.mulf %288, %296 : vector<8x32xf32>
    %305 = arith.addf %303, %304 : vector<8x32xf32>
    %306 = math.tanh %305 : vector<8x32xf32>
    %307 = arith.mulf %302, %306 : vector<8x32xf32>
    %c88_91 = arith.constant 88 : index
    %c0_92 = arith.constant 0 : index
    %308 = vector.load %arg20[%c88_91, %c0_92] : memref<128x32xf32, #tpu.memory_space<vmem>>, vector<8x32xf32>
    tpu.vector_store %arg20[%c88_91, %c0_92], %307 {strides = array<i32>} : memref<128x32xf32, #tpu.memory_space<vmem>>, vector<8x32xf32>,
    %c40 = arith.constant 40 : index
    %c0_93 = arith.constant 0 : index
    %309 = vector.load %arg17[%c40, %c0_93] : memref<128x128xf32, #tpu.memory_space<vmem>>, vector<8x128xf32>
    %cst_94 = arith.constant dense<0.000000e+00> : vector<8x128xf32>
    %310 = tpu.matmul %278, %13, %cst_94 {dimension_numbers = #tpu.dot_dimension_numbers<[1], [0], [0], [1], [0, 0, 1, 1], [], []>} : vector<8x32xf32>, vector<32x128xf32>, vector<8x128xf32> -> vector<8x128xf32>
    %311 = arith.addf %309, %310 : vector<8x128xf32>
    %312 = vector.extract_strided_slice %311 {offsets = [0, 0], sizes = [8, 32], strides = [1, 1]} : vector<8x128xf32> to vector<8x32xf32>
    %313 = arith.negf %312 : vector<8x32xf32>
    %314 = math.exp %313 : vector<8x32xf32>
    %cst_95 = arith.constant 1.000000e+00 : f32
    %315 = vector.broadcast %cst_95 : f32 to vector<8x32xf32>
    %316 = arith.addf %315, %314 : vector<8x32xf32>
    %317 = arith.divf %315, %316 : vector<8x32xf32>
    %318 = vector.extract_strided_slice %311 {offsets = [0, 32], sizes = [8, 32], strides = [1, 1]} : vector<8x128xf32> to vector<8x32xf32>
    %319 = arith.negf %318 : vector<8x32xf32>
    %320 = math.exp %319 : vector<8x32xf32>
    %cst_96 = arith.constant 1.000000e+00 : f32
    %321 = vector.broadcast %cst_96 : f32 to vector<8x32xf32>
    %322 = arith.addf %321, %320 : vector<8x32xf32>
    %323 = arith.divf %321, %322 : vector<8x32xf32>
    %324 = vector.extract_strided_slice %311 {offsets = [0, 64], sizes = [8, 32], strides = [1, 1]} : vector<8x128xf32> to vector<8x32xf32>
    %325 = math.tanh %324 : vector<8x32xf32>
    %326 = vector.extract_strided_slice %311 {offsets = [0, 96], sizes = [8, 32], strides = [1, 1]} : vector<8x128xf32> to vector<8x32xf32>
    %327 = arith.negf %326 : vector<8x32xf32>
    %328 = math.exp %327 : vector<8x32xf32>
    %cst_97 = arith.constant 1.000000e+00 : f32
    %329 = vector.broadcast %cst_97 : f32 to vector<8x32xf32>
    %330 = arith.addf %329, %328 : vector<8x32xf32>
    %331 = arith.divf %329, %330 : vector<8x32xf32>
    %332 = arith.mulf %323, %276 : vector<8x32xf32>
    %333 = arith.mulf %317, %325 : vector<8x32xf32>
    %334 = arith.addf %332, %333 : vector<8x32xf32>
    %335 = math.tanh %334 : vector<8x32xf32>
    %336 = arith.mulf %331, %335 : vector<8x32xf32>
    %c40_98 = arith.constant 40 : index
    %c0_99 = arith.constant 0 : index
    %337 = vector.load %arg19[%c40_98, %c0_99] : memref<128x32xf32, #tpu.memory_space<vmem>>, vector<8x32xf32>
    tpu.vector_store %arg19[%c40_98, %c0_99], %336 {strides = array<i32>} : memref<128x32xf32, #tpu.memory_space<vmem>>, vector<8x32xf32>,
    %c80 = arith.constant 80 : index
    %c0_100 = arith.constant 0 : index
    %338 = vector.load %arg18[%c80, %c0_100] : memref<128x128xf32, #tpu.memory_space<vmem>>, vector<8x128xf32>
    %cst_101 = arith.constant dense<0.000000e+00> : vector<8x128xf32>
    %339 = tpu.matmul %307, %14, %cst_101 {dimension_numbers = #tpu.dot_dimension_numbers<[1], [0], [0], [1], [0, 0, 1, 1], [], []>} : vector<8x32xf32>, vector<32x128xf32>, vector<8x128xf32> -> vector<8x128xf32>
    %340 = arith.addf %338, %339 : vector<8x128xf32>
    %341 = vector.extract_strided_slice %340 {offsets = [0, 0], sizes = [8, 32], strides = [1, 1]} : vector<8x128xf32> to vector<8x32xf32>
    %342 = arith.negf %341 : vector<8x32xf32>
    %343 = math.exp %342 : vector<8x32xf32>
    %cst_102 = arith.constant 1.000000e+00 : f32
    %344 = vector.broadcast %cst_102 : f32 to vector<8x32xf32>
    %345 = arith.addf %344, %343 : vector<8x32xf32>
    %346 = arith.divf %344, %345 : vector<8x32xf32>
    %347 = vector.extract_strided_slice %340 {offsets = [0, 32], sizes = [8, 32], strides = [1, 1]} : vector<8x128xf32> to vector<8x32xf32>
    %348 = arith.negf %347 : vector<8x32xf32>
    %349 = math.exp %348 : vector<8x32xf32>
    %cst_103 = arith.constant 1.000000e+00 : f32
    %350 = vector.broadcast %cst_103 : f32 to vector<8x32xf32>
    %351 = arith.addf %350, %349 : vector<8x32xf32>
    %352 = arith.divf %350, %351 : vector<8x32xf32>
    %353 = vector.extract_strided_slice %340 {offsets = [0, 64], sizes = [8, 32], strides = [1, 1]} : vector<8x128xf32> to vector<8x32xf32>
    %354 = math.tanh %353 : vector<8x32xf32>
    %355 = vector.extract_strided_slice %340 {offsets = [0, 96], sizes = [8, 32], strides = [1, 1]} : vector<8x128xf32> to vector<8x32xf32>
    %356 = arith.negf %355 : vector<8x32xf32>
    %357 = math.exp %356 : vector<8x32xf32>
    %cst_104 = arith.constant 1.000000e+00 : f32
    %358 = vector.broadcast %cst_104 : f32 to vector<8x32xf32>
    %359 = arith.addf %358, %357 : vector<8x32xf32>
    %360 = arith.divf %358, %359 : vector<8x32xf32>
    %361 = arith.mulf %352, %305 : vector<8x32xf32>
    %362 = arith.mulf %346, %354 : vector<8x32xf32>
    %363 = arith.addf %361, %362 : vector<8x32xf32>
    %364 = math.tanh %363 : vector<8x32xf32>
    %365 = arith.mulf %360, %364 : vector<8x32xf32>
    %c80_105 = arith.constant 80 : index
    %c0_106 = arith.constant 0 : index
    %366 = vector.load %arg20[%c80_105, %c0_106] : memref<128x32xf32, #tpu.memory_space<vmem>>, vector<8x32xf32>
    tpu.vector_store %arg20[%c80_105, %c0_106], %365 {strides = array<i32>} : memref<128x32xf32, #tpu.memory_space<vmem>>, vector<8x32xf32>,
    %c48 = arith.constant 48 : index
    %c0_107 = arith.constant 0 : index
    %367 = vector.load %arg17[%c48, %c0_107] : memref<128x128xf32, #tpu.memory_space<vmem>>, vector<8x128xf32>
    %cst_108 = arith.constant dense<0.000000e+00> : vector<8x128xf32>
    %368 = tpu.matmul %336, %13, %cst_108 {dimension_numbers = #tpu.dot_dimension_numbers<[1], [0], [0], [1], [0, 0, 1, 1], [], []>} : vector<8x32xf32>, vector<32x128xf32>, vector<8x128xf32> -> vector<8x128xf32>
    %369 = arith.addf %367, %368 : vector<8x128xf32>
    %370 = vector.extract_strided_slice %369 {offsets = [0, 0], sizes = [8, 32], strides = [1, 1]} : vector<8x128xf32> to vector<8x32xf32>
    %371 = arith.negf %370 : vector<8x32xf32>
    %372 = math.exp %371 : vector<8x32xf32>
    %cst_109 = arith.constant 1.000000e+00 : f32
    %373 = vector.broadcast %cst_109 : f32 to vector<8x32xf32>
    %374 = arith.addf %373, %372 : vector<8x32xf32>
    %375 = arith.divf %373, %374 : vector<8x32xf32>
    %376 = vector.extract_strided_slice %369 {offsets = [0, 32], sizes = [8, 32], strides = [1, 1]} : vector<8x128xf32> to vector<8x32xf32>
    %377 = arith.negf %376 : vector<8x32xf32>
    %378 = math.exp %377 : vector<8x32xf32>
    %cst_110 = arith.constant 1.000000e+00 : f32
    %379 = vector.broadcast %cst_110 : f32 to vector<8x32xf32>
    %380 = arith.addf %379, %378 : vector<8x32xf32>
    %381 = arith.divf %379, %380 : vector<8x32xf32>
    %382 = vector.extract_strided_slice %369 {offsets = [0, 64], sizes = [8, 32], strides = [1, 1]} : vector<8x128xf32> to vector<8x32xf32>
    %383 = math.tanh %382 : vector<8x32xf32>
    %384 = vector.extract_strided_slice %369 {offsets = [0, 96], sizes = [8, 32], strides = [1, 1]} : vector<8x128xf32> to vector<8x32xf32>
    %385 = arith.negf %384 : vector<8x32xf32>
    %386 = math.exp %385 : vector<8x32xf32>
    %cst_111 = arith.constant 1.000000e+00 : f32
    %387 = vector.broadcast %cst_111 : f32 to vector<8x32xf32>
    %388 = arith.addf %387, %386 : vector<8x32xf32>
    %389 = arith.divf %387, %388 : vector<8x32xf32>
    %390 = arith.mulf %381, %334 : vector<8x32xf32>
    %391 = arith.mulf %375, %383 : vector<8x32xf32>
    %392 = arith.addf %390, %391 : vector<8x32xf32>
    %393 = math.tanh %392 : vector<8x32xf32>
    %394 = arith.mulf %389, %393 : vector<8x32xf32>
    %c48_112 = arith.constant 48 : index
    %c0_113 = arith.constant 0 : index
    %395 = vector.load %arg19[%c48_112, %c0_113] : memref<128x32xf32, #tpu.memory_space<vmem>>, vector<8x32xf32>
    tpu.vector_store %arg19[%c48_112, %c0_113], %394 {strides = array<i32>} : memref<128x32xf32, #tpu.memory_space<vmem>>, vector<8x32xf32>,
    %c72 = arith.constant 72 : index
    %c0_114 = arith.constant 0 : index
    %396 = vector.load %arg18[%c72, %c0_114] : memref<128x128xf32, #tpu.memory_space<vmem>>, vector<8x128xf32>
    %cst_115 = arith.constant dense<0.000000e+00> : vector<8x128xf32>
    %397 = tpu.matmul %365, %14, %cst_115 {dimension_numbers = #tpu.dot_dimension_numbers<[1], [0], [0], [1], [0, 0, 1, 1], [], []>} : vector<8x32xf32>, vector<32x128xf32>, vector<8x128xf32> -> vector<8x128xf32>
    %398 = arith.addf %396, %397 : vector<8x128xf32>
    %399 = vector.extract_strided_slice %398 {offsets = [0, 0], sizes = [8, 32], strides = [1, 1]} : vector<8x128xf32> to vector<8x32xf32>
    %400 = arith.negf %399 : vector<8x32xf32>
    %401 = math.exp %400 : vector<8x32xf32>
    %cst_116 = arith.constant 1.000000e+00 : f32
    %402 = vector.broadcast %cst_116 : f32 to vector<8x32xf32>
    %403 = arith.addf %402, %401 : vector<8x32xf32>
    %404 = arith.divf %402, %403 : vector<8x32xf32>
    %405 = vector.extract_strided_slice %398 {offsets = [0, 32], sizes = [8, 32], strides = [1, 1]} : vector<8x128xf32> to vector<8x32xf32>
    %406 = arith.negf %405 : vector<8x32xf32>
    %407 = math.exp %406 : vector<8x32xf32>
    %cst_117 = arith.constant 1.000000e+00 : f32
    %408 = vector.broadcast %cst_117 : f32 to vector<8x32xf32>
    %409 = arith.addf %408, %407 : vector<8x32xf32>
    %410 = arith.divf %408, %409 : vector<8x32xf32>
    %411 = vector.extract_strided_slice %398 {offsets = [0, 64], sizes = [8, 32], strides = [1, 1]} : vector<8x128xf32> to vector<8x32xf32>
    %412 = math.tanh %411 : vector<8x32xf32>
    %413 = vector.extract_strided_slice %398 {offsets = [0, 96], sizes = [8, 32], strides = [1, 1]} : vector<8x128xf32> to vector<8x32xf32>
    %414 = arith.negf %413 : vector<8x32xf32>
    %415 = math.exp %414 : vector<8x32xf32>
    %cst_118 = arith.constant 1.000000e+00 : f32
    %416 = vector.broadcast %cst_118 : f32 to vector<8x32xf32>
    %417 = arith.addf %416, %415 : vector<8x32xf32>
    %418 = arith.divf %416, %417 : vector<8x32xf32>
    %419 = arith.mulf %410, %363 : vector<8x32xf32>
    %420 = arith.mulf %404, %412 : vector<8x32xf32>
    %421 = arith.addf %419, %420 : vector<8x32xf32>
    %422 = math.tanh %421 : vector<8x32xf32>
    %423 = arith.mulf %418, %422 : vector<8x32xf32>
    %c72_119 = arith.constant 72 : index
    %c0_120 = arith.constant 0 : index
    %424 = vector.load %arg20[%c72_119, %c0_120] : memref<128x32xf32, #tpu.memory_space<vmem>>, vector<8x32xf32>
    tpu.vector_store %arg20[%c72_119, %c0_120], %423 {strides = array<i32>} : memref<128x32xf32, #tpu.memory_space<vmem>>, vector<8x32xf32>,
    %c56 = arith.constant 56 : index
    %c0_121 = arith.constant 0 : index
    %425 = vector.load %arg17[%c56, %c0_121] : memref<128x128xf32, #tpu.memory_space<vmem>>, vector<8x128xf32>
    %cst_122 = arith.constant dense<0.000000e+00> : vector<8x128xf32>
    %426 = tpu.matmul %394, %13, %cst_122 {dimension_numbers = #tpu.dot_dimension_numbers<[1], [0], [0], [1], [0, 0, 1, 1], [], []>} : vector<8x32xf32>, vector<32x128xf32>, vector<8x128xf32> -> vector<8x128xf32>
    %427 = arith.addf %425, %426 : vector<8x128xf32>
    %428 = vector.extract_strided_slice %427 {offsets = [0, 0], sizes = [8, 32], strides = [1, 1]} : vector<8x128xf32> to vector<8x32xf32>
    %429 = arith.negf %428 : vector<8x32xf32>
    %430 = math.exp %429 : vector<8x32xf32>
    %cst_123 = arith.constant 1.000000e+00 : f32
    %431 = vector.broadcast %cst_123 : f32 to vector<8x32xf32>
    %432 = arith.addf %431, %430 : vector<8x32xf32>
    %433 = arith.divf %431, %432 : vector<8x32xf32>
    %434 = vector.extract_strided_slice %427 {offsets = [0, 32], sizes = [8, 32], strides = [1, 1]} : vector<8x128xf32> to vector<8x32xf32>
    %435 = arith.negf %434 : vector<8x32xf32>
    %436 = math.exp %435 : vector<8x32xf32>
    %cst_124 = arith.constant 1.000000e+00 : f32
    %437 = vector.broadcast %cst_124 : f32 to vector<8x32xf32>
    %438 = arith.addf %437, %436 : vector<8x32xf32>
    %439 = arith.divf %437, %438 : vector<8x32xf32>
    %440 = vector.extract_strided_slice %427 {offsets = [0, 64], sizes = [8, 32], strides = [1, 1]} : vector<8x128xf32> to vector<8x32xf32>
    %441 = math.tanh %440 : vector<8x32xf32>
    %442 = vector.extract_strided_slice %427 {offsets = [0, 96], sizes = [8, 32], strides = [1, 1]} : vector<8x128xf32> to vector<8x32xf32>
    %443 = arith.negf %442 : vector<8x32xf32>
    %444 = math.exp %443 : vector<8x32xf32>
    %cst_125 = arith.constant 1.000000e+00 : f32
    %445 = vector.broadcast %cst_125 : f32 to vector<8x32xf32>
    %446 = arith.addf %445, %444 : vector<8x32xf32>
    %447 = arith.divf %445, %446 : vector<8x32xf32>
    %448 = arith.mulf %439, %392 : vector<8x32xf32>
    %449 = arith.mulf %433, %441 : vector<8x32xf32>
    %450 = arith.addf %448, %449 : vector<8x32xf32>
    %451 = math.tanh %450 : vector<8x32xf32>
    %452 = arith.mulf %447, %451 : vector<8x32xf32>
    %c56_126 = arith.constant 56 : index
    %c0_127 = arith.constant 0 : index
    %453 = vector.load %arg19[%c56_126, %c0_127] : memref<128x32xf32, #tpu.memory_space<vmem>>, vector<8x32xf32>
    tpu.vector_store %arg19[%c56_126, %c0_127], %452 {strides = array<i32>} : memref<128x32xf32, #tpu.memory_space<vmem>>, vector<8x32xf32>,
    %c64 = arith.constant 64 : index
    %c0_128 = arith.constant 0 : index
    %454 = vector.load %arg18[%c64, %c0_128] : memref<128x128xf32, #tpu.memory_space<vmem>>, vector<8x128xf32>
    %cst_129 = arith.constant dense<0.000000e+00> : vector<8x128xf32>
    %455 = tpu.matmul %423, %14, %cst_129 {dimension_numbers = #tpu.dot_dimension_numbers<[1], [0], [0], [1], [0, 0, 1, 1], [], []>} : vector<8x32xf32>, vector<32x128xf32>, vector<8x128xf32> -> vector<8x128xf32>
    %456 = arith.addf %454, %455 : vector<8x128xf32>
    %457 = vector.extract_strided_slice %456 {offsets = [0, 0], sizes = [8, 32], strides = [1, 1]} : vector<8x128xf32> to vector<8x32xf32>
    %458 = arith.negf %457 : vector<8x32xf32>
    %459 = math.exp %458 : vector<8x32xf32>
    %cst_130 = arith.constant 1.000000e+00 : f32
    %460 = vector.broadcast %cst_130 : f32 to vector<8x32xf32>
    %461 = arith.addf %460, %459 : vector<8x32xf32>
    %462 = arith.divf %460, %461 : vector<8x32xf32>
    %463 = vector.extract_strided_slice %456 {offsets = [0, 32], sizes = [8, 32], strides = [1, 1]} : vector<8x128xf32> to vector<8x32xf32>
    %464 = arith.negf %463 : vector<8x32xf32>
    %465 = math.exp %464 : vector<8x32xf32>
    %cst_131 = arith.constant 1.000000e+00 : f32
    %466 = vector.broadcast %cst_131 : f32 to vector<8x32xf32>
    %467 = arith.addf %466, %465 : vector<8x32xf32>
    %468 = arith.divf %466, %467 : vector<8x32xf32>
    %469 = vector.extract_strided_slice %456 {offsets = [0, 64], sizes = [8, 32], strides = [1, 1]} : vector<8x128xf32> to vector<8x32xf32>
    %470 = math.tanh %469 : vector<8x32xf32>
    %471 = vector.extract_strided_slice %456 {offsets = [0, 96], sizes = [8, 32], strides = [1, 1]} : vector<8x128xf32> to vector<8x32xf32>
    %472 = arith.negf %471 : vector<8x32xf32>
    %473 = math.exp %472 : vector<8x32xf32>
    %cst_132 = arith.constant 1.000000e+00 : f32
    %474 = vector.broadcast %cst_132 : f32 to vector<8x32xf32>
    %475 = arith.addf %474, %473 : vector<8x32xf32>
    %476 = arith.divf %474, %475 : vector<8x32xf32>
    %477 = arith.mulf %468, %421 : vector<8x32xf32>
    %478 = arith.mulf %462, %470 : vector<8x32xf32>
    %479 = arith.addf %477, %478 : vector<8x32xf32>
    %480 = math.tanh %479 : vector<8x32xf32>
    %481 = arith.mulf %476, %480 : vector<8x32xf32>
    %c64_133 = arith.constant 64 : index
    %c0_134 = arith.constant 0 : index
    %482 = vector.load %arg20[%c64_133, %c0_134] : memref<128x32xf32, #tpu.memory_space<vmem>>, vector<8x32xf32>
    tpu.vector_store %arg20[%c64_133, %c0_134], %481 {strides = array<i32>} : memref<128x32xf32, #tpu.memory_space<vmem>>, vector<8x32xf32>,
    %c64_135 = arith.constant 64 : index
    %c0_136 = arith.constant 0 : index
    %483 = vector.load %arg17[%c64_135, %c0_136] : memref<128x128xf32, #tpu.memory_space<vmem>>, vector<8x128xf32>
    %cst_137 = arith.constant dense<0.000000e+00> : vector<8x128xf32>
    %484 = tpu.matmul %452, %13, %cst_137 {dimension_numbers = #tpu.dot_dimension_numbers<[1], [0], [0], [1], [0, 0, 1, 1], [], []>} : vector<8x32xf32>, vector<32x128xf32>, vector<8x128xf32> -> vector<8x128xf32>
    %485 = arith.addf %483, %484 : vector<8x128xf32>
    %486 = vector.extract_strided_slice %485 {offsets = [0, 0], sizes = [8, 32], strides = [1, 1]} : vector<8x128xf32> to vector<8x32xf32>
    %487 = arith.negf %486 : vector<8x32xf32>
    %488 = math.exp %487 : vector<8x32xf32>
    %cst_138 = arith.constant 1.000000e+00 : f32
    %489 = vector.broadcast %cst_138 : f32 to vector<8x32xf32>
    %490 = arith.addf %489, %488 : vector<8x32xf32>
    %491 = arith.divf %489, %490 : vector<8x32xf32>
    %492 = vector.extract_strided_slice %485 {offsets = [0, 32], sizes = [8, 32], strides = [1, 1]} : vector<8x128xf32> to vector<8x32xf32>
    %493 = arith.negf %492 : vector<8x32xf32>
    %494 = math.exp %493 : vector<8x32xf32>
    %cst_139 = arith.constant 1.000000e+00 : f32
    %495 = vector.broadcast %cst_139 : f32 to vector<8x32xf32>
    %496 = arith.addf %495, %494 : vector<8x32xf32>
    %497 = arith.divf %495, %496 : vector<8x32xf32>
    %498 = vector.extract_strided_slice %485 {offsets = [0, 64], sizes = [8, 32], strides = [1, 1]} : vector<8x128xf32> to vector<8x32xf32>
    %499 = math.tanh %498 : vector<8x32xf32>
    %500 = vector.extract_strided_slice %485 {offsets = [0, 96], sizes = [8, 32], strides = [1, 1]} : vector<8x128xf32> to vector<8x32xf32>
    %501 = arith.negf %500 : vector<8x32xf32>
    %502 = math.exp %501 : vector<8x32xf32>
    %cst_140 = arith.constant 1.000000e+00 : f32
    %503 = vector.broadcast %cst_140 : f32 to vector<8x32xf32>
    %504 = arith.addf %503, %502 : vector<8x32xf32>
    %505 = arith.divf %503, %504 : vector<8x32xf32>
    %506 = arith.mulf %497, %450 : vector<8x32xf32>
    %507 = arith.mulf %491, %499 : vector<8x32xf32>
    %508 = arith.addf %506, %507 : vector<8x32xf32>
    %509 = math.tanh %508 : vector<8x32xf32>
    %510 = arith.mulf %505, %509 : vector<8x32xf32>
    %c64_141 = arith.constant 64 : index
    %c0_142 = arith.constant 0 : index
    %511 = vector.load %arg19[%c64_141, %c0_142] : memref<128x32xf32, #tpu.memory_space<vmem>>, vector<8x32xf32>
    tpu.vector_store %arg19[%c64_141, %c0_142], %510 {strides = array<i32>} : memref<128x32xf32, #tpu.memory_space<vmem>>, vector<8x32xf32>,
    %c56_143 = arith.constant 56 : index
    %c0_144 = arith.constant 0 : index
    %512 = vector.load %arg18[%c56_143, %c0_144] : memref<128x128xf32, #tpu.memory_space<vmem>>, vector<8x128xf32>
    %cst_145 = arith.constant dense<0.000000e+00> : vector<8x128xf32>
    %513 = tpu.matmul %481, %14, %cst_145 {dimension_numbers = #tpu.dot_dimension_numbers<[1], [0], [0], [1], [0, 0, 1, 1], [], []>} : vector<8x32xf32>, vector<32x128xf32>, vector<8x128xf32> -> vector<8x128xf32>
    %514 = arith.addf %512, %513 : vector<8x128xf32>
    %515 = vector.extract_strided_slice %514 {offsets = [0, 0], sizes = [8, 32], strides = [1, 1]} : vector<8x128xf32> to vector<8x32xf32>
    %516 = arith.negf %515 : vector<8x32xf32>
    %517 = math.exp %516 : vector<8x32xf32>
    %cst_146 = arith.constant 1.000000e+00 : f32
    %518 = vector.broadcast %cst_146 : f32 to vector<8x32xf32>
    %519 = arith.addf %518, %517 : vector<8x32xf32>
    %520 = arith.divf %518, %519 : vector<8x32xf32>
    %521 = vector.extract_strided_slice %514 {offsets = [0, 32], sizes = [8, 32], strides = [1, 1]} : vector<8x128xf32> to vector<8x32xf32>
    %522 = arith.negf %521 : vector<8x32xf32>
    %523 = math.exp %522 : vector<8x32xf32>
    %cst_147 = arith.constant 1.000000e+00 : f32
    %524 = vector.broadcast %cst_147 : f32 to vector<8x32xf32>
    %525 = arith.addf %524, %523 : vector<8x32xf32>
    %526 = arith.divf %524, %525 : vector<8x32xf32>
    %527 = vector.extract_strided_slice %514 {offsets = [0, 64], sizes = [8, 32], strides = [1, 1]} : vector<8x128xf32> to vector<8x32xf32>
    %528 = math.tanh %527 : vector<8x32xf32>
    %529 = vector.extract_strided_slice %514 {offsets = [0, 96], sizes = [8, 32], strides = [1, 1]} : vector<8x128xf32> to vector<8x32xf32>
    %530 = arith.negf %529 : vector<8x32xf32>
    %531 = math.exp %530 : vector<8x32xf32>
    %cst_148 = arith.constant 1.000000e+00 : f32
    %532 = vector.broadcast %cst_148 : f32 to vector<8x32xf32>
    %533 = arith.addf %532, %531 : vector<8x32xf32>
    %534 = arith.divf %532, %533 : vector<8x32xf32>
    %535 = arith.mulf %526, %479 : vector<8x32xf32>
    %536 = arith.mulf %520, %528 : vector<8x32xf32>
    %537 = arith.addf %535, %536 : vector<8x32xf32>
    %538 = math.tanh %537 : vector<8x32xf32>
    %539 = arith.mulf %534, %538 : vector<8x32xf32>
    %c56_149 = arith.constant 56 : index
    %c0_150 = arith.constant 0 : index
    %540 = vector.load %arg20[%c56_149, %c0_150] : memref<128x32xf32, #tpu.memory_space<vmem>>, vector<8x32xf32>
    tpu.vector_store %arg20[%c56_149, %c0_150], %539 {strides = array<i32>} : memref<128x32xf32, #tpu.memory_space<vmem>>, vector<8x32xf32>,
    %c72_151 = arith.constant 72 : index
    %c0_152 = arith.constant 0 : index
    %541 = vector.load %arg17[%c72_151, %c0_152] : memref<128x128xf32, #tpu.memory_space<vmem>>, vector<8x128xf32>
    %cst_153 = arith.constant dense<0.000000e+00> : vector<8x128xf32>
    %542 = tpu.matmul %510, %13, %cst_153 {dimension_numbers = #tpu.dot_dimension_numbers<[1], [0], [0], [1], [0, 0, 1, 1], [], []>} : vector<8x32xf32>, vector<32x128xf32>, vector<8x128xf32> -> vector<8x128xf32>
    %543 = arith.addf %541, %542 : vector<8x128xf32>
    %544 = vector.extract_strided_slice %543 {offsets = [0, 0], sizes = [8, 32], strides = [1, 1]} : vector<8x128xf32> to vector<8x32xf32>
    %545 = arith.negf %544 : vector<8x32xf32>
    %546 = math.exp %545 : vector<8x32xf32>
    %cst_154 = arith.constant 1.000000e+00 : f32
    %547 = vector.broadcast %cst_154 : f32 to vector<8x32xf32>
    %548 = arith.addf %547, %546 : vector<8x32xf32>
    %549 = arith.divf %547, %548 : vector<8x32xf32>
    %550 = vector.extract_strided_slice %543 {offsets = [0, 32], sizes = [8, 32], strides = [1, 1]} : vector<8x128xf32> to vector<8x32xf32>
    %551 = arith.negf %550 : vector<8x32xf32>
    %552 = math.exp %551 : vector<8x32xf32>
    %cst_155 = arith.constant 1.000000e+00 : f32
    %553 = vector.broadcast %cst_155 : f32 to vector<8x32xf32>
    %554 = arith.addf %553, %552 : vector<8x32xf32>
    %555 = arith.divf %553, %554 : vector<8x32xf32>
    %556 = vector.extract_strided_slice %543 {offsets = [0, 64], sizes = [8, 32], strides = [1, 1]} : vector<8x128xf32> to vector<8x32xf32>
    %557 = math.tanh %556 : vector<8x32xf32>
    %558 = vector.extract_strided_slice %543 {offsets = [0, 96], sizes = [8, 32], strides = [1, 1]} : vector<8x128xf32> to vector<8x32xf32>
    %559 = arith.negf %558 : vector<8x32xf32>
    %560 = math.exp %559 : vector<8x32xf32>
    %cst_156 = arith.constant 1.000000e+00 : f32
    %561 = vector.broadcast %cst_156 : f32 to vector<8x32xf32>
    %562 = arith.addf %561, %560 : vector<8x32xf32>
    %563 = arith.divf %561, %562 : vector<8x32xf32>
    %564 = arith.mulf %555, %508 : vector<8x32xf32>
    %565 = arith.mulf %549, %557 : vector<8x32xf32>
    %566 = arith.addf %564, %565 : vector<8x32xf32>
    %567 = math.tanh %566 : vector<8x32xf32>
    %568 = arith.mulf %563, %567 : vector<8x32xf32>
    %c72_157 = arith.constant 72 : index
    %c0_158 = arith.constant 0 : index
    %569 = vector.load %arg19[%c72_157, %c0_158] : memref<128x32xf32, #tpu.memory_space<vmem>>, vector<8x32xf32>
    tpu.vector_store %arg19[%c72_157, %c0_158], %568 {strides = array<i32>} : memref<128x32xf32, #tpu.memory_space<vmem>>, vector<8x32xf32>,
    %c48_159 = arith.constant 48 : index
    %c0_160 = arith.constant 0 : index
    %570 = vector.load %arg18[%c48_159, %c0_160] : memref<128x128xf32, #tpu.memory_space<vmem>>, vector<8x128xf32>
    %cst_161 = arith.constant dense<0.000000e+00> : vector<8x128xf32>
    %571 = tpu.matmul %539, %14, %cst_161 {dimension_numbers = #tpu.dot_dimension_numbers<[1], [0], [0], [1], [0, 0, 1, 1], [], []>} : vector<8x32xf32>, vector<32x128xf32>, vector<8x128xf32> -> vector<8x128xf32>
    %572 = arith.addf %570, %571 : vector<8x128xf32>
    %573 = vector.extract_strided_slice %572 {offsets = [0, 0], sizes = [8, 32], strides = [1, 1]} : vector<8x128xf32> to vector<8x32xf32>
    %574 = arith.negf %573 : vector<8x32xf32>
    %575 = math.exp %574 : vector<8x32xf32>
    %cst_162 = arith.constant 1.000000e+00 : f32
    %576 = vector.broadcast %cst_162 : f32 to vector<8x32xf32>
    %577 = arith.addf %576, %575 : vector<8x32xf32>
    %578 = arith.divf %576, %577 : vector<8x32xf32>
    %579 = vector.extract_strided_slice %572 {offsets = [0, 32], sizes = [8, 32], strides = [1, 1]} : vector<8x128xf32> to vector<8x32xf32>
    %580 = arith.negf %579 : vector<8x32xf32>
    %581 = math.exp %580 : vector<8x32xf32>
    %cst_163 = arith.constant 1.000000e+00 : f32
    %582 = vector.broadcast %cst_163 : f32 to vector<8x32xf32>
    %583 = arith.addf %582, %581 : vector<8x32xf32>
    %584 = arith.divf %582, %583 : vector<8x32xf32>
    %585 = vector.extract_strided_slice %572 {offsets = [0, 64], sizes = [8, 32], strides = [1, 1]} : vector<8x128xf32> to vector<8x32xf32>
    %586 = math.tanh %585 : vector<8x32xf32>
    %587 = vector.extract_strided_slice %572 {offsets = [0, 96], sizes = [8, 32], strides = [1, 1]} : vector<8x128xf32> to vector<8x32xf32>
    %588 = arith.negf %587 : vector<8x32xf32>
    %589 = math.exp %588 : vector<8x32xf32>
    %cst_164 = arith.constant 1.000000e+00 : f32
    %590 = vector.broadcast %cst_164 : f32 to vector<8x32xf32>
    %591 = arith.addf %590, %589 : vector<8x32xf32>
    %592 = arith.divf %590, %591 : vector<8x32xf32>
    %593 = arith.mulf %584, %537 : vector<8x32xf32>
    %594 = arith.mulf %578, %586 : vector<8x32xf32>
    %595 = arith.addf %593, %594 : vector<8x32xf32>
    %596 = math.tanh %595 : vector<8x32xf32>
    %597 = arith.mulf %592, %596 : vector<8x32xf32>
    %c48_165 = arith.constant 48 : index
    %c0_166 = arith.constant 0 : index
    %598 = vector.load %arg20[%c48_165, %c0_166] : memref<128x32xf32, #tpu.memory_space<vmem>>, vector<8x32xf32>
    tpu.vector_store %arg20[%c48_165, %c0_166], %597 {strides = array<i32>} : memref<128x32xf32, #tpu.memory_space<vmem>>, vector<8x32xf32>,
    %c80_167 = arith.constant 80 : index
    %c0_168 = arith.constant 0 : index
    %599 = vector.load %arg17[%c80_167, %c0_168] : memref<128x128xf32, #tpu.memory_space<vmem>>, vector<8x128xf32>
    %cst_169 = arith.constant dense<0.000000e+00> : vector<8x128xf32>
    %600 = tpu.matmul %568, %13, %cst_169 {dimension_numbers = #tpu.dot_dimension_numbers<[1], [0], [0], [1], [0, 0, 1, 1], [], []>} : vector<8x32xf32>, vector<32x128xf32>, vector<8x128xf32> -> vector<8x128xf32>
    %601 = arith.addf %599, %600 : vector<8x128xf32>
    %602 = vector.extract_strided_slice %601 {offsets = [0, 0], sizes = [8, 32], strides = [1, 1]} : vector<8x128xf32> to vector<8x32xf32>
    %603 = arith.negf %602 : vector<8x32xf32>
    %604 = math.exp %603 : vector<8x32xf32>
    %cst_170 = arith.constant 1.000000e+00 : f32
    %605 = vector.broadcast %cst_170 : f32 to vector<8x32xf32>
    %606 = arith.addf %605, %604 : vector<8x32xf32>
    %607 = arith.divf %605, %606 : vector<8x32xf32>
    %608 = vector.extract_strided_slice %601 {offsets = [0, 32], sizes = [8, 32], strides = [1, 1]} : vector<8x128xf32> to vector<8x32xf32>
    %609 = arith.negf %608 : vector<8x32xf32>
    %610 = math.exp %609 : vector<8x32xf32>
    %cst_171 = arith.constant 1.000000e+00 : f32
    %611 = vector.broadcast %cst_171 : f32 to vector<8x32xf32>
    %612 = arith.addf %611, %610 : vector<8x32xf32>
    %613 = arith.divf %611, %612 : vector<8x32xf32>
    %614 = vector.extract_strided_slice %601 {offsets = [0, 64], sizes = [8, 32], strides = [1, 1]} : vector<8x128xf32> to vector<8x32xf32>
    %615 = math.tanh %614 : vector<8x32xf32>
    %616 = vector.extract_strided_slice %601 {offsets = [0, 96], sizes = [8, 32], strides = [1, 1]} : vector<8x128xf32> to vector<8x32xf32>
    %617 = arith.negf %616 : vector<8x32xf32>
    %618 = math.exp %617 : vector<8x32xf32>
    %cst_172 = arith.constant 1.000000e+00 : f32
    %619 = vector.broadcast %cst_172 : f32 to vector<8x32xf32>
    %620 = arith.addf %619, %618 : vector<8x32xf32>
    %621 = arith.divf %619, %620 : vector<8x32xf32>
    %622 = arith.mulf %613, %566 : vector<8x32xf32>
    %623 = arith.mulf %607, %615 : vector<8x32xf32>
    %624 = arith.addf %622, %623 : vector<8x32xf32>
    %625 = math.tanh %624 : vector<8x32xf32>
    %626 = arith.mulf %621, %625 : vector<8x32xf32>
    %c80_173 = arith.constant 80 : index
    %c0_174 = arith.constant 0 : index
    %627 = vector.load %arg19[%c80_173, %c0_174] : memref<128x32xf32, #tpu.memory_space<vmem>>, vector<8x32xf32>
    tpu.vector_store %arg19[%c80_173, %c0_174], %626 {strides = array<i32>} : memref<128x32xf32, #tpu.memory_space<vmem>>, vector<8x32xf32>,
    %c40_175 = arith.constant 40 : index
    %c0_176 = arith.constant 0 : index
    %628 = vector.load %arg18[%c40_175, %c0_176] : memref<128x128xf32, #tpu.memory_space<vmem>>, vector<8x128xf32>
    %cst_177 = arith.constant dense<0.000000e+00> : vector<8x128xf32>
    %629 = tpu.matmul %597, %14, %cst_177 {dimension_numbers = #tpu.dot_dimension_numbers<[1], [0], [0], [1], [0, 0, 1, 1], [], []>} : vector<8x32xf32>, vector<32x128xf32>, vector<8x128xf32> -> vector<8x128xf32>
    %630 = arith.addf %628, %629 : vector<8x128xf32>
    %631 = vector.extract_strided_slice %630 {offsets = [0, 0], sizes = [8, 32], strides = [1, 1]} : vector<8x128xf32> to vector<8x32xf32>
    %632 = arith.negf %631 : vector<8x32xf32>
    %633 = math.exp %632 : vector<8x32xf32>
    %cst_178 = arith.constant 1.000000e+00 : f32
    %634 = vector.broadcast %cst_178 : f32 to vector<8x32xf32>
    %635 = arith.addf %634, %633 : vector<8x32xf32>
    %636 = arith.divf %634, %635 : vector<8x32xf32>
    %637 = vector.extract_strided_slice %630 {offsets = [0, 32], sizes = [8, 32], strides = [1, 1]} : vector<8x128xf32> to vector<8x32xf32>
    %638 = arith.negf %637 : vector<8x32xf32>
    %639 = math.exp %638 : vector<8x32xf32>
    %cst_179 = arith.constant 1.000000e+00 : f32
    %640 = vector.broadcast %cst_179 : f32 to vector<8x32xf32>
    %641 = arith.addf %640, %639 : vector<8x32xf32>
    %642 = arith.divf %640, %641 : vector<8x32xf32>
    %643 = vector.extract_strided_slice %630 {offsets = [0, 64], sizes = [8, 32], strides = [1, 1]} : vector<8x128xf32> to vector<8x32xf32>
    %644 = math.tanh %643 : vector<8x32xf32>
    %645 = vector.extract_strided_slice %630 {offsets = [0, 96], sizes = [8, 32], strides = [1, 1]} : vector<8x128xf32> to vector<8x32xf32>
    %646 = arith.negf %645 : vector<8x32xf32>
    %647 = math.exp %646 : vector<8x32xf32>
    %cst_180 = arith.constant 1.000000e+00 : f32
    %648 = vector.broadcast %cst_180 : f32 to vector<8x32xf32>
    %649 = arith.addf %648, %647 : vector<8x32xf32>
    %650 = arith.divf %648, %649 : vector<8x32xf32>
    %651 = arith.mulf %642, %595 : vector<8x32xf32>
    %652 = arith.mulf %636, %644 : vector<8x32xf32>
    %653 = arith.addf %651, %652 : vector<8x32xf32>
    %654 = math.tanh %653 : vector<8x32xf32>
    %655 = arith.mulf %650, %654 : vector<8x32xf32>
    %c40_181 = arith.constant 40 : index
    %c0_182 = arith.constant 0 : index
    %656 = vector.load %arg20[%c40_181, %c0_182] : memref<128x32xf32, #tpu.memory_space<vmem>>, vector<8x32xf32>
    tpu.vector_store %arg20[%c40_181, %c0_182], %655 {strides = array<i32>} : memref<128x32xf32, #tpu.memory_space<vmem>>, vector<8x32xf32>,
    %c88_183 = arith.constant 88 : index
    %c0_184 = arith.constant 0 : index
    %657 = vector.load %arg17[%c88_183, %c0_184] : memref<128x128xf32, #tpu.memory_space<vmem>>, vector<8x128xf32>
    %cst_185 = arith.constant dense<0.000000e+00> : vector<8x128xf32>
    %658 = tpu.matmul %626, %13, %cst_185 {dimension_numbers = #tpu.dot_dimension_numbers<[1], [0], [0], [1], [0, 0, 1, 1], [], []>} : vector<8x32xf32>, vector<32x128xf32>, vector<8x128xf32> -> vector<8x128xf32>
    %659 = arith.addf %657, %658 : vector<8x128xf32>
    %660 = vector.extract_strided_slice %659 {offsets = [0, 0], sizes = [8, 32], strides = [1, 1]} : vector<8x128xf32> to vector<8x32xf32>
    %661 = arith.negf %660 : vector<8x32xf32>
    %662 = math.exp %661 : vector<8x32xf32>
    %cst_186 = arith.constant 1.000000e+00 : f32
    %663 = vector.broadcast %cst_186 : f32 to vector<8x32xf32>
    %664 = arith.addf %663, %662 : vector<8x32xf32>
    %665 = arith.divf %663, %664 : vector<8x32xf32>
    %666 = vector.extract_strided_slice %659 {offsets = [0, 32], sizes = [8, 32], strides = [1, 1]} : vector<8x128xf32> to vector<8x32xf32>
    %667 = arith.negf %666 : vector<8x32xf32>
    %668 = math.exp %667 : vector<8x32xf32>
    %cst_187 = arith.constant 1.000000e+00 : f32
    %669 = vector.broadcast %cst_187 : f32 to vector<8x32xf32>
    %670 = arith.addf %669, %668 : vector<8x32xf32>
    %671 = arith.divf %669, %670 : vector<8x32xf32>
    %672 = vector.extract_strided_slice %659 {offsets = [0, 64], sizes = [8, 32], strides = [1, 1]} : vector<8x128xf32> to vector<8x32xf32>
    %673 = math.tanh %672 : vector<8x32xf32>
    %674 = vector.extract_strided_slice %659 {offsets = [0, 96], sizes = [8, 32], strides = [1, 1]} : vector<8x128xf32> to vector<8x32xf32>
    %675 = arith.negf %674 : vector<8x32xf32>
    %676 = math.exp %675 : vector<8x32xf32>
    %cst_188 = arith.constant 1.000000e+00 : f32
    %677 = vector.broadcast %cst_188 : f32 to vector<8x32xf32>
    %678 = arith.addf %677, %676 : vector<8x32xf32>
    %679 = arith.divf %677, %678 : vector<8x32xf32>
    %680 = arith.mulf %671, %624 : vector<8x32xf32>
    %681 = arith.mulf %665, %673 : vector<8x32xf32>
    %682 = arith.addf %680, %681 : vector<8x32xf32>
    %683 = math.tanh %682 : vector<8x32xf32>
    %684 = arith.mulf %679, %683 : vector<8x32xf32>
    %c88_189 = arith.constant 88 : index
    %c0_190 = arith.constant 0 : index
    %685 = vector.load %arg19[%c88_189, %c0_190] : memref<128x32xf32, #tpu.memory_space<vmem>>, vector<8x32xf32>
    tpu.vector_store %arg19[%c88_189, %c0_190], %684 {strides = array<i32>} : memref<128x32xf32, #tpu.memory_space<vmem>>, vector<8x32xf32>,
    %c32_191 = arith.constant 32 : index
    %c0_192 = arith.constant 0 : index
    %686 = vector.load %arg18[%c32_191, %c0_192] : memref<128x128xf32, #tpu.memory_space<vmem>>, vector<8x128xf32>
    %cst_193 = arith.constant dense<0.000000e+00> : vector<8x128xf32>
    %687 = tpu.matmul %655, %14, %cst_193 {dimension_numbers = #tpu.dot_dimension_numbers<[1], [0], [0], [1], [0, 0, 1, 1], [], []>} : vector<8x32xf32>, vector<32x128xf32>, vector<8x128xf32> -> vector<8x128xf32>
    %688 = arith.addf %686, %687 : vector<8x128xf32>
    %689 = vector.extract_strided_slice %688 {offsets = [0, 0], sizes = [8, 32], strides = [1, 1]} : vector<8x128xf32> to vector<8x32xf32>
    %690 = arith.negf %689 : vector<8x32xf32>
    %691 = math.exp %690 : vector<8x32xf32>
    %cst_194 = arith.constant 1.000000e+00 : f32
    %692 = vector.broadcast %cst_194 : f32 to vector<8x32xf32>
    %693 = arith.addf %692, %691 : vector<8x32xf32>
    %694 = arith.divf %692, %693 : vector<8x32xf32>
    %695 = vector.extract_strided_slice %688 {offsets = [0, 32], sizes = [8, 32], strides = [1, 1]} : vector<8x128xf32> to vector<8x32xf32>
    %696 = arith.negf %695 : vector<8x32xf32>
    %697 = math.exp %696 : vector<8x32xf32>
    %cst_195 = arith.constant 1.000000e+00 : f32
    %698 = vector.broadcast %cst_195 : f32 to vector<8x32xf32>
    %699 = arith.addf %698, %697 : vector<8x32xf32>
    %700 = arith.divf %698, %699 : vector<8x32xf32>
    %701 = vector.extract_strided_slice %688 {offsets = [0, 64], sizes = [8, 32], strides = [1, 1]} : vector<8x128xf32> to vector<8x32xf32>
    %702 = math.tanh %701 : vector<8x32xf32>
    %703 = vector.extract_strided_slice %688 {offsets = [0, 96], sizes = [8, 32], strides = [1, 1]} : vector<8x128xf32> to vector<8x32xf32>
    %704 = arith.negf %703 : vector<8x32xf32>
    %705 = math.exp %704 : vector<8x32xf32>
    %cst_196 = arith.constant 1.000000e+00 : f32
    %706 = vector.broadcast %cst_196 : f32 to vector<8x32xf32>
    %707 = arith.addf %706, %705 : vector<8x32xf32>
    %708 = arith.divf %706, %707 : vector<8x32xf32>
    %709 = arith.mulf %700, %653 : vector<8x32xf32>
    %710 = arith.mulf %694, %702 : vector<8x32xf32>
    %711 = arith.addf %709, %710 : vector<8x32xf32>
    %712 = math.tanh %711 : vector<8x32xf32>
    %713 = arith.mulf %708, %712 : vector<8x32xf32>
    %c32_197 = arith.constant 32 : index
    %c0_198 = arith.constant 0 : index
    %714 = vector.load %arg20[%c32_197, %c0_198] : memref<128x32xf32, #tpu.memory_space<vmem>>, vector<8x32xf32>
    tpu.vector_store %arg20[%c32_197, %c0_198], %713 {strides = array<i32>} : memref<128x32xf32, #tpu.memory_space<vmem>>, vector<8x32xf32>,
    %c96_199 = arith.constant 96 : index
    %c0_200 = arith.constant 0 : index
    %715 = vector.load %arg17[%c96_199, %c0_200] : memref<128x128xf32, #tpu.memory_space<vmem>>, vector<8x128xf32>
    %cst_201 = arith.constant dense<0.000000e+00> : vector<8x128xf32>
    %716 = tpu.matmul %684, %13, %cst_201 {dimension_numbers = #tpu.dot_dimension_numbers<[1], [0], [0], [1], [0, 0, 1, 1], [], []>} : vector<8x32xf32>, vector<32x128xf32>, vector<8x128xf32> -> vector<8x128xf32>
    %717 = arith.addf %715, %716 : vector<8x128xf32>
    %718 = vector.extract_strided_slice %717 {offsets = [0, 0], sizes = [8, 32], strides = [1, 1]} : vector<8x128xf32> to vector<8x32xf32>
    %719 = arith.negf %718 : vector<8x32xf32>
    %720 = math.exp %719 : vector<8x32xf32>
    %cst_202 = arith.constant 1.000000e+00 : f32
    %721 = vector.broadcast %cst_202 : f32 to vector<8x32xf32>
    %722 = arith.addf %721, %720 : vector<8x32xf32>
    %723 = arith.divf %721, %722 : vector<8x32xf32>
    %724 = vector.extract_strided_slice %717 {offsets = [0, 32], sizes = [8, 32], strides = [1, 1]} : vector<8x128xf32> to vector<8x32xf32>
    %725 = arith.negf %724 : vector<8x32xf32>
    %726 = math.exp %725 : vector<8x32xf32>
    %cst_203 = arith.constant 1.000000e+00 : f32
    %727 = vector.broadcast %cst_203 : f32 to vector<8x32xf32>
    %728 = arith.addf %727, %726 : vector<8x32xf32>
    %729 = arith.divf %727, %728 : vector<8x32xf32>
    %730 = vector.extract_strided_slice %717 {offsets = [0, 64], sizes = [8, 32], strides = [1, 1]} : vector<8x128xf32> to vector<8x32xf32>
    %731 = math.tanh %730 : vector<8x32xf32>
    %732 = vector.extract_strided_slice %717 {offsets = [0, 96], sizes = [8, 32], strides = [1, 1]} : vector<8x128xf32> to vector<8x32xf32>
    %733 = arith.negf %732 : vector<8x32xf32>
    %734 = math.exp %733 : vector<8x32xf32>
    %cst_204 = arith.constant 1.000000e+00 : f32
    %735 = vector.broadcast %cst_204 : f32 to vector<8x32xf32>
    %736 = arith.addf %735, %734 : vector<8x32xf32>
    %737 = arith.divf %735, %736 : vector<8x32xf32>
    %738 = arith.mulf %729, %682 : vector<8x32xf32>
    %739 = arith.mulf %723, %731 : vector<8x32xf32>
    %740 = arith.addf %738, %739 : vector<8x32xf32>
    %741 = math.tanh %740 : vector<8x32xf32>
    %742 = arith.mulf %737, %741 : vector<8x32xf32>
    %c96_205 = arith.constant 96 : index
    %c0_206 = arith.constant 0 : index
    %743 = vector.load %arg19[%c96_205, %c0_206] : memref<128x32xf32, #tpu.memory_space<vmem>>, vector<8x32xf32>
    tpu.vector_store %arg19[%c96_205, %c0_206], %742 {strides = array<i32>} : memref<128x32xf32, #tpu.memory_space<vmem>>, vector<8x32xf32>,
    %c24_207 = arith.constant 24 : index
    %c0_208 = arith.constant 0 : index
    %744 = vector.load %arg18[%c24_207, %c0_208] : memref<128x128xf32, #tpu.memory_space<vmem>>, vector<8x128xf32>
    %cst_209 = arith.constant dense<0.000000e+00> : vector<8x128xf32>
    %745 = tpu.matmul %713, %14, %cst_209 {dimension_numbers = #tpu.dot_dimension_numbers<[1], [0], [0], [1], [0, 0, 1, 1], [], []>} : vector<8x32xf32>, vector<32x128xf32>, vector<8x128xf32> -> vector<8x128xf32>
    %746 = arith.addf %744, %745 : vector<8x128xf32>
    %747 = vector.extract_strided_slice %746 {offsets = [0, 0], sizes = [8, 32], strides = [1, 1]} : vector<8x128xf32> to vector<8x32xf32>
    %748 = arith.negf %747 : vector<8x32xf32>
    %749 = math.exp %748 : vector<8x32xf32>
    %cst_210 = arith.constant 1.000000e+00 : f32
    %750 = vector.broadcast %cst_210 : f32 to vector<8x32xf32>
    %751 = arith.addf %750, %749 : vector<8x32xf32>
    %752 = arith.divf %750, %751 : vector<8x32xf32>
    %753 = vector.extract_strided_slice %746 {offsets = [0, 32], sizes = [8, 32], strides = [1, 1]} : vector<8x128xf32> to vector<8x32xf32>
    %754 = arith.negf %753 : vector<8x32xf32>
    %755 = math.exp %754 : vector<8x32xf32>
    %cst_211 = arith.constant 1.000000e+00 : f32
    %756 = vector.broadcast %cst_211 : f32 to vector<8x32xf32>
    %757 = arith.addf %756, %755 : vector<8x32xf32>
    %758 = arith.divf %756, %757 : vector<8x32xf32>
    %759 = vector.extract_strided_slice %746 {offsets = [0, 64], sizes = [8, 32], strides = [1, 1]} : vector<8x128xf32> to vector<8x32xf32>
    %760 = math.tanh %759 : vector<8x32xf32>
    %761 = vector.extract_strided_slice %746 {offsets = [0, 96], sizes = [8, 32], strides = [1, 1]} : vector<8x128xf32> to vector<8x32xf32>
    %762 = arith.negf %761 : vector<8x32xf32>
    %763 = math.exp %762 : vector<8x32xf32>
    %cst_212 = arith.constant 1.000000e+00 : f32
    %764 = vector.broadcast %cst_212 : f32 to vector<8x32xf32>
    %765 = arith.addf %764, %763 : vector<8x32xf32>
    %766 = arith.divf %764, %765 : vector<8x32xf32>
    %767 = arith.mulf %758, %711 : vector<8x32xf32>
    %768 = arith.mulf %752, %760 : vector<8x32xf32>
    %769 = arith.addf %767, %768 : vector<8x32xf32>
    %770 = math.tanh %769 : vector<8x32xf32>
    %771 = arith.mulf %766, %770 : vector<8x32xf32>
    %c24_213 = arith.constant 24 : index
    %c0_214 = arith.constant 0 : index
    %772 = vector.load %arg20[%c24_213, %c0_214] : memref<128x32xf32, #tpu.memory_space<vmem>>, vector<8x32xf32>
    tpu.vector_store %arg20[%c24_213, %c0_214], %771 {strides = array<i32>} : memref<128x32xf32, #tpu.memory_space<vmem>>, vector<8x32xf32>,
    %c104_215 = arith.constant 104 : index
    %c0_216 = arith.constant 0 : index
    %773 = vector.load %arg17[%c104_215, %c0_216] : memref<128x128xf32, #tpu.memory_space<vmem>>, vector<8x128xf32>
    %cst_217 = arith.constant dense<0.000000e+00> : vector<8x128xf32>
    %774 = tpu.matmul %742, %13, %cst_217 {dimension_numbers = #tpu.dot_dimension_numbers<[1], [0], [0], [1], [0, 0, 1, 1], [], []>} : vector<8x32xf32>, vector<32x128xf32>, vector<8x128xf32> -> vector<8x128xf32>
    %775 = arith.addf %773, %774 : vector<8x128xf32>
    %776 = vector.extract_strided_slice %775 {offsets = [0, 0], sizes = [8, 32], strides = [1, 1]} : vector<8x128xf32> to vector<8x32xf32>
    %777 = arith.negf %776 : vector<8x32xf32>
    %778 = math.exp %777 : vector<8x32xf32>
    %cst_218 = arith.constant 1.000000e+00 : f32
    %779 = vector.broadcast %cst_218 : f32 to vector<8x32xf32>
    %780 = arith.addf %779, %778 : vector<8x32xf32>
    %781 = arith.divf %779, %780 : vector<8x32xf32>
    %782 = vector.extract_strided_slice %775 {offsets = [0, 32], sizes = [8, 32], strides = [1, 1]} : vector<8x128xf32> to vector<8x32xf32>
    %783 = arith.negf %782 : vector<8x32xf32>
    %784 = math.exp %783 : vector<8x32xf32>
    %cst_219 = arith.constant 1.000000e+00 : f32
    %785 = vector.broadcast %cst_219 : f32 to vector<8x32xf32>
    %786 = arith.addf %785, %784 : vector<8x32xf32>
    %787 = arith.divf %785, %786 : vector<8x32xf32>
    %788 = vector.extract_strided_slice %775 {offsets = [0, 64], sizes = [8, 32], strides = [1, 1]} : vector<8x128xf32> to vector<8x32xf32>
    %789 = math.tanh %788 : vector<8x32xf32>
    %790 = vector.extract_strided_slice %775 {offsets = [0, 96], sizes = [8, 32], strides = [1, 1]} : vector<8x128xf32> to vector<8x32xf32>
    %791 = arith.negf %790 : vector<8x32xf32>
    %792 = math.exp %791 : vector<8x32xf32>
    %cst_220 = arith.constant 1.000000e+00 : f32
    %793 = vector.broadcast %cst_220 : f32 to vector<8x32xf32>
    %794 = arith.addf %793, %792 : vector<8x32xf32>
    %795 = arith.divf %793, %794 : vector<8x32xf32>
    %796 = arith.mulf %787, %740 : vector<8x32xf32>
    %797 = arith.mulf %781, %789 : vector<8x32xf32>
    %798 = arith.addf %796, %797 : vector<8x32xf32>
    %799 = math.tanh %798 : vector<8x32xf32>
    %800 = arith.mulf %795, %799 : vector<8x32xf32>
    %c104_221 = arith.constant 104 : index
    %c0_222 = arith.constant 0 : index
    %801 = vector.load %arg19[%c104_221, %c0_222] : memref<128x32xf32, #tpu.memory_space<vmem>>, vector<8x32xf32>
    tpu.vector_store %arg19[%c104_221, %c0_222], %800 {strides = array<i32>} : memref<128x32xf32, #tpu.memory_space<vmem>>, vector<8x32xf32>,
    %c16_223 = arith.constant 16 : index
    %c0_224 = arith.constant 0 : index
    %802 = vector.load %arg18[%c16_223, %c0_224] : memref<128x128xf32, #tpu.memory_space<vmem>>, vector<8x128xf32>
    %cst_225 = arith.constant dense<0.000000e+00> : vector<8x128xf32>
    %803 = tpu.matmul %771, %14, %cst_225 {dimension_numbers = #tpu.dot_dimension_numbers<[1], [0], [0], [1], [0, 0, 1, 1], [], []>} : vector<8x32xf32>, vector<32x128xf32>, vector<8x128xf32> -> vector<8x128xf32>
    %804 = arith.addf %802, %803 : vector<8x128xf32>
    %805 = vector.extract_strided_slice %804 {offsets = [0, 0], sizes = [8, 32], strides = [1, 1]} : vector<8x128xf32> to vector<8x32xf32>
    %806 = arith.negf %805 : vector<8x32xf32>
    %807 = math.exp %806 : vector<8x32xf32>
    %cst_226 = arith.constant 1.000000e+00 : f32
    %808 = vector.broadcast %cst_226 : f32 to vector<8x32xf32>
    %809 = arith.addf %808, %807 : vector<8x32xf32>
    %810 = arith.divf %808, %809 : vector<8x32xf32>
    %811 = vector.extract_strided_slice %804 {offsets = [0, 32], sizes = [8, 32], strides = [1, 1]} : vector<8x128xf32> to vector<8x32xf32>
    %812 = arith.negf %811 : vector<8x32xf32>
    %813 = math.exp %812 : vector<8x32xf32>
    %cst_227 = arith.constant 1.000000e+00 : f32
    %814 = vector.broadcast %cst_227 : f32 to vector<8x32xf32>
    %815 = arith.addf %814, %813 : vector<8x32xf32>
    %816 = arith.divf %814, %815 : vector<8x32xf32>
    %817 = vector.extract_strided_slice %804 {offsets = [0, 64], sizes = [8, 32], strides = [1, 1]} : vector<8x128xf32> to vector<8x32xf32>
    %818 = math.tanh %817 : vector<8x32xf32>
    %819 = vector.extract_strided_slice %804 {offsets = [0, 96], sizes = [8, 32], strides = [1, 1]} : vector<8x128xf32> to vector<8x32xf32>
    %820 = arith.negf %819 : vector<8x32xf32>
    %821 = math.exp %820 : vector<8x32xf32>
    %cst_228 = arith.constant 1.000000e+00 : f32
    %822 = vector.broadcast %cst_228 : f32 to vector<8x32xf32>
    %823 = arith.addf %822, %821 : vector<8x32xf32>
    %824 = arith.divf %822, %823 : vector<8x32xf32>
    %825 = arith.mulf %816, %769 : vector<8x32xf32>
    %826 = arith.mulf %810, %818 : vector<8x32xf32>
    %827 = arith.addf %825, %826 : vector<8x32xf32>
    %828 = math.tanh %827 : vector<8x32xf32>
    %829 = arith.mulf %824, %828 : vector<8x32xf32>
    %c16_229 = arith.constant 16 : index
    %c0_230 = arith.constant 0 : index
    %830 = vector.load %arg20[%c16_229, %c0_230] : memref<128x32xf32, #tpu.memory_space<vmem>>, vector<8x32xf32>
    tpu.vector_store %arg20[%c16_229, %c0_230], %829 {strides = array<i32>} : memref<128x32xf32, #tpu.memory_space<vmem>>, vector<8x32xf32>,
    %c112_231 = arith.constant 112 : index
    %c0_232 = arith.constant 0 : index
    %831 = vector.load %arg17[%c112_231, %c0_232] : memref<128x128xf32, #tpu.memory_space<vmem>>, vector<8x128xf32>
    %cst_233 = arith.constant dense<0.000000e+00> : vector<8x128xf32>
    %832 = tpu.matmul %800, %13, %cst_233 {dimension_numbers = #tpu.dot_dimension_numbers<[1], [0], [0], [1], [0, 0, 1, 1], [], []>} : vector<8x32xf32>, vector<32x128xf32>, vector<8x128xf32> -> vector<8x128xf32>
    %833 = arith.addf %831, %832 : vector<8x128xf32>
    %834 = vector.extract_strided_slice %833 {offsets = [0, 0], sizes = [8, 32], strides = [1, 1]} : vector<8x128xf32> to vector<8x32xf32>
    %835 = arith.negf %834 : vector<8x32xf32>
    %836 = math.exp %835 : vector<8x32xf32>
    %cst_234 = arith.constant 1.000000e+00 : f32
    %837 = vector.broadcast %cst_234 : f32 to vector<8x32xf32>
    %838 = arith.addf %837, %836 : vector<8x32xf32>
    %839 = arith.divf %837, %838 : vector<8x32xf32>
    %840 = vector.extract_strided_slice %833 {offsets = [0, 32], sizes = [8, 32], strides = [1, 1]} : vector<8x128xf32> to vector<8x32xf32>
    %841 = arith.negf %840 : vector<8x32xf32>
    %842 = math.exp %841 : vector<8x32xf32>
    %cst_235 = arith.constant 1.000000e+00 : f32
    %843 = vector.broadcast %cst_235 : f32 to vector<8x32xf32>
    %844 = arith.addf %843, %842 : vector<8x32xf32>
    %845 = arith.divf %843, %844 : vector<8x32xf32>
    %846 = vector.extract_strided_slice %833 {offsets = [0, 64], sizes = [8, 32], strides = [1, 1]} : vector<8x128xf32> to vector<8x32xf32>
    %847 = math.tanh %846 : vector<8x32xf32>
    %848 = vector.extract_strided_slice %833 {offsets = [0, 96], sizes = [8, 32], strides = [1, 1]} : vector<8x128xf32> to vector<8x32xf32>
    %849 = arith.negf %848 : vector<8x32xf32>
    %850 = math.exp %849 : vector<8x32xf32>
    %cst_236 = arith.constant 1.000000e+00 : f32
    %851 = vector.broadcast %cst_236 : f32 to vector<8x32xf32>
    %852 = arith.addf %851, %850 : vector<8x32xf32>
    %853 = arith.divf %851, %852 : vector<8x32xf32>
    %854 = arith.mulf %845, %798 : vector<8x32xf32>
    %855 = arith.mulf %839, %847 : vector<8x32xf32>
    %856 = arith.addf %854, %855 : vector<8x32xf32>
    %857 = math.tanh %856 : vector<8x32xf32>
    %858 = arith.mulf %853, %857 : vector<8x32xf32>
    %c112_237 = arith.constant 112 : index
    %c0_238 = arith.constant 0 : index
    %859 = vector.load %arg19[%c112_237, %c0_238] : memref<128x32xf32, #tpu.memory_space<vmem>>, vector<8x32xf32>
    tpu.vector_store %arg19[%c112_237, %c0_238], %858 {strides = array<i32>} : memref<128x32xf32, #tpu.memory_space<vmem>>, vector<8x32xf32>,
    %c8_239 = arith.constant 8 : index
    %c0_240 = arith.constant 0 : index
    %860 = vector.load %arg18[%c8_239, %c0_240] : memref<128x128xf32, #tpu.memory_space<vmem>>, vector<8x128xf32>
    %cst_241 = arith.constant dense<0.000000e+00> : vector<8x128xf32>
    %861 = tpu.matmul %829, %14, %cst_241 {dimension_numbers = #tpu.dot_dimension_numbers<[1], [0], [0], [1], [0, 0, 1, 1], [], []>} : vector<8x32xf32>, vector<32x128xf32>, vector<8x128xf32> -> vector<8x128xf32>
    %862 = arith.addf %860, %861 : vector<8x128xf32>
    %863 = vector.extract_strided_slice %862 {offsets = [0, 0], sizes = [8, 32], strides = [1, 1]} : vector<8x128xf32> to vector<8x32xf32>
    %864 = arith.negf %863 : vector<8x32xf32>
    %865 = math.exp %864 : vector<8x32xf32>
    %cst_242 = arith.constant 1.000000e+00 : f32
    %866 = vector.broadcast %cst_242 : f32 to vector<8x32xf32>
    %867 = arith.addf %866, %865 : vector<8x32xf32>
    %868 = arith.divf %866, %867 : vector<8x32xf32>
    %869 = vector.extract_strided_slice %862 {offsets = [0, 32], sizes = [8, 32], strides = [1, 1]} : vector<8x128xf32> to vector<8x32xf32>
    %870 = arith.negf %869 : vector<8x32xf32>
    %871 = math.exp %870 : vector<8x32xf32>
    %cst_243 = arith.constant 1.000000e+00 : f32
    %872 = vector.broadcast %cst_243 : f32 to vector<8x32xf32>
    %873 = arith.addf %872, %871 : vector<8x32xf32>
    %874 = arith.divf %872, %873 : vector<8x32xf32>
    %875 = vector.extract_strided_slice %862 {offsets = [0, 64], sizes = [8, 32], strides = [1, 1]} : vector<8x128xf32> to vector<8x32xf32>
    %876 = math.tanh %875 : vector<8x32xf32>
    %877 = vector.extract_strided_slice %862 {offsets = [0, 96], sizes = [8, 32], strides = [1, 1]} : vector<8x128xf32> to vector<8x32xf32>
    %878 = arith.negf %877 : vector<8x32xf32>
    %879 = math.exp %878 : vector<8x32xf32>
    %cst_244 = arith.constant 1.000000e+00 : f32
    %880 = vector.broadcast %cst_244 : f32 to vector<8x32xf32>
    %881 = arith.addf %880, %879 : vector<8x32xf32>
    %882 = arith.divf %880, %881 : vector<8x32xf32>
    %883 = arith.mulf %874, %827 : vector<8x32xf32>
    %884 = arith.mulf %868, %876 : vector<8x32xf32>
    %885 = arith.addf %883, %884 : vector<8x32xf32>
    %886 = math.tanh %885 : vector<8x32xf32>
    %887 = arith.mulf %882, %886 : vector<8x32xf32>
    %c8_245 = arith.constant 8 : index
    %c0_246 = arith.constant 0 : index
    %888 = vector.load %arg20[%c8_245, %c0_246] : memref<128x32xf32, #tpu.memory_space<vmem>>, vector<8x32xf32>
    tpu.vector_store %arg20[%c8_245, %c0_246], %887 {strides = array<i32>} : memref<128x32xf32, #tpu.memory_space<vmem>>, vector<8x32xf32>,
    %c120_247 = arith.constant 120 : index
    %c0_248 = arith.constant 0 : index
    %889 = vector.load %arg17[%c120_247, %c0_248] : memref<128x128xf32, #tpu.memory_space<vmem>>, vector<8x128xf32>
    %cst_249 = arith.constant dense<0.000000e+00> : vector<8x128xf32>
    %890 = tpu.matmul %858, %13, %cst_249 {dimension_numbers = #tpu.dot_dimension_numbers<[1], [0], [0], [1], [0, 0, 1, 1], [], []>} : vector<8x32xf32>, vector<32x128xf32>, vector<8x128xf32> -> vector<8x128xf32>
    %891 = arith.addf %889, %890 : vector<8x128xf32>
    %892 = vector.extract_strided_slice %891 {offsets = [0, 0], sizes = [8, 32], strides = [1, 1]} : vector<8x128xf32> to vector<8x32xf32>
    %893 = arith.negf %892 : vector<8x32xf32>
    %894 = math.exp %893 : vector<8x32xf32>
    %cst_250 = arith.constant 1.000000e+00 : f32
    %895 = vector.broadcast %cst_250 : f32 to vector<8x32xf32>
    %896 = arith.addf %895, %894 : vector<8x32xf32>
    %897 = arith.divf %895, %896 : vector<8x32xf32>
    %898 = vector.extract_strided_slice %891 {offsets = [0, 32], sizes = [8, 32], strides = [1, 1]} : vector<8x128xf32> to vector<8x32xf32>
    %899 = arith.negf %898 : vector<8x32xf32>
    %900 = math.exp %899 : vector<8x32xf32>
    %cst_251 = arith.constant 1.000000e+00 : f32
    %901 = vector.broadcast %cst_251 : f32 to vector<8x32xf32>
    %902 = arith.addf %901, %900 : vector<8x32xf32>
    %903 = arith.divf %901, %902 : vector<8x32xf32>
    %904 = vector.extract_strided_slice %891 {offsets = [0, 64], sizes = [8, 32], strides = [1, 1]} : vector<8x128xf32> to vector<8x32xf32>
    %905 = math.tanh %904 : vector<8x32xf32>
    %906 = vector.extract_strided_slice %891 {offsets = [0, 96], sizes = [8, 32], strides = [1, 1]} : vector<8x128xf32> to vector<8x32xf32>
    %907 = arith.negf %906 : vector<8x32xf32>
    %908 = math.exp %907 : vector<8x32xf32>
    %cst_252 = arith.constant 1.000000e+00 : f32
    %909 = vector.broadcast %cst_252 : f32 to vector<8x32xf32>
    %910 = arith.addf %909, %908 : vector<8x32xf32>
    %911 = arith.divf %909, %910 : vector<8x32xf32>
    %912 = arith.mulf %903, %856 : vector<8x32xf32>
    %913 = arith.mulf %897, %905 : vector<8x32xf32>
    %914 = arith.addf %912, %913 : vector<8x32xf32>
    %915 = math.tanh %914 : vector<8x32xf32>
    %916 = arith.mulf %911, %915 : vector<8x32xf32>
    %c120_253 = arith.constant 120 : index
    %c0_254 = arith.constant 0 : index
    %917 = vector.load %arg19[%c120_253, %c0_254] : memref<128x32xf32, #tpu.memory_space<vmem>>, vector<8x32xf32>
    tpu.vector_store %arg19[%c120_253, %c0_254], %916 {strides = array<i32>} : memref<128x32xf32, #tpu.memory_space<vmem>>, vector<8x32xf32>,
    %c0_255 = arith.constant 0 : index
    %c0_256 = arith.constant 0 : index
    %918 = vector.load %arg18[%c0_255, %c0_256] : memref<128x128xf32, #tpu.memory_space<vmem>>, vector<8x128xf32>
    %cst_257 = arith.constant dense<0.000000e+00> : vector<8x128xf32>
    %919 = tpu.matmul %887, %14, %cst_257 {dimension_numbers = #tpu.dot_dimension_numbers<[1], [0], [0], [1], [0, 0, 1, 1], [], []>} : vector<8x32xf32>, vector<32x128xf32>, vector<8x128xf32> -> vector<8x128xf32>
    %920 = arith.addf %918, %919 : vector<8x128xf32>
    %921 = vector.extract_strided_slice %920 {offsets = [0, 0], sizes = [8, 32], strides = [1, 1]} : vector<8x128xf32> to vector<8x32xf32>
    %922 = arith.negf %921 : vector<8x32xf32>
    %923 = math.exp %922 : vector<8x32xf32>
    %cst_258 = arith.constant 1.000000e+00 : f32
    %924 = vector.broadcast %cst_258 : f32 to vector<8x32xf32>
    %925 = arith.addf %924, %923 : vector<8x32xf32>
    %926 = arith.divf %924, %925 : vector<8x32xf32>
    %927 = vector.extract_strided_slice %920 {offsets = [0, 32], sizes = [8, 32], strides = [1, 1]} : vector<8x128xf32> to vector<8x32xf32>
    %928 = arith.negf %927 : vector<8x32xf32>
    %929 = math.exp %928 : vector<8x32xf32>
    %cst_259 = arith.constant 1.000000e+00 : f32
    %930 = vector.broadcast %cst_259 : f32 to vector<8x32xf32>
    %931 = arith.addf %930, %929 : vector<8x32xf32>
    %932 = arith.divf %930, %931 : vector<8x32xf32>
    %933 = vector.extract_strided_slice %920 {offsets = [0, 64], sizes = [8, 32], strides = [1, 1]} : vector<8x128xf32> to vector<8x32xf32>
    %934 = math.tanh %933 : vector<8x32xf32>
    %935 = vector.extract_strided_slice %920 {offsets = [0, 96], sizes = [8, 32], strides = [1, 1]} : vector<8x128xf32> to vector<8x32xf32>
    %936 = arith.negf %935 : vector<8x32xf32>
    %937 = math.exp %936 : vector<8x32xf32>
    %cst_260 = arith.constant 1.000000e+00 : f32
    %938 = vector.broadcast %cst_260 : f32 to vector<8x32xf32>
    %939 = arith.addf %938, %937 : vector<8x32xf32>
    %940 = arith.divf %938, %939 : vector<8x32xf32>
    %941 = arith.mulf %932, %885 : vector<8x32xf32>
    %942 = arith.mulf %926, %934 : vector<8x32xf32>
    %943 = arith.addf %941, %942 : vector<8x32xf32>
    %944 = math.tanh %943 : vector<8x32xf32>
    %945 = arith.mulf %940, %944 : vector<8x32xf32>
    %c0_261 = arith.constant 0 : index
    %c0_262 = arith.constant 0 : index
    %946 = vector.load %arg20[%c0_261, %c0_262] : memref<128x32xf32, #tpu.memory_space<vmem>>, vector<8x32xf32>
    tpu.vector_store %arg20[%c0_261, %c0_262], %945 {strides = array<i32>} : memref<128x32xf32, #tpu.memory_space<vmem>>, vector<8x32xf32>,
    %c0_263 = arith.constant 0 : index
    %c0_264 = arith.constant 0 : index
    %947 = vector.load %arg19[%c0_263, %c0_264] : memref<128x32xf32, #tpu.memory_space<vmem>>, vector<128x32xf32>
    %c0_265 = arith.constant 0 : index
    %c0_266 = arith.constant 0 : index
    %948 = vector.load %arg20[%c0_265, %c0_266] : memref<128x32xf32, #tpu.memory_space<vmem>>, vector<128x32xf32>
    %c0_267 = arith.constant 0 : index
    %c0_268 = arith.constant 0 : index
    %949 = vector.load %arg8[%c0_267, %c0_268] : memref<64x128xf32, #tpu.memory_space<vmem>>, vector<32x128xf32>
    %cst_269 = arith.constant dense<0.000000e+00> : vector<128x128xf32>
    %950 = tpu.matmul %947, %949, %cst_269 {dimension_numbers = #tpu.dot_dimension_numbers<[1], [0], [0], [1], [0, 0, 1, 1], [], []>} : vector<128x32xf32>, vector<32x128xf32>, vector<128x128xf32> -> vector<128x128xf32>
    %c32_270 = arith.constant 32 : index
    %c0_271 = arith.constant 0 : index
    %951 = vector.load %arg8[%c32_270, %c0_271] : memref<64x128xf32, #tpu.memory_space<vmem>>, vector<32x128xf32>
    %cst_272 = arith.constant dense<0.000000e+00> : vector<128x128xf32>
    %952 = tpu.matmul %948, %951, %cst_272 {dimension_numbers = #tpu.dot_dimension_numbers<[1], [0], [0], [1], [0, 0, 1, 1], [], []>} : vector<128x32xf32>, vector<32x128xf32>, vector<128x128xf32> -> vector<128x128xf32>
    %953 = arith.addf %950, %952 : vector<128x128xf32>
    %c0_273 = arith.constant 0 : index
    %c0_274 = arith.constant 0 : index
    %954 = vector.load %arg10[%c0_273, %c0_274] : memref<1x128xf32, #tpu.memory_space<vmem>>, vector<1x128xf32>
    %955 = vector.broadcast %954 : vector<1x128xf32> to vector<128x128xf32>
    %956 = arith.addf %953, %955 : vector<128x128xf32>
    %c0_275 = arith.constant 0 : index
    %c0_276 = arith.constant 0 : index
    %957 = vector.load %arg17[%c0_275, %c0_276] : memref<128x128xf32, #tpu.memory_space<vmem>>, vector<128x128xf32>
    tpu.vector_store %arg17[%c0_275, %c0_276], %956 {strides = array<i32>} : memref<128x128xf32, #tpu.memory_space<vmem>>, vector<128x128xf32>,
    %c0_277 = arith.constant 0 : index
    %c0_278 = arith.constant 0 : index
    %958 = vector.load %arg11[%c0_277, %c0_278] : memref<64x128xf32, #tpu.memory_space<vmem>>, vector<32x128xf32>
    %cst_279 = arith.constant dense<0.000000e+00> : vector<128x128xf32>
    %959 = tpu.matmul %947, %958, %cst_279 {dimension_numbers = #tpu.dot_dimension_numbers<[1], [0], [0], [1], [0, 0, 1, 1], [], []>} : vector<128x32xf32>, vector<32x128xf32>, vector<128x128xf32> -> vector<128x128xf32>
    %c32_280 = arith.constant 32 : index
    %c0_281 = arith.constant 0 : index
    %960 = vector.load %arg11[%c32_280, %c0_281] : memref<64x128xf32, #tpu.memory_space<vmem>>, vector<32x128xf32>
    %cst_282 = arith.constant dense<0.000000e+00> : vector<128x128xf32>
    %961 = tpu.matmul %948, %960, %cst_282 {dimension_numbers = #tpu.dot_dimension_numbers<[1], [0], [0], [1], [0, 0, 1, 1], [], []>} : vector<128x32xf32>, vector<32x128xf32>, vector<128x128xf32> -> vector<128x128xf32>
    %962 = arith.addf %959, %961 : vector<128x128xf32>
    %c0_283 = arith.constant 0 : index
    %c0_284 = arith.constant 0 : index
    %963 = vector.load %arg13[%c0_283, %c0_284] : memref<1x128xf32, #tpu.memory_space<vmem>>, vector<1x128xf32>
    %964 = vector.broadcast %963 : vector<1x128xf32> to vector<128x128xf32>
    %965 = arith.addf %962, %964 : vector<128x128xf32>
    %c0_285 = arith.constant 0 : index
    %c0_286 = arith.constant 0 : index
    %966 = vector.load %arg18[%c0_285, %c0_286] : memref<128x128xf32, #tpu.memory_space<vmem>>, vector<128x128xf32>
    tpu.vector_store %arg18[%c0_285, %c0_286], %965 {strides = array<i32>} : memref<128x128xf32, #tpu.memory_space<vmem>>, vector<128x128xf32>,
    %c0_287 = arith.constant 0 : index
    %c0_288 = arith.constant 0 : index
    %967 = vector.load %arg9[%c0_287, %c0_288] : memref<32x128xf32, #tpu.memory_space<vmem>>, vector<32x128xf32>
    %c0_289 = arith.constant 0 : index
    %c0_290 = arith.constant 0 : index
    %968 = vector.load %arg12[%c0_289, %c0_290] : memref<32x128xf32, #tpu.memory_space<vmem>>, vector<32x128xf32>
    %cst_291 = arith.constant 0.000000e+00 : f32
    %969 = vector.broadcast %cst_291 : f32 to vector<8x32xf32>
    %cst_292 = arith.constant 0.000000e+00 : f32
    %970 = vector.broadcast %cst_292 : f32 to vector<8x32xf32>
    %cst_293 = arith.constant 0.000000e+00 : f32
    %971 = vector.broadcast %cst_293 : f32 to vector<8x32xf32>
    %cst_294 = arith.constant 0.000000e+00 : f32
    %972 = vector.broadcast %cst_294 : f32 to vector<8x32xf32>
    %c0_295 = arith.constant 0 : index
    %c0_296 = arith.constant 0 : index
    %973 = vector.load %arg17[%c0_295, %c0_296] : memref<128x128xf32, #tpu.memory_space<vmem>>, vector<8x128xf32>
    %cst_297 = arith.constant dense<0.000000e+00> : vector<8x128xf32>
    %974 = tpu.matmul %969, %967, %cst_297 {dimension_numbers = #tpu.dot_dimension_numbers<[1], [0], [0], [1], [0, 0, 1, 1], [], []>} : vector<8x32xf32>, vector<32x128xf32>, vector<8x128xf32> -> vector<8x128xf32>
    %975 = arith.addf %973, %974 : vector<8x128xf32>
    %976 = vector.extract_strided_slice %975 {offsets = [0, 0], sizes = [8, 32], strides = [1, 1]} : vector<8x128xf32> to vector<8x32xf32>
    %977 = arith.negf %976 : vector<8x32xf32>
    %978 = math.exp %977 : vector<8x32xf32>
    %cst_298 = arith.constant 1.000000e+00 : f32
    %979 = vector.broadcast %cst_298 : f32 to vector<8x32xf32>
    %980 = arith.addf %979, %978 : vector<8x32xf32>
    %981 = arith.divf %979, %980 : vector<8x32xf32>
    %982 = vector.extract_strided_slice %975 {offsets = [0, 32], sizes = [8, 32], strides = [1, 1]} : vector<8x128xf32> to vector<8x32xf32>
    %983 = arith.negf %982 : vector<8x32xf32>
    %984 = math.exp %983 : vector<8x32xf32>
    %cst_299 = arith.constant 1.000000e+00 : f32
    %985 = vector.broadcast %cst_299 : f32 to vector<8x32xf32>
    %986 = arith.addf %985, %984 : vector<8x32xf32>
    %987 = arith.divf %985, %986 : vector<8x32xf32>
    %988 = vector.extract_strided_slice %975 {offsets = [0, 64], sizes = [8, 32], strides = [1, 1]} : vector<8x128xf32> to vector<8x32xf32>
    %989 = math.tanh %988 : vector<8x32xf32>
    %990 = vector.extract_strided_slice %975 {offsets = [0, 96], sizes = [8, 32], strides = [1, 1]} : vector<8x128xf32> to vector<8x32xf32>
    %991 = arith.negf %990 : vector<8x32xf32>
    %992 = math.exp %991 : vector<8x32xf32>
    %cst_300 = arith.constant 1.000000e+00 : f32
    %993 = vector.broadcast %cst_300 : f32 to vector<8x32xf32>
    %994 = arith.addf %993, %992 : vector<8x32xf32>
    %995 = arith.divf %993, %994 : vector<8x32xf32>
    %996 = arith.mulf %987, %970 : vector<8x32xf32>
    %997 = arith.mulf %981, %989 : vector<8x32xf32>
    %998 = arith.addf %996, %997 : vector<8x32xf32>
    %999 = math.tanh %998 : vector<8x32xf32>
    %1000 = arith.mulf %995, %999 : vector<8x32xf32>
    %c0_301 = arith.constant 0 : index
    %c0_302 = arith.constant 0 : index
    %1001 = vector.load %arg19[%c0_301, %c0_302] : memref<128x32xf32, #tpu.memory_space<vmem>>, vector<8x32xf32>
    tpu.vector_store %arg19[%c0_301, %c0_302], %1000 {strides = array<i32>} : memref<128x32xf32, #tpu.memory_space<vmem>>, vector<8x32xf32>,
    %c120_303 = arith.constant 120 : index
    %c0_304 = arith.constant 0 : index
    %1002 = vector.load %arg18[%c120_303, %c0_304] : memref<128x128xf32, #tpu.memory_space<vmem>>, vector<8x128xf32>
    %cst_305 = arith.constant dense<0.000000e+00> : vector<8x128xf32>
    %1003 = tpu.matmul %971, %968, %cst_305 {dimension_numbers = #tpu.dot_dimension_numbers<[1], [0], [0], [1], [0, 0, 1, 1], [], []>} : vector<8x32xf32>, vector<32x128xf32>, vector<8x128xf32> -> vector<8x128xf32>
    %1004 = arith.addf %1002, %1003 : vector<8x128xf32>
    %1005 = vector.extract_strided_slice %1004 {offsets = [0, 0], sizes = [8, 32], strides = [1, 1]} : vector<8x128xf32> to vector<8x32xf32>
    %1006 = arith.negf %1005 : vector<8x32xf32>
    %1007 = math.exp %1006 : vector<8x32xf32>
    %cst_306 = arith.constant 1.000000e+00 : f32
    %1008 = vector.broadcast %cst_306 : f32 to vector<8x32xf32>
    %1009 = arith.addf %1008, %1007 : vector<8x32xf32>
    %1010 = arith.divf %1008, %1009 : vector<8x32xf32>
    %1011 = vector.extract_strided_slice %1004 {offsets = [0, 32], sizes = [8, 32], strides = [1, 1]} : vector<8x128xf32> to vector<8x32xf32>
    %1012 = arith.negf %1011 : vector<8x32xf32>
    %1013 = math.exp %1012 : vector<8x32xf32>
    %cst_307 = arith.constant 1.000000e+00 : f32
    %1014 = vector.broadcast %cst_307 : f32 to vector<8x32xf32>
    %1015 = arith.addf %1014, %1013 : vector<8x32xf32>
    %1016 = arith.divf %1014, %1015 : vector<8x32xf32>
    %1017 = vector.extract_strided_slice %1004 {offsets = [0, 64], sizes = [8, 32], strides = [1, 1]} : vector<8x128xf32> to vector<8x32xf32>
    %1018 = math.tanh %1017 : vector<8x32xf32>
    %1019 = vector.extract_strided_slice %1004 {offsets = [0, 96], sizes = [8, 32], strides = [1, 1]} : vector<8x128xf32> to vector<8x32xf32>
    %1020 = arith.negf %1019 : vector<8x32xf32>
    %1021 = math.exp %1020 : vector<8x32xf32>
    %cst_308 = arith.constant 1.000000e+00 : f32
    %1022 = vector.broadcast %cst_308 : f32 to vector<8x32xf32>
    %1023 = arith.addf %1022, %1021 : vector<8x32xf32>
    %1024 = arith.divf %1022, %1023 : vector<8x32xf32>
    %1025 = arith.mulf %1016, %972 : vector<8x32xf32>
    %1026 = arith.mulf %1010, %1018 : vector<8x32xf32>
    %1027 = arith.addf %1025, %1026 : vector<8x32xf32>
    %1028 = math.tanh %1027 : vector<8x32xf32>
    %1029 = arith.mulf %1024, %1028 : vector<8x32xf32>
    %c120_309 = arith.constant 120 : index
    %c0_310 = arith.constant 0 : index
    %1030 = vector.load %arg20[%c120_309, %c0_310] : memref<128x32xf32, #tpu.memory_space<vmem>>, vector<8x32xf32>
    tpu.vector_store %arg20[%c120_309, %c0_310], %1029 {strides = array<i32>} : memref<128x32xf32, #tpu.memory_space<vmem>>, vector<8x32xf32>,
    %c8_311 = arith.constant 8 : index
    %c0_312 = arith.constant 0 : index
    %1031 = vector.load %arg17[%c8_311, %c0_312] : memref<128x128xf32, #tpu.memory_space<vmem>>, vector<8x128xf32>
    %cst_313 = arith.constant dense<0.000000e+00> : vector<8x128xf32>
    %1032 = tpu.matmul %1000, %967, %cst_313 {dimension_numbers = #tpu.dot_dimension_numbers<[1], [0], [0], [1], [0, 0, 1, 1], [], []>} : vector<8x32xf32>, vector<32x128xf32>, vector<8x128xf32> -> vector<8x128xf32>
    %1033 = arith.addf %1031, %1032 : vector<8x128xf32>
    %1034 = vector.extract_strided_slice %1033 {offsets = [0, 0], sizes = [8, 32], strides = [1, 1]} : vector<8x128xf32> to vector<8x32xf32>
    %1035 = arith.negf %1034 : vector<8x32xf32>
    %1036 = math.exp %1035 : vector<8x32xf32>
    %cst_314 = arith.constant 1.000000e+00 : f32
    %1037 = vector.broadcast %cst_314 : f32 to vector<8x32xf32>
    %1038 = arith.addf %1037, %1036 : vector<8x32xf32>
    %1039 = arith.divf %1037, %1038 : vector<8x32xf32>
    %1040 = vector.extract_strided_slice %1033 {offsets = [0, 32], sizes = [8, 32], strides = [1, 1]} : vector<8x128xf32> to vector<8x32xf32>
    %1041 = arith.negf %1040 : vector<8x32xf32>
    %1042 = math.exp %1041 : vector<8x32xf32>
    %cst_315 = arith.constant 1.000000e+00 : f32
    %1043 = vector.broadcast %cst_315 : f32 to vector<8x32xf32>
    %1044 = arith.addf %1043, %1042 : vector<8x32xf32>
    %1045 = arith.divf %1043, %1044 : vector<8x32xf32>
    %1046 = vector.extract_strided_slice %1033 {offsets = [0, 64], sizes = [8, 32], strides = [1, 1]} : vector<8x128xf32> to vector<8x32xf32>
    %1047 = math.tanh %1046 : vector<8x32xf32>
    %1048 = vector.extract_strided_slice %1033 {offsets = [0, 96], sizes = [8, 32], strides = [1, 1]} : vector<8x128xf32> to vector<8x32xf32>
    %1049 = arith.negf %1048 : vector<8x32xf32>
    %1050 = math.exp %1049 : vector<8x32xf32>
    %cst_316 = arith.constant 1.000000e+00 : f32
    %1051 = vector.broadcast %cst_316 : f32 to vector<8x32xf32>
    %1052 = arith.addf %1051, %1050 : vector<8x32xf32>
    %1053 = arith.divf %1051, %1052 : vector<8x32xf32>
    %1054 = arith.mulf %1045, %998 : vector<8x32xf32>
    %1055 = arith.mulf %1039, %1047 : vector<8x32xf32>
    %1056 = arith.addf %1054, %1055 : vector<8x32xf32>
    %1057 = math.tanh %1056 : vector<8x32xf32>
    %1058 = arith.mulf %1053, %1057 : vector<8x32xf32>
    %c8_317 = arith.constant 8 : index
    %c0_318 = arith.constant 0 : index
    %1059 = vector.load %arg19[%c8_317, %c0_318] : memref<128x32xf32, #tpu.memory_space<vmem>>, vector<8x32xf32>
    tpu.vector_store %arg19[%c8_317, %c0_318], %1058 {strides = array<i32>} : memref<128x32xf32, #tpu.memory_space<vmem>>, vector<8x32xf32>,
    %c112_319 = arith.constant 112 : index
    %c0_320 = arith.constant 0 : index
    %1060 = vector.load %arg18[%c112_319, %c0_320] : memref<128x128xf32, #tpu.memory_space<vmem>>, vector<8x128xf32>
    %cst_321 = arith.constant dense<0.000000e+00> : vector<8x128xf32>
    %1061 = tpu.matmul %1029, %968, %cst_321 {dimension_numbers = #tpu.dot_dimension_numbers<[1], [0], [0], [1], [0, 0, 1, 1], [], []>} : vector<8x32xf32>, vector<32x128xf32>, vector<8x128xf32> -> vector<8x128xf32>
    %1062 = arith.addf %1060, %1061 : vector<8x128xf32>
    %1063 = vector.extract_strided_slice %1062 {offsets = [0, 0], sizes = [8, 32], strides = [1, 1]} : vector<8x128xf32> to vector<8x32xf32>
    %1064 = arith.negf %1063 : vector<8x32xf32>
    %1065 = math.exp %1064 : vector<8x32xf32>
    %cst_322 = arith.constant 1.000000e+00 : f32
    %1066 = vector.broadcast %cst_322 : f32 to vector<8x32xf32>
    %1067 = arith.addf %1066, %1065 : vector<8x32xf32>
    %1068 = arith.divf %1066, %1067 : vector<8x32xf32>
    %1069 = vector.extract_strided_slice %1062 {offsets = [0, 32], sizes = [8, 32], strides = [1, 1]} : vector<8x128xf32> to vector<8x32xf32>
    %1070 = arith.negf %1069 : vector<8x32xf32>
    %1071 = math.exp %1070 : vector<8x32xf32>
    %cst_323 = arith.constant 1.000000e+00 : f32
    %1072 = vector.broadcast %cst_323 : f32 to vector<8x32xf32>
    %1073 = arith.addf %1072, %1071 : vector<8x32xf32>
    %1074 = arith.divf %1072, %1073 : vector<8x32xf32>
    %1075 = vector.extract_strided_slice %1062 {offsets = [0, 64], sizes = [8, 32], strides = [1, 1]} : vector<8x128xf32> to vector<8x32xf32>
    %1076 = math.tanh %1075 : vector<8x32xf32>
    %1077 = vector.extract_strided_slice %1062 {offsets = [0, 96], sizes = [8, 32], strides = [1, 1]} : vector<8x128xf32> to vector<8x32xf32>
    %1078 = arith.negf %1077 : vector<8x32xf32>
    %1079 = math.exp %1078 : vector<8x32xf32>
    %cst_324 = arith.constant 1.000000e+00 : f32
    %1080 = vector.broadcast %cst_324 : f32 to vector<8x32xf32>
    %1081 = arith.addf %1080, %1079 : vector<8x32xf32>
    %1082 = arith.divf %1080, %1081 : vector<8x32xf32>
    %1083 = arith.mulf %1074, %1027 : vector<8x32xf32>
    %1084 = arith.mulf %1068, %1076 : vector<8x32xf32>
    %1085 = arith.addf %1083, %1084 : vector<8x32xf32>
    %1086 = math.tanh %1085 : vector<8x32xf32>
    %1087 = arith.mulf %1082, %1086 : vector<8x32xf32>
    %c112_325 = arith.constant 112 : index
    %c0_326 = arith.constant 0 : index
    %1088 = vector.load %arg20[%c112_325, %c0_326] : memref<128x32xf32, #tpu.memory_space<vmem>>, vector<8x32xf32>
    tpu.vector_store %arg20[%c112_325, %c0_326], %1087 {strides = array<i32>} : memref<128x32xf32, #tpu.memory_space<vmem>>, vector<8x32xf32>,
    %c16_327 = arith.constant 16 : index
    %c0_328 = arith.constant 0 : index
    %1089 = vector.load %arg17[%c16_327, %c0_328] : memref<128x128xf32, #tpu.memory_space<vmem>>, vector<8x128xf32>
    %cst_329 = arith.constant dense<0.000000e+00> : vector<8x128xf32>
    %1090 = tpu.matmul %1058, %967, %cst_329 {dimension_numbers = #tpu.dot_dimension_numbers<[1], [0], [0], [1], [0, 0, 1, 1], [], []>} : vector<8x32xf32>, vector<32x128xf32>, vector<8x128xf32> -> vector<8x128xf32>
    %1091 = arith.addf %1089, %1090 : vector<8x128xf32>
    %1092 = vector.extract_strided_slice %1091 {offsets = [0, 0], sizes = [8, 32], strides = [1, 1]} : vector<8x128xf32> to vector<8x32xf32>
    %1093 = arith.negf %1092 : vector<8x32xf32>
    %1094 = math.exp %1093 : vector<8x32xf32>
    %cst_330 = arith.constant 1.000000e+00 : f32
    %1095 = vector.broadcast %cst_330 : f32 to vector<8x32xf32>
    %1096 = arith.addf %1095, %1094 : vector<8x32xf32>
    %1097 = arith.divf %1095, %1096 : vector<8x32xf32>
    %1098 = vector.extract_strided_slice %1091 {offsets = [0, 32], sizes = [8, 32], strides = [1, 1]} : vector<8x128xf32> to vector<8x32xf32>
    %1099 = arith.negf %1098 : vector<8x32xf32>
    %1100 = math.exp %1099 : vector<8x32xf32>
    %cst_331 = arith.constant 1.000000e+00 : f32
    %1101 = vector.broadcast %cst_331 : f32 to vector<8x32xf32>
    %1102 = arith.addf %1101, %1100 : vector<8x32xf32>
    %1103 = arith.divf %1101, %1102 : vector<8x32xf32>
    %1104 = vector.extract_strided_slice %1091 {offsets = [0, 64], sizes = [8, 32], strides = [1, 1]} : vector<8x128xf32> to vector<8x32xf32>
    %1105 = math.tanh %1104 : vector<8x32xf32>
    %1106 = vector.extract_strided_slice %1091 {offsets = [0, 96], sizes = [8, 32], strides = [1, 1]} : vector<8x128xf32> to vector<8x32xf32>
    %1107 = arith.negf %1106 : vector<8x32xf32>
    %1108 = math.exp %1107 : vector<8x32xf32>
    %cst_332 = arith.constant 1.000000e+00 : f32
    %1109 = vector.broadcast %cst_332 : f32 to vector<8x32xf32>
    %1110 = arith.addf %1109, %1108 : vector<8x32xf32>
    %1111 = arith.divf %1109, %1110 : vector<8x32xf32>
    %1112 = arith.mulf %1103, %1056 : vector<8x32xf32>
    %1113 = arith.mulf %1097, %1105 : vector<8x32xf32>
    %1114 = arith.addf %1112, %1113 : vector<8x32xf32>
    %1115 = math.tanh %1114 : vector<8x32xf32>
    %1116 = arith.mulf %1111, %1115 : vector<8x32xf32>
    %c16_333 = arith.constant 16 : index
    %c0_334 = arith.constant 0 : index
    %1117 = vector.load %arg19[%c16_333, %c0_334] : memref<128x32xf32, #tpu.memory_space<vmem>>, vector<8x32xf32>
    tpu.vector_store %arg19[%c16_333, %c0_334], %1116 {strides = array<i32>} : memref<128x32xf32, #tpu.memory_space<vmem>>, vector<8x32xf32>,
    %c104_335 = arith.constant 104 : index
    %c0_336 = arith.constant 0 : index
    %1118 = vector.load %arg18[%c104_335, %c0_336] : memref<128x128xf32, #tpu.memory_space<vmem>>, vector<8x128xf32>
    %cst_337 = arith.constant dense<0.000000e+00> : vector<8x128xf32>
    %1119 = tpu.matmul %1087, %968, %cst_337 {dimension_numbers = #tpu.dot_dimension_numbers<[1], [0], [0], [1], [0, 0, 1, 1], [], []>} : vector<8x32xf32>, vector<32x128xf32>, vector<8x128xf32> -> vector<8x128xf32>
    %1120 = arith.addf %1118, %1119 : vector<8x128xf32>
    %1121 = vector.extract_strided_slice %1120 {offsets = [0, 0], sizes = [8, 32], strides = [1, 1]} : vector<8x128xf32> to vector<8x32xf32>
    %1122 = arith.negf %1121 : vector<8x32xf32>
    %1123 = math.exp %1122 : vector<8x32xf32>
    %cst_338 = arith.constant 1.000000e+00 : f32
    %1124 = vector.broadcast %cst_338 : f32 to vector<8x32xf32>
    %1125 = arith.addf %1124, %1123 : vector<8x32xf32>
    %1126 = arith.divf %1124, %1125 : vector<8x32xf32>
    %1127 = vector.extract_strided_slice %1120 {offsets = [0, 32], sizes = [8, 32], strides = [1, 1]} : vector<8x128xf32> to vector<8x32xf32>
    %1128 = arith.negf %1127 : vector<8x32xf32>
    %1129 = math.exp %1128 : vector<8x32xf32>
    %cst_339 = arith.constant 1.000000e+00 : f32
    %1130 = vector.broadcast %cst_339 : f32 to vector<8x32xf32>
    %1131 = arith.addf %1130, %1129 : vector<8x32xf32>
    %1132 = arith.divf %1130, %1131 : vector<8x32xf32>
    %1133 = vector.extract_strided_slice %1120 {offsets = [0, 64], sizes = [8, 32], strides = [1, 1]} : vector<8x128xf32> to vector<8x32xf32>
    %1134 = math.tanh %1133 : vector<8x32xf32>
    %1135 = vector.extract_strided_slice %1120 {offsets = [0, 96], sizes = [8, 32], strides = [1, 1]} : vector<8x128xf32> to vector<8x32xf32>
    %1136 = arith.negf %1135 : vector<8x32xf32>
    %1137 = math.exp %1136 : vector<8x32xf32>
    %cst_340 = arith.constant 1.000000e+00 : f32
    %1138 = vector.broadcast %cst_340 : f32 to vector<8x32xf32>
    %1139 = arith.addf %1138, %1137 : vector<8x32xf32>
    %1140 = arith.divf %1138, %1139 : vector<8x32xf32>
    %1141 = arith.mulf %1132, %1085 : vector<8x32xf32>
    %1142 = arith.mulf %1126, %1134 : vector<8x32xf32>
    %1143 = arith.addf %1141, %1142 : vector<8x32xf32>
    %1144 = math.tanh %1143 : vector<8x32xf32>
    %1145 = arith.mulf %1140, %1144 : vector<8x32xf32>
    %c104_341 = arith.constant 104 : index
    %c0_342 = arith.constant 0 : index
    %1146 = vector.load %arg20[%c104_341, %c0_342] : memref<128x32xf32, #tpu.memory_space<vmem>>, vector<8x32xf32>
    tpu.vector_store %arg20[%c104_341, %c0_342], %1145 {strides = array<i32>} : memref<128x32xf32, #tpu.memory_space<vmem>>, vector<8x32xf32>,
    %c24_343 = arith.constant 24 : index
    %c0_344 = arith.constant 0 : index
    %1147 = vector.load %arg17[%c24_343, %c0_344] : memref<128x128xf32, #tpu.memory_space<vmem>>, vector<8x128xf32>
    %cst_345 = arith.constant dense<0.000000e+00> : vector<8x128xf32>
    %1148 = tpu.matmul %1116, %967, %cst_345 {dimension_numbers = #tpu.dot_dimension_numbers<[1], [0], [0], [1], [0, 0, 1, 1], [], []>} : vector<8x32xf32>, vector<32x128xf32>, vector<8x128xf32> -> vector<8x128xf32>
    %1149 = arith.addf %1147, %1148 : vector<8x128xf32>
    %1150 = vector.extract_strided_slice %1149 {offsets = [0, 0], sizes = [8, 32], strides = [1, 1]} : vector<8x128xf32> to vector<8x32xf32>
    %1151 = arith.negf %1150 : vector<8x32xf32>
    %1152 = math.exp %1151 : vector<8x32xf32>
    %cst_346 = arith.constant 1.000000e+00 : f32
    %1153 = vector.broadcast %cst_346 : f32 to vector<8x32xf32>
    %1154 = arith.addf %1153, %1152 : vector<8x32xf32>
    %1155 = arith.divf %1153, %1154 : vector<8x32xf32>
    %1156 = vector.extract_strided_slice %1149 {offsets = [0, 32], sizes = [8, 32], strides = [1, 1]} : vector<8x128xf32> to vector<8x32xf32>
    %1157 = arith.negf %1156 : vector<8x32xf32>
    %1158 = math.exp %1157 : vector<8x32xf32>
    %cst_347 = arith.constant 1.000000e+00 : f32
    %1159 = vector.broadcast %cst_347 : f32 to vector<8x32xf32>
    %1160 = arith.addf %1159, %1158 : vector<8x32xf32>
    %1161 = arith.divf %1159, %1160 : vector<8x32xf32>
    %1162 = vector.extract_strided_slice %1149 {offsets = [0, 64], sizes = [8, 32], strides = [1, 1]} : vector<8x128xf32> to vector<8x32xf32>
    %1163 = math.tanh %1162 : vector<8x32xf32>
    %1164 = vector.extract_strided_slice %1149 {offsets = [0, 96], sizes = [8, 32], strides = [1, 1]} : vector<8x128xf32> to vector<8x32xf32>
    %1165 = arith.negf %1164 : vector<8x32xf32>
    %1166 = math.exp %1165 : vector<8x32xf32>
    %cst_348 = arith.constant 1.000000e+00 : f32
    %1167 = vector.broadcast %cst_348 : f32 to vector<8x32xf32>
    %1168 = arith.addf %1167, %1166 : vector<8x32xf32>
    %1169 = arith.divf %1167, %1168 : vector<8x32xf32>
    %1170 = arith.mulf %1161, %1114 : vector<8x32xf32>
    %1171 = arith.mulf %1155, %1163 : vector<8x32xf32>
    %1172 = arith.addf %1170, %1171 : vector<8x32xf32>
    %1173 = math.tanh %1172 : vector<8x32xf32>
    %1174 = arith.mulf %1169, %1173 : vector<8x32xf32>
    %c24_349 = arith.constant 24 : index
    %c0_350 = arith.constant 0 : index
    %1175 = vector.load %arg19[%c24_349, %c0_350] : memref<128x32xf32, #tpu.memory_space<vmem>>, vector<8x32xf32>
    tpu.vector_store %arg19[%c24_349, %c0_350], %1174 {strides = array<i32>} : memref<128x32xf32, #tpu.memory_space<vmem>>, vector<8x32xf32>,
    %c96_351 = arith.constant 96 : index
    %c0_352 = arith.constant 0 : index
    %1176 = vector.load %arg18[%c96_351, %c0_352] : memref<128x128xf32, #tpu.memory_space<vmem>>, vector<8x128xf32>
    %cst_353 = arith.constant dense<0.000000e+00> : vector<8x128xf32>
    %1177 = tpu.matmul %1145, %968, %cst_353 {dimension_numbers = #tpu.dot_dimension_numbers<[1], [0], [0], [1], [0, 0, 1, 1], [], []>} : vector<8x32xf32>, vector<32x128xf32>, vector<8x128xf32> -> vector<8x128xf32>
    %1178 = arith.addf %1176, %1177 : vector<8x128xf32>
    %1179 = vector.extract_strided_slice %1178 {offsets = [0, 0], sizes = [8, 32], strides = [1, 1]} : vector<8x128xf32> to vector<8x32xf32>
    %1180 = arith.negf %1179 : vector<8x32xf32>
    %1181 = math.exp %1180 : vector<8x32xf32>
    %cst_354 = arith.constant 1.000000e+00 : f32
    %1182 = vector.broadcast %cst_354 : f32 to vector<8x32xf32>
    %1183 = arith.addf %1182, %1181 : vector<8x32xf32>
    %1184 = arith.divf %1182, %1183 : vector<8x32xf32>
    %1185 = vector.extract_strided_slice %1178 {offsets = [0, 32], sizes = [8, 32], strides = [1, 1]} : vector<8x128xf32> to vector<8x32xf32>
    %1186 = arith.negf %1185 : vector<8x32xf32>
    %1187 = math.exp %1186 : vector<8x32xf32>
    %cst_355 = arith.constant 1.000000e+00 : f32
    %1188 = vector.broadcast %cst_355 : f32 to vector<8x32xf32>
    %1189 = arith.addf %1188, %1187 : vector<8x32xf32>
    %1190 = arith.divf %1188, %1189 : vector<8x32xf32>
    %1191 = vector.extract_strided_slice %1178 {offsets = [0, 64], sizes = [8, 32], strides = [1, 1]} : vector<8x128xf32> to vector<8x32xf32>
    %1192 = math.tanh %1191 : vector<8x32xf32>
    %1193 = vector.extract_strided_slice %1178 {offsets = [0, 96], sizes = [8, 32], strides = [1, 1]} : vector<8x128xf32> to vector<8x32xf32>
    %1194 = arith.negf %1193 : vector<8x32xf32>
    %1195 = math.exp %1194 : vector<8x32xf32>
    %cst_356 = arith.constant 1.000000e+00 : f32
    %1196 = vector.broadcast %cst_356 : f32 to vector<8x32xf32>
    %1197 = arith.addf %1196, %1195 : vector<8x32xf32>
    %1198 = arith.divf %1196, %1197 : vector<8x32xf32>
    %1199 = arith.mulf %1190, %1143 : vector<8x32xf32>
    %1200 = arith.mulf %1184, %1192 : vector<8x32xf32>
    %1201 = arith.addf %1199, %1200 : vector<8x32xf32>
    %1202 = math.tanh %1201 : vector<8x32xf32>
    %1203 = arith.mulf %1198, %1202 : vector<8x32xf32>
    %c96_357 = arith.constant 96 : index
    %c0_358 = arith.constant 0 : index
    %1204 = vector.load %arg20[%c96_357, %c0_358] : memref<128x32xf32, #tpu.memory_space<vmem>>, vector<8x32xf32>
    tpu.vector_store %arg20[%c96_357, %c0_358], %1203 {strides = array<i32>} : memref<128x32xf32, #tpu.memory_space<vmem>>, vector<8x32xf32>,
    %c32_359 = arith.constant 32 : index
    %c0_360 = arith.constant 0 : index
    %1205 = vector.load %arg17[%c32_359, %c0_360] : memref<128x128xf32, #tpu.memory_space<vmem>>, vector<8x128xf32>
    %cst_361 = arith.constant dense<0.000000e+00> : vector<8x128xf32>
    %1206 = tpu.matmul %1174, %967, %cst_361 {dimension_numbers = #tpu.dot_dimension_numbers<[1], [0], [0], [1], [0, 0, 1, 1], [], []>} : vector<8x32xf32>, vector<32x128xf32>, vector<8x128xf32> -> vector<8x128xf32>
    %1207 = arith.addf %1205, %1206 : vector<8x128xf32>
    %1208 = vector.extract_strided_slice %1207 {offsets = [0, 0], sizes = [8, 32], strides = [1, 1]} : vector<8x128xf32> to vector<8x32xf32>
    %1209 = arith.negf %1208 : vector<8x32xf32>
    %1210 = math.exp %1209 : vector<8x32xf32>
    %cst_362 = arith.constant 1.000000e+00 : f32
    %1211 = vector.broadcast %cst_362 : f32 to vector<8x32xf32>
    %1212 = arith.addf %1211, %1210 : vector<8x32xf32>
    %1213 = arith.divf %1211, %1212 : vector<8x32xf32>
    %1214 = vector.extract_strided_slice %1207 {offsets = [0, 32], sizes = [8, 32], strides = [1, 1]} : vector<8x128xf32> to vector<8x32xf32>
    %1215 = arith.negf %1214 : vector<8x32xf32>
    %1216 = math.exp %1215 : vector<8x32xf32>
    %cst_363 = arith.constant 1.000000e+00 : f32
    %1217 = vector.broadcast %cst_363 : f32 to vector<8x32xf32>
    %1218 = arith.addf %1217, %1216 : vector<8x32xf32>
    %1219 = arith.divf %1217, %1218 : vector<8x32xf32>
    %1220 = vector.extract_strided_slice %1207 {offsets = [0, 64], sizes = [8, 32], strides = [1, 1]} : vector<8x128xf32> to vector<8x32xf32>
    %1221 = math.tanh %1220 : vector<8x32xf32>
    %1222 = vector.extract_strided_slice %1207 {offsets = [0, 96], sizes = [8, 32], strides = [1, 1]} : vector<8x128xf32> to vector<8x32xf32>
    %1223 = arith.negf %1222 : vector<8x32xf32>
    %1224 = math.exp %1223 : vector<8x32xf32>
    %cst_364 = arith.constant 1.000000e+00 : f32
    %1225 = vector.broadcast %cst_364 : f32 to vector<8x32xf32>
    %1226 = arith.addf %1225, %1224 : vector<8x32xf32>
    %1227 = arith.divf %1225, %1226 : vector<8x32xf32>
    %1228 = arith.mulf %1219, %1172 : vector<8x32xf32>
    %1229 = arith.mulf %1213, %1221 : vector<8x32xf32>
    %1230 = arith.addf %1228, %1229 : vector<8x32xf32>
    %1231 = math.tanh %1230 : vector<8x32xf32>
    %1232 = arith.mulf %1227, %1231 : vector<8x32xf32>
    %c32_365 = arith.constant 32 : index
    %c0_366 = arith.constant 0 : index
    %1233 = vector.load %arg19[%c32_365, %c0_366] : memref<128x32xf32, #tpu.memory_space<vmem>>, vector<8x32xf32>
    tpu.vector_store %arg19[%c32_365, %c0_366], %1232 {strides = array<i32>} : memref<128x32xf32, #tpu.memory_space<vmem>>, vector<8x32xf32>,
    %c88_367 = arith.constant 88 : index
    %c0_368 = arith.constant 0 : index
    %1234 = vector.load %arg18[%c88_367, %c0_368] : memref<128x128xf32, #tpu.memory_space<vmem>>, vector<8x128xf32>
    %cst_369 = arith.constant dense<0.000000e+00> : vector<8x128xf32>
    %1235 = tpu.matmul %1203, %968, %cst_369 {dimension_numbers = #tpu.dot_dimension_numbers<[1], [0], [0], [1], [0, 0, 1, 1], [], []>} : vector<8x32xf32>, vector<32x128xf32>, vector<8x128xf32> -> vector<8x128xf32>
    %1236 = arith.addf %1234, %1235 : vector<8x128xf32>
    %1237 = vector.extract_strided_slice %1236 {offsets = [0, 0], sizes = [8, 32], strides = [1, 1]} : vector<8x128xf32> to vector<8x32xf32>
    %1238 = arith.negf %1237 : vector<8x32xf32>
    %1239 = math.exp %1238 : vector<8x32xf32>
    %cst_370 = arith.constant 1.000000e+00 : f32
    %1240 = vector.broadcast %cst_370 : f32 to vector<8x32xf32>
    %1241 = arith.addf %1240, %1239 : vector<8x32xf32>
    %1242 = arith.divf %1240, %1241 : vector<8x32xf32>
    %1243 = vector.extract_strided_slice %1236 {offsets = [0, 32], sizes = [8, 32], strides = [1, 1]} : vector<8x128xf32> to vector<8x32xf32>
    %1244 = arith.negf %1243 : vector<8x32xf32>
    %1245 = math.exp %1244 : vector<8x32xf32>
    %cst_371 = arith.constant 1.000000e+00 : f32
    %1246 = vector.broadcast %cst_371 : f32 to vector<8x32xf32>
    %1247 = arith.addf %1246, %1245 : vector<8x32xf32>
    %1248 = arith.divf %1246, %1247 : vector<8x32xf32>
    %1249 = vector.extract_strided_slice %1236 {offsets = [0, 64], sizes = [8, 32], strides = [1, 1]} : vector<8x128xf32> to vector<8x32xf32>
    %1250 = math.tanh %1249 : vector<8x32xf32>
    %1251 = vector.extract_strided_slice %1236 {offsets = [0, 96], sizes = [8, 32], strides = [1, 1]} : vector<8x128xf32> to vector<8x32xf32>
    %1252 = arith.negf %1251 : vector<8x32xf32>
    %1253 = math.exp %1252 : vector<8x32xf32>
    %cst_372 = arith.constant 1.000000e+00 : f32
    %1254 = vector.broadcast %cst_372 : f32 to vector<8x32xf32>
    %1255 = arith.addf %1254, %1253 : vector<8x32xf32>
    %1256 = arith.divf %1254, %1255 : vector<8x32xf32>
    %1257 = arith.mulf %1248, %1201 : vector<8x32xf32>
    %1258 = arith.mulf %1242, %1250 : vector<8x32xf32>
    %1259 = arith.addf %1257, %1258 : vector<8x32xf32>
    %1260 = math.tanh %1259 : vector<8x32xf32>
    %1261 = arith.mulf %1256, %1260 : vector<8x32xf32>
    %c88_373 = arith.constant 88 : index
    %c0_374 = arith.constant 0 : index
    %1262 = vector.load %arg20[%c88_373, %c0_374] : memref<128x32xf32, #tpu.memory_space<vmem>>, vector<8x32xf32>
    tpu.vector_store %arg20[%c88_373, %c0_374], %1261 {strides = array<i32>} : memref<128x32xf32, #tpu.memory_space<vmem>>, vector<8x32xf32>,
    %c40_375 = arith.constant 40 : index
    %c0_376 = arith.constant 0 : index
    %1263 = vector.load %arg17[%c40_375, %c0_376] : memref<128x128xf32, #tpu.memory_space<vmem>>, vector<8x128xf32>
    %cst_377 = arith.constant dense<0.000000e+00> : vector<8x128xf32>
    %1264 = tpu.matmul %1232, %967, %cst_377 {dimension_numbers = #tpu.dot_dimension_numbers<[1], [0], [0], [1], [0, 0, 1, 1], [], []>} : vector<8x32xf32>, vector<32x128xf32>, vector<8x128xf32> -> vector<8x128xf32>
    %1265 = arith.addf %1263, %1264 : vector<8x128xf32>
    %1266 = vector.extract_strided_slice %1265 {offsets = [0, 0], sizes = [8, 32], strides = [1, 1]} : vector<8x128xf32> to vector<8x32xf32>
    %1267 = arith.negf %1266 : vector<8x32xf32>
    %1268 = math.exp %1267 : vector<8x32xf32>
    %cst_378 = arith.constant 1.000000e+00 : f32
    %1269 = vector.broadcast %cst_378 : f32 to vector<8x32xf32>
    %1270 = arith.addf %1269, %1268 : vector<8x32xf32>
    %1271 = arith.divf %1269, %1270 : vector<8x32xf32>
    %1272 = vector.extract_strided_slice %1265 {offsets = [0, 32], sizes = [8, 32], strides = [1, 1]} : vector<8x128xf32> to vector<8x32xf32>
    %1273 = arith.negf %1272 : vector<8x32xf32>
    %1274 = math.exp %1273 : vector<8x32xf32>
    %cst_379 = arith.constant 1.000000e+00 : f32
    %1275 = vector.broadcast %cst_379 : f32 to vector<8x32xf32>
    %1276 = arith.addf %1275, %1274 : vector<8x32xf32>
    %1277 = arith.divf %1275, %1276 : vector<8x32xf32>
    %1278 = vector.extract_strided_slice %1265 {offsets = [0, 64], sizes = [8, 32], strides = [1, 1]} : vector<8x128xf32> to vector<8x32xf32>
    %1279 = math.tanh %1278 : vector<8x32xf32>
    %1280 = vector.extract_strided_slice %1265 {offsets = [0, 96], sizes = [8, 32], strides = [1, 1]} : vector<8x128xf32> to vector<8x32xf32>
    %1281 = arith.negf %1280 : vector<8x32xf32>
    %1282 = math.exp %1281 : vector<8x32xf32>
    %cst_380 = arith.constant 1.000000e+00 : f32
    %1283 = vector.broadcast %cst_380 : f32 to vector<8x32xf32>
    %1284 = arith.addf %1283, %1282 : vector<8x32xf32>
    %1285 = arith.divf %1283, %1284 : vector<8x32xf32>
    %1286 = arith.mulf %1277, %1230 : vector<8x32xf32>
    %1287 = arith.mulf %1271, %1279 : vector<8x32xf32>
    %1288 = arith.addf %1286, %1287 : vector<8x32xf32>
    %1289 = math.tanh %1288 : vector<8x32xf32>
    %1290 = arith.mulf %1285, %1289 : vector<8x32xf32>
    %c40_381 = arith.constant 40 : index
    %c0_382 = arith.constant 0 : index
    %1291 = vector.load %arg19[%c40_381, %c0_382] : memref<128x32xf32, #tpu.memory_space<vmem>>, vector<8x32xf32>
    tpu.vector_store %arg19[%c40_381, %c0_382], %1290 {strides = array<i32>} : memref<128x32xf32, #tpu.memory_space<vmem>>, vector<8x32xf32>,
    %c80_383 = arith.constant 80 : index
    %c0_384 = arith.constant 0 : index
    %1292 = vector.load %arg18[%c80_383, %c0_384] : memref<128x128xf32, #tpu.memory_space<vmem>>, vector<8x128xf32>
    %cst_385 = arith.constant dense<0.000000e+00> : vector<8x128xf32>
    %1293 = tpu.matmul %1261, %968, %cst_385 {dimension_numbers = #tpu.dot_dimension_numbers<[1], [0], [0], [1], [0, 0, 1, 1], [], []>} : vector<8x32xf32>, vector<32x128xf32>, vector<8x128xf32> -> vector<8x128xf32>
    %1294 = arith.addf %1292, %1293 : vector<8x128xf32>
    %1295 = vector.extract_strided_slice %1294 {offsets = [0, 0], sizes = [8, 32], strides = [1, 1]} : vector<8x128xf32> to vector<8x32xf32>
    %1296 = arith.negf %1295 : vector<8x32xf32>
    %1297 = math.exp %1296 : vector<8x32xf32>
    %cst_386 = arith.constant 1.000000e+00 : f32
    %1298 = vector.broadcast %cst_386 : f32 to vector<8x32xf32>
    %1299 = arith.addf %1298, %1297 : vector<8x32xf32>
    %1300 = arith.divf %1298, %1299 : vector<8x32xf32>
    %1301 = vector.extract_strided_slice %1294 {offsets = [0, 32], sizes = [8, 32], strides = [1, 1]} : vector<8x128xf32> to vector<8x32xf32>
    %1302 = arith.negf %1301 : vector<8x32xf32>
    %1303 = math.exp %1302 : vector<8x32xf32>
    %cst_387 = arith.constant 1.000000e+00 : f32
    %1304 = vector.broadcast %cst_387 : f32 to vector<8x32xf32>
    %1305 = arith.addf %1304, %1303 : vector<8x32xf32>
    %1306 = arith.divf %1304, %1305 : vector<8x32xf32>
    %1307 = vector.extract_strided_slice %1294 {offsets = [0, 64], sizes = [8, 32], strides = [1, 1]} : vector<8x128xf32> to vector<8x32xf32>
    %1308 = math.tanh %1307 : vector<8x32xf32>
    %1309 = vector.extract_strided_slice %1294 {offsets = [0, 96], sizes = [8, 32], strides = [1, 1]} : vector<8x128xf32> to vector<8x32xf32>
    %1310 = arith.negf %1309 : vector<8x32xf32>
    %1311 = math.exp %1310 : vector<8x32xf32>
    %cst_388 = arith.constant 1.000000e+00 : f32
    %1312 = vector.broadcast %cst_388 : f32 to vector<8x32xf32>
    %1313 = arith.addf %1312, %1311 : vector<8x32xf32>
    %1314 = arith.divf %1312, %1313 : vector<8x32xf32>
    %1315 = arith.mulf %1306, %1259 : vector<8x32xf32>
    %1316 = arith.mulf %1300, %1308 : vector<8x32xf32>
    %1317 = arith.addf %1315, %1316 : vector<8x32xf32>
    %1318 = math.tanh %1317 : vector<8x32xf32>
    %1319 = arith.mulf %1314, %1318 : vector<8x32xf32>
    %c80_389 = arith.constant 80 : index
    %c0_390 = arith.constant 0 : index
    %1320 = vector.load %arg20[%c80_389, %c0_390] : memref<128x32xf32, #tpu.memory_space<vmem>>, vector<8x32xf32>
    tpu.vector_store %arg20[%c80_389, %c0_390], %1319 {strides = array<i32>} : memref<128x32xf32, #tpu.memory_space<vmem>>, vector<8x32xf32>,
    %c48_391 = arith.constant 48 : index
    %c0_392 = arith.constant 0 : index
    %1321 = vector.load %arg17[%c48_391, %c0_392] : memref<128x128xf32, #tpu.memory_space<vmem>>, vector<8x128xf32>
    %cst_393 = arith.constant dense<0.000000e+00> : vector<8x128xf32>
    %1322 = tpu.matmul %1290, %967, %cst_393 {dimension_numbers = #tpu.dot_dimension_numbers<[1], [0], [0], [1], [0, 0, 1, 1], [], []>} : vector<8x32xf32>, vector<32x128xf32>, vector<8x128xf32> -> vector<8x128xf32>
    %1323 = arith.addf %1321, %1322 : vector<8x128xf32>
    %1324 = vector.extract_strided_slice %1323 {offsets = [0, 0], sizes = [8, 32], strides = [1, 1]} : vector<8x128xf32> to vector<8x32xf32>
    %1325 = arith.negf %1324 : vector<8x32xf32>
    %1326 = math.exp %1325 : vector<8x32xf32>
    %cst_394 = arith.constant 1.000000e+00 : f32
    %1327 = vector.broadcast %cst_394 : f32 to vector<8x32xf32>
    %1328 = arith.addf %1327, %1326 : vector<8x32xf32>
    %1329 = arith.divf %1327, %1328 : vector<8x32xf32>
    %1330 = vector.extract_strided_slice %1323 {offsets = [0, 32], sizes = [8, 32], strides = [1, 1]} : vector<8x128xf32> to vector<8x32xf32>
    %1331 = arith.negf %1330 : vector<8x32xf32>
    %1332 = math.exp %1331 : vector<8x32xf32>
    %cst_395 = arith.constant 1.000000e+00 : f32
    %1333 = vector.broadcast %cst_395 : f32 to vector<8x32xf32>
    %1334 = arith.addf %1333, %1332 : vector<8x32xf32>
    %1335 = arith.divf %1333, %1334 : vector<8x32xf32>
    %1336 = vector.extract_strided_slice %1323 {offsets = [0, 64], sizes = [8, 32], strides = [1, 1]} : vector<8x128xf32> to vector<8x32xf32>
    %1337 = math.tanh %1336 : vector<8x32xf32>
    %1338 = vector.extract_strided_slice %1323 {offsets = [0, 96], sizes = [8, 32], strides = [1, 1]} : vector<8x128xf32> to vector<8x32xf32>
    %1339 = arith.negf %1338 : vector<8x32xf32>
    %1340 = math.exp %1339 : vector<8x32xf32>
    %cst_396 = arith.constant 1.000000e+00 : f32
    %1341 = vector.broadcast %cst_396 : f32 to vector<8x32xf32>
    %1342 = arith.addf %1341, %1340 : vector<8x32xf32>
    %1343 = arith.divf %1341, %1342 : vector<8x32xf32>
    %1344 = arith.mulf %1335, %1288 : vector<8x32xf32>
    %1345 = arith.mulf %1329, %1337 : vector<8x32xf32>
    %1346 = arith.addf %1344, %1345 : vector<8x32xf32>
    %1347 = math.tanh %1346 : vector<8x32xf32>
    %1348 = arith.mulf %1343, %1347 : vector<8x32xf32>
    %c48_397 = arith.constant 48 : index
    %c0_398 = arith.constant 0 : index
    %1349 = vector.load %arg19[%c48_397, %c0_398] : memref<128x32xf32, #tpu.memory_space<vmem>>, vector<8x32xf32>
    tpu.vector_store %arg19[%c48_397, %c0_398], %1348 {strides = array<i32>} : memref<128x32xf32, #tpu.memory_space<vmem>>, vector<8x32xf32>,
    %c72_399 = arith.constant 72 : index
    %c0_400 = arith.constant 0 : index
    %1350 = vector.load %arg18[%c72_399, %c0_400] : memref<128x128xf32, #tpu.memory_space<vmem>>, vector<8x128xf32>
    %cst_401 = arith.constant dense<0.000000e+00> : vector<8x128xf32>
    %1351 = tpu.matmul %1319, %968, %cst_401 {dimension_numbers = #tpu.dot_dimension_numbers<[1], [0], [0], [1], [0, 0, 1, 1], [], []>} : vector<8x32xf32>, vector<32x128xf32>, vector<8x128xf32> -> vector<8x128xf32>
    %1352 = arith.addf %1350, %1351 : vector<8x128xf32>
    %1353 = vector.extract_strided_slice %1352 {offsets = [0, 0], sizes = [8, 32], strides = [1, 1]} : vector<8x128xf32> to vector<8x32xf32>
    %1354 = arith.negf %1353 : vector<8x32xf32>
    %1355 = math.exp %1354 : vector<8x32xf32>
    %cst_402 = arith.constant 1.000000e+00 : f32
    %1356 = vector.broadcast %cst_402 : f32 to vector<8x32xf32>
    %1357 = arith.addf %1356, %1355 : vector<8x32xf32>
    %1358 = arith.divf %1356, %1357 : vector<8x32xf32>
    %1359 = vector.extract_strided_slice %1352 {offsets = [0, 32], sizes = [8, 32], strides = [1, 1]} : vector<8x128xf32> to vector<8x32xf32>
    %1360 = arith.negf %1359 : vector<8x32xf32>
    %1361 = math.exp %1360 : vector<8x32xf32>
    %cst_403 = arith.constant 1.000000e+00 : f32
    %1362 = vector.broadcast %cst_403 : f32 to vector<8x32xf32>
    %1363 = arith.addf %1362, %1361 : vector<8x32xf32>
    %1364 = arith.divf %1362, %1363 : vector<8x32xf32>
    %1365 = vector.extract_strided_slice %1352 {offsets = [0, 64], sizes = [8, 32], strides = [1, 1]} : vector<8x128xf32> to vector<8x32xf32>
    %1366 = math.tanh %1365 : vector<8x32xf32>
    %1367 = vector.extract_strided_slice %1352 {offsets = [0, 96], sizes = [8, 32], strides = [1, 1]} : vector<8x128xf32> to vector<8x32xf32>
    %1368 = arith.negf %1367 : vector<8x32xf32>
    %1369 = math.exp %1368 : vector<8x32xf32>
    %cst_404 = arith.constant 1.000000e+00 : f32
    %1370 = vector.broadcast %cst_404 : f32 to vector<8x32xf32>
    %1371 = arith.addf %1370, %1369 : vector<8x32xf32>
    %1372 = arith.divf %1370, %1371 : vector<8x32xf32>
    %1373 = arith.mulf %1364, %1317 : vector<8x32xf32>
    %1374 = arith.mulf %1358, %1366 : vector<8x32xf32>
    %1375 = arith.addf %1373, %1374 : vector<8x32xf32>
    %1376 = math.tanh %1375 : vector<8x32xf32>
    %1377 = arith.mulf %1372, %1376 : vector<8x32xf32>
    %c72_405 = arith.constant 72 : index
    %c0_406 = arith.constant 0 : index
    %1378 = vector.load %arg20[%c72_405, %c0_406] : memref<128x32xf32, #tpu.memory_space<vmem>>, vector<8x32xf32>
    tpu.vector_store %arg20[%c72_405, %c0_406], %1377 {strides = array<i32>} : memref<128x32xf32, #tpu.memory_space<vmem>>, vector<8x32xf32>,
    %c56_407 = arith.constant 56 : index
    %c0_408 = arith.constant 0 : index
    %1379 = vector.load %arg17[%c56_407, %c0_408] : memref<128x128xf32, #tpu.memory_space<vmem>>, vector<8x128xf32>
    %cst_409 = arith.constant dense<0.000000e+00> : vector<8x128xf32>
    %1380 = tpu.matmul %1348, %967, %cst_409 {dimension_numbers = #tpu.dot_dimension_numbers<[1], [0], [0], [1], [0, 0, 1, 1], [], []>} : vector<8x32xf32>, vector<32x128xf32>, vector<8x128xf32> -> vector<8x128xf32>
    %1381 = arith.addf %1379, %1380 : vector<8x128xf32>
    %1382 = vector.extract_strided_slice %1381 {offsets = [0, 0], sizes = [8, 32], strides = [1, 1]} : vector<8x128xf32> to vector<8x32xf32>
    %1383 = arith.negf %1382 : vector<8x32xf32>
    %1384 = math.exp %1383 : vector<8x32xf32>
    %cst_410 = arith.constant 1.000000e+00 : f32
    %1385 = vector.broadcast %cst_410 : f32 to vector<8x32xf32>
    %1386 = arith.addf %1385, %1384 : vector<8x32xf32>
    %1387 = arith.divf %1385, %1386 : vector<8x32xf32>
    %1388 = vector.extract_strided_slice %1381 {offsets = [0, 32], sizes = [8, 32], strides = [1, 1]} : vector<8x128xf32> to vector<8x32xf32>
    %1389 = arith.negf %1388 : vector<8x32xf32>
    %1390 = math.exp %1389 : vector<8x32xf32>
    %cst_411 = arith.constant 1.000000e+00 : f32
    %1391 = vector.broadcast %cst_411 : f32 to vector<8x32xf32>
    %1392 = arith.addf %1391, %1390 : vector<8x32xf32>
    %1393 = arith.divf %1391, %1392 : vector<8x32xf32>
    %1394 = vector.extract_strided_slice %1381 {offsets = [0, 64], sizes = [8, 32], strides = [1, 1]} : vector<8x128xf32> to vector<8x32xf32>
    %1395 = math.tanh %1394 : vector<8x32xf32>
    %1396 = vector.extract_strided_slice %1381 {offsets = [0, 96], sizes = [8, 32], strides = [1, 1]} : vector<8x128xf32> to vector<8x32xf32>
    %1397 = arith.negf %1396 : vector<8x32xf32>
    %1398 = math.exp %1397 : vector<8x32xf32>
    %cst_412 = arith.constant 1.000000e+00 : f32
    %1399 = vector.broadcast %cst_412 : f32 to vector<8x32xf32>
    %1400 = arith.addf %1399, %1398 : vector<8x32xf32>
    %1401 = arith.divf %1399, %1400 : vector<8x32xf32>
    %1402 = arith.mulf %1393, %1346 : vector<8x32xf32>
    %1403 = arith.mulf %1387, %1395 : vector<8x32xf32>
    %1404 = arith.addf %1402, %1403 : vector<8x32xf32>
    %1405 = math.tanh %1404 : vector<8x32xf32>
    %1406 = arith.mulf %1401, %1405 : vector<8x32xf32>
    %c56_413 = arith.constant 56 : index
    %c0_414 = arith.constant 0 : index
    %1407 = vector.load %arg19[%c56_413, %c0_414] : memref<128x32xf32, #tpu.memory_space<vmem>>, vector<8x32xf32>
    tpu.vector_store %arg19[%c56_413, %c0_414], %1406 {strides = array<i32>} : memref<128x32xf32, #tpu.memory_space<vmem>>, vector<8x32xf32>,
    %c64_415 = arith.constant 64 : index
    %c0_416 = arith.constant 0 : index
    %1408 = vector.load %arg18[%c64_415, %c0_416] : memref<128x128xf32, #tpu.memory_space<vmem>>, vector<8x128xf32>
    %cst_417 = arith.constant dense<0.000000e+00> : vector<8x128xf32>
    %1409 = tpu.matmul %1377, %968, %cst_417 {dimension_numbers = #tpu.dot_dimension_numbers<[1], [0], [0], [1], [0, 0, 1, 1], [], []>} : vector<8x32xf32>, vector<32x128xf32>, vector<8x128xf32> -> vector<8x128xf32>
    %1410 = arith.addf %1408, %1409 : vector<8x128xf32>
    %1411 = vector.extract_strided_slice %1410 {offsets = [0, 0], sizes = [8, 32], strides = [1, 1]} : vector<8x128xf32> to vector<8x32xf32>
    %1412 = arith.negf %1411 : vector<8x32xf32>
    %1413 = math.exp %1412 : vector<8x32xf32>
    %cst_418 = arith.constant 1.000000e+00 : f32
    %1414 = vector.broadcast %cst_418 : f32 to vector<8x32xf32>
    %1415 = arith.addf %1414, %1413 : vector<8x32xf32>
    %1416 = arith.divf %1414, %1415 : vector<8x32xf32>
    %1417 = vector.extract_strided_slice %1410 {offsets = [0, 32], sizes = [8, 32], strides = [1, 1]} : vector<8x128xf32> to vector<8x32xf32>
    %1418 = arith.negf %1417 : vector<8x32xf32>
    %1419 = math.exp %1418 : vector<8x32xf32>
    %cst_419 = arith.constant 1.000000e+00 : f32
    %1420 = vector.broadcast %cst_419 : f32 to vector<8x32xf32>
    %1421 = arith.addf %1420, %1419 : vector<8x32xf32>
    %1422 = arith.divf %1420, %1421 : vector<8x32xf32>
    %1423 = vector.extract_strided_slice %1410 {offsets = [0, 64], sizes = [8, 32], strides = [1, 1]} : vector<8x128xf32> to vector<8x32xf32>
    %1424 = math.tanh %1423 : vector<8x32xf32>
    %1425 = vector.extract_strided_slice %1410 {offsets = [0, 96], sizes = [8, 32], strides = [1, 1]} : vector<8x128xf32> to vector<8x32xf32>
    %1426 = arith.negf %1425 : vector<8x32xf32>
    %1427 = math.exp %1426 : vector<8x32xf32>
    %cst_420 = arith.constant 1.000000e+00 : f32
    %1428 = vector.broadcast %cst_420 : f32 to vector<8x32xf32>
    %1429 = arith.addf %1428, %1427 : vector<8x32xf32>
    %1430 = arith.divf %1428, %1429 : vector<8x32xf32>
    %1431 = arith.mulf %1422, %1375 : vector<8x32xf32>
    %1432 = arith.mulf %1416, %1424 : vector<8x32xf32>
    %1433 = arith.addf %1431, %1432 : vector<8x32xf32>
    %1434 = math.tanh %1433 : vector<8x32xf32>
    %1435 = arith.mulf %1430, %1434 : vector<8x32xf32>
    %c64_421 = arith.constant 64 : index
    %c0_422 = arith.constant 0 : index
    %1436 = vector.load %arg20[%c64_421, %c0_422] : memref<128x32xf32, #tpu.memory_space<vmem>>, vector<8x32xf32>
    tpu.vector_store %arg20[%c64_421, %c0_422], %1435 {strides = array<i32>} : memref<128x32xf32, #tpu.memory_space<vmem>>, vector<8x32xf32>,
    %c64_423 = arith.constant 64 : index
    %c0_424 = arith.constant 0 : index
    %1437 = vector.load %arg17[%c64_423, %c0_424] : memref<128x128xf32, #tpu.memory_space<vmem>>, vector<8x128xf32>
    %cst_425 = arith.constant dense<0.000000e+00> : vector<8x128xf32>
    %1438 = tpu.matmul %1406, %967, %cst_425 {dimension_numbers = #tpu.dot_dimension_numbers<[1], [0], [0], [1], [0, 0, 1, 1], [], []>} : vector<8x32xf32>, vector<32x128xf32>, vector<8x128xf32> -> vector<8x128xf32>
    %1439 = arith.addf %1437, %1438 : vector<8x128xf32>
    %1440 = vector.extract_strided_slice %1439 {offsets = [0, 0], sizes = [8, 32], strides = [1, 1]} : vector<8x128xf32> to vector<8x32xf32>
    %1441 = arith.negf %1440 : vector<8x32xf32>
    %1442 = math.exp %1441 : vector<8x32xf32>
    %cst_426 = arith.constant 1.000000e+00 : f32
    %1443 = vector.broadcast %cst_426 : f32 to vector<8x32xf32>
    %1444 = arith.addf %1443, %1442 : vector<8x32xf32>
    %1445 = arith.divf %1443, %1444 : vector<8x32xf32>
    %1446 = vector.extract_strided_slice %1439 {offsets = [0, 32], sizes = [8, 32], strides = [1, 1]} : vector<8x128xf32> to vector<8x32xf32>
    %1447 = arith.negf %1446 : vector<8x32xf32>
    %1448 = math.exp %1447 : vector<8x32xf32>
    %cst_427 = arith.constant 1.000000e+00 : f32
    %1449 = vector.broadcast %cst_427 : f32 to vector<8x32xf32>
    %1450 = arith.addf %1449, %1448 : vector<8x32xf32>
    %1451 = arith.divf %1449, %1450 : vector<8x32xf32>
    %1452 = vector.extract_strided_slice %1439 {offsets = [0, 64], sizes = [8, 32], strides = [1, 1]} : vector<8x128xf32> to vector<8x32xf32>
    %1453 = math.tanh %1452 : vector<8x32xf32>
    %1454 = vector.extract_strided_slice %1439 {offsets = [0, 96], sizes = [8, 32], strides = [1, 1]} : vector<8x128xf32> to vector<8x32xf32>
    %1455 = arith.negf %1454 : vector<8x32xf32>
    %1456 = math.exp %1455 : vector<8x32xf32>
    %cst_428 = arith.constant 1.000000e+00 : f32
    %1457 = vector.broadcast %cst_428 : f32 to vector<8x32xf32>
    %1458 = arith.addf %1457, %1456 : vector<8x32xf32>
    %1459 = arith.divf %1457, %1458 : vector<8x32xf32>
    %1460 = arith.mulf %1451, %1404 : vector<8x32xf32>
    %1461 = arith.mulf %1445, %1453 : vector<8x32xf32>
    %1462 = arith.addf %1460, %1461 : vector<8x32xf32>
    %1463 = math.tanh %1462 : vector<8x32xf32>
    %1464 = arith.mulf %1459, %1463 : vector<8x32xf32>
    %c64_429 = arith.constant 64 : index
    %c0_430 = arith.constant 0 : index
    %1465 = vector.load %arg19[%c64_429, %c0_430] : memref<128x32xf32, #tpu.memory_space<vmem>>, vector<8x32xf32>
    tpu.vector_store %arg19[%c64_429, %c0_430], %1464 {strides = array<i32>} : memref<128x32xf32, #tpu.memory_space<vmem>>, vector<8x32xf32>,
    %c56_431 = arith.constant 56 : index
    %c0_432 = arith.constant 0 : index
    %1466 = vector.load %arg18[%c56_431, %c0_432] : memref<128x128xf32, #tpu.memory_space<vmem>>, vector<8x128xf32>
    %cst_433 = arith.constant dense<0.000000e+00> : vector<8x128xf32>
    %1467 = tpu.matmul %1435, %968, %cst_433 {dimension_numbers = #tpu.dot_dimension_numbers<[1], [0], [0], [1], [0, 0, 1, 1], [], []>} : vector<8x32xf32>, vector<32x128xf32>, vector<8x128xf32> -> vector<8x128xf32>
    %1468 = arith.addf %1466, %1467 : vector<8x128xf32>
    %1469 = vector.extract_strided_slice %1468 {offsets = [0, 0], sizes = [8, 32], strides = [1, 1]} : vector<8x128xf32> to vector<8x32xf32>
    %1470 = arith.negf %1469 : vector<8x32xf32>
    %1471 = math.exp %1470 : vector<8x32xf32>
    %cst_434 = arith.constant 1.000000e+00 : f32
    %1472 = vector.broadcast %cst_434 : f32 to vector<8x32xf32>
    %1473 = arith.addf %1472, %1471 : vector<8x32xf32>
    %1474 = arith.divf %1472, %1473 : vector<8x32xf32>
    %1475 = vector.extract_strided_slice %1468 {offsets = [0, 32], sizes = [8, 32], strides = [1, 1]} : vector<8x128xf32> to vector<8x32xf32>
    %1476 = arith.negf %1475 : vector<8x32xf32>
    %1477 = math.exp %1476 : vector<8x32xf32>
    %cst_435 = arith.constant 1.000000e+00 : f32
    %1478 = vector.broadcast %cst_435 : f32 to vector<8x32xf32>
    %1479 = arith.addf %1478, %1477 : vector<8x32xf32>
    %1480 = arith.divf %1478, %1479 : vector<8x32xf32>
    %1481 = vector.extract_strided_slice %1468 {offsets = [0, 64], sizes = [8, 32], strides = [1, 1]} : vector<8x128xf32> to vector<8x32xf32>
    %1482 = math.tanh %1481 : vector<8x32xf32>
    %1483 = vector.extract_strided_slice %1468 {offsets = [0, 96], sizes = [8, 32], strides = [1, 1]} : vector<8x128xf32> to vector<8x32xf32>
    %1484 = arith.negf %1483 : vector<8x32xf32>
    %1485 = math.exp %1484 : vector<8x32xf32>
    %cst_436 = arith.constant 1.000000e+00 : f32
    %1486 = vector.broadcast %cst_436 : f32 to vector<8x32xf32>
    %1487 = arith.addf %1486, %1485 : vector<8x32xf32>
    %1488 = arith.divf %1486, %1487 : vector<8x32xf32>
    %1489 = arith.mulf %1480, %1433 : vector<8x32xf32>
    %1490 = arith.mulf %1474, %1482 : vector<8x32xf32>
    %1491 = arith.addf %1489, %1490 : vector<8x32xf32>
    %1492 = math.tanh %1491 : vector<8x32xf32>
    %1493 = arith.mulf %1488, %1492 : vector<8x32xf32>
    %c56_437 = arith.constant 56 : index
    %c0_438 = arith.constant 0 : index
    %1494 = vector.load %arg20[%c56_437, %c0_438] : memref<128x32xf32, #tpu.memory_space<vmem>>, vector<8x32xf32>
    tpu.vector_store %arg20[%c56_437, %c0_438], %1493 {strides = array<i32>} : memref<128x32xf32, #tpu.memory_space<vmem>>, vector<8x32xf32>,
    %c72_439 = arith.constant 72 : index
    %c0_440 = arith.constant 0 : index
    %1495 = vector.load %arg17[%c72_439, %c0_440] : memref<128x128xf32, #tpu.memory_space<vmem>>, vector<8x128xf32>
    %cst_441 = arith.constant dense<0.000000e+00> : vector<8x128xf32>
    %1496 = tpu.matmul %1464, %967, %cst_441 {dimension_numbers = #tpu.dot_dimension_numbers<[1], [0], [0], [1], [0, 0, 1, 1], [], []>} : vector<8x32xf32>, vector<32x128xf32>, vector<8x128xf32> -> vector<8x128xf32>
    %1497 = arith.addf %1495, %1496 : vector<8x128xf32>
    %1498 = vector.extract_strided_slice %1497 {offsets = [0, 0], sizes = [8, 32], strides = [1, 1]} : vector<8x128xf32> to vector<8x32xf32>
    %1499 = arith.negf %1498 : vector<8x32xf32>
    %1500 = math.exp %1499 : vector<8x32xf32>
    %cst_442 = arith.constant 1.000000e+00 : f32
    %1501 = vector.broadcast %cst_442 : f32 to vector<8x32xf32>
    %1502 = arith.addf %1501, %1500 : vector<8x32xf32>
    %1503 = arith.divf %1501, %1502 : vector<8x32xf32>
    %1504 = vector.extract_strided_slice %1497 {offsets = [0, 32], sizes = [8, 32], strides = [1, 1]} : vector<8x128xf32> to vector<8x32xf32>
    %1505 = arith.negf %1504 : vector<8x32xf32>
    %1506 = math.exp %1505 : vector<8x32xf32>
    %cst_443 = arith.constant 1.000000e+00 : f32
    %1507 = vector.broadcast %cst_443 : f32 to vector<8x32xf32>
    %1508 = arith.addf %1507, %1506 : vector<8x32xf32>
    %1509 = arith.divf %1507, %1508 : vector<8x32xf32>
    %1510 = vector.extract_strided_slice %1497 {offsets = [0, 64], sizes = [8, 32], strides = [1, 1]} : vector<8x128xf32> to vector<8x32xf32>
    %1511 = math.tanh %1510 : vector<8x32xf32>
    %1512 = vector.extract_strided_slice %1497 {offsets = [0, 96], sizes = [8, 32], strides = [1, 1]} : vector<8x128xf32> to vector<8x32xf32>
    %1513 = arith.negf %1512 : vector<8x32xf32>
    %1514 = math.exp %1513 : vector<8x32xf32>
    %cst_444 = arith.constant 1.000000e+00 : f32
    %1515 = vector.broadcast %cst_444 : f32 to vector<8x32xf32>
    %1516 = arith.addf %1515, %1514 : vector<8x32xf32>
    %1517 = arith.divf %1515, %1516 : vector<8x32xf32>
    %1518 = arith.mulf %1509, %1462 : vector<8x32xf32>
    %1519 = arith.mulf %1503, %1511 : vector<8x32xf32>
    %1520 = arith.addf %1518, %1519 : vector<8x32xf32>
    %1521 = math.tanh %1520 : vector<8x32xf32>
    %1522 = arith.mulf %1517, %1521 : vector<8x32xf32>
    %c72_445 = arith.constant 72 : index
    %c0_446 = arith.constant 0 : index
    %1523 = vector.load %arg19[%c72_445, %c0_446] : memref<128x32xf32, #tpu.memory_space<vmem>>, vector<8x32xf32>
    tpu.vector_store %arg19[%c72_445, %c0_446], %1522 {strides = array<i32>} : memref<128x32xf32, #tpu.memory_space<vmem>>, vector<8x32xf32>,
    %c48_447 = arith.constant 48 : index
    %c0_448 = arith.constant 0 : index
    %1524 = vector.load %arg18[%c48_447, %c0_448] : memref<128x128xf32, #tpu.memory_space<vmem>>, vector<8x128xf32>
    %cst_449 = arith.constant dense<0.000000e+00> : vector<8x128xf32>
    %1525 = tpu.matmul %1493, %968, %cst_449 {dimension_numbers = #tpu.dot_dimension_numbers<[1], [0], [0], [1], [0, 0, 1, 1], [], []>} : vector<8x32xf32>, vector<32x128xf32>, vector<8x128xf32> -> vector<8x128xf32>
    %1526 = arith.addf %1524, %1525 : vector<8x128xf32>
    %1527 = vector.extract_strided_slice %1526 {offsets = [0, 0], sizes = [8, 32], strides = [1, 1]} : vector<8x128xf32> to vector<8x32xf32>
    %1528 = arith.negf %1527 : vector<8x32xf32>
    %1529 = math.exp %1528 : vector<8x32xf32>
    %cst_450 = arith.constant 1.000000e+00 : f32
    %1530 = vector.broadcast %cst_450 : f32 to vector<8x32xf32>
    %1531 = arith.addf %1530, %1529 : vector<8x32xf32>
    %1532 = arith.divf %1530, %1531 : vector<8x32xf32>
    %1533 = vector.extract_strided_slice %1526 {offsets = [0, 32], sizes = [8, 32], strides = [1, 1]} : vector<8x128xf32> to vector<8x32xf32>
    %1534 = arith.negf %1533 : vector<8x32xf32>
    %1535 = math.exp %1534 : vector<8x32xf32>
    %cst_451 = arith.constant 1.000000e+00 : f32
    %1536 = vector.broadcast %cst_451 : f32 to vector<8x32xf32>
    %1537 = arith.addf %1536, %1535 : vector<8x32xf32>
    %1538 = arith.divf %1536, %1537 : vector<8x32xf32>
    %1539 = vector.extract_strided_slice %1526 {offsets = [0, 64], sizes = [8, 32], strides = [1, 1]} : vector<8x128xf32> to vector<8x32xf32>
    %1540 = math.tanh %1539 : vector<8x32xf32>
    %1541 = vector.extract_strided_slice %1526 {offsets = [0, 96], sizes = [8, 32], strides = [1, 1]} : vector<8x128xf32> to vector<8x32xf32>
    %1542 = arith.negf %1541 : vector<8x32xf32>
    %1543 = math.exp %1542 : vector<8x32xf32>
    %cst_452 = arith.constant 1.000000e+00 : f32
    %1544 = vector.broadcast %cst_452 : f32 to vector<8x32xf32>
    %1545 = arith.addf %1544, %1543 : vector<8x32xf32>
    %1546 = arith.divf %1544, %1545 : vector<8x32xf32>
    %1547 = arith.mulf %1538, %1491 : vector<8x32xf32>
    %1548 = arith.mulf %1532, %1540 : vector<8x32xf32>
    %1549 = arith.addf %1547, %1548 : vector<8x32xf32>
    %1550 = math.tanh %1549 : vector<8x32xf32>
    %1551 = arith.mulf %1546, %1550 : vector<8x32xf32>
    %c48_453 = arith.constant 48 : index
    %c0_454 = arith.constant 0 : index
    %1552 = vector.load %arg20[%c48_453, %c0_454] : memref<128x32xf32, #tpu.memory_space<vmem>>, vector<8x32xf32>
    tpu.vector_store %arg20[%c48_453, %c0_454], %1551 {strides = array<i32>} : memref<128x32xf32, #tpu.memory_space<vmem>>, vector<8x32xf32>,
    %c80_455 = arith.constant 80 : index
    %c0_456 = arith.constant 0 : index
    %1553 = vector.load %arg17[%c80_455, %c0_456] : memref<128x128xf32, #tpu.memory_space<vmem>>, vector<8x128xf32>
    %cst_457 = arith.constant dense<0.000000e+00> : vector<8x128xf32>
    %1554 = tpu.matmul %1522, %967, %cst_457 {dimension_numbers = #tpu.dot_dimension_numbers<[1], [0], [0], [1], [0, 0, 1, 1], [], []>} : vector<8x32xf32>, vector<32x128xf32>, vector<8x128xf32> -> vector<8x128xf32>
    %1555 = arith.addf %1553, %1554 : vector<8x128xf32>
    %1556 = vector.extract_strided_slice %1555 {offsets = [0, 0], sizes = [8, 32], strides = [1, 1]} : vector<8x128xf32> to vector<8x32xf32>
    %1557 = arith.negf %1556 : vector<8x32xf32>
    %1558 = math.exp %1557 : vector<8x32xf32>
    %cst_458 = arith.constant 1.000000e+00 : f32
    %1559 = vector.broadcast %cst_458 : f32 to vector<8x32xf32>
    %1560 = arith.addf %1559, %1558 : vector<8x32xf32>
    %1561 = arith.divf %1559, %1560 : vector<8x32xf32>
    %1562 = vector.extract_strided_slice %1555 {offsets = [0, 32], sizes = [8, 32], strides = [1, 1]} : vector<8x128xf32> to vector<8x32xf32>
    %1563 = arith.negf %1562 : vector<8x32xf32>
    %1564 = math.exp %1563 : vector<8x32xf32>
    %cst_459 = arith.constant 1.000000e+00 : f32
    %1565 = vector.broadcast %cst_459 : f32 to vector<8x32xf32>
    %1566 = arith.addf %1565, %1564 : vector<8x32xf32>
    %1567 = arith.divf %1565, %1566 : vector<8x32xf32>
    %1568 = vector.extract_strided_slice %1555 {offsets = [0, 64], sizes = [8, 32], strides = [1, 1]} : vector<8x128xf32> to vector<8x32xf32>
    %1569 = math.tanh %1568 : vector<8x32xf32>
    %1570 = vector.extract_strided_slice %1555 {offsets = [0, 96], sizes = [8, 32], strides = [1, 1]} : vector<8x128xf32> to vector<8x32xf32>
    %1571 = arith.negf %1570 : vector<8x32xf32>
    %1572 = math.exp %1571 : vector<8x32xf32>
    %cst_460 = arith.constant 1.000000e+00 : f32
    %1573 = vector.broadcast %cst_460 : f32 to vector<8x32xf32>
    %1574 = arith.addf %1573, %1572 : vector<8x32xf32>
    %1575 = arith.divf %1573, %1574 : vector<8x32xf32>
    %1576 = arith.mulf %1567, %1520 : vector<8x32xf32>
    %1577 = arith.mulf %1561, %1569 : vector<8x32xf32>
    %1578 = arith.addf %1576, %1577 : vector<8x32xf32>
    %1579 = math.tanh %1578 : vector<8x32xf32>
    %1580 = arith.mulf %1575, %1579 : vector<8x32xf32>
    %c80_461 = arith.constant 80 : index
    %c0_462 = arith.constant 0 : index
    %1581 = vector.load %arg19[%c80_461, %c0_462] : memref<128x32xf32, #tpu.memory_space<vmem>>, vector<8x32xf32>
    tpu.vector_store %arg19[%c80_461, %c0_462], %1580 {strides = array<i32>} : memref<128x32xf32, #tpu.memory_space<vmem>>, vector<8x32xf32>,
    %c40_463 = arith.constant 40 : index
    %c0_464 = arith.constant 0 : index
    %1582 = vector.load %arg18[%c40_463, %c0_464] : memref<128x128xf32, #tpu.memory_space<vmem>>, vector<8x128xf32>
    %cst_465 = arith.constant dense<0.000000e+00> : vector<8x128xf32>
    %1583 = tpu.matmul %1551, %968, %cst_465 {dimension_numbers = #tpu.dot_dimension_numbers<[1], [0], [0], [1], [0, 0, 1, 1], [], []>} : vector<8x32xf32>, vector<32x128xf32>, vector<8x128xf32> -> vector<8x128xf32>
    %1584 = arith.addf %1582, %1583 : vector<8x128xf32>
    %1585 = vector.extract_strided_slice %1584 {offsets = [0, 0], sizes = [8, 32], strides = [1, 1]} : vector<8x128xf32> to vector<8x32xf32>
    %1586 = arith.negf %1585 : vector<8x32xf32>
    %1587 = math.exp %1586 : vector<8x32xf32>
    %cst_466 = arith.constant 1.000000e+00 : f32
    %1588 = vector.broadcast %cst_466 : f32 to vector<8x32xf32>
    %1589 = arith.addf %1588, %1587 : vector<8x32xf32>
    %1590 = arith.divf %1588, %1589 : vector<8x32xf32>
    %1591 = vector.extract_strided_slice %1584 {offsets = [0, 32], sizes = [8, 32], strides = [1, 1]} : vector<8x128xf32> to vector<8x32xf32>
    %1592 = arith.negf %1591 : vector<8x32xf32>
    %1593 = math.exp %1592 : vector<8x32xf32>
    %cst_467 = arith.constant 1.000000e+00 : f32
    %1594 = vector.broadcast %cst_467 : f32 to vector<8x32xf32>
    %1595 = arith.addf %1594, %1593 : vector<8x32xf32>
    %1596 = arith.divf %1594, %1595 : vector<8x32xf32>
    %1597 = vector.extract_strided_slice %1584 {offsets = [0, 64], sizes = [8, 32], strides = [1, 1]} : vector<8x128xf32> to vector<8x32xf32>
    %1598 = math.tanh %1597 : vector<8x32xf32>
    %1599 = vector.extract_strided_slice %1584 {offsets = [0, 96], sizes = [8, 32], strides = [1, 1]} : vector<8x128xf32> to vector<8x32xf32>
    %1600 = arith.negf %1599 : vector<8x32xf32>
    %1601 = math.exp %1600 : vector<8x32xf32>
    %cst_468 = arith.constant 1.000000e+00 : f32
    %1602 = vector.broadcast %cst_468 : f32 to vector<8x32xf32>
    %1603 = arith.addf %1602, %1601 : vector<8x32xf32>
    %1604 = arith.divf %1602, %1603 : vector<8x32xf32>
    %1605 = arith.mulf %1596, %1549 : vector<8x32xf32>
    %1606 = arith.mulf %1590, %1598 : vector<8x32xf32>
    %1607 = arith.addf %1605, %1606 : vector<8x32xf32>
    %1608 = math.tanh %1607 : vector<8x32xf32>
    %1609 = arith.mulf %1604, %1608 : vector<8x32xf32>
    %c40_469 = arith.constant 40 : index
    %c0_470 = arith.constant 0 : index
    %1610 = vector.load %arg20[%c40_469, %c0_470] : memref<128x32xf32, #tpu.memory_space<vmem>>, vector<8x32xf32>
    tpu.vector_store %arg20[%c40_469, %c0_470], %1609 {strides = array<i32>} : memref<128x32xf32, #tpu.memory_space<vmem>>, vector<8x32xf32>,
    %c88_471 = arith.constant 88 : index
    %c0_472 = arith.constant 0 : index
    %1611 = vector.load %arg17[%c88_471, %c0_472] : memref<128x128xf32, #tpu.memory_space<vmem>>, vector<8x128xf32>
    %cst_473 = arith.constant dense<0.000000e+00> : vector<8x128xf32>
    %1612 = tpu.matmul %1580, %967, %cst_473 {dimension_numbers = #tpu.dot_dimension_numbers<[1], [0], [0], [1], [0, 0, 1, 1], [], []>} : vector<8x32xf32>, vector<32x128xf32>, vector<8x128xf32> -> vector<8x128xf32>
    %1613 = arith.addf %1611, %1612 : vector<8x128xf32>
    %1614 = vector.extract_strided_slice %1613 {offsets = [0, 0], sizes = [8, 32], strides = [1, 1]} : vector<8x128xf32> to vector<8x32xf32>
    %1615 = arith.negf %1614 : vector<8x32xf32>
    %1616 = math.exp %1615 : vector<8x32xf32>
    %cst_474 = arith.constant 1.000000e+00 : f32
    %1617 = vector.broadcast %cst_474 : f32 to vector<8x32xf32>
    %1618 = arith.addf %1617, %1616 : vector<8x32xf32>
    %1619 = arith.divf %1617, %1618 : vector<8x32xf32>
    %1620 = vector.extract_strided_slice %1613 {offsets = [0, 32], sizes = [8, 32], strides = [1, 1]} : vector<8x128xf32> to vector<8x32xf32>
    %1621 = arith.negf %1620 : vector<8x32xf32>
    %1622 = math.exp %1621 : vector<8x32xf32>
    %cst_475 = arith.constant 1.000000e+00 : f32
    %1623 = vector.broadcast %cst_475 : f32 to vector<8x32xf32>
    %1624 = arith.addf %1623, %1622 : vector<8x32xf32>
    %1625 = arith.divf %1623, %1624 : vector<8x32xf32>
    %1626 = vector.extract_strided_slice %1613 {offsets = [0, 64], sizes = [8, 32], strides = [1, 1]} : vector<8x128xf32> to vector<8x32xf32>
    %1627 = math.tanh %1626 : vector<8x32xf32>
    %1628 = vector.extract_strided_slice %1613 {offsets = [0, 96], sizes = [8, 32], strides = [1, 1]} : vector<8x128xf32> to vector<8x32xf32>
    %1629 = arith.negf %1628 : vector<8x32xf32>
    %1630 = math.exp %1629 : vector<8x32xf32>
    %cst_476 = arith.constant 1.000000e+00 : f32
    %1631 = vector.broadcast %cst_476 : f32 to vector<8x32xf32>
    %1632 = arith.addf %1631, %1630 : vector<8x32xf32>
    %1633 = arith.divf %1631, %1632 : vector<8x32xf32>
    %1634 = arith.mulf %1625, %1578 : vector<8x32xf32>
    %1635 = arith.mulf %1619, %1627 : vector<8x32xf32>
    %1636 = arith.addf %1634, %1635 : vector<8x32xf32>
    %1637 = math.tanh %1636 : vector<8x32xf32>
    %1638 = arith.mulf %1633, %1637 : vector<8x32xf32>
    %c88_477 = arith.constant 88 : index
    %c0_478 = arith.constant 0 : index
    %1639 = vector.load %arg19[%c88_477, %c0_478] : memref<128x32xf32, #tpu.memory_space<vmem>>, vector<8x32xf32>
    tpu.vector_store %arg19[%c88_477, %c0_478], %1638 {strides = array<i32>} : memref<128x32xf32, #tpu.memory_space<vmem>>, vector<8x32xf32>,
    %c32_479 = arith.constant 32 : index
    %c0_480 = arith.constant 0 : index
    %1640 = vector.load %arg18[%c32_479, %c0_480] : memref<128x128xf32, #tpu.memory_space<vmem>>, vector<8x128xf32>
    %cst_481 = arith.constant dense<0.000000e+00> : vector<8x128xf32>
    %1641 = tpu.matmul %1609, %968, %cst_481 {dimension_numbers = #tpu.dot_dimension_numbers<[1], [0], [0], [1], [0, 0, 1, 1], [], []>} : vector<8x32xf32>, vector<32x128xf32>, vector<8x128xf32> -> vector<8x128xf32>
    %1642 = arith.addf %1640, %1641 : vector<8x128xf32>
    %1643 = vector.extract_strided_slice %1642 {offsets = [0, 0], sizes = [8, 32], strides = [1, 1]} : vector<8x128xf32> to vector<8x32xf32>
    %1644 = arith.negf %1643 : vector<8x32xf32>
    %1645 = math.exp %1644 : vector<8x32xf32>
    %cst_482 = arith.constant 1.000000e+00 : f32
    %1646 = vector.broadcast %cst_482 : f32 to vector<8x32xf32>
    %1647 = arith.addf %1646, %1645 : vector<8x32xf32>
    %1648 = arith.divf %1646, %1647 : vector<8x32xf32>
    %1649 = vector.extract_strided_slice %1642 {offsets = [0, 32], sizes = [8, 32], strides = [1, 1]} : vector<8x128xf32> to vector<8x32xf32>
    %1650 = arith.negf %1649 : vector<8x32xf32>
    %1651 = math.exp %1650 : vector<8x32xf32>
    %cst_483 = arith.constant 1.000000e+00 : f32
    %1652 = vector.broadcast %cst_483 : f32 to vector<8x32xf32>
    %1653 = arith.addf %1652, %1651 : vector<8x32xf32>
    %1654 = arith.divf %1652, %1653 : vector<8x32xf32>
    %1655 = vector.extract_strided_slice %1642 {offsets = [0, 64], sizes = [8, 32], strides = [1, 1]} : vector<8x128xf32> to vector<8x32xf32>
    %1656 = math.tanh %1655 : vector<8x32xf32>
    %1657 = vector.extract_strided_slice %1642 {offsets = [0, 96], sizes = [8, 32], strides = [1, 1]} : vector<8x128xf32> to vector<8x32xf32>
    %1658 = arith.negf %1657 : vector<8x32xf32>
    %1659 = math.exp %1658 : vector<8x32xf32>
    %cst_484 = arith.constant 1.000000e+00 : f32
    %1660 = vector.broadcast %cst_484 : f32 to vector<8x32xf32>
    %1661 = arith.addf %1660, %1659 : vector<8x32xf32>
    %1662 = arith.divf %1660, %1661 : vector<8x32xf32>
    %1663 = arith.mulf %1654, %1607 : vector<8x32xf32>
    %1664 = arith.mulf %1648, %1656 : vector<8x32xf32>
    %1665 = arith.addf %1663, %1664 : vector<8x32xf32>
    %1666 = math.tanh %1665 : vector<8x32xf32>
    %1667 = arith.mulf %1662, %1666 : vector<8x32xf32>
    %c32_485 = arith.constant 32 : index
    %c0_486 = arith.constant 0 : index
    %1668 = vector.load %arg20[%c32_485, %c0_486] : memref<128x32xf32, #tpu.memory_space<vmem>>, vector<8x32xf32>
    tpu.vector_store %arg20[%c32_485, %c0_486], %1667 {strides = array<i32>} : memref<128x32xf32, #tpu.memory_space<vmem>>, vector<8x32xf32>,
    %c96_487 = arith.constant 96 : index
    %c0_488 = arith.constant 0 : index
    %1669 = vector.load %arg17[%c96_487, %c0_488] : memref<128x128xf32, #tpu.memory_space<vmem>>, vector<8x128xf32>
    %cst_489 = arith.constant dense<0.000000e+00> : vector<8x128xf32>
    %1670 = tpu.matmul %1638, %967, %cst_489 {dimension_numbers = #tpu.dot_dimension_numbers<[1], [0], [0], [1], [0, 0, 1, 1], [], []>} : vector<8x32xf32>, vector<32x128xf32>, vector<8x128xf32> -> vector<8x128xf32>
    %1671 = arith.addf %1669, %1670 : vector<8x128xf32>
    %1672 = vector.extract_strided_slice %1671 {offsets = [0, 0], sizes = [8, 32], strides = [1, 1]} : vector<8x128xf32> to vector<8x32xf32>
    %1673 = arith.negf %1672 : vector<8x32xf32>
    %1674 = math.exp %1673 : vector<8x32xf32>
    %cst_490 = arith.constant 1.000000e+00 : f32
    %1675 = vector.broadcast %cst_490 : f32 to vector<8x32xf32>
    %1676 = arith.addf %1675, %1674 : vector<8x32xf32>
    %1677 = arith.divf %1675, %1676 : vector<8x32xf32>
    %1678 = vector.extract_strided_slice %1671 {offsets = [0, 32], sizes = [8, 32], strides = [1, 1]} : vector<8x128xf32> to vector<8x32xf32>
    %1679 = arith.negf %1678 : vector<8x32xf32>
    %1680 = math.exp %1679 : vector<8x32xf32>
    %cst_491 = arith.constant 1.000000e+00 : f32
    %1681 = vector.broadcast %cst_491 : f32 to vector<8x32xf32>
    %1682 = arith.addf %1681, %1680 : vector<8x32xf32>
    %1683 = arith.divf %1681, %1682 : vector<8x32xf32>
    %1684 = vector.extract_strided_slice %1671 {offsets = [0, 64], sizes = [8, 32], strides = [1, 1]} : vector<8x128xf32> to vector<8x32xf32>
    %1685 = math.tanh %1684 : vector<8x32xf32>
    %1686 = vector.extract_strided_slice %1671 {offsets = [0, 96], sizes = [8, 32], strides = [1, 1]} : vector<8x128xf32> to vector<8x32xf32>
    %1687 = arith.negf %1686 : vector<8x32xf32>
    %1688 = math.exp %1687 : vector<8x32xf32>
    %cst_492 = arith.constant 1.000000e+00 : f32
    %1689 = vector.broadcast %cst_492 : f32 to vector<8x32xf32>
    %1690 = arith.addf %1689, %1688 : vector<8x32xf32>
    %1691 = arith.divf %1689, %1690 : vector<8x32xf32>
    %1692 = arith.mulf %1683, %1636 : vector<8x32xf32>
    %1693 = arith.mulf %1677, %1685 : vector<8x32xf32>
    %1694 = arith.addf %1692, %1693 : vector<8x32xf32>
    %1695 = math.tanh %1694 : vector<8x32xf32>
    %1696 = arith.mulf %1691, %1695 : vector<8x32xf32>
    %c96_493 = arith.constant 96 : index
    %c0_494 = arith.constant 0 : index
    %1697 = vector.load %arg19[%c96_493, %c0_494] : memref<128x32xf32, #tpu.memory_space<vmem>>, vector<8x32xf32>
    tpu.vector_store %arg19[%c96_493, %c0_494], %1696 {strides = array<i32>} : memref<128x32xf32, #tpu.memory_space<vmem>>, vector<8x32xf32>,
    %c24_495 = arith.constant 24 : index
    %c0_496 = arith.constant 0 : index
    %1698 = vector.load %arg18[%c24_495, %c0_496] : memref<128x128xf32, #tpu.memory_space<vmem>>, vector<8x128xf32>
    %cst_497 = arith.constant dense<0.000000e+00> : vector<8x128xf32>
    %1699 = tpu.matmul %1667, %968, %cst_497 {dimension_numbers = #tpu.dot_dimension_numbers<[1], [0], [0], [1], [0, 0, 1, 1], [], []>} : vector<8x32xf32>, vector<32x128xf32>, vector<8x128xf32> -> vector<8x128xf32>
    %1700 = arith.addf %1698, %1699 : vector<8x128xf32>
    %1701 = vector.extract_strided_slice %1700 {offsets = [0, 0], sizes = [8, 32], strides = [1, 1]} : vector<8x128xf32> to vector<8x32xf32>
    %1702 = arith.negf %1701 : vector<8x32xf32>
    %1703 = math.exp %1702 : vector<8x32xf32>
    %cst_498 = arith.constant 1.000000e+00 : f32
    %1704 = vector.broadcast %cst_498 : f32 to vector<8x32xf32>
    %1705 = arith.addf %1704, %1703 : vector<8x32xf32>
    %1706 = arith.divf %1704, %1705 : vector<8x32xf32>
    %1707 = vector.extract_strided_slice %1700 {offsets = [0, 32], sizes = [8, 32], strides = [1, 1]} : vector<8x128xf32> to vector<8x32xf32>
    %1708 = arith.negf %1707 : vector<8x32xf32>
    %1709 = math.exp %1708 : vector<8x32xf32>
    %cst_499 = arith.constant 1.000000e+00 : f32
    %1710 = vector.broadcast %cst_499 : f32 to vector<8x32xf32>
    %1711 = arith.addf %1710, %1709 : vector<8x32xf32>
    %1712 = arith.divf %1710, %1711 : vector<8x32xf32>
    %1713 = vector.extract_strided_slice %1700 {offsets = [0, 64], sizes = [8, 32], strides = [1, 1]} : vector<8x128xf32> to vector<8x32xf32>
    %1714 = math.tanh %1713 : vector<8x32xf32>
    %1715 = vector.extract_strided_slice %1700 {offsets = [0, 96], sizes = [8, 32], strides = [1, 1]} : vector<8x128xf32> to vector<8x32xf32>
    %1716 = arith.negf %1715 : vector<8x32xf32>
    %1717 = math.exp %1716 : vector<8x32xf32>
    %cst_500 = arith.constant 1.000000e+00 : f32
    %1718 = vector.broadcast %cst_500 : f32 to vector<8x32xf32>
    %1719 = arith.addf %1718, %1717 : vector<8x32xf32>
    %1720 = arith.divf %1718, %1719 : vector<8x32xf32>
    %1721 = arith.mulf %1712, %1665 : vector<8x32xf32>
    %1722 = arith.mulf %1706, %1714 : vector<8x32xf32>
    %1723 = arith.addf %1721, %1722 : vector<8x32xf32>
    %1724 = math.tanh %1723 : vector<8x32xf32>
    %1725 = arith.mulf %1720, %1724 : vector<8x32xf32>
    %c24_501 = arith.constant 24 : index
    %c0_502 = arith.constant 0 : index
    %1726 = vector.load %arg20[%c24_501, %c0_502] : memref<128x32xf32, #tpu.memory_space<vmem>>, vector<8x32xf32>
    tpu.vector_store %arg20[%c24_501, %c0_502], %1725 {strides = array<i32>} : memref<128x32xf32, #tpu.memory_space<vmem>>, vector<8x32xf32>,
    %c104_503 = arith.constant 104 : index
    %c0_504 = arith.constant 0 : index
    %1727 = vector.load %arg17[%c104_503, %c0_504] : memref<128x128xf32, #tpu.memory_space<vmem>>, vector<8x128xf32>
    %cst_505 = arith.constant dense<0.000000e+00> : vector<8x128xf32>
    %1728 = tpu.matmul %1696, %967, %cst_505 {dimension_numbers = #tpu.dot_dimension_numbers<[1], [0], [0], [1], [0, 0, 1, 1], [], []>} : vector<8x32xf32>, vector<32x128xf32>, vector<8x128xf32> -> vector<8x128xf32>
    %1729 = arith.addf %1727, %1728 : vector<8x128xf32>
    %1730 = vector.extract_strided_slice %1729 {offsets = [0, 0], sizes = [8, 32], strides = [1, 1]} : vector<8x128xf32> to vector<8x32xf32>
    %1731 = arith.negf %1730 : vector<8x32xf32>
    %1732 = math.exp %1731 : vector<8x32xf32>
    %cst_506 = arith.constant 1.000000e+00 : f32
    %1733 = vector.broadcast %cst_506 : f32 to vector<8x32xf32>
    %1734 = arith.addf %1733, %1732 : vector<8x32xf32>
    %1735 = arith.divf %1733, %1734 : vector<8x32xf32>
    %1736 = vector.extract_strided_slice %1729 {offsets = [0, 32], sizes = [8, 32], strides = [1, 1]} : vector<8x128xf32> to vector<8x32xf32>
    %1737 = arith.negf %1736 : vector<8x32xf32>
    %1738 = math.exp %1737 : vector<8x32xf32>
    %cst_507 = arith.constant 1.000000e+00 : f32
    %1739 = vector.broadcast %cst_507 : f32 to vector<8x32xf32>
    %1740 = arith.addf %1739, %1738 : vector<8x32xf32>
    %1741 = arith.divf %1739, %1740 : vector<8x32xf32>
    %1742 = vector.extract_strided_slice %1729 {offsets = [0, 64], sizes = [8, 32], strides = [1, 1]} : vector<8x128xf32> to vector<8x32xf32>
    %1743 = math.tanh %1742 : vector<8x32xf32>
    %1744 = vector.extract_strided_slice %1729 {offsets = [0, 96], sizes = [8, 32], strides = [1, 1]} : vector<8x128xf32> to vector<8x32xf32>
    %1745 = arith.negf %1744 : vector<8x32xf32>
    %1746 = math.exp %1745 : vector<8x32xf32>
    %cst_508 = arith.constant 1.000000e+00 : f32
    %1747 = vector.broadcast %cst_508 : f32 to vector<8x32xf32>
    %1748 = arith.addf %1747, %1746 : vector<8x32xf32>
    %1749 = arith.divf %1747, %1748 : vector<8x32xf32>
    %1750 = arith.mulf %1741, %1694 : vector<8x32xf32>
    %1751 = arith.mulf %1735, %1743 : vector<8x32xf32>
    %1752 = arith.addf %1750, %1751 : vector<8x32xf32>
    %1753 = math.tanh %1752 : vector<8x32xf32>
    %1754 = arith.mulf %1749, %1753 : vector<8x32xf32>
    %c104_509 = arith.constant 104 : index
    %c0_510 = arith.constant 0 : index
    %1755 = vector.load %arg19[%c104_509, %c0_510] : memref<128x32xf32, #tpu.memory_space<vmem>>, vector<8x32xf32>
    tpu.vector_store %arg19[%c104_509, %c0_510], %1754 {strides = array<i32>} : memref<128x32xf32, #tpu.memory_space<vmem>>, vector<8x32xf32>,
    %c16_511 = arith.constant 16 : index
    %c0_512 = arith.constant 0 : index
    %1756 = vector.load %arg18[%c16_511, %c0_512] : memref<128x128xf32, #tpu.memory_space<vmem>>, vector<8x128xf32>
    %cst_513 = arith.constant dense<0.000000e+00> : vector<8x128xf32>
    %1757 = tpu.matmul %1725, %968, %cst_513 {dimension_numbers = #tpu.dot_dimension_numbers<[1], [0], [0], [1], [0, 0, 1, 1], [], []>} : vector<8x32xf32>, vector<32x128xf32>, vector<8x128xf32> -> vector<8x128xf32>
    %1758 = arith.addf %1756, %1757 : vector<8x128xf32>
    %1759 = vector.extract_strided_slice %1758 {offsets = [0, 0], sizes = [8, 32], strides = [1, 1]} : vector<8x128xf32> to vector<8x32xf32>
    %1760 = arith.negf %1759 : vector<8x32xf32>
    %1761 = math.exp %1760 : vector<8x32xf32>
    %cst_514 = arith.constant 1.000000e+00 : f32
    %1762 = vector.broadcast %cst_514 : f32 to vector<8x32xf32>
    %1763 = arith.addf %1762, %1761 : vector<8x32xf32>
    %1764 = arith.divf %1762, %1763 : vector<8x32xf32>
    %1765 = vector.extract_strided_slice %1758 {offsets = [0, 32], sizes = [8, 32], strides = [1, 1]} : vector<8x128xf32> to vector<8x32xf32>
    %1766 = arith.negf %1765 : vector<8x32xf32>
    %1767 = math.exp %1766 : vector<8x32xf32>
    %cst_515 = arith.constant 1.000000e+00 : f32
    %1768 = vector.broadcast %cst_515 : f32 to vector<8x32xf32>
    %1769 = arith.addf %1768, %1767 : vector<8x32xf32>
    %1770 = arith.divf %1768, %1769 : vector<8x32xf32>
    %1771 = vector.extract_strided_slice %1758 {offsets = [0, 64], sizes = [8, 32], strides = [1, 1]} : vector<8x128xf32> to vector<8x32xf32>
    %1772 = math.tanh %1771 : vector<8x32xf32>
    %1773 = vector.extract_strided_slice %1758 {offsets = [0, 96], sizes = [8, 32], strides = [1, 1]} : vector<8x128xf32> to vector<8x32xf32>
    %1774 = arith.negf %1773 : vector<8x32xf32>
    %1775 = math.exp %1774 : vector<8x32xf32>
    %cst_516 = arith.constant 1.000000e+00 : f32
    %1776 = vector.broadcast %cst_516 : f32 to vector<8x32xf32>
    %1777 = arith.addf %1776, %1775 : vector<8x32xf32>
    %1778 = arith.divf %1776, %1777 : vector<8x32xf32>
    %1779 = arith.mulf %1770, %1723 : vector<8x32xf32>
    %1780 = arith.mulf %1764, %1772 : vector<8x32xf32>
    %1781 = arith.addf %1779, %1780 : vector<8x32xf32>
    %1782 = math.tanh %1781 : vector<8x32xf32>
    %1783 = arith.mulf %1778, %1782 : vector<8x32xf32>
    %c16_517 = arith.constant 16 : index
    %c0_518 = arith.constant 0 : index
    %1784 = vector.load %arg20[%c16_517, %c0_518] : memref<128x32xf32, #tpu.memory_space<vmem>>, vector<8x32xf32>
    tpu.vector_store %arg20[%c16_517, %c0_518], %1783 {strides = array<i32>} : memref<128x32xf32, #tpu.memory_space<vmem>>, vector<8x32xf32>,
    %c112_519 = arith.constant 112 : index
    %c0_520 = arith.constant 0 : index
    %1785 = vector.load %arg17[%c112_519, %c0_520] : memref<128x128xf32, #tpu.memory_space<vmem>>, vector<8x128xf32>
    %cst_521 = arith.constant dense<0.000000e+00> : vector<8x128xf32>
    %1786 = tpu.matmul %1754, %967, %cst_521 {dimension_numbers = #tpu.dot_dimension_numbers<[1], [0], [0], [1], [0, 0, 1, 1], [], []>} : vector<8x32xf32>, vector<32x128xf32>, vector<8x128xf32> -> vector<8x128xf32>
    %1787 = arith.addf %1785, %1786 : vector<8x128xf32>
    %1788 = vector.extract_strided_slice %1787 {offsets = [0, 0], sizes = [8, 32], strides = [1, 1]} : vector<8x128xf32> to vector<8x32xf32>
    %1789 = arith.negf %1788 : vector<8x32xf32>
    %1790 = math.exp %1789 : vector<8x32xf32>
    %cst_522 = arith.constant 1.000000e+00 : f32
    %1791 = vector.broadcast %cst_522 : f32 to vector<8x32xf32>
    %1792 = arith.addf %1791, %1790 : vector<8x32xf32>
    %1793 = arith.divf %1791, %1792 : vector<8x32xf32>
    %1794 = vector.extract_strided_slice %1787 {offsets = [0, 32], sizes = [8, 32], strides = [1, 1]} : vector<8x128xf32> to vector<8x32xf32>
    %1795 = arith.negf %1794 : vector<8x32xf32>
    %1796 = math.exp %1795 : vector<8x32xf32>
    %cst_523 = arith.constant 1.000000e+00 : f32
    %1797 = vector.broadcast %cst_523 : f32 to vector<8x32xf32>
    %1798 = arith.addf %1797, %1796 : vector<8x32xf32>
    %1799 = arith.divf %1797, %1798 : vector<8x32xf32>
    %1800 = vector.extract_strided_slice %1787 {offsets = [0, 64], sizes = [8, 32], strides = [1, 1]} : vector<8x128xf32> to vector<8x32xf32>
    %1801 = math.tanh %1800 : vector<8x32xf32>
    %1802 = vector.extract_strided_slice %1787 {offsets = [0, 96], sizes = [8, 32], strides = [1, 1]} : vector<8x128xf32> to vector<8x32xf32>
    %1803 = arith.negf %1802 : vector<8x32xf32>
    %1804 = math.exp %1803 : vector<8x32xf32>
    %cst_524 = arith.constant 1.000000e+00 : f32
    %1805 = vector.broadcast %cst_524 : f32 to vector<8x32xf32>
    %1806 = arith.addf %1805, %1804 : vector<8x32xf32>
    %1807 = arith.divf %1805, %1806 : vector<8x32xf32>
    %1808 = arith.mulf %1799, %1752 : vector<8x32xf32>
    %1809 = arith.mulf %1793, %1801 : vector<8x32xf32>
    %1810 = arith.addf %1808, %1809 : vector<8x32xf32>
    %1811 = math.tanh %1810 : vector<8x32xf32>
    %1812 = arith.mulf %1807, %1811 : vector<8x32xf32>
    %c112_525 = arith.constant 112 : index
    %c0_526 = arith.constant 0 : index
    %1813 = vector.load %arg19[%c112_525, %c0_526] : memref<128x32xf32, #tpu.memory_space<vmem>>, vector<8x32xf32>
    tpu.vector_store %arg19[%c112_525, %c0_526], %1812 {strides = array<i32>} : memref<128x32xf32, #tpu.memory_space<vmem>>, vector<8x32xf32>,
    %c8_527 = arith.constant 8 : index
    %c0_528 = arith.constant 0 : index
    %1814 = vector.load %arg18[%c8_527, %c0_528] : memref<128x128xf32, #tpu.memory_space<vmem>>, vector<8x128xf32>
    %cst_529 = arith.constant dense<0.000000e+00> : vector<8x128xf32>
    %1815 = tpu.matmul %1783, %968, %cst_529 {dimension_numbers = #tpu.dot_dimension_numbers<[1], [0], [0], [1], [0, 0, 1, 1], [], []>} : vector<8x32xf32>, vector<32x128xf32>, vector<8x128xf32> -> vector<8x128xf32>
    %1816 = arith.addf %1814, %1815 : vector<8x128xf32>
    %1817 = vector.extract_strided_slice %1816 {offsets = [0, 0], sizes = [8, 32], strides = [1, 1]} : vector<8x128xf32> to vector<8x32xf32>
    %1818 = arith.negf %1817 : vector<8x32xf32>
    %1819 = math.exp %1818 : vector<8x32xf32>
    %cst_530 = arith.constant 1.000000e+00 : f32
    %1820 = vector.broadcast %cst_530 : f32 to vector<8x32xf32>
    %1821 = arith.addf %1820, %1819 : vector<8x32xf32>
    %1822 = arith.divf %1820, %1821 : vector<8x32xf32>
    %1823 = vector.extract_strided_slice %1816 {offsets = [0, 32], sizes = [8, 32], strides = [1, 1]} : vector<8x128xf32> to vector<8x32xf32>
    %1824 = arith.negf %1823 : vector<8x32xf32>
    %1825 = math.exp %1824 : vector<8x32xf32>
    %cst_531 = arith.constant 1.000000e+00 : f32
    %1826 = vector.broadcast %cst_531 : f32 to vector<8x32xf32>
    %1827 = arith.addf %1826, %1825 : vector<8x32xf32>
    %1828 = arith.divf %1826, %1827 : vector<8x32xf32>
    %1829 = vector.extract_strided_slice %1816 {offsets = [0, 64], sizes = [8, 32], strides = [1, 1]} : vector<8x128xf32> to vector<8x32xf32>
    %1830 = math.tanh %1829 : vector<8x32xf32>
    %1831 = vector.extract_strided_slice %1816 {offsets = [0, 96], sizes = [8, 32], strides = [1, 1]} : vector<8x128xf32> to vector<8x32xf32>
    %1832 = arith.negf %1831 : vector<8x32xf32>
    %1833 = math.exp %1832 : vector<8x32xf32>
    %cst_532 = arith.constant 1.000000e+00 : f32
    %1834 = vector.broadcast %cst_532 : f32 to vector<8x32xf32>
    %1835 = arith.addf %1834, %1833 : vector<8x32xf32>
    %1836 = arith.divf %1834, %1835 : vector<8x32xf32>
    %1837 = arith.mulf %1828, %1781 : vector<8x32xf32>
    %1838 = arith.mulf %1822, %1830 : vector<8x32xf32>
    %1839 = arith.addf %1837, %1838 : vector<8x32xf32>
    %1840 = math.tanh %1839 : vector<8x32xf32>
    %1841 = arith.mulf %1836, %1840 : vector<8x32xf32>
    %c8_533 = arith.constant 8 : index
    %c0_534 = arith.constant 0 : index
    %1842 = vector.load %arg20[%c8_533, %c0_534] : memref<128x32xf32, #tpu.memory_space<vmem>>, vector<8x32xf32>
    tpu.vector_store %arg20[%c8_533, %c0_534], %1841 {strides = array<i32>} : memref<128x32xf32, #tpu.memory_space<vmem>>, vector<8x32xf32>,
    %c120_535 = arith.constant 120 : index
    %c0_536 = arith.constant 0 : index
    %1843 = vector.load %arg17[%c120_535, %c0_536] : memref<128x128xf32, #tpu.memory_space<vmem>>, vector<8x128xf32>
    %cst_537 = arith.constant dense<0.000000e+00> : vector<8x128xf32>
    %1844 = tpu.matmul %1812, %967, %cst_537 {dimension_numbers = #tpu.dot_dimension_numbers<[1], [0], [0], [1], [0, 0, 1, 1], [], []>} : vector<8x32xf32>, vector<32x128xf32>, vector<8x128xf32> -> vector<8x128xf32>
    %1845 = arith.addf %1843, %1844 : vector<8x128xf32>
    %1846 = vector.extract_strided_slice %1845 {offsets = [0, 0], sizes = [8, 32], strides = [1, 1]} : vector<8x128xf32> to vector<8x32xf32>
    %1847 = arith.negf %1846 : vector<8x32xf32>
    %1848 = math.exp %1847 : vector<8x32xf32>
    %cst_538 = arith.constant 1.000000e+00 : f32
    %1849 = vector.broadcast %cst_538 : f32 to vector<8x32xf32>
    %1850 = arith.addf %1849, %1848 : vector<8x32xf32>
    %1851 = arith.divf %1849, %1850 : vector<8x32xf32>
    %1852 = vector.extract_strided_slice %1845 {offsets = [0, 32], sizes = [8, 32], strides = [1, 1]} : vector<8x128xf32> to vector<8x32xf32>
    %1853 = arith.negf %1852 : vector<8x32xf32>
    %1854 = math.exp %1853 : vector<8x32xf32>
    %cst_539 = arith.constant 1.000000e+00 : f32
    %1855 = vector.broadcast %cst_539 : f32 to vector<8x32xf32>
    %1856 = arith.addf %1855, %1854 : vector<8x32xf32>
    %1857 = arith.divf %1855, %1856 : vector<8x32xf32>
    %1858 = vector.extract_strided_slice %1845 {offsets = [0, 64], sizes = [8, 32], strides = [1, 1]} : vector<8x128xf32> to vector<8x32xf32>
    %1859 = math.tanh %1858 : vector<8x32xf32>
    %1860 = vector.extract_strided_slice %1845 {offsets = [0, 96], sizes = [8, 32], strides = [1, 1]} : vector<8x128xf32> to vector<8x32xf32>
    %1861 = arith.negf %1860 : vector<8x32xf32>
    %1862 = math.exp %1861 : vector<8x32xf32>
    %cst_540 = arith.constant 1.000000e+00 : f32
    %1863 = vector.broadcast %cst_540 : f32 to vector<8x32xf32>
    %1864 = arith.addf %1863, %1862 : vector<8x32xf32>
    %1865 = arith.divf %1863, %1864 : vector<8x32xf32>
    %1866 = arith.mulf %1857, %1810 : vector<8x32xf32>
    %1867 = arith.mulf %1851, %1859 : vector<8x32xf32>
    %1868 = arith.addf %1866, %1867 : vector<8x32xf32>
    %1869 = math.tanh %1868 : vector<8x32xf32>
    %1870 = arith.mulf %1865, %1869 : vector<8x32xf32>
    %c120_541 = arith.constant 120 : index
    %c0_542 = arith.constant 0 : index
    %1871 = vector.load %arg19[%c120_541, %c0_542] : memref<128x32xf32, #tpu.memory_space<vmem>>, vector<8x32xf32>
    tpu.vector_store %arg19[%c120_541, %c0_542], %1870 {strides = array<i32>} : memref<128x32xf32, #tpu.memory_space<vmem>>, vector<8x32xf32>,
    %c0_543 = arith.constant 0 : index
    %c0_544 = arith.constant 0 : index
    %1872 = vector.load %arg18[%c0_543, %c0_544] : memref<128x128xf32, #tpu.memory_space<vmem>>, vector<8x128xf32>
    %cst_545 = arith.constant dense<0.000000e+00> : vector<8x128xf32>
    %1873 = tpu.matmul %1841, %968, %cst_545 {dimension_numbers = #tpu.dot_dimension_numbers<[1], [0], [0], [1], [0, 0, 1, 1], [], []>} : vector<8x32xf32>, vector<32x128xf32>, vector<8x128xf32> -> vector<8x128xf32>
    %1874 = arith.addf %1872, %1873 : vector<8x128xf32>
    %1875 = vector.extract_strided_slice %1874 {offsets = [0, 0], sizes = [8, 32], strides = [1, 1]} : vector<8x128xf32> to vector<8x32xf32>
    %1876 = arith.negf %1875 : vector<8x32xf32>
    %1877 = math.exp %1876 : vector<8x32xf32>
    %cst_546 = arith.constant 1.000000e+00 : f32
    %1878 = vector.broadcast %cst_546 : f32 to vector<8x32xf32>
    %1879 = arith.addf %1878, %1877 : vector<8x32xf32>
    %1880 = arith.divf %1878, %1879 : vector<8x32xf32>
    %1881 = vector.extract_strided_slice %1874 {offsets = [0, 32], sizes = [8, 32], strides = [1, 1]} : vector<8x128xf32> to vector<8x32xf32>
    %1882 = arith.negf %1881 : vector<8x32xf32>
    %1883 = math.exp %1882 : vector<8x32xf32>
    %cst_547 = arith.constant 1.000000e+00 : f32
    %1884 = vector.broadcast %cst_547 : f32 to vector<8x32xf32>
    %1885 = arith.addf %1884, %1883 : vector<8x32xf32>
    %1886 = arith.divf %1884, %1885 : vector<8x32xf32>
    %1887 = vector.extract_strided_slice %1874 {offsets = [0, 64], sizes = [8, 32], strides = [1, 1]} : vector<8x128xf32> to vector<8x32xf32>
    %1888 = math.tanh %1887 : vector<8x32xf32>
    %1889 = vector.extract_strided_slice %1874 {offsets = [0, 96], sizes = [8, 32], strides = [1, 1]} : vector<8x128xf32> to vector<8x32xf32>
    %1890 = arith.negf %1889 : vector<8x32xf32>
    %1891 = math.exp %1890 : vector<8x32xf32>
    %cst_548 = arith.constant 1.000000e+00 : f32
    %1892 = vector.broadcast %cst_548 : f32 to vector<8x32xf32>
    %1893 = arith.addf %1892, %1891 : vector<8x32xf32>
    %1894 = arith.divf %1892, %1893 : vector<8x32xf32>
    %1895 = arith.mulf %1886, %1839 : vector<8x32xf32>
    %1896 = arith.mulf %1880, %1888 : vector<8x32xf32>
    %1897 = arith.addf %1895, %1896 : vector<8x32xf32>
    %1898 = math.tanh %1897 : vector<8x32xf32>
    %1899 = arith.mulf %1894, %1898 : vector<8x32xf32>
    %c0_549 = arith.constant 0 : index
    %c0_550 = arith.constant 0 : index
    %1900 = vector.load %arg20[%c0_549, %c0_550] : memref<128x32xf32, #tpu.memory_space<vmem>>, vector<8x32xf32>
    tpu.vector_store %arg20[%c0_549, %c0_550], %1899 {strides = array<i32>} : memref<128x32xf32, #tpu.memory_space<vmem>>, vector<8x32xf32>,
    %c0_551 = arith.constant 0 : index
    %c0_552 = arith.constant 0 : index
    %1901 = vector.load %arg19[%c0_551, %c0_552] : memref<128x32xf32, #tpu.memory_space<vmem>>, vector<128x32xf32>
    %c0_553 = arith.constant 0 : index
    %c0_554 = arith.constant 0 : index
    %1902 = vector.load %arg14[%c0_553, %c0_554] : memref<64x10xf32, #tpu.memory_space<vmem>>, vector<32x10xf32>
    %cst_555 = arith.constant dense<0.000000e+00> : vector<128x10xf32>
    %1903 = tpu.matmul %1901, %1902, %cst_555 {dimension_numbers = #tpu.dot_dimension_numbers<[1], [0], [0], [1], [0, 0, 1, 1], [], []>} : vector<128x32xf32>, vector<32x10xf32>, vector<128x10xf32> -> vector<128x10xf32>
    %c0_556 = arith.constant 0 : index
    %c0_557 = arith.constant 0 : index
    %1904 = vector.load %arg20[%c0_556, %c0_557] : memref<128x32xf32, #tpu.memory_space<vmem>>, vector<128x32xf32>
    %c32_558 = arith.constant 32 : index
    %c0_559 = arith.constant 0 : index
    %1905 = vector.load %arg14[%c32_558, %c0_559] : memref<64x10xf32, #tpu.memory_space<vmem>>, vector<32x10xf32>
    %cst_560 = arith.constant dense<0.000000e+00> : vector<128x10xf32>
    %1906 = tpu.matmul %1904, %1905, %cst_560 {dimension_numbers = #tpu.dot_dimension_numbers<[1], [0], [0], [1], [0, 0, 1, 1], [], []>} : vector<128x32xf32>, vector<32x10xf32>, vector<128x10xf32> -> vector<128x10xf32>
    %1907 = arith.addf %1903, %1906 : vector<128x10xf32>
    %c0_561 = arith.constant 0 : index
    %c0_562 = arith.constant 0 : index
    %1908 = vector.load %arg15[%c0_561, %c0_562] : memref<1x10xf32, #tpu.memory_space<vmem>>, vector<1x10xf32>
    %1909 = vector.broadcast %1908 : vector<1x10xf32> to vector<128x10xf32>
    %1910 = arith.addf %1907, %1909 : vector<128x10xf32>
    %c0_563 = arith.constant 0 : index
    %c0_564 = arith.constant 0 : index
    %1911 = vector.load %arg16[%c0_563, %c0_564] : memref<128x10xf32, #tpu.memory_space<vmem>>, vector<128x10xf32>
    tpu.vector_store %arg16[%c0_563, %c0_564], %1910 {strides = array<i32>} : memref<128x10xf32, #tpu.memory_space<vmem>>, vector<128x10xf32>,
    return
  }
  func.func @transform_0(%arg0: i32) -> (i32, i32) {
    %c0_i32 = arith.constant 0 : i32
    %c0_i32_0 = arith.constant 0 : i32
    %c0_i32_1 = arith.constant 0 : i32
    return %c0_i32, %c0_i32_0 : i32, i32
  }
  func.func @transform_1(%arg0: i32) -> (i32, i32) {
    %c0_i32 = arith.constant 0 : i32
    %c0_i32_0 = arith.constant 0 : i32
    %c0_i32_1 = arith.constant 0 : i32
    return %c0_i32, %c0_i32_0 : i32, i32
  }
  func.func @transform_2(%arg0: i32) -> (i32, i32) {
    %c0_i32 = arith.constant 0 : i32
    %c0_i32_0 = arith.constant 0 : i32
    %c0_i32_1 = arith.constant 0 : i32
    return %c0_i32, %c0_i32_0 : i32, i32
  }
  func.func @transform_3(%arg0: i32) -> (i32, i32) {
    %c0_i32 = arith.constant 0 : i32
    %c0_i32_0 = arith.constant 0 : i32
    %c0_i32_1 = arith.constant 0 : i32
    return %c0_i32, %c0_i32_0 : i32, i32
  }
  func.func @transform_4(%arg0: i32) -> (i32, i32) {
    %c0_i32 = arith.constant 0 : i32
    %c0_i32_0 = arith.constant 0 : i32
    %c0_i32_1 = arith.constant 0 : i32
    return %c0_i32, %c0_i32_0 : i32, i32
  }
  func.func @transform_5(%arg0: i32) -> (i32, i32) {
    %c0_i32 = arith.constant 0 : i32
    %c0_i32_0 = arith.constant 0 : i32
    %c0_i32_1 = arith.constant 0 : i32
    return %c0_i32, %c0_i32_0 : i32, i32
  }
  func.func @transform_6(%arg0: i32) -> (i32, i32) {
    %c0_i32 = arith.constant 0 : i32
    %c0_i32_0 = arith.constant 0 : i32
    %c0_i32_1 = arith.constant 0 : i32
    return %c0_i32, %c0_i32_0 : i32, i32
  }
  func.func @transform_7(%arg0: i32) -> (i32, i32) {
    %c0_i32 = arith.constant 0 : i32
    %c0_i32_0 = arith.constant 0 : i32
    %c0_i32_1 = arith.constant 0 : i32
    return %c0_i32, %c0_i32_0 : i32, i32
  }
  func.func @transform_8(%arg0: i32) -> (i32, i32) {
    %c0_i32 = arith.constant 0 : i32
    %c0_i32_0 = arith.constant 0 : i32
    %c0_i32_1 = arith.constant 0 : i32
    return %c0_i32, %c0_i32_0 : i32, i32
  }
  func.func @transform_9(%arg0: i32) -> (i32, i32) {
    %c0_i32 = arith.constant 0 : i32
    %c0_i32_0 = arith.constant 0 : i32
    %c0_i32_1 = arith.constant 0 : i32
    return %c0_i32, %c0_i32_0 : i32, i32
  }
  func.func @transform_10(%arg0: i32) -> (i32, i32) {
    %c0_i32 = arith.constant 0 : i32
    %c0_i32_0 = arith.constant 0 : i32
    %c0_i32_1 = arith.constant 0 : i32
    return %c0_i32, %c0_i32_0 : i32, i32
  }
  func.func @transform_11(%arg0: i32) -> (i32, i32) {
    %c0_i32 = arith.constant 0 : i32
    %c0_i32_0 = arith.constant 0 : i32
    %c0_i32_1 = arith.constant 0 : i32
    return %c0_i32, %c0_i32_0 : i32, i32
  }
  func.func @transform_12(%arg0: i32) -> (i32, i32) {
    %c0_i32 = arith.constant 0 : i32
    %c0_i32_0 = arith.constant 0 : i32
    %c0_i32_1 = arith.constant 0 : i32
    return %c0_i32, %c0_i32_0 : i32, i32
  }
  func.func @transform_13(%arg0: i32) -> (i32, i32) {
    %c0_i32 = arith.constant 0 : i32
    %c0_i32_0 = arith.constant 0 : i32
    %c0_i32_1 = arith.constant 0 : i32
    return %c0_i32, %c0_i32_0 : i32, i32
  }
  func.func @transform_14(%arg0: i32) -> (i32, i32) {
    %c0_i32 = arith.constant 0 : i32
    %c0_i32_0 = arith.constant 0 : i32
    %c0_i32_1 = arith.constant 0 : i32
    return %c0_i32, %c0_i32_0 : i32, i32
  }
  func.func @transform_15(%arg0: i32) -> (i32, i32) {
    %c0_i32 = arith.constant 0 : i32
    %c0_i32_0 = arith.constant 0 : i32
    %c0_i32_1 = arith.constant 0 : i32
    return %c0_i32, %c0_i32_0 : i32, i32
  }
}

</mosaic_0001>

<bundles_post_ra>
// kernel: tpu_custom_call.1
= control target key start
LH: loop header
LB: loop body
LE: loop exit
PB: predicated region body
PF: predicated region fallthrough
CT: control target
= control target key end

     0   :  { %20 = vsyncpa [#allocation7], 0  ;;  %s8127_s0 = inlined_call_operand.vmem [shape: f32[128,16], index: 0, kind: input, shape index: {}]   ;;  %s8128_s1 = inlined_call_operand.vmem [shape: f32[16,128], index: 1, kind: input, shape index: {}]   ;;  %s8129_s2 = inlined_call_operand.vmem [shape: f32[32,128], index: 2, kind: input, shape index: {}]   ;;  %s8130_s3 = inlined_call_operand.vmem [shape: f32[1,128], index: 3, kind: input, shape index: {}]   ;;  %s8131_s4 = inlined_call_operand.hbm [shape: f32[16,128], index: 4, kind: input, shape index: {}]   ;;  %s8132_s5 = inlined_call_operand.vmem [shape: f32[32,128], index: 5, kind: input, shape index: {}]   ;;  %s8133_s6 = inlined_call_operand.vmem [shape: f32[1,128], index: 6, kind: input, shape index: {}]   ;;  %s8134_s7 = inlined_call_operand.vmem [shape: f32[64,128], index: 7, kind: input, shape index: {}]   ;;  %s8135_s8 = inlined_call_operand.hbm [shape: f32[32,128], index: 8, kind: input, shape index: {}]   ;;  %s8136_s9 = inlined_call_operand.vmem [shape: f32[1,128], index: 9, kind: input, shape index: {}]   ;;  %s8137_s10 = inlined_call_operand.vmem [shape: f32[64,128], index: 10, kind: input, shape index: {}]   ;;  %s8138_s11 = inlined_call_operand.hbm [shape: f32[32,128], index: 11, kind: input, shape index: {}]   ;;  %s8139_s12 = inlined_call_operand.vmem [shape: f32[1,128], index: 12, kind: input, shape index: {}]   ;;  %s8140_s13 = inlined_call_operand.vmem [shape: f32[64,10], index: 13, kind: input, shape index: {}]   ;;  %s8141_s14 = inlined_call_operand.vmem [shape: f32[1,10], index: 14, kind: input, shape index: {}]   ;;  %s8142_s15 = inlined_call_operand.vmem [shape: f32[128,10], index: 15, kind: output, shape index: {}]  }
   0x1   :  { %21 = vsyncpa [#allocation9], 0  ;;  %s53_s20 = sshll.u32 %s8135_s8, 4  ;;  %s6262_s21 = smov [#allocation8]   ;;  %s54_s20 = int_to_ptr.hbm [resolvable:$true] %s53_s20 }
   0x2   :  { %s55_s22 = sshll.u32 %s6262_s21, 4  ;;  %s34_s25 = sshll.u32 %s8131_s4, 4  ;;  %s56_s22 = int_to_ptr.vmem [resolvable:$true] %s55_s22  ;;  %s35_s25 = int_to_ptr.hbm [resolvable:$true] %s34_s25 }
   0x3   :  { %s6263_s26 = smov 128   ;;  %s6264_s27 = smov 8  }
   0x4   :  { %61 = dma.hbm_to_vmem [thread:$0]  %s54_s20, 512, %s56_s22, [#allocation9], %s6263_s26, %s6263_s26, %s6264_s27  }
   0x5   :  { %s6265_s28 = smov [#allocation6]   ;;  %s70_s17 = sshll.u32 %s8138_s11, 4  ;;  %s71_s17 = int_to_ptr.hbm [resolvable:$true] %s70_s17 }
   0x6   :  { %s36_s29 = sshll.u32 %s6265_s28, 4  ;;  %s6266_s8 = smov [#allocation10]   ;;  %s37_s29 = int_to_ptr.vmem [resolvable:$true] %s36_s29 }
   0x7   :  { %42 = dma.hbm_to_vmem [thread:$0]  %s35_s25, 256, %s37_s29, [#allocation7], %s6263_s26, %s6263_s26, %s6264_s27  }
   0x8   :  { %s72_s18 = sshll.u32 %s6266_s8, 4  ;;  %s73_s18 = int_to_ptr.vmem [resolvable:$true] %s72_s18 }
   0x9   :  { %78 = dma.hbm_to_vmem [thread:$0]  %s71_s17, 512, %s73_s18, [#allocation9], %s6263_s26, %s6263_s26, %s6264_s27  }
   0xa   :  { %6258 = dma.done.wait [#allocation7], 256  }
   0xb   :  { %6259 = vsyncadd [#allocation7], 4294967040 }
   0xc   :  { %6260 = dma.done.wait [#allocation9], 1024  }
   0xd   :  { %6261 = vsyncadd [#allocation9], 4294966272  ;;  %v250_v0 = vld [vmem:[#allocation6 + $0x8] sm:$0xff]  ;;  %v249_v1 = vld [vmem:[#allocation6] sm:$0xff]  ;;  %vm119_vm0 = vcmask 130048   ;;  %v6267_v14 = vmov 0.0  }
   0xe   :  { %5611 = vmatpush.msra.mxu3 %v250_v0  ;;  %v105_v2 = vld [vmem:[%s8127_s0 + $0x40] sm:$0xff]  ;;  %269 = vmatpush.msra.mxu1 %v250_v0  ;;  %v6365_v3 = vld [vmem:[%s8132_s5 + $0x18] sm:$0xff]  ;;  %v6371_v4 = vld [vmem:[%s8132_s5 + $0x10] sm:$0xff]  ;;  %s6268_s18 = smov 64   ;;  %s6269_s21 = smov 32   ;;  %vm345_vm9 = vcmask 261120  }
   0xf   :  { %v6377_v5 = vld [vmem:[%s8132_s5 + $0x8] sm:$0xff]  ;;  %v107_v7 = vld [vmem:[%s8127_s0 + $0x50] sm:$0xff]  ;;  %v6392_v8 = vld [vmem:[%s8132_s5] sm:$0xff] }
  0x10   :  { %5612 = vmatpush.msra.mxu3 %v249_v1  ;;  %270 = vmatpush.msra.mxu1 %v249_v1  ;;  %v106_v6 = vld [vmem:[%s8127_s0 + $0x48] sm:$0xff]  ;;  %v108_v9 = vld [vmem:[%s8127_s0 + $0x58] sm:$0xff]  ;;  %v109_v10 = vld [vmem:[%s8127_s0 + $0x60] sm:$0xff] }
  0x11   :  { %5381 = vmatmul.msk.f32.vlgmr.msra.gmra.mxu3 %vm119_vm0, %v105_v2  ;;  %v110_v11 = vld [vmem:[%s8127_s0 + $0x68] sm:$0xff]  ;;  %v111_v12 = vld [vmem:[%s8127_s0 + $0x70] sm:$0xff]  ;;  %v112_v13 = vld [vmem:[%s8127_s0 + $0x78] sm:$0xff] }
  0x12   :  { %425 = vmatpush.msrb.mxu3 %v6365_v3  ;;  %v114_v21 = vld [vmem:[%s8128_s1 + $0x8] sm:$0xff]  ;;  %v113_v22 = vld [vmem:[%s8128_s1] sm:$0xff]  ;;  %v6447_v24 = vld [vmem:[%s8129_s2 + $0x18] sm:$0xff] }
  0x13   :  { %5609 = vmatpush.msra.mxu2 %v114_v21  ;;  %182 = vmatpush.msra.mxu0 %v114_v21  ;;  %v6453_v25 = vld [vmem:[%s8129_s2 + $0x10] sm:$0xff]  ;;  %v6461_v27 = vld [vmem:[%s8129_s2 + $0x8] sm:$0xff]  ;;  %v6467_v28 = vld [vmem:[%s8133_s6] ss:$0 sm:$0xff] }
  0x14   :  { %426 = vmatpush.msrb.mxu3 %v6371_v4  ;;  %v6476_v33 = vld [vmem:[%s8129_s2] sm:$0xff] }
  0x15   :  { %5610 = vmatpush.msra.mxu2 %v113_v22  ;;  %183 = vmatpush.msra.mxu0 %v113_v22  ;;  %v97_v34 = vld [vmem:[%s8127_s0] sm:$0xff] }
  0x16   :  { %427 = vmatpush.msrb.mxu3 %v6377_v5  ;;  %5365 = vmatmul.msk.f32.vlgmr.msra.gmra.mxu2 %vm119_vm0, %v105_v2  ;;  %v6517_v61 = vld [vmem:[%s8130_s3] ss:$0 sm:$0xff] }
  0x17   :  { %361 = vmatpush.msrb.mxu2 %v6447_v24  ;;  %5357 = vmatmul.msk.f32.vlgmr.msra.gmra.mxu0 %vm119_vm0, %v97_v34 }
  0x18   :  { %428 = vmatpush.msrb.mxu3 %v6392_v8  ;;  %5373 = vmatmul.msk.f32.vlgmr.msra.gmra.mxu1 %vm119_vm0, %v97_v34 }
  0x19   :  { %5382 = vmatmul.msk.f32.gmra.mxu3 %vm119_vm0, %v106_v6  ;;  %362 = vmatpush.msrb.mxu2 %v6453_v25 }
  0x1a   :  { %557 = vmatpush.msra.mxu3 %v6365_v3 }
  0x1b   :  { %363 = vmatpush.msrb.mxu2 %v6461_v27 }
  0x1c   :  { %558 = vmatpush.msra.mxu3 %v6371_v4 }
  0x1d   :  { %364 = vmatpush.msrb.mxu2 %v6476_v33 }
  0x1e   :  { %559 = vmatpush.msra.mxu3 %v6377_v5  ;;  %5366 = vmatmul.msk.f32.gmra.mxu2 %vm119_vm0, %v106_v6 }
  0x1f   :  { %491 = vmatpush.msra.mxu2 %v6447_v24 }
  0x20   :  { %560 = vmatpush.msra.mxu3 %v6392_v8 }
  0x21   :  { %5383 = vmatmul.msk.f32.gmra.mxu3 %vm119_vm0, %v107_v7  ;;  %492 = vmatpush.msra.mxu2 %v6453_v25 }
  0x23   :  { %493 = vmatpush.msra.mxu2 %v6461_v27 }
  0x25   :  { %494 = vmatpush.msra.mxu2 %v6476_v33 }
  0x26   :  { %5367 = vmatmul.msk.f32.gmra.mxu2 %vm119_vm0, %v107_v7 }
  0x29   :  { %5384 = vmatmul.msk.f32.gmra.mxu3 %vm119_vm0, %v108_v9 }
  0x2e   :  { %5368 = vmatmul.msk.f32.gmra.mxu2 %vm119_vm0, %v108_v9 }
  0x31   :  { %5385 = vmatmul.msk.f32.gmra.mxu3 %vm119_vm0, %v109_v10 }
  0x36   :  { %5369 = vmatmul.msk.f32.gmra.mxu2 %vm119_vm0, %v109_v10 }
  0x39   :  { %5386 = vmatmul.msk.f32.gmra.mxu3 %vm119_vm0, %v110_v11 }
  0x3e   :  { %5370 = vmatmul.msk.f32.gmra.mxu2 %vm119_vm0, %v110_v11 }
  0x41   :  { %5387 = vmatmul.msk.f32.gmra.mxu3 %vm119_vm0, %v111_v12 }
  0x46   :  { %5371 = vmatmul.msk.f32.gmra.mxu2 %vm119_vm0, %v111_v12 }
  0x49   :  { %5388 = vmatmul.msk.f32.gmra.mxu3 %vm119_vm0, %v112_v13 }
  0x4e   :  { %5372 = vmatmul.msk.f32.gmra.mxu2 %vm119_vm0, %v112_v13 }
  0x51   :  { %429 = vmatmul.f32.vlgmr.msrb.gmra.mxu3 %v6267_v14 }
  0x52   :  { %689 = vmatpush.msrb.mxu3 %v6365_v3 }
  0x54   :  { %690 = vmatpush.msrb.mxu3 %v6371_v4 }
  0x56   :  { %691 = vmatpush.msrb.mxu3 %v6377_v5  ;;  %365 = vmatmul.f32.vlgmr.msrb.gmra.mxu2 %v6267_v14 }
  0x57   :  { %623 = vmatpush.msrb.mxu2 %v6447_v24 }
  0x58   :  { %692 = vmatpush.msrb.mxu3 %v6392_v8 }
  0x59   :  { %624 = vmatpush.msrb.mxu2 %v6453_v25 }
  0x5b   :  { %625 = vmatpush.msrb.mxu2 %v6461_v27 }
  0x5d   :  { %626 = vmatpush.msrb.mxu2 %v6476_v33 }
  0x94   :  { %v6424_v15 = vpop.f32.mrf.mxu3  ;;  %v185_v59 = vpop.f32.mrf.mxu0 }
  0x95   :  { %v186_v63 = vadd.f32 %v6517_v61, %v185_v59  ;;  %v101_v59 = vld [vmem:[%s8127_s0 + $0x20] sm:$0xff] }
  0x99   :  { %v6498_v50 = vpop.f32.mrf.mxu2 }
  0x9c   :  { %v6426_v16 = vpop.f32.mrf.mxu3 }
  0xa1   :  { %v6500_v51 = vpop.f32.mrf.mxu2 }
  0xa4   :  { %v6428_v17 = vpop.f32.mrf.mxu3 }
  0xa9   :  { %v6502_v52 = vpop.f32.mrf.mxu2 }
  0xac   :  { %v6430_v18 = vpop.f32.mrf.mxu3 }
  0xb1   :  { %v6504_v53 = vpop.f32.mrf.mxu2 }
  0xb4   :  { %v6432_v19 = vpop.f32.mrf.mxu3 }
  0xb9   :  { %v6506_v54 = vpop.f32.mrf.mxu2 }
  0xbc   :  { %v6434_v20 = vpop.f32.mrf.mxu3 }
  0xc1   :  { %v6508_v55 = vpop.f32.mrf.mxu2 }
  0xc4   :  { %v6442_v23 = vpop.f32.mrf.mxu3 }
  0xc9   :  { %v6510_v56 = vpop.f32.mrf.mxu2 }
  0xcc   :  { %v317_v26 = vpop.f32.mrf.mxu3 }
  0xcd   :  { %v318_v29 = vadd.f32 %v6467_v28, %v317_v26 }
  0xd1   :  { %v6512_v57 = vpop.f32.mrf.mxu2 }
  0xd4   :  { %v430_v30 = vpop.f32.mrf.mxu3 }
  0xd5   :  { %v433_v31 = vadd.f32 %v430_v30, %v318_v29 }
  0xd7   :  { %5626 = vtanh.f32 %v433_v31  ;;  %v5390_v35 = vmul.f32 -1.442695, %v433_v31 }
  0xd9   :  { %5628 = vpow2.f32 %v5390_v35  ;;  %v366_v0 = vpop.f32.mrf.mxu2 }
  0xda   :  { %v369_v1 = vadd.f32 %v366_v0, %v186_v63 }
  0xdc   :  { %v5389_v7 = vmul.f32 -1.442695, %v369_v1 }
  0xdd   :  { %v5627_v32 = vpop.eup %5626 }
  0xde   :  { %456 = vrot.lane.b32.xlu0 %v5627_v32, %s6268_s18 }
  0xdf   :  { %v5629_v36 = vpop.eup %5628 }
  0xe0   :  { %v437_v37 = vadd.f32 1.0, %v5629_v36 }
  0xe2   :  { %5630 = vrcp.f32 %v437_v37  ;;  %v449_v43 = vand.u32 2147483648, %v437_v37  ;;  %vm443_vm2 = vweird.f32 %v437_v37  ;;  %v447_v44 = vand.u32 2147483647, %v437_v37 }
  0xe4   :  { %v450_v46 = vor.u32 1.1754944e-38, %v449_v43  ;;  %vm448_vm4 = vcmp.eq.f32.partialorder %v447_v44, 8.507059e+37  ;;  %v98_v43 = vld [vmem:[%s8127_s0 + $0x8] sm:$0xff]  ;;  %v99_v44 = vld [vmem:[%s8127_s0 + $0x10] sm:$0xff] }
  0xe5   :  { %5374 = vmatmul.msk.f32.gmra.mxu1 %vm119_vm0, %v98_v43  ;;  %5358 = vmatmul.msk.f32.gmra.mxu0 %vm119_vm0, %v98_v43 }
  0xe8   :  { %v5631_v38 = vpop.eup %5630 }
  0xe9   :  { %v439_v39 = vmul.f32 %v5631_v38, %v437_v37  ;;  %vm444_vm1 = vweird.f32 %v5631_v38 }
  0xea   :  { %vm445_vm3 = vmor %vm443_vm2, %vm444_vm1 }
  0xeb   :  { %v440_v40 = vsub.f32 1.0, %v439_v39 }
  0xed   :  { %v441_v41 = vmul.f32 %v5631_v38, %v440_v40  ;;  %5375 = vmatmul.msk.f32.gmra.mxu1 %vm119_vm0, %v99_v44  ;;  %5359 = vmatmul.msk.f32.gmra.mxu0 %vm119_vm0, %v99_v44 }
  0xef   :  { %v442_v42 = vadd.f32 %v5631_v38, %v441_v41 }
  0xf1   :  { %v446_v45 = vsel %vm445_vm3, %v5631_v38, %v442_v42 }
  0xf2   :  { %v451_v48 = vsel %vm448_vm4, %v450_v46, %v446_v45  ;;  %v100_v45 = vld [vmem:[%s8127_s0 + $0x18] sm:$0xff]  ;;  %v315_v46 = vadd.f32 %v6467_v28, %v6442_v23 }
  0xf3   :  { %v454_v58 = vmul.f32 0.0, %v451_v48 }
  0xf5   :  { %5376 = vmatmul.msk.f32.gmra.mxu1 %vm119_vm0, %v100_v45  ;;  %5360 = vmatmul.msk.f32.gmra.mxu0 %vm119_vm0, %v100_v45 }
  0xfd   :  { %5377 = vmatmul.msk.f32.gmra.mxu1 %vm119_vm0, %v101_v59  ;;  %5361 = vmatmul.msk.f32.gmra.mxu0 %vm119_vm0, %v101_v59 }
 0x150   :  { %v457_v47 = vpop.permute.xlu0 %456 }
 0x151   :  { %v459_v49 = vmul.f32 %v457_v47, %v451_v48 }
 0x153   :  { %461 = vrot.lane.b32.xlu0 %v459_v49, %s6269_s21 }
 0x162   :  { %v188_v44 = vpop.f32.mrf.mxu0 }
 0x163   :  { %v189_v45 = vadd.f32 %v6517_v61, %v188_v44 }
 0x1c5   :  { %v462_v60 = vpop.permute.xlu0 %461 }
 0x1c6   :  { %v6519_v62 = vadd.f32 %v462_v60, %v454_v58 }
 0x1c8   :  { %5632 = vtanh.f32 %v6519_v62 }
 0x1c9   :  { %5634 = vtanh.f32 %v369_v1  ;;  %v102_v1 = vld [vmem:[%s8127_s0 + $0x28] sm:$0xff] }
 0x1ca   :  { %5636 = vpow2.f32 %v5389_v7  ;;  %5378 = vmatmul.msk.f32.gmra.mxu1 %vm119_vm0, %v102_v1  ;;  %5362 = vmatmul.msk.f32.gmra.mxu0 %vm119_vm0, %v102_v1 }
 0x1ce   :  { %v5633_v2 = vpop.eup %5632 }
 0x1cf   :  { %467 = vrot.lane.b32.xlu1 %v5633_v2, %s6268_s18  ;;  %v5635_v6 = vpop.eup %5634  ;;  %v103_v2 = vld [vmem:[%s8127_s0 + $0x30] sm:$0xff] }
 0x1d0   :  { %v5637_v9 = vpop.eup %5636 }
 0x1d1   :  { %v373_v10 = vadd.f32 1.0, %v5637_v9 }
 0x1d2   :  { %5379 = vmatmul.msk.f32.gmra.mxu1 %vm119_vm0, %v103_v2  ;;  %5363 = vmatmul.msk.f32.gmra.mxu0 %vm119_vm0, %v103_v2 }
 0x1d3   :  { %5638 = vrcp.f32 %v373_v10  ;;  %vm379_vm5 = vweird.f32 %v373_v10  ;;  %v385_v26 = vand.u32 2147483648, %v373_v10  ;;  %v383_v31 = vand.u32 2147483647, %v373_v10 }
 0x1d5   :  { %v386_v32 = vor.u32 1.1754944e-38, %v385_v26  ;;  %vm384_vm8 = vcmp.eq.f32.partialorder %v383_v31, 8.507059e+37 }
 0x1d7   :  { %392 = vrot.lane.b32.xlu1 %v5635_v6, %s6268_s18 }
 0x1d9   :  { %v5639_v11 = vpop.eup %5638 }
 0x1da   :  { %v375_v12 = vmul.f32 %v5639_v11, %v373_v10  ;;  %vm380_vm6 = vweird.f32 %v5639_v11  ;;  %v104_v10 = vld [vmem:[%s8127_s0 + $0x38] sm:$0xff] }
 0x1db   :  { %vm381_vm7 = vmor %vm379_vm5, %vm380_vm6  ;;  %5380 = vmatmul.msk.f32.gmra.mxu1 %vm119_vm0, %v104_v10  ;;  %5364 = vmatmul.msk.f32.gmra.mxu0 %vm119_vm0, %v104_v10 }
 0x1dc   :  { %v376_v13 = vsub.f32 1.0, %v375_v12  ;;  %v2490_v12 = vld [vmem:[%s8134_s7 + $0x10] sm:$0xff] }
 0x1de   :  { %v377_v21 = vmul.f32 %v5639_v11, %v376_v13  ;;  %v2489_v13 = vld [vmem:[%s8134_s7 + $0x8] sm:$0xff] }
 0x1e0   :  { %v378_v30 = vadd.f32 %v5639_v11, %v377_v21 }
 0x1e2   :  { %v382_v34 = vsel %vm381_vm7, %v5639_v11, %v378_v30  ;;  %v2491_v11 = vld [vmem:[%s8134_s7 + $0x18] sm:$0xff] }
 0x1e3   :  { %v387_v36 = vsel %vm384_vm8, %v386_v32, %v382_v34  ;;  %2669 = vmatpush.msrb.mxu1 %v2491_v11 }
 0x1e4   :  { %v390_v39 = vmul.f32 0.0, %v387_v36 }
 0x1e5   :  { %2670 = vmatpush.msrb.mxu1 %v2490_v12 }
 0x1e7   :  { %2671 = vmatpush.msrb.mxu1 %v2489_v13 }
 0x241   :  { %v468_v22 = vpop.permute.xlu1 %467 }
 0x242   :  { %v470_v29 = vmul.f32 %v468_v22, %v451_v48  ;;  %v2488_v22 = vld [vmem:[%s8134_s7] sm:$0xff] }
 0x243   :  { %2672 = vmatpush.msrb.mxu1 %v2488_v22 }
 0x244   :  { %472 = vrot.lane.b32.xlu2 %v470_v29, %s6269_s21 }
 0x249   :  { %v393_v35 = vpop.permute.xlu1 %392 }
 0x24a   :  { %v395_v37 = vmul.f32 %v393_v35, %v387_v36 }
 0x24c   :  { %397 = vrot.lane.b32.xlu2 %v395_v37, %s6269_s21 }
 0x29e   :  { %v473_v38 = vpop.permute.xlu2 %472 }
 0x29f   :  { %475 = vst.msk [vmem:[#allocation5 + $0x78] sm:$0xff] %vm345_vm9, %v473_v38  ;;  %5393 = vmatmul.msk.f32.vlgmr.msra.gmra.mxu3 %vm345_vm9, %v473_v38 }
 0x2a0   :  { %821 = vmatpush.msra.mxu3 %v6365_v3 }
 0x2a2   :  { %822 = vmatpush.msra.mxu3 %v6371_v4 }
 0x2a4   :  { %823 = vmatpush.msra.mxu3 %v6377_v5 }
 0x2a6   :  { %v398_v40 = vpop.permute.xlu2 %397  ;;  %824 = vmatpush.msra.mxu3 %v6392_v8 }
 0x2a7   :  { %v6533_v41 = vadd.f32 %v398_v40, %v390_v39 }
 0x2a9   :  { %5640 = vtanh.f32 %v6533_v41 }
 0x2af   :  { %v5641_v42 = vpop.eup %5640 }
 0x2b0   :  { %403 = vrot.lane.b32.xlu0 %v5641_v42, %s6268_s18 }
 0x322   :  { %v562_v47 = vpop.f32.mrf.mxu3  ;;  %v404_v48 = vpop.permute.xlu0 %403 }
 0x323   :  { %v565_v49 = vadd.f32 %v562_v47, %v315_v46  ;;  %v406_v58 = vmul.f32 %v404_v48, %v387_v36 }
 0x325   :  { %5642 = vtanh.f32 %v565_v49  ;;  %408 = vrot.lane.b32.xlu1 %v406_v58, %s6269_s21  ;;  %v5394_v60 = vmul.f32 -1.442695, %v565_v49 }
 0x327   :  { %5644 = vpow2.f32 %v5394_v60 }
 0x32b   :  { %v5643_v23 = vpop.eup %5642 }
 0x32c   :  { %588 = vrot.lane.b32.xlu2 %v5643_v23, %s6268_s18 }
 0x32d   :  { %v5645_v63 = vpop.eup %5644 }
 0x32e   :  { %v569_v0 = vadd.f32 1.0, %v5645_v63 }
 0x330   :  { %5646 = vrcp.f32 %v569_v0  ;;  %v581_v29 = vand.u32 2147483648, %v569_v0  ;;  %vm575_vm11 = vweird.f32 %v569_v0  ;;  %v579_v30 = vand.u32 2147483647, %v569_v0 }
 0x332   :  { %v582_v32 = vor.u32 1.1754944e-38, %v581_v29  ;;  %vm580_vm13 = vcmp.eq.f32.partialorder %v579_v30, 8.507059e+37 }
 0x336   :  { %v5647_v6 = vpop.eup %5646 }
 0x337   :  { %v571_v7 = vmul.f32 %v5647_v6, %v569_v0  ;;  %vm576_vm10 = vweird.f32 %v5647_v6 }
 0x338   :  { %vm577_vm12 = vmor %vm575_vm11, %vm576_vm10 }
 0x339   :  { %v572_v9 = vsub.f32 1.0, %v571_v7 }
 0x33b   :  { %v573_v21 = vmul.f32 %v5647_v6, %v572_v9 }
 0x33d   :  { %v574_v26 = vadd.f32 %v5647_v6, %v573_v21 }
 0x33f   :  { %v578_v31 = vsel %vm577_vm12, %v5647_v6, %v574_v26 }
 0x340   :  { %v583_v34 = vsel %vm580_vm13, %v582_v32, %v578_v31 }
 0x341   :  { %v586_v39 = vmul.f32 %v583_v34, %v6519_v62 }
 0x386   :  { %v589_v35 = vpop.permute.xlu2 %588 }
 0x387   :  { %v591_v36 = vmul.f32 %v589_v35, %v583_v34 }
 0x389   :  { %593 = vrot.lane.b32.xlu0 %v591_v36, %s6269_s21 }
 0x397   :  { %v409_v37 = vpop.permute.xlu1 %408 }
 0x398   :  { %411 = vst.msk [vmem:[#allocation4] sm:$0xff] %vm345_vm9, %v409_v37  ;;  %5391 = vmatmul.msk.f32.vlgmr.msra.gmra.mxu2 %vm345_vm9, %v409_v37 }
 0x399   :  { %755 = vmatpush.msra.mxu2 %v6447_v24 }
 0x39b   :  { %756 = vmatpush.msra.mxu2 %v6453_v25 }
 0x39d   :  { %757 = vmatpush.msra.mxu2 %v6461_v27 }
 0x39f   :  { %v2456_v38 = vld [vmem:[#allocation4] sm:$0xff]  ;;  %758 = vmatpush.msra.mxu2 %v6476_v33 }
 0x3a0   :  { %5467 = vmatmul.msk.f32.vlgmr.msrb.gmra.mxu1 %vm345_vm9, %v2456_v38 }
 0x3fb   :  { %v594_v40 = vpop.permute.xlu0 %593 }
 0x3fc   :  { %v6597_v42 = vadd.f32 %v594_v40, %v586_v39 }
 0x3fe   :  { %5648 = vtanh.f32 %v6597_v42 }
 0x404   :  { %v5649_v43 = vpop.eup %5648 }
 0x405   :  { %599 = vrot.lane.b32.xlu1 %v5649_v43, %s6268_s18 }
 0x41b   :  { %v496_v46 = vpop.f32.mrf.mxu2 }
 0x41c   :  { %v499_v47 = vadd.f32 %v496_v46, %v189_v45 }
 0x41e   :  { %5650 = vtanh.f32 %v499_v47  ;;  %v5392_v49 = vmul.f32 -1.442695, %v499_v47 }
 0x420   :  { %5652 = vpow2.f32 %v5392_v49 }
 0x424   :  { %v5651_v48 = vpop.eup %5650 }
 0x425   :  { %522 = vrot.lane.b32.xlu2 %v5651_v48, %s6268_s18 }
 0x426   :  { %v5653_v62 = vpop.eup %5652 }
 0x427   :  { %v503_v58 = vadd.f32 1.0, %v5653_v62 }
 0x429   :  { %5654 = vrcp.f32 %v503_v58  ;;  %v515_v6 = vand.u32 2147483648, %v503_v58  ;;  %vm509_vm15 = vweird.f32 %v503_v58  ;;  %v513_v7 = vand.u32 2147483647, %v503_v58 }
 0x42b   :  { %v516_v10 = vor.u32 1.1754944e-38, %v515_v6  ;;  %vm514_vm1 = vcmp.eq.f32.partialorder %v513_v7, 8.507059e+37 }
 0x42f   :  { %v5655_v59 = vpop.eup %5654 }
 0x430   :  { %v505_v23 = vmul.f32 %v5655_v59, %v503_v58  ;;  %vm510_vm14 = vweird.f32 %v5655_v59 }
 0x431   :  { %vm511_vm0 = vmor %vm509_vm15, %vm510_vm14 }
 0x432   :  { %v506_v60 = vsub.f32 1.0, %v505_v23 }
 0x434   :  { %v507_v63 = vmul.f32 %v5655_v59, %v506_v60 }
 0x436   :  { %v508_v2 = vadd.f32 %v5655_v59, %v507_v63 }
 0x438   :  { %v512_v9 = vsel %vm511_vm0, %v5655_v59, %v508_v2  ;;  %v191_v2 = vpop.f32.mrf.mxu0 }
 0x439   :  { %v517_v12 = vsel %vm514_vm1, %v516_v10, %v512_v9  ;;  %v192_v6 = vadd.f32 %v6517_v61, %v191_v2 }
 0x43a   :  { %v520_v22 = vmul.f32 %v517_v12, %v6533_v41 }
 0x477   :  { %v600_v0 = vpop.permute.xlu1 %599 }
 0x478   :  { %v602_v1 = vmul.f32 %v600_v0, %v583_v34  ;;  %v312_v34 = vadd.f32 %v6467_v28, %v6434_v20 }
 0x47a   :  { %604 = vrot.lane.b32.xlu0 %v602_v1, %s6269_s21 }
 0x47f   :  { %v523_v11 = vpop.permute.xlu2 %522 }
 0x480   :  { %v525_v13 = vmul.f32 %v523_v11, %v517_v12 }
 0x482   :  { %527 = vrot.lane.b32.xlu1 %v525_v13, %s6269_s21 }
 0x4ec   :  { %v605_v21 = vpop.permute.xlu0 %604 }
 0x4ed   :  { %607 = vst.msk [vmem:[#allocation5 + $0x70] sm:$0xff] %vm345_vm9, %v605_v21  ;;  %5397 = vmatmul.msk.f32.vlgmr.msrb.gmra.mxu3 %vm345_vm9, %v605_v21 }
 0x4ee   :  { %953 = vmatpush.msrb.mxu3 %v6365_v3 }
 0x4f0   :  { %954 = vmatpush.msrb.mxu3 %v6371_v4 }
 0x4f2   :  { %955 = vmatpush.msrb.mxu3 %v6377_v5 }
 0x4f4   :  { %v528_v26 = vpop.permute.xlu1 %527  ;;  %956 = vmatpush.msrb.mxu3 %v6392_v8 }
 0x4f5   :  { %v6612_v29 = vadd.f32 %v528_v26, %v520_v22 }
 0x4f7   :  { %5656 = vtanh.f32 %v6612_v29 }
 0x4fd   :  { %v5657_v30 = vpop.eup %5656 }
 0x4fe   :  { %533 = vrot.lane.b32.xlu2 %v5657_v30, %s6268_s18 }
 0x558   :  { %v534_v31 = vpop.permute.xlu2 %533 }
 0x559   :  { %v536_v32 = vmul.f32 %v534_v31, %v517_v12 }
 0x55b   :  { %538 = vrot.lane.b32.xlu0 %v536_v32, %s6269_s21 }
 0x570   :  { %v694_v35 = vpop.f32.mrf.mxu3 }
 0x571   :  { %v697_v36 = vadd.f32 %v694_v35, %v312_v34 }
 0x573   :  { %5658 = vtanh.f32 %v697_v36  ;;  %v5398_v37 = vmul.f32 -1.442695, %v697_v36 }
 0x575   :  { %5660 = vpow2.f32 %v5398_v37 }
 0x579   :  { %v5659_v41 = vpop.eup %5658 }
 0x57a   :  { %720 = vrot.lane.b32.xlu1 %v5659_v41, %s6268_s18 }
 0x57b   :  { %v5661_v38 = vpop.eup %5660 }
 0x57c   :  { %v701_v39 = vadd.f32 1.0, %v5661_v38 }
 0x57e   :  { %5662 = vrcp.f32 %v701_v39  ;;  %v713_v48 = vand.u32 2147483648, %v701_v39  ;;  %vm707_vm3 = vweird.f32 %v701_v39  ;;  %v711_v49 = vand.u32 2147483647, %v701_v39 }
 0x580   :  { %v714_v58 = vor.u32 1.1754944e-38, %v713_v48  ;;  %vm712_vm5 = vcmp.eq.f32.partialorder %v711_v49, 8.507059e+37 }
 0x584   :  { %v5663_v43 = vpop.eup %5662 }
 0x585   :  { %v703_v44 = vmul.f32 %v5663_v43, %v701_v39  ;;  %vm708_vm2 = vweird.f32 %v5663_v43 }
 0x586   :  { %vm709_vm4 = vmor %vm707_vm3, %vm708_vm2 }
 0x587   :  { %v704_v45 = vsub.f32 1.0, %v703_v44 }
 0x589   :  { %v705_v46 = vmul.f32 %v5663_v43, %v704_v45 }
 0x58b   :  { %v706_v47 = vadd.f32 %v5663_v43, %v705_v46 }
 0x58d   :  { %v710_v62 = vsel %vm709_vm4, %v5663_v43, %v706_v47  ;;  %v309_v47 = vadd.f32 %v6467_v28, %v6432_v19 }
 0x58e   :  { %v715_v59 = vsel %vm712_vm5, %v714_v58, %v710_v62 }
 0x58f   :  { %v718_v63 = vmul.f32 %v715_v59, %v6597_v42 }
 0x5cd   :  { %v539_v40 = vpop.permute.xlu0 %538 }
 0x5ce   :  { %541 = vst.msk [vmem:[#allocation4 + $0x8] sm:$0xff] %vm345_vm9, %v539_v40  ;;  %5395 = vmatmul.msk.f32.vlgmr.msrb.gmra.mxu2 %vm345_vm9, %v539_v40 }
 0x5cf   :  { %887 = vmatpush.msrb.mxu2 %v6447_v24 }
 0x5d1   :  { %888 = vmatpush.msrb.mxu2 %v6453_v25 }
 0x5d3   :  { %889 = vmatpush.msrb.mxu2 %v6461_v27 }
 0x5d5   :  { %v2457_v20 = vld [vmem:[#allocation4 + $0x8] sm:$0xff]  ;;  %890 = vmatpush.msrb.mxu2 %v6476_v33 }
 0x5d6   :  { %5468 = vmatmul.msk.f32.gmra.mxu1 %vm345_vm9, %v2457_v20 }
 0x5ec   :  { %v721_v23 = vpop.permute.xlu1 %720 }
 0x5ed   :  { %v723_v60 = vmul.f32 %v721_v23, %v715_v59 }
 0x5ef   :  { %725 = vrot.lane.b32.xlu2 %v723_v60, %s6269_s21 }
 0x649   :  { %v726_v0 = vpop.permute.xlu2 %725 }
 0x64a   :  { %v6629_v1 = vadd.f32 %v726_v0, %v718_v63 }
 0x64c   :  { %5664 = vtanh.f32 %v6629_v1 }
 0x651   :  { %v628_v7 = vpop.f32.mrf.mxu2 }
 0x652   :  { %v5665_v9 = vpop.eup %5664  ;;  %v631_v10 = vadd.f32 %v628_v7, %v192_v6 }
 0x653   :  { %731 = vrot.lane.b32.xlu0 %v5665_v9, %s6268_s18 }
 0x654   :  { %5666 = vtanh.f32 %v631_v10  ;;  %v5396_v12 = vmul.f32 -1.442695, %v631_v10 }
 0x656   :  { %5668 = vpow2.f32 %v5396_v12 }
 0x65a   :  { %v5667_v11 = vpop.eup %5666 }
 0x65b   :  { %654 = vrot.lane.b32.xlu1 %v5667_v11, %s6268_s18 }
 0x65c   :  { %v5669_v42 = vpop.eup %5668 }
 0x65d   :  { %v635_v13 = vadd.f32 1.0, %v5669_v42 }
 0x65f   :  { %5670 = vrcp.f32 %v635_v13  ;;  %v647_v35 = vand.u32 2147483648, %v635_v13  ;;  %vm641_vm7 = vweird.f32 %v635_v13  ;;  %v645_v36 = vand.u32 2147483647, %v635_v13 }
 0x661   :  { %v648_v37 = vor.u32 1.1754944e-38, %v647_v35  ;;  %vm646_vm10 = vcmp.eq.f32.partialorder %v645_v36, 8.507059e+37 }
 0x665   :  { %v5671_v21 = vpop.eup %5670 }
 0x666   :  { %v637_v22 = vmul.f32 %v5671_v21, %v635_v13  ;;  %vm642_vm6 = vweird.f32 %v5671_v21 }
 0x667   :  { %vm643_vm8 = vmor %vm641_vm7, %vm642_vm6 }
 0x668   :  { %v638_v26 = vsub.f32 1.0, %v637_v22 }
 0x66a   :  { %v639_v30 = vmul.f32 %v5671_v21, %v638_v26 }
 0x66c   :  { %v640_v34 = vadd.f32 %v5671_v21, %v639_v30 }
 0x66e   :  { %v644_v41 = vsel %vm643_vm8, %v5671_v21, %v640_v34 }
 0x66f   :  { %v649_v38 = vsel %vm646_vm10, %v648_v37, %v644_v41 }
 0x670   :  { %v652_v43 = vmul.f32 %v649_v38, %v6612_v29 }
 0x6c5   :  { %v732_v31 = vpop.permute.xlu0 %731 }
 0x6c6   :  { %v734_v32 = vmul.f32 %v732_v31, %v715_v59 }
 0x6c8   :  { %736 = vrot.lane.b32.xlu2 %v734_v32, %s6269_s21  ;;  %v194_v32 = vpop.f32.mrf.mxu0 }
 0x6c9   :  { %v195_v34 = vadd.f32 %v6517_v61, %v194_v32 }
 0x6cd   :  { %v655_v39 = vpop.permute.xlu1 %654 }
 0x6ce   :  { %v657_v40 = vmul.f32 %v655_v39, %v649_v38 }
 0x6d0   :  { %659 = vrot.lane.b32.xlu0 %v657_v40, %s6269_s21 }
 0x722   :  { %v737_v20 = vpop.permute.xlu2 %736 }
 0x723   :  { %739 = vst.msk [vmem:[#allocation5 + $0x68] sm:$0xff] %vm345_vm9, %v737_v20  ;;  %5401 = vmatmul.msk.f32.vlgmr.msra.gmra.mxu3 %vm345_vm9, %v737_v20 }
 0x724   :  { %1085 = vmatpush.msra.mxu3 %v6365_v3 }
 0x726   :  { %1086 = vmatpush.msra.mxu3 %v6371_v4 }
 0x728   :  { %1087 = vmatpush.msra.mxu3 %v6377_v5 }
 0x72a   :  { %1088 = vmatpush.msra.mxu3 %v6392_v8 }
 0x742   :  { %v660_v44 = vpop.permute.xlu0 %659 }
 0x743   :  { %v6644_v45 = vadd.f32 %v660_v44, %v652_v43 }
 0x745   :  { %5672 = vtanh.f32 %v6644_v45 }
 0x74b   :  { %v5673_v46 = vpop.eup %5672 }
 0x74c   :  { %665 = vrot.lane.b32.xlu1 %v5673_v46, %s6268_s18 }
 0x7a6   :  { %v826_v48 = vpop.f32.mrf.mxu3 }
 0x7a7   :  { %v829_v49 = vadd.f32 %v826_v48, %v309_v47 }
 0x7a9   :  { %5674 = vtanh.f32 %v829_v49  ;;  %v5402_v29 = vmul.f32 -1.442695, %v829_v49 }
 0x7ab   :  { %5676 = vpow2.f32 %v5402_v29 }
 0x7af   :  { %v5675_v62 = vpop.eup %5674 }
 0x7b0   :  { %852 = vrot.lane.b32.xlu0 %v5675_v62, %s6268_s18 }
 0x7b1   :  { %v5677_v23 = vpop.eup %5676 }
 0x7b2   :  { %v833_v60 = vadd.f32 1.0, %v5677_v23 }
 0x7b4   :  { %5678 = vrcp.f32 %v833_v60  ;;  %v845_v9 = vand.u32 2147483648, %v833_v60  ;;  %vm839_vm12 = vweird.f32 %v833_v60  ;;  %v843_v10 = vand.u32 2147483647, %v833_v60 }
 0x7b6   :  { %v846_v12 = vor.u32 1.1754944e-38, %v845_v9  ;;  %vm844_vm14 = vcmp.eq.f32.partialorder %v843_v10, 8.507059e+37 }
 0x7ba   :  { %v5679_v63 = vpop.eup %5678 }
 0x7bb   :  { %v835_v0 = vmul.f32 %v5679_v63, %v833_v60  ;;  %vm840_vm11 = vweird.f32 %v5679_v63 }
 0x7bc   :  { %vm841_vm13 = vmor %vm839_vm12, %vm840_vm11 }
 0x7bd   :  { %v836_v2 = vsub.f32 1.0, %v835_v0 }
 0x7be   :  { %v666_v58 = vpop.permute.xlu1 %665 }
 0x7bf   :  { %v668_v59 = vmul.f32 %v666_v58, %v649_v38  ;;  %v837_v6 = vmul.f32 %v5679_v63, %v836_v2 }
 0x7c1   :  { %670 = vrot.lane.b32.xlu2 %v668_v59, %s6269_s21  ;;  %v838_v7 = vadd.f32 %v5679_v63, %v837_v6 }
 0x7c3   :  { %v842_v11 = vsel %vm841_vm13, %v5679_v63, %v838_v7  ;;  %v306_v7 = vadd.f32 %v6467_v28, %v6430_v18 }
 0x7c4   :  { %v847_v42 = vsel %vm844_vm14, %v846_v12, %v842_v11 }
 0x7c5   :  { %v850_v26 = vmul.f32 %v847_v42, %v6629_v1 }
 0x81b   :  { %v671_v19 = vpop.permute.xlu2 %670 }
 0x81c   :  { %673 = vst.msk [vmem:[#allocation4 + $0x10] sm:$0xff] %vm345_vm9, %v671_v19  ;;  %5399 = vmatmul.msk.f32.vlgmr.msra.gmra.mxu2 %vm345_vm9, %v671_v19 }
 0x81d   :  { %1019 = vmatpush.msra.mxu2 %v6447_v24 }
 0x81f   :  { %1020 = vmatpush.msra.mxu2 %v6453_v25 }
 0x821   :  { %1021 = vmatpush.msra.mxu2 %v6461_v27 }
 0x822   :  { %v853_v13 = vpop.permute.xlu0 %852 }
 0x823   :  { %v855_v21 = vmul.f32 %v853_v13, %v847_v42  ;;  %v2458_v22 = vld [vmem:[#allocation4 + $0x10] sm:$0xff]  ;;  %1022 = vmatpush.msra.mxu2 %v6476_v33 }
 0x824   :  { %5469 = vmatmul.msk.f32.gmra.mxu1 %vm345_vm9, %v2458_v22 }
 0x825   :  { %857 = vrot.lane.b32.xlu1 %v855_v21, %s6269_s21 }
 0x897   :  { %v858_v30 = vpop.permute.xlu1 %857 }
 0x898   :  { %v6661_v31 = vadd.f32 %v858_v30, %v850_v26 }
 0x89a   :  { %5680 = vtanh.f32 %v6661_v31 }
 0x89f   :  { %v760_v35 = vpop.f32.mrf.mxu2 }
 0x8a0   :  { %v5681_v36 = vpop.eup %5680  ;;  %v763_v41 = vadd.f32 %v760_v35, %v195_v34 }
 0x8a1   :  { %863 = vrot.lane.b32.xlu2 %v5681_v36, %s6268_s18 }
 0x8a2   :  { %5682 = vtanh.f32 %v763_v41  ;;  %v5400_v38 = vmul.f32 -1.442695, %v763_v41 }
 0x8a4   :  { %5684 = vpow2.f32 %v5400_v38 }
 0x8a8   :  { %v5683_v37 = vpop.eup %5682 }
 0x8a9   :  { %786 = vrot.lane.b32.xlu0 %v5683_v37, %s6268_s18 }
 0x8aa   :  { %v5685_v1 = vpop.eup %5684 }
 0x8ab   :  { %v767_v39 = vadd.f32 1.0, %v5685_v1 }
 0x8ad   :  { %5686 = vrcp.f32 %v767_v39  ;;  %v779_v49 = vand.u32 2147483648, %v767_v39  ;;  %vm773_vm0 = vweird.f32 %v767_v39  ;;  %v777_v62 = vand.u32 2147483647, %v767_v39 }
 0x8af   :  { %v780_v59 = vor.u32 1.1754944e-38, %v779_v49  ;;  %vm778_vm2 = vcmp.eq.f32.partialorder %v777_v62, 8.507059e+37 }
 0x8b3   :  { %v5687_v43 = vpop.eup %5686 }
 0x8b4   :  { %v769_v44 = vmul.f32 %v5687_v43, %v767_v39  ;;  %vm774_vm15 = vweird.f32 %v5687_v43 }
 0x8b5   :  { %vm775_vm1 = vmor %vm773_vm0, %vm774_vm15 }
 0x8b6   :  { %v770_v46 = vsub.f32 1.0, %v769_v44 }
 0x8b8   :  { %v771_v47 = vmul.f32 %v5687_v43, %v770_v46 }
 0x8ba   :  { %v772_v48 = vadd.f32 %v5687_v43, %v771_v47 }
 0x8bc   :  { %v776_v58 = vsel %vm775_vm1, %v5687_v43, %v772_v48 }
 0x8bd   :  { %v781_v29 = vsel %vm778_vm2, %v780_v59, %v776_v58 }
 0x8be   :  { %v784_v0 = vmul.f32 %v781_v29, %v6644_v45 }
 0x8fb   :  { %v864_v40 = vpop.permute.xlu2 %863 }
 0x8fc   :  { %v866_v20 = vmul.f32 %v864_v40, %v847_v42 }
 0x8fe   :  { %868 = vrot.lane.b32.xlu1 %v866_v20, %s6269_s21 }
 0x91b   :  { %v787_v23 = vpop.permute.xlu0 %786 }
 0x91c   :  { %v789_v60 = vmul.f32 %v787_v23, %v781_v29 }
 0x91e   :  { %791 = vrot.lane.b32.xlu2 %v789_v60, %s6269_s21 }
 0x970   :  { %v869_v63 = vpop.permute.xlu1 %868 }
 0x971   :  { %871 = vst.msk [vmem:[#allocation5 + $0x60] sm:$0xff] %vm345_vm9, %v869_v63  ;;  %5405 = vmatmul.msk.f32.vlgmr.msrb.gmra.mxu3 %vm345_vm9, %v869_v63 }
 0x972   :  { %1217 = vmatpush.msrb.mxu3 %v6365_v3 }
 0x974   :  { %1218 = vmatpush.msrb.mxu3 %v6371_v4 }
 0x976   :  { %1219 = vmatpush.msrb.mxu3 %v6377_v5 }
 0x978   :  { %v792_v2 = vpop.permute.xlu2 %791  ;;  %1220 = vmatpush.msrb.mxu3 %v6392_v8 }
 0x979   :  { %v6676_v6 = vadd.f32 %v792_v2, %v784_v0 }
 0x97b   :  { %5688 = vtanh.f32 %v6676_v6 }
 0x981   :  { %v5689_v19 = vpop.eup %5688 }
 0x982   :  { %797 = vrot.lane.b32.xlu0 %v5689_v19, %s6268_s18 }
 0x9f4   :  { %v958_v3 = vpop.f32.mrf.mxu3  ;;  %v798_v9 = vpop.permute.xlu0 %797 }
 0x9f5   :  { %v961_v4 = vadd.f32 %v958_v3, %v306_v7  ;;  %v800_v10 = vmul.f32 %v798_v9, %v781_v29  ;;  %v6706_v3 = vld [vmem:[%s8132_s5 + $0x18] sm:$0xff]  ;;  %v6712_v9 = vld [vmem:[%s8132_s5 + $0x10] sm:$0xff] }
 0x9f7   :  { %5690 = vtanh.f32 %v961_v4  ;;  %802 = vrot.lane.b32.xlu1 %v800_v10, %s6269_s21  ;;  %v5406_v8 = vmul.f32 -1.442695, %v961_v4  ;;  %v6718_v4 = vld [vmem:[%s8132_s5 + $0x8] sm:$0xff] }
 0x9f9   :  { %5692 = vpow2.f32 %v5406_v8  ;;  %v6725_v8 = vld [vmem:[%s8132_s5] sm:$0xff] }
 0x9fd   :  { %v5691_v5 = vpop.eup %5690 }
 0x9fe   :  { %984 = vrot.lane.b32.xlu2 %v5691_v5, %s6268_s18 }
 0x9ff   :  { %v5693_v45 = vpop.eup %5692 }
 0xa00   :  { %v965_v11 = vadd.f32 1.0, %v5693_v45 }
 0xa02   :  { %5694 = vrcp.f32 %v965_v11  ;;  %v977_v22 = vand.u32 2147483648, %v965_v11  ;;  %vm971_vm4 = vweird.f32 %v965_v11  ;;  %v975_v26 = vand.u32 2147483647, %v965_v11 }
 0xa04   :  { %v978_v32 = vor.u32 1.1754944e-38, %v977_v22  ;;  %vm976_vm6 = vcmp.eq.f32.partialorder %v975_v26, 8.507059e+37 }
 0xa08   :  { %v5695_v12 = vpop.eup %5694 }
 0xa09   :  { %v967_v42 = vmul.f32 %v5695_v12, %v965_v11  ;;  %vm972_vm3 = vweird.f32 %v5695_v12 }
 0xa0a   :  { %vm973_vm5 = vmor %vm971_vm4, %vm972_vm3 }
 0xa0b   :  { %v968_v13 = vsub.f32 1.0, %v967_v42 }
 0xa0d   :  { %v969_v21 = vmul.f32 %v5695_v12, %v968_v13 }
 0xa0f   :  { %v970_v18 = vadd.f32 %v5695_v12, %v969_v21 }
 0xa11   :  { %v974_v30 = vsel %vm973_vm5, %v5695_v12, %v970_v18 }
 0xa12   :  { %v979_v34 = vsel %vm976_vm6, %v978_v32, %v974_v30 }
 0xa13   :  { %v982_v38 = vmul.f32 %v979_v34, %v6661_v31 }
 0xa58   :  { %v985_v35 = vpop.permute.xlu2 %984 }
 0xa59   :  { %v987_v36 = vmul.f32 %v985_v35, %v979_v34 }
 0xa5b   :  { %989 = vrot.lane.b32.xlu0 %v987_v36, %s6269_s21  ;;  %v6759_v36 = vld [vmem:[%s8129_s2] sm:$0xff] }
 0xa69   :  { %v803_v41 = vpop.permute.xlu1 %802 }
 0xa6a   :  { %805 = vst.msk [vmem:[#allocation4 + $0x18] sm:$0xff] %vm345_vm9, %v803_v41  ;;  %5403 = vmatmul.msk.f32.vlgmr.msrb.gmra.mxu2 %vm345_vm9, %v803_v41 }
 0xa6b   :  { %1151 = vmatpush.msrb.mxu2 %v6447_v24  ;;  %v197_v24 = vpop.f32.mrf.mxu0 }
 0xa6d   :  { %1152 = vmatpush.msrb.mxu2 %v6453_v25  ;;  %v198_v25 = vadd.f32 %v6517_v61, %v197_v24 }
 0xa6f   :  { %1153 = vmatpush.msrb.mxu2 %v6461_v27 }
 0xa71   :  { %v2459_v37 = vld [vmem:[#allocation4 + $0x18] sm:$0xff]  ;;  %1154 = vmatpush.msrb.mxu2 %v6476_v33 }
 0xa72   :  { %5470 = vmatmul.msk.f32.gmra.mxu1 %vm345_vm9, %v2459_v37 }
 0xacd   :  { %v990_v1 = vpop.permute.xlu0 %989 }
 0xace   :  { %v6693_v39 = vadd.f32 %v990_v1, %v982_v38 }
 0xad0   :  { %5696 = vtanh.f32 %v6693_v39 }
 0xad6   :  { %v5697_v40 = vpop.eup %5696 }
 0xad7   :  { %995 = vrot.lane.b32.xlu1 %v5697_v40, %s6268_s18 }
 0xaed   :  { %v892_v20 = vpop.f32.mrf.mxu2 }
 0xaee   :  { %v895_v27 = vadd.f32 %v892_v20, %v198_v25 }
 0xaf0   :  { %5698 = vtanh.f32 %v895_v27  ;;  %v5404_v33 = vmul.f32 -1.442695, %v895_v27 }
 0xaf2   :  { %5700 = vpow2.f32 %v5404_v33 }
 0xaf6   :  { %v5699_v43 = vpop.eup %5698 }
 0xaf7   :  { %918 = vrot.lane.b32.xlu2 %v5699_v43, %s6268_s18 }
 0xaf8   :  { %v5701_v31 = vpop.eup %5700 }
 0xaf9   :  { %v899_v44 = vadd.f32 1.0, %v5701_v31 }
 0xafb   :  { %5702 = vrcp.f32 %v899_v44  ;;  %v911_v29 = vand.u32 2147483648, %v899_v44  ;;  %vm905_vm8 = vweird.f32 %v899_v44  ;;  %v909_v23 = vand.u32 2147483647, %v899_v44 }
 0xafd   :  { %v912_v63 = vor.u32 1.1754944e-38, %v911_v29  ;;  %vm910_vm11 = vcmp.eq.f32.partialorder %v909_v23, 8.507059e+37 }
 0xb01   :  { %v5703_v46 = vpop.eup %5702 }
 0xb02   :  { %v901_v47 = vmul.f32 %v5703_v46, %v899_v44  ;;  %vm906_vm7 = vweird.f32 %v5703_v46 }
 0xb03   :  { %vm907_vm10 = vmor %vm905_vm8, %vm906_vm7 }
 0xb04   :  { %v902_v48 = vsub.f32 1.0, %v901_v47 }
 0xb06   :  { %v903_v49 = vmul.f32 %v5703_v46, %v902_v48  ;;  %v200_v48 = vpop.f32.mrf.mxu0 }
 0xb08   :  { %v904_v59 = vadd.f32 %v5703_v46, %v903_v49  ;;  %v201_v49 = vadd.f32 %v6517_v61, %v200_v48 }
 0xb0a   :  { %v908_v60 = vsel %vm907_vm10, %v5703_v46, %v904_v59 }
 0xb0b   :  { %v913_v0 = vsel %vm910_vm11, %v912_v63, %v908_v60 }
 0xb0c   :  { %v916_v10 = vmul.f32 %v913_v0, %v6676_v6  ;;  %v303_v6 = vadd.f32 %v6467_v28, %v6428_v17  ;;  %v6747_v17 = vld [vmem:[%s8129_s2 + $0x10] sm:$0xff]  ;;  %v6753_v28 = vld [vmem:[%s8129_s2 + $0x8] sm:$0xff] }
 0xb49   :  { %v996_v62 = vpop.permute.xlu1 %995 }
 0xb4a   :  { %v998_v58 = vmul.f32 %v996_v62, %v979_v34  ;;  %v6741_v34 = vld [vmem:[%s8129_s2 + $0x18] sm:$0xff] }
 0xb4c   :  { %1000 = vrot.lane.b32.xlu0 %v998_v58, %s6269_s21 }
 0xb51   :  { %v919_v2 = vpop.permute.xlu2 %918 }
 0xb52   :  { %v921_v19 = vmul.f32 %v919_v2, %v913_v0 }
 0xb54   :  { %923 = vrot.lane.b32.xlu1 %v921_v19, %s6269_s21 }
 0xbbe   :  { %v1001_v7 = vpop.permute.xlu0 %1000 }
 0xbbf   :  { %1003 = vst.msk [vmem:[#allocation5 + $0x58] sm:$0xff] %vm345_vm9, %v1001_v7  ;;  %5409 = vmatmul.msk.f32.vlgmr.msra.gmra.mxu3 %vm345_vm9, %v1001_v7 }
 0xbc0   :  { %1349 = vmatpush.msra.mxu3 %v6706_v3 }
 0xbc2   :  { %1350 = vmatpush.msra.mxu3 %v6712_v9 }
 0xbc4   :  { %1351 = vmatpush.msra.mxu3 %v6718_v4 }
 0xbc6   :  { %v924_v5 = vpop.permute.xlu1 %923  ;;  %1352 = vmatpush.msra.mxu3 %v6725_v8 }
 0xbc7   :  { %v6728_v45 = vadd.f32 %v924_v5, %v916_v10 }
 0xbc9   :  { %5704 = vtanh.f32 %v6728_v45 }
 0xbcf   :  { %v5705_v11 = vpop.eup %5704 }
 0xbd0   :  { %929 = vrot.lane.b32.xlu2 %v5705_v11, %s6268_s18 }
 0xc2a   :  { %v930_v12 = vpop.permute.xlu2 %929 }
 0xc2b   :  { %v932_v42 = vmul.f32 %v930_v12, %v913_v0 }
 0xc2d   :  { %934 = vrot.lane.b32.xlu0 %v932_v42, %s6269_s21 }
 0xc42   :  { %v1090_v13 = vpop.f32.mrf.mxu3 }
 0xc43   :  { %v1093_v21 = vadd.f32 %v1090_v13, %v303_v6 }
 0xc45   :  { %5706 = vtanh.f32 %v1093_v21  ;;  %v5410_v22 = vmul.f32 -1.442695, %v1093_v21 }
 0xc47   :  { %5708 = vpow2.f32 %v5410_v22 }
 0xc4b   :  { %v5707_v18 = vpop.eup %5706 }
 0xc4c   :  { %1116 = vrot.lane.b32.xlu1 %v5707_v18, %s6268_s18 }
 0xc4d   :  { %v5709_v26 = vpop.eup %5708 }
 0xc4e   :  { %v1097_v30 = vadd.f32 1.0, %v5709_v26 }
 0xc50   :  { %5710 = vrcp.f32 %v1097_v30  ;;  %v1109_v24 = vand.u32 2147483648, %v1097_v30  ;;  %vm1103_vm13 = vweird.f32 %v1097_v30  ;;  %v1107_v25 = vand.u32 2147483647, %v1097_v30 }
 0xc52   :  { %v1110_v27 = vor.u32 1.1754944e-38, %v1109_v24  ;;  %vm1108_vm15 = vcmp.eq.f32.partialorder %v1107_v25, 8.507059e+37 }
 0xc56   :  { %v5711_v41 = vpop.eup %5710 }
 0xc57   :  { %v1099_v37 = vmul.f32 %v5711_v41, %v1097_v30  ;;  %vm1104_vm12 = vweird.f32 %v5711_v41 }
 0xc58   :  { %vm1105_vm14 = vmor %vm1103_vm13, %vm1104_vm12 }
 0xc59   :  { %v1100_v38 = vsub.f32 1.0, %v1099_v37 }
 0xc5b   :  { %v1101_v1 = vmul.f32 %v5711_v41, %v1100_v38 }
 0xc5d   :  { %v1102_v40 = vadd.f32 %v5711_v41, %v1101_v1 }
 0xc5f   :  { %v1106_v20 = vsel %vm1105_vm14, %v5711_v41, %v1102_v40 }
 0xc60   :  { %v1111_v43 = vsel %vm1108_vm15, %v1110_v27, %v1106_v20 }
 0xc61   :  { %v1114_v44 = vmul.f32 %v1111_v43, %v6693_v39 }
 0xc9f   :  { %v935_v32 = vpop.permute.xlu0 %934 }
 0xca0   :  { %937 = vst.msk [vmem:[#allocation4 + $0x20] sm:$0xff] %vm345_vm9, %v935_v32  ;;  %5407 = vmatmul.msk.f32.vlgmr.msra.gmra.mxu2 %vm345_vm9, %v935_v32 }
 0xca1   :  { %1283 = vmatpush.msra.mxu2 %v6741_v34 }
 0xca3   :  { %1284 = vmatpush.msra.mxu2 %v6747_v17 }
 0xca5   :  { %1285 = vmatpush.msra.mxu2 %v6753_v28 }
 0xca7   :  { %v2460_v35 = vld [vmem:[#allocation4 + $0x20] sm:$0xff]  ;;  %1286 = vmatpush.msra.mxu2 %v6759_v36 }
 0xca8   :  { %5471 = vmatmul.msk.f32.gmra.mxu1 %vm345_vm9, %v2460_v35  ;;  %v6787_v35 = vld [vmem:[%s8133_s6] ss:$0 sm:$0xff] }
 0xca9   :  { %v300_v41 = vadd.f32 %v6787_v35, %v6426_v16 }
 0xcbe   :  { %v1117_v33 = vpop.permute.xlu1 %1116 }
 0xcbf   :  { %v1119_v31 = vmul.f32 %v1117_v33, %v1111_v43 }
 0xcc1   :  { %1121 = vrot.lane.b32.xlu2 %v1119_v31, %s6269_s21 }
 0xd1b   :  { %v1122_v46 = vpop.permute.xlu2 %1121 }
 0xd1c   :  { %v6765_v47 = vadd.f32 %v1122_v46, %v1114_v44 }
 0xd1e   :  { %5712 = vtanh.f32 %v6765_v47 }
 0xd23   :  { %v1024_v62 = vpop.f32.mrf.mxu2 }
 0xd24   :  { %v5713_v58 = vpop.eup %5712  ;;  %v1027_v59 = vadd.f32 %v1024_v62, %v201_v49 }
 0xd25   :  { %1127 = vrot.lane.b32.xlu0 %v5713_v58, %s6268_s18 }
 0xd26   :  { %5714 = vtanh.f32 %v1027_v59  ;;  %v5408_v23 = vmul.f32 -1.442695, %v1027_v59 }
 0xd28   :  { %5716 = vpow2.f32 %v5408_v23 }
 0xd2c   :  { %v5715_v29 = vpop.eup %5714 }
 0xd2d   :  { %1050 = vrot.lane.b32.xlu1 %v5715_v29, %s6268_s18 }
 0xd2e   :  { %v5717_v39 = vpop.eup %5716 }
 0xd2f   :  { %v1031_v60 = vadd.f32 1.0, %v5717_v39 }
 0xd31   :  { %5718 = vrcp.f32 %v1031_v60  ;;  %v1043_v5 = vand.u32 2147483648, %v1031_v60  ;;  %vm1037_vm1 = vweird.f32 %v1031_v60  ;;  %v1041_v11 = vand.u32 2147483647, %v1031_v60 }
 0xd33   :  { %v1044_v42 = vor.u32 1.1754944e-38, %v1043_v5  ;;  %vm1042_vm3 = vcmp.eq.f32.partialorder %v1041_v11, 8.507059e+37 }
 0xd37   :  { %v5719_v63 = vpop.eup %5718 }
 0xd38   :  { %v1033_v0 = vmul.f32 %v5719_v63, %v1031_v60  ;;  %vm1038_vm0 = vweird.f32 %v5719_v63 }
 0xd39   :  { %vm1039_vm2 = vmor %vm1037_vm1, %vm1038_vm0 }
 0xd3a   :  { %v1034_v2 = vsub.f32 1.0, %v1033_v0  ;;  %v203_v0 = vpop.f32.mrf.mxu0 }
 0xd3c   :  { %v1035_v19 = vmul.f32 %v5719_v63, %v1034_v2  ;;  %v6808_v2 = vld [vmem:[%s8130_s3] ss:$0 sm:$0xff] }
 0xd3e   :  { %v1036_v10 = vadd.f32 %v5719_v63, %v1035_v19  ;;  %v204_v19 = vadd.f32 %v6808_v2, %v203_v0 }
 0xd40   :  { %v1040_v12 = vsel %vm1039_vm2, %v5719_v63, %v1036_v10 }
 0xd41   :  { %v1045_v6 = vsel %vm1042_vm3, %v1044_v42, %v1040_v12 }
 0xd42   :  { %v1048_v22 = vmul.f32 %v1045_v6, %v6728_v45 }
 0xd97   :  { %v1128_v7 = vpop.permute.xlu0 %1127 }
 0xd98   :  { %v1130_v61 = vmul.f32 %v1128_v7, %v1111_v43 }
 0xd9a   :  { %1132 = vrot.lane.b32.xlu2 %v1130_v61, %s6269_s21 }
 0xd9f   :  { %v1051_v13 = vpop.permute.xlu1 %1050 }
 0xda0   :  { %v1053_v21 = vmul.f32 %v1051_v13, %v1045_v6 }
 0xda2   :  { %1055 = vrot.lane.b32.xlu0 %v1053_v21, %s6269_s21 }
 0xdf4   :  { %v1133_v18 = vpop.permute.xlu2 %1132 }
 0xdf5   :  { %1135 = vst.msk [vmem:[#allocation5 + $0x50] sm:$0xff] %vm345_vm9, %v1133_v18  ;;  %5413 = vmatmul.msk.f32.vlgmr.msrb.gmra.mxu3 %vm345_vm9, %v1133_v18 }
 0xdf6   :  { %1481 = vmatpush.msrb.mxu3 %v6706_v3 }
 0xdf8   :  { %1482 = vmatpush.msrb.mxu3 %v6712_v9 }
 0xdfa   :  { %1483 = vmatpush.msrb.mxu3 %v6718_v4 }
 0xdfc   :  { %1484 = vmatpush.msrb.mxu3 %v6725_v8 }
 0xe14   :  { %v1056_v26 = vpop.permute.xlu0 %1055 }
 0xe15   :  { %v6780_v30 = vadd.f32 %v1056_v26, %v1048_v22 }
 0xe17   :  { %5720 = vtanh.f32 %v6780_v30 }
 0xe1d   :  { %v5721_v32 = vpop.eup %5720 }
 0xe1e   :  { %1061 = vrot.lane.b32.xlu1 %v5721_v32, %s6268_s18 }
 0xe78   :  { %v1222_v37 = vpop.f32.mrf.mxu3 }
 0xe79   :  { %v1225_v38 = vadd.f32 %v1222_v37, %v300_v41 }
 0xe7b   :  { %5722 = vtanh.f32 %v1225_v38  ;;  %v5414_v24 = vmul.f32 -1.442695, %v1225_v38 }
 0xe7d   :  { %5724 = vpow2.f32 %v5414_v24 }
 0xe81   :  { %v5723_v45 = vpop.eup %5722 }
 0xe82   :  { %1248 = vrot.lane.b32.xlu0 %v5723_v45, %s6268_s18 }
 0xe83   :  { %v5725_v25 = vpop.eup %5724 }
 0xe84   :  { %v1229_v20 = vadd.f32 1.0, %v5725_v25 }
 0xe86   :  { %5726 = vrcp.f32 %v1229_v20  ;;  %v1241_v46 = vand.u32 2147483648, %v1229_v20  ;;  %vm1235_vm5 = vweird.f32 %v1229_v20  ;;  %v1239_v48 = vand.u32 2147483647, %v1229_v20 }
 0xe88   :  { %v1242_v62 = vor.u32 1.1754944e-38, %v1241_v46  ;;  %vm1240_vm7 = vcmp.eq.f32.partialorder %v1239_v48, 8.507059e+37 }
 0xe8c   :  { %v5727_v27 = vpop.eup %5726 }
 0xe8d   :  { %v1231_v43 = vmul.f32 %v5727_v27, %v1229_v20  ;;  %vm1236_vm4 = vweird.f32 %v5727_v27 }
 0xe8e   :  { %vm1237_vm6 = vmor %vm1235_vm5, %vm1236_vm4 }
 0xe8f   :  { %v1232_v33 = vsub.f32 1.0, %v1231_v43 }
 0xe90   :  { %v1062_v1 = vpop.permute.xlu1 %1061 }
 0xe91   :  { %v1064_v40 = vmul.f32 %v1062_v1, %v1045_v6  ;;  %v1233_v31 = vmul.f32 %v5727_v27, %v1232_v33  ;;  %v297_v33 = vadd.f32 %v6787_v35, %v6424_v15 }
 0xe93   :  { %1066 = vrot.lane.b32.xlu2 %v1064_v40, %s6269_s21  ;;  %v1234_v44 = vadd.f32 %v5727_v27, %v1233_v31 }
 0xe95   :  { %v1238_v49 = vsel %vm1237_vm6, %v5727_v27, %v1234_v44 }
 0xe96   :  { %v1243_v58 = vsel %vm1240_vm7, %v1242_v62, %v1238_v49 }
 0xe97   :  { %v1246_v39 = vmul.f32 %v1243_v58, %v6765_v47 }
 0xeed   :  { %v1067_v16 = vpop.permute.xlu2 %1066 }
 0xeee   :  { %1069 = vst.msk [vmem:[#allocation4 + $0x28] sm:$0xff] %vm345_vm9, %v1067_v16  ;;  %5411 = vmatmul.msk.f32.vlgmr.msrb.gmra.mxu2 %vm345_vm9, %v1067_v16 }
 0xeef   :  { %1415 = vmatpush.msrb.mxu2 %v6741_v34 }
 0xef1   :  { %1416 = vmatpush.msrb.mxu2 %v6747_v17 }
 0xef3   :  { %1417 = vmatpush.msrb.mxu2 %v6753_v28 }
 0xef4   :  { %v1249_v59 = vpop.permute.xlu0 %1248 }
 0xef5   :  { %v1251_v29 = vmul.f32 %v1249_v59, %v1243_v58  ;;  %v2461_v23 = vld [vmem:[#allocation4 + $0x28] sm:$0xff]  ;;  %1418 = vmatpush.msrb.mxu2 %v6759_v36 }
 0xef6   :  { %5472 = vmatmul.msk.f32.gmra.mxu1 %vm345_vm9, %v2461_v23 }
 0xef7   :  { %1253 = vrot.lane.b32.xlu1 %v1251_v29, %s6269_s21 }
 0xf69   :  { %v1254_v60 = vpop.permute.xlu1 %1253 }
 0xf6a   :  { %v6802_v63 = vadd.f32 %v1254_v60, %v1246_v39 }
 0xf6c   :  { %5728 = vtanh.f32 %v6802_v63 }
 0xf71   :  { %v1156_v7 = vpop.f32.mrf.mxu2 }
 0xf72   :  { %v5729_v61 = vpop.eup %5728  ;;  %v1159_v10 = vadd.f32 %v1156_v7, %v204_v19 }
 0xf73   :  { %1259 = vrot.lane.b32.xlu2 %v5729_v61, %s6268_s18 }
 0xf74   :  { %5730 = vtanh.f32 %v1159_v10  ;;  %v5412_v5 = vmul.f32 -1.442695, %v1159_v10 }
 0xf76   :  { %5732 = vpow2.f32 %v5412_v5 }
 0xf7a   :  { %v5731_v47 = vpop.eup %5730 }
 0xf7b   :  { %1182 = vrot.lane.b32.xlu0 %v5731_v47, %s6268_s18 }
 0xf7c   :  { %v5733_v11 = vpop.eup %5732 }
 0xf7d   :  { %v1163_v12 = vadd.f32 1.0, %v5733_v11 }
 0xf7f   :  { %5734 = vrcp.f32 %v1163_v12  ;;  %v1175_v32 = vand.u32 2147483648, %v1163_v12  ;;  %vm1169_vm10 = vweird.f32 %v1163_v12  ;;  %v1173_v41 = vand.u32 2147483647, %v1163_v12 }
 0xf81   :  { %v1176_v38 = vor.u32 1.1754944e-38, %v1175_v32  ;;  %vm1174_vm12 = vcmp.eq.f32.partialorder %v1173_v41, 8.507059e+37 }
 0xf85   :  { %v5735_v13 = vpop.eup %5734 }
 0xf86   :  { %v1165_v21 = vmul.f32 %v5735_v13, %v1163_v12  ;;  %vm1170_vm8 = vweird.f32 %v5735_v13 }
 0xf87   :  { %vm1171_vm11 = vmor %vm1169_vm10, %vm1170_vm8 }
 0xf88   :  { %v1166_v18 = vsub.f32 1.0, %v1165_v21 }
 0xf8a   :  { %v1167_v22 = vmul.f32 %v5735_v13, %v1166_v18 }
 0xf8c   :  { %v1168_v26 = vadd.f32 %v5735_v13, %v1167_v22 }
 0xf8e   :  { %v1172_v37 = vsel %vm1171_vm11, %v5735_v13, %v1168_v26  ;;  %v206_v13 = vpop.f32.mrf.mxu0 }
 0xf8f   :  { %v1177_v45 = vsel %vm1174_vm12, %v1176_v38, %v1172_v37  ;;  %v207_v21 = vadd.f32 %v6808_v2, %v206_v13 }
 0xf90   :  { %v1180_v25 = vmul.f32 %v1177_v45, %v6780_v30 }
 0xfcd   :  { %v1260_v42 = vpop.permute.xlu2 %1259 }
 0xfce   :  { %v1262_v6 = vmul.f32 %v1260_v42, %v1243_v58 }
 0xfd0   :  { %1264 = vrot.lane.b32.xlu1 %v1262_v6, %s6269_s21 }
 0xfed   :  { %v1183_v1 = vpop.permute.xlu0 %1182 }
 0xfee   :  { %v1185_v40 = vmul.f32 %v1183_v1, %v1177_v45 }
 0xff0   :  { %1187 = vrot.lane.b32.xlu2 %v1185_v40, %s6269_s21 }
0x1042   :  { %v1265_v24 = vpop.permute.xlu1 %1264 }
0x1043   :  { %1267 = vst.msk [vmem:[#allocation5 + $0x48] sm:$0xff] %vm345_vm9, %v1265_v24  ;;  %5417 = vmatmul.msk.f32.vlgmr.msra.gmra.mxu3 %vm345_vm9, %v1265_v24 }
0x1044   :  { %1613 = vmatpush.msra.mxu3 %v6706_v3 }
0x1046   :  { %1614 = vmatpush.msra.mxu3 %v6712_v9 }
0x1048   :  { %1615 = vmatpush.msra.mxu3 %v6718_v4 }
0x104a   :  { %v1188_v20 = vpop.permute.xlu2 %1187  ;;  %1616 = vmatpush.msra.mxu3 %v6725_v8 }
0x104b   :  { %v6822_v27 = vadd.f32 %v1188_v20, %v1180_v25 }
0x104d   :  { %5736 = vtanh.f32 %v6822_v27 }
0x1053   :  { %v5737_v43 = vpop.eup %5736 }
0x1054   :  { %1193 = vrot.lane.b32.xlu0 %v5737_v43, %s6268_s18 }
0x10c6   :  { %v1354_v31 = vpop.f32.mrf.mxu3  ;;  %v1194_v16 = vpop.permute.xlu0 %1193 }
0x10c7   :  { %v1357_v44 = vadd.f32 %v1354_v31, %v297_v33  ;;  %v1196_v46 = vmul.f32 %v1194_v16, %v1177_v45 }
0x10c9   :  { %5738 = vtanh.f32 %v1357_v44  ;;  %1198 = vrot.lane.b32.xlu1 %v1196_v46, %s6269_s21  ;;  %v5418_v48 = vmul.f32 -1.442695, %v1357_v44 }
0x10cb   :  { %5740 = vpow2.f32 %v5418_v48 }
0x10cf   :  { %v5739_v30 = vpop.eup %5738 }
0x10d0   :  { %1380 = vrot.lane.b32.xlu2 %v5739_v30, %s6268_s18 }
0x10d1   :  { %v5741_v49 = vpop.eup %5740 }
0x10d2   :  { %v1361_v62 = vadd.f32 1.0, %v5741_v49 }
0x10d4   :  { %5742 = vrcp.f32 %v1361_v62  ;;  %v1373_v39 = vand.u32 2147483648, %v1361_v62  ;;  %vm1367_vm14 = vweird.f32 %v1361_v62  ;;  %v1371_v60 = vand.u32 2147483647, %v1361_v62 }
0x10d6   :  { %v1374_v19 = vor.u32 1.1754944e-38, %v1373_v39  ;;  %vm1372_vm0 = vcmp.eq.f32.partialorder %v1371_v60, 8.507059e+37 }
0x10da   :  { %v5743_v58 = vpop.eup %5742 }
0x10db   :  { %v1363_v59 = vmul.f32 %v5743_v58, %v1361_v62  ;;  %vm1368_vm13 = vweird.f32 %v5743_v58 }
0x10dc   :  { %vm1369_vm15 = vmor %vm1367_vm14, %vm1368_vm13 }
0x10dd   :  { %v1364_v29 = vsub.f32 1.0, %v1363_v59  ;;  %v6858_v59 = vpop.f32.mrf.mxu1 }
0x10df   :  { %v1365_v23 = vmul.f32 %v5743_v58, %v1364_v29 }
0x10e1   :  { %v1366_v15 = vadd.f32 %v5743_v58, %v1365_v23 }
0x10e3   :  { %v1370_v0 = vsel %vm1369_vm15, %v5743_v58, %v1366_v15 }
0x10e4   :  { %v1375_v7 = vsel %vm1372_vm0, %v1374_v19, %v1370_v0 }
0x10e5   :  { %v1378_v11 = vmul.f32 %v1375_v7, %v6802_v63  ;;  %v6860_v29 = vpop.f32.mrf.mxu1 }
0x10ed   :  { %v6862_v23 = vpop.f32.mrf.mxu1 }
0x10f5   :  { %v6864_v15 = vpop.f32.mrf.mxu1 }
0x10fd   :  { %v6866_v39 = vpop.f32.mrf.mxu1 }
0x112a   :  { %v1381_v61 = vpop.permute.xlu2 %1380 }
0x112b   :  { %v1383_v10 = vmul.f32 %v1381_v61, %v1375_v7 }
0x112d   :  { %1385 = vrot.lane.b32.xlu0 %v1383_v10, %s6269_s21 }
0x113b   :  { %v1199_v47 = vpop.permute.xlu1 %1198 }
0x113c   :  { %1201 = vst.msk [vmem:[#allocation4 + $0x30] sm:$0xff] %vm345_vm9, %v1199_v47  ;;  %5415 = vmatmul.msk.f32.vlgmr.msra.gmra.mxu2 %vm345_vm9, %v1199_v47 }
0x113d   :  { %1547 = vmatpush.msra.mxu2 %v6741_v34 }
0x113f   :  { %1548 = vmatpush.msra.mxu2 %v6747_v17 }
0x1141   :  { %1549 = vmatpush.msra.mxu2 %v6753_v28 }
0x1143   :  { %v2462_v5 = vld [vmem:[#allocation4 + $0x30] sm:$0xff]  ;;  %1550 = vmatpush.msra.mxu2 %v6759_v36 }
0x1144   :  { %5473 = vmatmul.msk.f32.gmra.mxu1 %vm345_vm9, %v2462_v5 }
0x119f   :  { %v1386_v12 = vpop.permute.xlu0 %1385 }
0x11a0   :  { %v6839_v42 = vadd.f32 %v1386_v12, %v1378_v11 }
0x11a2   :  { %5744 = vtanh.f32 %v6839_v42 }
0x11a8   :  { %v5745_v6 = vpop.eup %5744 }
0x11a9   :  { %1391 = vrot.lane.b32.xlu1 %v5745_v6, %s6268_s18 }
0x11bf   :  { %v1288_v18 = vpop.f32.mrf.mxu2 }
0x11c0   :  { %v1291_v22 = vadd.f32 %v1288_v18, %v207_v21 }
0x11c2   :  { %5746 = vtanh.f32 %v1291_v22  ;;  %v5416_v32 = vmul.f32 -1.442695, %v1291_v22 }
0x11c4   :  { %5748 = vpow2.f32 %v5416_v32 }
0x11c8   :  { %v5747_v26 = vpop.eup %5746 }
0x11c9   :  { %1314 = vrot.lane.b32.xlu2 %v5747_v26, %s6268_s18 }
0x11ca   :  { %v5749_v63 = vpop.eup %5748 }
0x11cb   :  { %v1295_v41 = vadd.f32 1.0, %v5749_v63 }
0x11cd   :  { %5750 = vrcp.f32 %v1295_v41  ;;  %v1307_v20 = vand.u32 2147483648, %v1295_v41  ;;  %vm1301_vm2 = vweird.f32 %v1295_v41  ;;  %v1305_v43 = vand.u32 2147483647, %v1295_v41 }
0x11cf   :  { %v1308_v31 = vor.u32 1.1754944e-38, %v1307_v20  ;;  %vm1306_vm4 = vcmp.eq.f32.partialorder %v1305_v43, 8.507059e+37 }
0x11d3   :  { %v5751_v37 = vpop.eup %5750 }
0x11d4   :  { %v1297_v38 = vmul.f32 %v5751_v37, %v1295_v41  ;;  %vm1302_vm1 = vweird.f32 %v5751_v37 }
0x11d5   :  { %vm1303_vm3 = vmor %vm1301_vm2, %vm1302_vm1 }
0x11d6   :  { %v1298_v45 = vsub.f32 1.0, %v1297_v38 }
0x11d8   :  { %v1299_v1 = vmul.f32 %v5751_v37, %v1298_v45 }
0x11da   :  { %v1300_v25 = vadd.f32 %v5751_v37, %v1299_v1 }
0x11dc   :  { %v1304_v33 = vsel %vm1303_vm3, %v5751_v37, %v1300_v25 }
0x11dd   :  { %v1309_v16 = vsel %vm1306_vm4, %v1308_v31, %v1304_v33  ;;  %v210_v33 = vadd.f32 %v6808_v2, %v6498_v50 }
0x11de   :  { %v1312_v48 = vmul.f32 %v1309_v16, %v6822_v27  ;;  %v6868_v27 = vpop.f32.mrf.mxu1 }
0x11e6   :  { %v6871_v19 = vpop.f32.mrf.mxu1 }
0x121b   :  { %v1392_v40 = vpop.permute.xlu1 %1391 }
0x121c   :  { %v1394_v24 = vmul.f32 %v1392_v40, %v1375_v7  ;;  %v293_v7 = vpop.f32.mrf.mxu1 }
0x121d   :  { %v294_v61 = vadd.f32 %v6787_v35, %v293_v7 }
0x121e   :  { %1396 = vrot.lane.b32.xlu0 %v1394_v24, %s6269_s21 }
0x1223   :  { %v1315_v44 = vpop.permute.xlu2 %1314 }
0x1224   :  { %v1317_v46 = vmul.f32 %v1315_v44, %v1309_v16 }
0x1226   :  { %1319 = vrot.lane.b32.xlu1 %v1317_v46, %s6269_s21 }
0x1290   :  { %v1397_v30 = vpop.permute.xlu0 %1396 }
0x1291   :  { %1399 = vst.msk [vmem:[#allocation5 + $0x40] sm:$0xff] %vm345_vm9, %v1397_v30  ;;  %5421 = vmatmul.msk.f32.vlgmr.msrb.gmra.mxu3 %vm345_vm9, %v1397_v30 }
0x1292   :  { %1745 = vmatpush.msrb.mxu3 %v6706_v3 }
0x1294   :  { %1746 = vmatpush.msrb.mxu3 %v6712_v9 }
0x1296   :  { %1747 = vmatpush.msrb.mxu3 %v6718_v4 }
0x1298   :  { %v1320_v49 = vpop.permute.xlu1 %1319  ;;  %1748 = vmatpush.msrb.mxu3 %v6725_v8 }
0x1299   :  { %v6854_v62 = vadd.f32 %v1320_v49, %v1312_v48 }
0x129b   :  { %5752 = vtanh.f32 %v6854_v62 }
0x12a1   :  { %v5753_v58 = vpop.eup %5752 }
0x12a2   :  { %1325 = vrot.lane.b32.xlu2 %v5753_v58, %s6268_s18 }
0x12fc   :  { %v1326_v60 = vpop.permute.xlu2 %1325 }
0x12fd   :  { %v1328_v0 = vmul.f32 %v1326_v60, %v1309_v16 }
0x12ff   :  { %1330 = vrot.lane.b32.xlu0 %v1328_v0, %s6269_s21 }
0x1314   :  { %v1486_v10 = vpop.f32.mrf.mxu3 }
0x1315   :  { %v1489_v47 = vadd.f32 %v1486_v10, %v294_v61 }
0x1317   :  { %5754 = vtanh.f32 %v1489_v47  ;;  %v5422_v11 = vmul.f32 -1.442695, %v1489_v47 }
0x1319   :  { %5756 = vpow2.f32 %v5422_v11 }
0x131d   :  { %v5755_v5 = vpop.eup %5754 }
0x131e   :  { %1512 = vrot.lane.b32.xlu1 %v5755_v5, %s6268_s18 }
0x131f   :  { %v5757_v12 = vpop.eup %5756 }
0x1320   :  { %v1493_v6 = vadd.f32 1.0, %v5757_v12 }
0x1322   :  { %5758 = vrcp.f32 %v1493_v6  ;;  %v1505_v41 = vand.u32 2147483648, %v1493_v6  ;;  %vm1499_vm6 = vweird.f32 %v1493_v6  ;;  %v1503_v37 = vand.u32 2147483647, %v1493_v6 }
0x1324   :  { %v1506_v45 = vor.u32 1.1754944e-38, %v1505_v41  ;;  %vm1504_vm8 = vcmp.eq.f32.partialorder %v1503_v37, 8.507059e+37 }
0x1328   :  { %v5759_v18 = vpop.eup %5758 }
0x1329   :  { %v1495_v22 = vmul.f32 %v5759_v18, %v1493_v6  ;;  %vm1500_vm5 = vweird.f32 %v5759_v18 }
0x132a   :  { %vm1501_vm7 = vmor %vm1499_vm6, %vm1500_vm5 }
0x132b   :  { %v1496_v26 = vsub.f32 1.0, %v1495_v22 }
0x132d   :  { %v1497_v32 = vmul.f32 %v5759_v18, %v1496_v26 }
0x132f   :  { %v1498_v63 = vadd.f32 %v5759_v18, %v1497_v32 }
0x1331   :  { %v1502_v38 = vsel %vm1501_vm7, %v5759_v18, %v1498_v63  ;;  %v291_v63 = vadd.f32 %v6787_v35, %v6871_v19 }
0x1332   :  { %v1507_v1 = vsel %vm1504_vm8, %v1506_v45, %v1502_v38 }
0x1333   :  { %v1510_v25 = vmul.f32 %v1507_v1, %v6839_v42 }
0x1371   :  { %v1331_v13 = vpop.permute.xlu0 %1330 }
0x1372   :  { %1333 = vst.msk [vmem:[#allocation4 + $0x38] sm:$0xff] %vm345_vm9, %v1331_v13  ;;  %5419 = vmatmul.msk.f32.vlgmr.msrb.gmra.mxu2 %vm345_vm9, %v1331_v13 }
0x1373   :  { %1679 = vmatpush.msrb.mxu2 %v6741_v34 }
0x1375   :  { %1680 = vmatpush.msrb.mxu2 %v6747_v17 }
0x1377   :  { %1681 = vmatpush.msrb.mxu2 %v6753_v28 }
0x1379   :  { %v2463_v21 = vld [vmem:[#allocation4 + $0x38] sm:$0xff]  ;;  %1682 = vmatpush.msrb.mxu2 %v6759_v36 }
0x137a   :  { %5474 = vmatmul.msk.f32.gmra.mxu1 %vm345_vm9, %v2463_v21 }
0x1390   :  { %v1513_v40 = vpop.permute.xlu1 %1512 }
0x1391   :  { %v1515_v24 = vmul.f32 %v1513_v40, %v1507_v1 }
0x1393   :  { %1517 = vrot.lane.b32.xlu2 %v1515_v24, %s6269_s21 }
0x13ed   :  { %v1518_v20 = vpop.permute.xlu2 %1517 }
0x13ee   :  { %v6884_v43 = vadd.f32 %v1518_v20, %v1510_v25 }
0x13f0   :  { %5760 = vtanh.f32 %v6884_v43 }
0x13f5   :  { %v1420_v31 = vpop.f32.mrf.mxu2 }
0x13f6   :  { %v5761_v16 = vpop.eup %5760  ;;  %v1423_v44 = vadd.f32 %v1420_v31, %v210_v33 }
0x13f7   :  { %1523 = vrot.lane.b32.xlu0 %v5761_v16, %s6268_s18 }
0x13f8   :  { %5762 = vtanh.f32 %v1423_v44  ;;  %v5420_v30 = vmul.f32 -1.442695, %v1423_v44 }
0x13fa   :  { %5764 = vpow2.f32 %v5420_v30 }
0x13fe   :  { %v5763_v46 = vpop.eup %5762 }
0x13ff   :  { %1446 = vrot.lane.b32.xlu1 %v5763_v46, %s6268_s18 }
0x1400   :  { %v5765_v42 = vpop.eup %5764 }
0x1401   :  { %v1427_v48 = vadd.f32 1.0, %v5765_v42 }
0x1403   :  { %5766 = vrcp.f32 %v1427_v48  ;;  %v1439_v10 = vand.u32 2147483648, %v1427_v48  ;;  %vm1433_vm11 = vweird.f32 %v1427_v48  ;;  %v1437_v47 = vand.u32 2147483647, %v1427_v48 }
0x1405   :  { %v1440_v11 = vor.u32 1.1754944e-38, %v1439_v10  ;;  %vm1438_vm13 = vcmp.eq.f32.partialorder %v1437_v47, 8.507059e+37 }
0x1409   :  { %v5767_v49 = vpop.eup %5766 }
0x140a   :  { %v1429_v58 = vmul.f32 %v5767_v49, %v1427_v48  ;;  %vm1434_vm10 = vweird.f32 %v5767_v49 }
0x140b   :  { %vm1435_vm12 = vmor %vm1433_vm11, %vm1434_vm10 }
0x140c   :  { %v1430_v60 = vsub.f32 1.0, %v1429_v58 }
0x140e   :  { %v1431_v0 = vmul.f32 %v5767_v49, %v1430_v60 }
0x1410   :  { %v1432_v61 = vadd.f32 %v5767_v49, %v1431_v0 }
0x1412   :  { %v1436_v5 = vsel %vm1435_vm12, %v5767_v49, %v1432_v61  ;;  %v213_v61 = vadd.f32 %v6808_v2, %v6500_v51 }
0x1413   :  { %v1441_v12 = vsel %vm1438_vm13, %v1440_v11, %v1436_v5 }
0x1414   :  { %v1444_v18 = vmul.f32 %v1441_v12, %v6854_v62 }
0x1469   :  { %v1524_v7 = vpop.permute.xlu0 %1523 }
0x146a   :  { %v1526_v50 = vmul.f32 %v1524_v7, %v1507_v1 }
0x146c   :  { %1528 = vrot.lane.b32.xlu2 %v1526_v50, %s6269_s21 }
0x1471   :  { %v1447_v6 = vpop.permute.xlu1 %1446 }
0x1472   :  { %v1449_v13 = vmul.f32 %v1447_v6, %v1441_v12 }
0x1474   :  { %1451 = vrot.lane.b32.xlu0 %v1449_v13, %s6269_s21 }
0x14c6   :  { %v1529_v21 = vpop.permute.xlu2 %1528 }
0x14c7   :  { %1531 = vst.msk [vmem:[#allocation5 + $0x38] sm:$0xff] %vm345_vm9, %v1529_v21  ;;  %5425 = vmatmul.msk.f32.vlgmr.msra.gmra.mxu3 %vm345_vm9, %v1529_v21 }
0x14c8   :  { %1877 = vmatpush.msra.mxu3 %v6706_v3 }
0x14ca   :  { %1878 = vmatpush.msra.mxu3 %v6712_v9 }
0x14cc   :  { %1879 = vmatpush.msra.mxu3 %v6718_v4 }
0x14ce   :  { %1880 = vmatpush.msra.mxu3 %v6725_v8 }
0x14e6   :  { %v1452_v22 = vpop.permute.xlu0 %1451 }
0x14e7   :  { %v6900_v26 = vadd.f32 %v1452_v22, %v1444_v18 }
0x14e9   :  { %5768 = vtanh.f32 %v6900_v26 }
0x14ef   :  { %v5769_v32 = vpop.eup %5768 }
0x14f0   :  { %1457 = vrot.lane.b32.xlu1 %v5769_v32, %s6268_s18 }
0x154a   :  { %v1618_v41 = vpop.f32.mrf.mxu3 }
0x154b   :  { %v1621_v37 = vadd.f32 %v1618_v41, %v291_v63 }
0x154d   :  { %5770 = vtanh.f32 %v1621_v37  ;;  %v5426_v62 = vmul.f32 -1.442695, %v1621_v37 }
0x154f   :  { %5772 = vpow2.f32 %v5426_v62 }
0x1553   :  { %v5771_v38 = vpop.eup %5770 }
0x1554   :  { %1644 = vrot.lane.b32.xlu0 %v5771_v38, %s6268_s18 }
0x1555   :  { %v5773_v40 = vpop.eup %5772 }
0x1556   :  { %v1625_v24 = vadd.f32 1.0, %v5773_v40 }
0x1558   :  { %5774 = vrcp.f32 %v1625_v24  ;;  %v1637_v44 = vand.u32 2147483648, %v1625_v24  ;;  %vm1631_vm15 = vweird.f32 %v1625_v24  ;;  %v1635_v46 = vand.u32 2147483647, %v1625_v24 }
0x155a   :  { %v1638_v42 = vor.u32 1.1754944e-38, %v1637_v44  ;;  %vm1636_vm1 = vcmp.eq.f32.partialorder %v1635_v46, 8.507059e+37 }
0x155e   :  { %v5775_v25 = vpop.eup %5774 }
0x155f   :  { %v1627_v20 = vmul.f32 %v5775_v25, %v1625_v24  ;;  %vm1632_vm14 = vweird.f32 %v5775_v25 }
0x1560   :  { %vm1633_vm0 = vmor %vm1631_vm15, %vm1632_vm14 }
0x1561   :  { %v1628_v33 = vsub.f32 1.0, %v1627_v20 }
0x1562   :  { %v1458_v45 = vpop.permute.xlu1 %1457 }
0x1563   :  { %v1460_v1 = vmul.f32 %v1458_v45, %v1441_v12  ;;  %v1629_v31 = vmul.f32 %v5775_v25, %v1628_v33 }
0x1565   :  { %1462 = vrot.lane.b32.xlu2 %v1460_v1, %s6269_s21  ;;  %v1630_v16 = vadd.f32 %v5775_v25, %v1629_v31 }
0x1567   :  { %v1634_v30 = vsel %vm1633_vm0, %v5775_v25, %v1630_v16 }
0x1568   :  { %v1639_v48 = vsel %vm1636_vm1, %v1638_v42, %v1634_v30 }
0x1569   :  { %v1642_v0 = vmul.f32 %v1639_v48, %v6884_v43 }
0x15bf   :  { %v1463_v19 = vpop.permute.xlu2 %1462 }
0x15c0   :  { %1465 = vst.msk [vmem:[#allocation4 + $0x40] sm:$0xff] %vm345_vm9, %v1463_v19  ;;  %5423 = vmatmul.msk.f32.vlgmr.msra.gmra.mxu2 %vm345_vm9, %v1463_v19  ;;  %v288_v19 = vadd.f32 %v6787_v35, %v6868_v27 }
0x15c1   :  { %1811 = vmatpush.msra.mxu2 %v6741_v34 }
0x15c3   :  { %1812 = vmatpush.msra.mxu2 %v6747_v17 }
0x15c5   :  { %1813 = vmatpush.msra.mxu2 %v6753_v28 }
0x15c6   :  { %v1645_v49 = vpop.permute.xlu0 %1644 }
0x15c7   :  { %v1647_v58 = vmul.f32 %v1645_v49, %v1639_v48  ;;  %v6913_v60 = vld [vmem:[#allocation4 + $0x40] sm:$0xff]  ;;  %1814 = vmatpush.msra.mxu2 %v6759_v36 }
0x15c8   :  { %5475 = vmatmul.msk.f32.gmra.mxu1 %vm345_vm9, %v6913_v60 }
0x15c9   :  { %1649 = vrot.lane.b32.xlu1 %v1647_v58, %s6269_s21 }
0x163b   :  { %v1650_v7 = vpop.permute.xlu1 %1649 }
0x163c   :  { %v6920_v50 = vadd.f32 %v1650_v7, %v1642_v0 }
0x163e   :  { %5776 = vtanh.f32 %v6920_v50 }
0x1643   :  { %v1552_v10 = vpop.f32.mrf.mxu2 }
0x1644   :  { %v5777_v47 = vpop.eup %5776  ;;  %v1555_v5 = vadd.f32 %v1552_v10, %v213_v61 }
0x1645   :  { %1655 = vrot.lane.b32.xlu2 %v5777_v47, %s6268_s18 }
0x1646   :  { %5778 = vtanh.f32 %v1555_v5  ;;  %v5424_v12 = vmul.f32 -1.442695, %v1555_v5 }
0x1648   :  { %5780 = vpow2.f32 %v5424_v12 }
0x164c   :  { %v5779_v11 = vpop.eup %5778 }
0x164d   :  { %1578 = vrot.lane.b32.xlu0 %v5779_v11, %s6268_s18 }
0x164e   :  { %v5781_v43 = vpop.eup %5780 }
0x164f   :  { %v1559_v6 = vadd.f32 1.0, %v5781_v43 }
0x1651   :  { %5782 = vrcp.f32 %v1559_v6  ;;  %v1571_v41 = vand.u32 2147483648, %v1559_v6  ;;  %vm1565_vm3 = vweird.f32 %v1559_v6  ;;  %v1569_v37 = vand.u32 2147483647, %v1559_v6 }
0x1653   :  { %v1572_v45 = vor.u32 1.1754944e-38, %v1571_v41  ;;  %vm1570_vm5 = vcmp.eq.f32.partialorder %v1569_v37, 8.507059e+37 }
0x1657   :  { %v5783_v18 = vpop.eup %5782 }
0x1658   :  { %v1561_v51 = vmul.f32 %v5783_v18, %v1559_v6  ;;  %vm1566_vm2 = vweird.f32 %v5783_v18 }
0x1659   :  { %vm1567_vm4 = vmor %vm1565_vm3, %vm1566_vm2 }
0x165a   :  { %v1562_v22 = vsub.f32 1.0, %v1561_v51 }
0x165c   :  { %v1563_v32 = vmul.f32 %v5783_v18, %v1562_v22 }
0x165e   :  { %v1564_v63 = vadd.f32 %v5783_v18, %v1563_v32 }
0x1660   :  { %v1568_v38 = vsel %vm1567_vm4, %v5783_v18, %v1564_v63 }
0x1661   :  { %v1573_v1 = vsel %vm1570_vm5, %v1572_v45, %v1568_v38 }
0x1662   :  { %v1576_v25 = vmul.f32 %v1573_v1, %v6900_v26 }
0x169f   :  { %v1656_v13 = vpop.permute.xlu2 %1655 }
0x16a0   :  { %v1658_v21 = vmul.f32 %v1656_v13, %v1639_v48 }
0x16a2   :  { %1660 = vrot.lane.b32.xlu1 %v1658_v21, %s6269_s21 }
0x16bf   :  { %v1579_v62 = vpop.permute.xlu0 %1578 }
0x16c0   :  { %v1581_v40 = vmul.f32 %v1579_v62, %v1573_v1 }
0x16c2   :  { %1583 = vrot.lane.b32.xlu2 %v1581_v40, %s6269_s21 }
0x1714   :  { %v1661_v24 = vpop.permute.xlu1 %1660 }
0x1715   :  { %1663 = vst.msk [vmem:[#allocation5 + $0x30] sm:$0xff] %vm345_vm9, %v1661_v24  ;;  %5429 = vmatmul.msk.f32.vlgmr.msrb.gmra.mxu3 %vm345_vm9, %v1661_v24 }
0x1716   :  { %2009 = vmatpush.msrb.mxu3 %v6706_v3 }
0x1718   :  { %2010 = vmatpush.msrb.mxu3 %v6712_v9 }
0x171a   :  { %2011 = vmatpush.msrb.mxu3 %v6718_v4 }
0x171c   :  { %v1584_v20 = vpop.permute.xlu2 %1583  ;;  %2012 = vmatpush.msrb.mxu3 %v6725_v8 }
0x171d   :  { %v6936_v33 = vadd.f32 %v1584_v20, %v1576_v25 }
0x171f   :  { %5784 = vtanh.f32 %v6936_v33 }
0x1725   :  { %v5785_v31 = vpop.eup %5784 }
0x1726   :  { %1589 = vrot.lane.b32.xlu0 %v5785_v31, %s6268_s18 }
0x1798   :  { %v1750_v3 = vpop.f32.mrf.mxu3  ;;  %v1590_v16 = vpop.permute.xlu0 %1589 }
0x1799   :  { %v1753_v9 = vadd.f32 %v1750_v3, %v288_v19  ;;  %v1592_v44 = vmul.f32 %v1590_v16, %v1573_v1  ;;  %v6970_v19 = vld [vmem:[%s8132_s5 + $0x18] sm:$0xff]  ;;  %v6976_v3 = vld [vmem:[%s8132_s5 + $0x10] sm:$0xff]  ;;  %v6982_v16 = vld [vmem:[%s8132_s5 + $0x8] sm:$0xff] }
0x179b   :  { %5786 = vtanh.f32 %v1753_v9  ;;  %1594 = vrot.lane.b32.xlu1 %v1592_v44, %s6269_s21  ;;  %v5430_v8 = vmul.f32 -1.442695, %v1753_v9 }
0x179d   :  { %5788 = vpow2.f32 %v5430_v8 }
0x17a1   :  { %v5787_v4 = vpop.eup %5786 }
0x17a2   :  { %1776 = vrot.lane.b32.xlu2 %v5787_v4, %s6268_s18  ;;  %v6989_v4 = vld [vmem:[%s8132_s5] sm:$0xff] }
0x17a3   :  { %v5789_v26 = vpop.eup %5788 }
0x17a4   :  { %v1757_v46 = vadd.f32 1.0, %v5789_v26 }
0x17a6   :  { %5790 = vrcp.f32 %v1757_v46  ;;  %v1769_v58 = vand.u32 2147483648, %v1757_v46  ;;  %vm1763_vm7 = vweird.f32 %v1757_v46  ;;  %v1767_v0 = vand.u32 2147483647, %v1757_v46 }
0x17a8   :  { %v1770_v61 = vor.u32 1.1754944e-38, %v1769_v58  ;;  %vm1768_vm10 = vcmp.eq.f32.partialorder %v1767_v0, 8.507059e+37 }
0x17ac   :  { %v5791_v30 = vpop.eup %5790 }
0x17ad   :  { %v1759_v42 = vmul.f32 %v5791_v30, %v1757_v46  ;;  %vm1764_vm6 = vweird.f32 %v5791_v30 }
0x17ae   :  { %vm1765_vm8 = vmor %vm1763_vm7, %vm1764_vm6 }
0x17af   :  { %v1760_v48 = vsub.f32 1.0, %v1759_v42 }
0x17b1   :  { %v1761_v49 = vmul.f32 %v5791_v30, %v1760_v48 }
0x17b3   :  { %v1762_v27 = vadd.f32 %v5791_v30, %v1761_v49 }
0x17b5   :  { %v1766_v7 = vsel %vm1765_vm8, %v5791_v30, %v1762_v27 }
0x17b6   :  { %v1771_v10 = vsel %vm1768_vm10, %v1770_v61, %v1766_v7  ;;  %v7005_v61 = vld [vmem:[%s8129_s2 + $0x18] sm:$0xff] }
0x17b7   :  { %v1774_v43 = vmul.f32 %v1771_v10, %v6920_v50 }
0x17fc   :  { %v1777_v47 = vpop.permute.xlu2 %1776 }
0x17fd   :  { %v1779_v5 = vmul.f32 %v1777_v47, %v1771_v10  ;;  %v7025_v47 = vld [vmem:[%s8129_s2] sm:$0xff] }
0x17ff   :  { %1781 = vrot.lane.b32.xlu0 %v1779_v5, %s6269_s21 }
0x180d   :  { %v1595_v11 = vpop.permute.xlu1 %1594 }
0x180e   :  { %1597 = vst.msk [vmem:[#allocation4 + $0x48] sm:$0xff] %vm345_vm9, %v1595_v11  ;;  %5427 = vmatmul.msk.f32.vlgmr.msrb.gmra.mxu2 %vm345_vm9, %v1595_v11 }
0x180f   :  { %1943 = vmatpush.msrb.mxu2 %v6741_v34  ;;  %v216_v34 = vadd.f32 %v6808_v2, %v6502_v52 }
0x1811   :  { %1944 = vmatpush.msrb.mxu2 %v6747_v17 }
0x1813   :  { %1945 = vmatpush.msrb.mxu2 %v6753_v28 }
0x1815   :  { %v6950_v12 = vld [vmem:[#allocation4 + $0x48] sm:$0xff]  ;;  %1946 = vmatpush.msrb.mxu2 %v6759_v36 }
0x1816   :  { %5476 = vmatmul.msk.f32.gmra.mxu1 %vm345_vm9, %v6950_v12 }
0x1871   :  { %v1782_v6 = vpop.permute.xlu0 %1781 }
0x1872   :  { %v6956_v13 = vadd.f32 %v1782_v6, %v1774_v43 }
0x1874   :  { %5792 = vtanh.f32 %v6956_v13 }
0x187a   :  { %v5793_v21 = vpop.eup %5792 }
0x187b   :  { %1787 = vrot.lane.b32.xlu1 %v5793_v21, %s6268_s18 }
0x1891   :  { %v1684_v17 = vpop.f32.mrf.mxu2 }
0x1892   :  { %v1687_v28 = vadd.f32 %v1684_v17, %v216_v34 }
0x1894   :  { %5794 = vtanh.f32 %v1687_v28  ;;  %v5428_v18 = vmul.f32 -1.442695, %v1687_v28 }
0x1896   :  { %5796 = vpow2.f32 %v5428_v18 }
0x189a   :  { %v5795_v36 = vpop.eup %5794 }
0x189b   :  { %1710 = vrot.lane.b32.xlu2 %v5795_v36, %s6268_s18 }
0x189c   :  { %v5797_v50 = vpop.eup %5796 }
0x189d   :  { %v1691_v51 = vadd.f32 1.0, %v5797_v50 }
0x189f   :  { %5798 = vrcp.f32 %v1691_v51  ;;  %v1703_v52 = vand.u32 2147483648, %v1691_v51  ;;  %vm1697_vm12 = vweird.f32 %v1691_v51  ;;  %v1701_v1 = vand.u32 2147483647, %v1691_v51 }
0x18a1   :  { %v1704_v40 = vor.u32 1.1754944e-38, %v1703_v52  ;;  %vm1702_vm14 = vcmp.eq.f32.partialorder %v1701_v1, 8.507059e+37 }
0x18a5   :  { %v5799_v22 = vpop.eup %5798 }
0x18a6   :  { %v1693_v32 = vmul.f32 %v5799_v22, %v1691_v51  ;;  %vm1698_vm11 = vweird.f32 %v5799_v22 }
0x18a7   :  { %vm1699_vm13 = vmor %vm1697_vm12, %vm1698_vm11 }
0x18a8   :  { %v1694_v63 = vsub.f32 1.0, %v1693_v32 }
0x18aa   :  { %v1695_v41 = vmul.f32 %v5799_v22, %v1694_v63 }
0x18ac   :  { %v1696_v45 = vadd.f32 %v5799_v22, %v1695_v41  ;;  %v219_v41 = vadd.f32 %v6808_v2, %v6504_v53 }
0x18ae   :  { %v1700_v62 = vsel %vm1699_vm13, %v5799_v22, %v1696_v45 }
0x18af   :  { %v1705_v24 = vsel %vm1702_vm14, %v1704_v40, %v1700_v62 }
0x18b0   :  { %v1708_v9 = vmul.f32 %v1705_v24, %v6936_v33  ;;  %v285_v33 = vadd.f32 %v6787_v35, %v6866_v39  ;;  %v7011_v35 = vld [vmem:[%s8129_s2 + $0x10] sm:$0xff]  ;;  %v7017_v39 = vld [vmem:[%s8129_s2 + $0x8] sm:$0xff] }
0x18ed   :  { %v1788_v37 = vpop.permute.xlu1 %1787 }
0x18ee   :  { %v1790_v38 = vmul.f32 %v1788_v37, %v1771_v10 }
0x18f0   :  { %1792 = vrot.lane.b32.xlu0 %v1790_v38, %s6269_s21 }
0x18f5   :  { %v1711_v25 = vpop.permute.xlu2 %1710 }
0x18f6   :  { %v1713_v20 = vmul.f32 %v1711_v25, %v1705_v24 }
0x18f8   :  { %1715 = vrot.lane.b32.xlu1 %v1713_v20, %s6269_s21 }
0x1962   :  { %v1793_v31 = vpop.permute.xlu0 %1792 }
0x1963   :  { %1795 = vst.msk [vmem:[#allocation5 + $0x28] sm:$0xff] %vm345_vm9, %v1793_v31  ;;  %5433 = vmatmul.msk.f32.vlgmr.msra.gmra.mxu3 %vm345_vm9, %v1793_v31 }
0x1964   :  { %2141 = vmatpush.msra.mxu3 %v6970_v19 }
0x1966   :  { %2142 = vmatpush.msra.mxu3 %v6976_v3 }
0x1968   :  { %2143 = vmatpush.msra.mxu3 %v6982_v16 }
0x196a   :  { %v1716_v44 = vpop.permute.xlu1 %1715  ;;  %2144 = vmatpush.msra.mxu3 %v6989_v4 }
0x196b   :  { %v6992_v8 = vadd.f32 %v1716_v44, %v1708_v9 }
0x196d   :  { %5800 = vtanh.f32 %v6992_v8 }
0x1973   :  { %v5801_v26 = vpop.eup %5800 }
0x1974   :  { %1721 = vrot.lane.b32.xlu2 %v5801_v26, %s6268_s18 }
0x19ce   :  { %v1722_v46 = vpop.permute.xlu2 %1721 }
0x19cf   :  { %v1724_v30 = vmul.f32 %v1722_v46, %v1705_v24 }
0x19d1   :  { %1726 = vrot.lane.b32.xlu0 %v1724_v30, %s6269_s21 }
0x19e6   :  { %v1882_v42 = vpop.f32.mrf.mxu3 }
0x19e7   :  { %v1885_v48 = vadd.f32 %v1882_v42, %v285_v33 }
0x19e9   :  { %5802 = vtanh.f32 %v1885_v48  ;;  %v5434_v27 = vmul.f32 -1.442695, %v1885_v48 }
0x19eb   :  { %5804 = vpow2.f32 %v5434_v27 }
0x19ef   :  { %v5803_v49 = vpop.eup %5802 }
0x19f0   :  { %1908 = vrot.lane.b32.xlu1 %v5803_v49, %s6268_s18 }
0x19f1   :  { %v5805_v58 = vpop.eup %5804 }
0x19f2   :  { %v1889_v0 = vadd.f32 1.0, %v5805_v58 }
0x19f4   :  { %5806 = vrcp.f32 %v1889_v0  ;;  %v1901_v34 = vand.u32 2147483648, %v1889_v0  ;;  %vm1895_vm0 = vweird.f32 %v1889_v0  ;;  %v1899_v17 = vand.u32 2147483647, %v1889_v0 }
0x19f6   :  { %v1902_v36 = vor.u32 1.1754944e-38, %v1901_v34  ;;  %vm1900_vm2 = vcmp.eq.f32.partialorder %v1899_v17, 8.507059e+37 }
0x19fa   :  { %v5807_v5 = vpop.eup %5806 }
0x19fb   :  { %v1891_v11 = vmul.f32 %v5807_v5, %v1889_v0  ;;  %vm1896_vm15 = vweird.f32 %v5807_v5 }
0x19fc   :  { %vm1897_vm1 = vmor %vm1895_vm0, %vm1896_vm15 }
0x19fd   :  { %v1892_v43 = vsub.f32 1.0, %v1891_v11 }
0x19ff   :  { %v1893_v6 = vmul.f32 %v5807_v5, %v1892_v43 }
0x1a01   :  { %v1894_v21 = vadd.f32 %v5807_v5, %v1893_v6 }
0x1a03   :  { %v1898_v28 = vsel %vm1897_vm1, %v5807_v5, %v1894_v21 }
0x1a04   :  { %v1903_v18 = vsel %vm1900_vm2, %v1902_v36, %v1898_v28 }
0x1a05   :  { %v1906_v22 = vmul.f32 %v1903_v18, %v6956_v13 }
0x1a43   :  { %v1727_v7 = vpop.permute.xlu0 %1726 }
0x1a44   :  { %1729 = vst.msk [vmem:[#allocation4 + $0x50] sm:$0xff] %vm345_vm9, %v1727_v7  ;;  %5431 = vmatmul.msk.f32.vlgmr.msra.gmra.mxu2 %vm345_vm9, %v1727_v7  ;;  %v7055_v7 = vld [vmem:[%s8133_s6] ss:$0 sm:$0xff] }
0x1a45   :  { %2075 = vmatpush.msra.mxu2 %v7005_v61  ;;  %v282_v5 = vadd.f32 %v7055_v7, %v6864_v15 }
0x1a47   :  { %2076 = vmatpush.msra.mxu2 %v7011_v35 }
0x1a49   :  { %2077 = vmatpush.msra.mxu2 %v7017_v39 }
0x1a4b   :  { %v7020_v10 = vld [vmem:[#allocation4 + $0x50] sm:$0xff]  ;;  %2078 = vmatpush.msra.mxu2 %v7025_v47 }
0x1a4c   :  { %5477 = vmatmul.msk.f32.gmra.mxu1 %vm345_vm9, %v7020_v10 }
0x1a62   :  { %v1909_v50 = vpop.permute.xlu1 %1908 }
0x1a63   :  { %v1911_v51 = vmul.f32 %v1909_v50, %v1903_v18 }
0x1a65   :  { %1913 = vrot.lane.b32.xlu2 %v1911_v51, %s6269_s21 }
0x1abf   :  { %v1914_v32 = vpop.permute.xlu2 %1913 }
0x1ac0   :  { %v7032_v63 = vadd.f32 %v1914_v32, %v1906_v22 }
0x1ac2   :  { %5808 = vtanh.f32 %v7032_v63 }
0x1ac7   :  { %v1816_v37 = vpop.f32.mrf.mxu2 }
0x1ac8   :  { %v5809_v38 = vpop.eup %5808  ;;  %v1819_v45 = vadd.f32 %v1816_v37, %v219_v41 }
0x1ac9   :  { %1919 = vrot.lane.b32.xlu0 %v5809_v38, %s6268_s18 }
0x1aca   :  { %5810 = vtanh.f32 %v1819_v45  ;;  %v5432_v1 = vmul.f32 -1.442695, %v1819_v45 }
0x1acc   :  { %5812 = vpow2.f32 %v5432_v1 }
0x1ad0   :  { %v5811_v52 = vpop.eup %5810 }
0x1ad1   :  { %1842 = vrot.lane.b32.xlu1 %v5811_v52, %s6268_s18 }
0x1ad2   :  { %v5813_v13 = vpop.eup %5812 }
0x1ad3   :  { %v1823_v62 = vadd.f32 1.0, %v5813_v13 }
0x1ad5   :  { %5814 = vrcp.f32 %v1823_v62  ;;  %v1835_v9 = vand.u32 2147483648, %v1823_v62  ;;  %vm1829_vm4 = vweird.f32 %v1823_v62  ;;  %v1833_v44 = vand.u32 2147483647, %v1823_v62 }
0x1ad7   :  { %v1836_v46 = vor.u32 1.1754944e-38, %v1835_v9  ;;  %vm1834_vm6 = vcmp.eq.f32.partialorder %v1833_v44, 8.507059e+37 }
0x1adb   :  { %v5815_v40 = vpop.eup %5814 }
0x1adc   :  { %v1825_v24 = vmul.f32 %v5815_v40, %v1823_v62  ;;  %vm1830_vm3 = vweird.f32 %v5815_v40 }
0x1add   :  { %vm1831_vm5 = vmor %vm1829_vm4, %vm1830_vm3 }
0x1ade   :  { %v1826_v25 = vsub.f32 1.0, %v1825_v24 }
0x1ae0   :  { %v1827_v20 = vmul.f32 %v5815_v40, %v1826_v25  ;;  %v7079_v25 = vld [vmem:[%s8130_s3] ss:$0 sm:$0xff] }
0x1ae2   :  { %v1828_v2 = vadd.f32 %v5815_v40, %v1827_v20  ;;  %v222_v20 = vadd.f32 %v7079_v25, %v6506_v54 }
0x1ae4   :  { %v1832_v26 = vsel %vm1831_vm5, %v5815_v40, %v1828_v2 }
0x1ae5   :  { %v1837_v30 = vsel %vm1834_vm6, %v1836_v46, %v1832_v26 }
0x1ae6   :  { %v1840_v49 = vmul.f32 %v1837_v30, %v6992_v8 }
0x1b3b   :  { %v1920_v31 = vpop.permute.xlu0 %1919 }
0x1b3c   :  { %v1922_v53 = vmul.f32 %v1920_v31, %v1903_v18 }
0x1b3e   :  { %1924 = vrot.lane.b32.xlu2 %v1922_v53, %s6269_s21 }
0x1b43   :  { %v1843_v33 = vpop.permute.xlu1 %1842 }
0x1b44   :  { %v1845_v42 = vmul.f32 %v1843_v33, %v1837_v30 }
0x1b46   :  { %1847 = vrot.lane.b32.xlu0 %v1845_v42, %s6269_s21 }
0x1b98   :  { %v1925_v48 = vpop.permute.xlu2 %1924 }
0x1b99   :  { %1927 = vst.msk [vmem:[#allocation5 + $0x20] sm:$0xff] %vm345_vm9, %v1925_v48  ;;  %5437 = vmatmul.msk.f32.vlgmr.msrb.gmra.mxu3 %vm345_vm9, %v1925_v48 }
0x1b9a   :  { %2273 = vmatpush.msrb.mxu3 %v6970_v19 }
0x1b9c   :  { %2274 = vmatpush.msrb.mxu3 %v6976_v3 }
0x1b9e   :  { %2275 = vmatpush.msrb.mxu3 %v6982_v16 }
0x1ba0   :  { %2276 = vmatpush.msrb.mxu3 %v6989_v4 }
0x1bb8   :  { %v1848_v27 = vpop.permute.xlu0 %1847 }
0x1bb9   :  { %v7048_v58 = vadd.f32 %v1848_v27, %v1840_v49 }
0x1bbb   :  { %5816 = vtanh.f32 %v7048_v58 }
0x1bc1   :  { %v5817_v0 = vpop.eup %5816 }
0x1bc2   :  { %1853 = vrot.lane.b32.xlu1 %v5817_v0, %s6268_s18 }
0x1c1c   :  { %v2014_v11 = vpop.f32.mrf.mxu3 }
0x1c1d   :  { %v2017_v43 = vadd.f32 %v2014_v11, %v282_v5 }
0x1c1f   :  { %5818 = vtanh.f32 %v2017_v43  ;;  %v5438_v34 = vmul.f32 -1.442695, %v2017_v43 }
0x1c21   :  { %5820 = vpow2.f32 %v5438_v34 }
0x1c25   :  { %v5819_v8 = vpop.eup %5818 }
0x1c26   :  { %2040 = vrot.lane.b32.xlu0 %v5819_v8, %s6268_s18 }
0x1c27   :  { %v5821_v17 = vpop.eup %5820 }
0x1c28   :  { %v2021_v28 = vadd.f32 1.0, %v5821_v17 }
0x1c2a   :  { %5822 = vrcp.f32 %v2021_v28  ;;  %v2033_v32 = vand.u32 2147483648, %v2021_v28  ;;  %vm2027_vm8 = vweird.f32 %v2021_v28  ;;  %v2031_v41 = vand.u32 2147483647, %v2021_v28 }
0x1c2c   :  { %v2034_v38 = vor.u32 1.1754944e-38, %v2033_v32  ;;  %vm2032_vm11 = vcmp.eq.f32.partialorder %v2031_v41, 8.507059e+37 }
0x1c30   :  { %v5823_v36 = vpop.eup %5822 }
0x1c31   :  { %v2023_v18 = vmul.f32 %v5823_v36, %v2021_v28  ;;  %vm2028_vm7 = vweird.f32 %v5823_v36 }
0x1c32   :  { %vm2029_vm10 = vmor %vm2027_vm8, %vm2028_vm7 }
0x1c33   :  { %v2024_v50 = vsub.f32 1.0, %v2023_v18  ;;  %v279_v18 = vadd.f32 %v7055_v7, %v6862_v23 }
0x1c34   :  { %v1854_v6 = vpop.permute.xlu1 %1853 }
0x1c35   :  { %v1856_v21 = vmul.f32 %v1854_v6, %v1837_v30  ;;  %v2025_v51 = vmul.f32 %v5823_v36, %v2024_v50 }
0x1c37   :  { %1858 = vrot.lane.b32.xlu2 %v1856_v21, %s6269_s21  ;;  %v2026_v22 = vadd.f32 %v5823_v36, %v2025_v51 }
0x1c39   :  { %v2030_v37 = vsel %vm2029_vm10, %v5823_v36, %v2026_v22 }
0x1c3a   :  { %v2035_v45 = vsel %vm2032_vm11, %v2034_v38, %v2030_v37 }
0x1c3b   :  { %v2038_v62 = vmul.f32 %v2035_v45, %v7032_v63 }
0x1c91   :  { %v1859_v15 = vpop.permute.xlu2 %1858 }
0x1c92   :  { %1861 = vst.msk [vmem:[#allocation4 + $0x58] sm:$0xff] %vm345_vm9, %v1859_v15  ;;  %5435 = vmatmul.msk.f32.vlgmr.msrb.gmra.mxu2 %vm345_vm9, %v1859_v15 }
0x1c93   :  { %2207 = vmatpush.msrb.mxu2 %v7005_v61 }
0x1c95   :  { %2208 = vmatpush.msrb.mxu2 %v7011_v35 }
0x1c97   :  { %2209 = vmatpush.msrb.mxu2 %v7017_v39 }
0x1c98   :  { %v2041_v52 = vpop.permute.xlu0 %2040 }
0x1c99   :  { %v2043_v1 = vmul.f32 %v2041_v52, %v2035_v45  ;;  %v7066_v13 = vld [vmem:[#allocation4 + $0x58] sm:$0xff]  ;;  %2210 = vmatpush.msrb.mxu2 %v7025_v47 }
0x1c9a   :  { %5478 = vmatmul.msk.f32.gmra.mxu1 %vm345_vm9, %v7066_v13 }
0x1c9b   :  { %2045 = vrot.lane.b32.xlu1 %v2043_v1, %s6269_s21 }
0x1d0d   :  { %v2046_v40 = vpop.permute.xlu1 %2045 }
0x1d0e   :  { %v7073_v24 = vadd.f32 %v2046_v40, %v2038_v62 }
0x1d10   :  { %5824 = vtanh.f32 %v7073_v24 }
0x1d15   :  { %v1948_v31 = vpop.f32.mrf.mxu2 }
0x1d16   :  { %v5825_v53 = vpop.eup %5824  ;;  %v1951_v2 = vadd.f32 %v1948_v31, %v222_v20 }
0x1d17   :  { %2051 = vrot.lane.b32.xlu2 %v5825_v53, %s6268_s18 }
0x1d18   :  { %5826 = vtanh.f32 %v1951_v2  ;;  %v5436_v9 = vmul.f32 -1.442695, %v1951_v2 }
0x1d1a   :  { %5828 = vpow2.f32 %v5436_v9 }
0x1d1e   :  { %v5827_v63 = vpop.eup %5826 }
0x1d1f   :  { %1974 = vrot.lane.b32.xlu0 %v5827_v63, %s6268_s18 }
0x1d20   :  { %v5829_v44 = vpop.eup %5828 }
0x1d21   :  { %v1955_v26 = vadd.f32 1.0, %v5829_v44 }
0x1d23   :  { %5830 = vrcp.f32 %v1955_v26  ;;  %v1967_v27 = vand.u32 2147483648, %v1955_v26  ;;  %vm1961_vm13 = vweird.f32 %v1955_v26  ;;  %v1965_v0 = vand.u32 2147483647, %v1955_v26 }
0x1d25   :  { %v1968_v11 = vor.u32 1.1754944e-38, %v1967_v27  ;;  %vm1966_vm15 = vcmp.eq.f32.partialorder %v1965_v0, 8.507059e+37 }
0x1d29   :  { %v5831_v33 = vpop.eup %5830 }
0x1d2a   :  { %v1957_v54 = vmul.f32 %v5831_v33, %v1955_v26  ;;  %vm1962_vm12 = vweird.f32 %v5831_v33 }
0x1d2b   :  { %vm1963_vm14 = vmor %vm1961_vm13, %vm1962_vm12 }
0x1d2c   :  { %v1958_v42 = vsub.f32 1.0, %v1957_v54 }
0x1d2e   :  { %v1959_v48 = vmul.f32 %v5831_v33, %v1958_v42 }
0x1d30   :  { %v1960_v49 = vadd.f32 %v5831_v33, %v1959_v48 }
0x1d32   :  { %v1964_v5 = vsel %vm1963_vm14, %v5831_v33, %v1960_v49 }
0x1d33   :  { %v1969_v43 = vsel %vm1966_vm15, %v1968_v11, %v1964_v5 }
0x1d34   :  { %v1972_v34 = vmul.f32 %v1969_v43, %v7048_v58 }
0x1d71   :  { %v2052_v46 = vpop.permute.xlu2 %2051 }
0x1d72   :  { %v2054_v30 = vmul.f32 %v2052_v46, %v2035_v45 }
0x1d74   :  { %2056 = vrot.lane.b32.xlu1 %v2054_v30, %s6269_s21 }
0x1d91   :  { %v1975_v8 = vpop.permute.xlu0 %1974 }
0x1d92   :  { %v1977_v6 = vmul.f32 %v1975_v8, %v1969_v43 }
0x1d94   :  { %1979 = vrot.lane.b32.xlu2 %v1977_v6, %s6269_s21 }
0x1de6   :  { %v2057_v21 = vpop.permute.xlu1 %2056 }
0x1de7   :  { %2059 = vst.msk [vmem:[#allocation5 + $0x18] sm:$0xff] %vm345_vm9, %v2057_v21  ;;  %5441 = vmatmul.msk.f32.vlgmr.msra.gmra.mxu3 %vm345_vm9, %v2057_v21 }
0x1de8   :  { %2405 = vmatpush.msra.mxu3 %v6970_v19 }
0x1dea   :  { %2406 = vmatpush.msra.mxu3 %v6976_v3 }
0x1dec   :  { %2407 = vmatpush.msra.mxu3 %v6982_v16 }
0x1dee   :  { %v1980_v17 = vpop.permute.xlu2 %1979  ;;  %2408 = vmatpush.msra.mxu3 %v6989_v4 }
0x1def   :  { %v7094_v28 = vadd.f32 %v1980_v17, %v1972_v34 }
0x1df1   :  { %5832 = vtanh.f32 %v7094_v28 }
0x1df7   :  { %v5833_v36 = vpop.eup %5832 }
0x1df8   :  { %1985 = vrot.lane.b32.xlu0 %v5833_v36, %s6268_s18 }
0x1e6a   :  { %v2146_v19 = vpop.f32.mrf.mxu3  ;;  %v1986_v50 = vpop.permute.xlu0 %1985 }
0x1e6b   :  { %v2149_v3 = vadd.f32 %v2146_v19, %v279_v18  ;;  %v1988_v51 = vmul.f32 %v1986_v50, %v1969_v43 }
0x1e6d   :  { %5834 = vtanh.f32 %v2149_v3  ;;  %1990 = vrot.lane.b32.xlu1 %v1988_v51, %s6269_s21  ;;  %v5442_v4 = vmul.f32 -1.442695, %v2149_v3  ;;  %v276_v3 = vadd.f32 %v7055_v7, %v6860_v29 }
0x1e6f   :  { %5836 = vpow2.f32 %v5442_v4 }
0x1e73   :  { %v5835_v16 = vpop.eup %5834 }
0x1e74   :  { %2172 = vrot.lane.b32.xlu2 %v5835_v16, %s6268_s18 }
0x1e75   :  { %v5837_v58 = vpop.eup %5836 }
0x1e76   :  { %v2153_v15 = vadd.f32 1.0, %v5837_v58 }
0x1e78   :  { %5838 = vrcp.f32 %v2153_v15  ;;  %v2165_v38 = vand.u32 2147483648, %v2153_v15  ;;  %vm2159_vm1 = vweird.f32 %v2153_v15  ;;  %v2163_v45 = vand.u32 2147483647, %v2153_v15 }
0x1e7a   :  { %v2166_v1 = vor.u32 1.1754944e-38, %v2165_v38  ;;  %vm2164_vm3 = vcmp.eq.f32.partialorder %v2163_v45, 8.507059e+37 }
0x1e7e   :  { %v5839_v22 = vpop.eup %5838 }
0x1e7f   :  { %v2155_v32 = vmul.f32 %v5839_v22, %v2153_v15  ;;  %vm2160_vm0 = vweird.f32 %v5839_v22 }
0x1e80   :  { %vm2161_vm2 = vmor %vm2159_vm1, %vm2160_vm0 }
0x1e81   :  { %v2156_v41 = vsub.f32 1.0, %v2155_v32 }
0x1e83   :  { %v2157_v37 = vmul.f32 %v5839_v22, %v2156_v41 }
0x1e85   :  { %v2158_v23 = vadd.f32 %v5839_v22, %v2157_v37 }
0x1e87   :  { %v2162_v52 = vsel %vm2161_vm2, %v5839_v22, %v2158_v23 }
0x1e88   :  { %v2167_v62 = vsel %vm2164_vm3, %v2166_v1, %v2162_v52 }
0x1e89   :  { %v2170_v2 = vmul.f32 %v2167_v62, %v7073_v24 }
0x1ece   :  { %v2173_v40 = vpop.permute.xlu2 %2172 }
0x1ecf   :  { %v2175_v20 = vmul.f32 %v2173_v40, %v2167_v62 }
0x1ed1   :  { %2177 = vrot.lane.b32.xlu0 %v2175_v20, %s6269_s21 }
0x1edf   :  { %v1991_v31 = vpop.permute.xlu1 %1990 }
0x1ee0   :  { %1993 = vst.msk [vmem:[#allocation4 + $0x60] sm:$0xff] %vm345_vm9, %v1991_v31  ;;  %5439 = vmatmul.msk.f32.vlgmr.msra.gmra.mxu2 %vm345_vm9, %v1991_v31 }
0x1ee1   :  { %2339 = vmatpush.msra.mxu2 %v7005_v61  ;;  %v225_v61 = vadd.f32 %v7079_v25, %v6508_v55 }
0x1ee3   :  { %2340 = vmatpush.msra.mxu2 %v7011_v35 }
0x1ee5   :  { %2341 = vmatpush.msra.mxu2 %v7017_v39 }
0x1ee7   :  { %v7108_v53 = vld [vmem:[#allocation4 + $0x60] sm:$0xff]  ;;  %2342 = vmatpush.msra.mxu2 %v7025_v47 }
0x1ee8   :  { %5479 = vmatmul.msk.f32.gmra.mxu1 %vm345_vm9, %v7108_v53 }
0x1f43   :  { %v2178_v63 = vpop.permute.xlu0 %2177 }
0x1f44   :  { %v7114_v9 = vadd.f32 %v2178_v63, %v2170_v2 }
0x1f46   :  { %5840 = vtanh.f32 %v7114_v9 }
0x1f4c   :  { %v5841_v44 = vpop.eup %5840 }
0x1f4d   :  { %2183 = vrot.lane.b32.xlu1 %v5841_v44, %s6268_s18 }
0x1f63   :  { %v2080_v35 = vpop.f32.mrf.mxu2 }
0x1f64   :  { %v2083_v39 = vadd.f32 %v2080_v35, %v225_v61  ;;  %v228_v61 = vadd.f32 %v7079_v25, %v6510_v56 }
0x1f66   :  { %5842 = vtanh.f32 %v2083_v39  ;;  %v5440_v26 = vmul.f32 -1.442695, %v2083_v39 }
0x1f68   :  { %5844 = vpow2.f32 %v5440_v26 }
0x1f6c   :  { %v5843_v47 = vpop.eup %5842 }
0x1f6d   :  { %2106 = vrot.lane.b32.xlu2 %v5843_v47, %s6268_s18 }
0x1f6e   :  { %v5845_v24 = vpop.eup %5844 }
0x1f6f   :  { %v2087_v46 = vadd.f32 1.0, %v5845_v24 }
0x1f71   :  { %5846 = vrcp.f32 %v2087_v46  ;;  %v2099_v55 = vand.u32 2147483648, %v2087_v46  ;;  %vm2093_vm5 = vweird.f32 %v2087_v46  ;;  %v2097_v0 = vand.u32 2147483647, %v2087_v46 }
0x1f73   :  { %v2100_v11 = vor.u32 1.1754944e-38, %v2099_v55  ;;  %vm2098_vm7 = vcmp.eq.f32.partialorder %v2097_v0, 8.507059e+37 }
0x1f77   :  { %v5847_v30 = vpop.eup %5846 }
0x1f78   :  { %v2089_v33 = vmul.f32 %v5847_v30, %v2087_v46  ;;  %vm2094_vm4 = vweird.f32 %v5847_v30 }
0x1f79   :  { %vm2095_vm6 = vmor %vm2093_vm5, %vm2094_vm4 }
0x1f7a   :  { %v2090_v54 = vsub.f32 1.0, %v2089_v33 }
0x1f7c   :  { %v2091_v42 = vmul.f32 %v5847_v30, %v2090_v54 }
0x1f7e   :  { %v2092_v27 = vadd.f32 %v5847_v30, %v2091_v42 }
0x1f80   :  { %v2096_v5 = vsel %vm2095_vm6, %v5847_v30, %v2092_v27 }
0x1f81   :  { %v2101_v43 = vsel %vm2098_vm7, %v2100_v11, %v2096_v5 }
0x1f82   :  { %v2104_v34 = vmul.f32 %v2101_v43, %v7094_v28 }
0x1fbf   :  { %v2184_v48 = vpop.permute.xlu1 %2183 }
0x1fc0   :  { %v2186_v49 = vmul.f32 %v2184_v48, %v2167_v62 }
0x1fc2   :  { %2188 = vrot.lane.b32.xlu0 %v2186_v49, %s6269_s21 }
0x1fc7   :  { %v2107_v8 = vpop.permute.xlu2 %2106 }
0x1fc8   :  { %v2109_v6 = vmul.f32 %v2107_v8, %v2101_v43 }
0x1fca   :  { %2111 = vrot.lane.b32.xlu1 %v2109_v6, %s6269_s21  ;;  %v2761_v6 = vld [vmem:[%s8137_s10 + $0x18] sm:$0xff] }
0x2034   :  { %v2189_v21 = vpop.permute.xlu0 %2188 }
0x2035   :  { %2191 = vst.msk [vmem:[#allocation5 + $0x10] sm:$0xff] %vm345_vm9, %v2189_v21  ;;  %5445 = vmatmul.msk.f32.vlgmr.msrb.gmra.mxu3 %vm345_vm9, %v2189_v21  ;;  %v2760_v21 = vld [vmem:[%s8137_s10 + $0x10] sm:$0xff] }
0x2036   :  { %2843 = vmatpush.msrb.mxu3 %v2761_v6 }
0x2038   :  { %2844 = vmatpush.msrb.mxu3 %v2760_v21 }
0x203c   :  { %v2112_v17 = vpop.permute.xlu1 %2111 }
0x203d   :  { %v7126_v36 = vadd.f32 %v2112_v17, %v2104_v34  ;;  %v2759_v34 = vld [vmem:[%s8137_s10 + $0x8] sm:$0xff]  ;;  %v2758_v17 = vld [vmem:[%s8137_s10] sm:$0xff] }
0x203e   :  { %2845 = vmatpush.msrb.mxu3 %v2759_v34  ;;  %v2495_v34 = vld [vmem:[%s8134_s7 + $0x38] sm:$0xff] }
0x203f   :  { %5848 = vtanh.f32 %v7126_v36  ;;  %2556 = vmatpush.msrb.mxu0 %v2495_v34 }
0x2040   :  { %2846 = vmatpush.msrb.mxu3 %v2758_v17  ;;  %v2765_v17 = vld [vmem:[%s8137_s10 + $0x38] sm:$0xff] }
0x2045   :  { %v5849_v18 = vpop.eup %5848 }
0x2046   :  { %2117 = vrot.lane.b32.xlu2 %v5849_v18, %s6268_s18 }
0x20a0   :  { %v2118_v19 = vpop.permute.xlu2 %2117 }
0x20a1   :  { %v2120_v50 = vmul.f32 %v2118_v19, %v2101_v43  ;;  %v6158_v19 = vld [vmem:[#allocation4] sm:$0xff] }
0x20a3   :  { %2122 = vrot.lane.b32.xlu0 %v2120_v50, %s6269_s21  ;;  %v6159_v50 = vld [vmem:[#allocation4 + $0x8] sm:$0xff] }
0x20b8   :  { %v2278_v51 = vpop.f32.mrf.mxu3 }
0x20b9   :  { %v2281_v16 = vadd.f32 %v2278_v51, %v276_v3  ;;  %v6160_v3 = vld [vmem:[#allocation4 + $0x10] sm:$0xff] }
0x20bb   :  { %5850 = vtanh.f32 %v2281_v16  ;;  %v5446_v28 = vmul.f32 -1.442695, %v2281_v16 }
0x20bd   :  { %5852 = vpow2.f32 %v5446_v28  ;;  %v6161_v28 = vld [vmem:[#allocation4 + $0x18] sm:$0xff] }
0x20c1   :  { %v5851_v4 = vpop.eup %5850 }
0x20c2   :  { %2304 = vrot.lane.b32.xlu1 %v5851_v4, %s6268_s18 }
0x20c3   :  { %v5853_v58 = vpop.eup %5852 }
0x20c4   :  { %v2285_v15 = vadd.f32 1.0, %v5853_v58 }
0x20c6   :  { %5854 = vrcp.f32 %v2285_v15  ;;  %v2297_v45 = vand.u32 2147483648, %v2285_v15  ;;  %vm2291_vm10 = vweird.f32 %v2285_v15  ;;  %v2295_v52 = vand.u32 2147483647, %v2285_v15 }
0x20c8   :  { %v2298_v62 = vor.u32 1.1754944e-38, %v2297_v45  ;;  %vm2296_vm12 = vcmp.eq.f32.partialorder %v2295_v52, 8.507059e+37 }
0x20cc   :  { %v5855_v41 = vpop.eup %5854 }
0x20cd   :  { %v2287_v29 = vmul.f32 %v5855_v41, %v2285_v15  ;;  %vm2292_vm8 = vweird.f32 %v5855_v41  ;;  %v6162_v15 = vld [vmem:[#allocation4 + $0x20] sm:$0xff] }
0x20ce   :  { %vm2293_vm11 = vmor %vm2291_vm10, %vm2292_vm8 }
0x20cf   :  { %v2288_v37 = vsub.f32 1.0, %v2287_v29  ;;  %v273_v29 = vadd.f32 %v7055_v7, %v6858_v59 }
0x20d1   :  { %v2289_v23 = vmul.f32 %v5855_v41, %v2288_v37 }
0x20d3   :  { %v2290_v38 = vadd.f32 %v5855_v41, %v2289_v23 }
0x20d5   :  { %v2294_v1 = vsel %vm2293_vm11, %v5855_v41, %v2290_v38  ;;  %v6164_v41 = vld [vmem:[#allocation4 + $0x30] sm:$0xff] }
0x20d6   :  { %v2299_v40 = vsel %vm2296_vm12, %v2298_v62, %v2294_v1 }
0x20d7   :  { %v2302_v2 = vmul.f32 %v2299_v40, %v7114_v9 }
0x2115   :  { %v2123_v22 = vpop.permute.xlu0 %2122 }
0x2116   :  { %2125 = vst.msk [vmem:[#allocation4 + $0x68] sm:$0xff] %vm345_vm9, %v2123_v22  ;;  %5443 = vmatmul.msk.f32.vlgmr.msrb.gmra.mxu2 %vm345_vm9, %v2123_v22  ;;  %v6163_v22 = vld [vmem:[#allocation4 + $0x28] sm:$0xff] }
0x2117   :  { %2778 = vmatpush.msrb.mxu2 %v2765_v17 }
0x211d   :  { %v7136_v32 = vld [vmem:[#allocation4 + $0x68] sm:$0xff] }
0x211e   :  { %5480 = vmatmul.msk.f32.gmra.mxu1 %vm345_vm9, %v7136_v32 }
0x2134   :  { %v2305_v20 = vpop.permute.xlu1 %2304 }
0x2135   :  { %v2307_v31 = vmul.f32 %v2305_v20, %v2299_v40 }
0x2137   :  { %2309 = vrot.lane.b32.xlu2 %v2307_v31, %s6269_s21 }
0x2191   :  { %v2310_v63 = vpop.permute.xlu2 %2309 }
0x2192   :  { %v7142_v44 = vadd.f32 %v2310_v63, %v2302_v2 }
0x2194   :  { %5856 = vtanh.f32 %v7142_v44 }
0x2199   :  { %v2212_v35 = vpop.f32.mrf.mxu2 }
0x219a   :  { %v5857_v39 = vpop.eup %5856  ;;  %v2215_v47 = vadd.f32 %v2212_v35, %v228_v61 }
0x219b   :  { %2315 = vrot.lane.b32.xlu0 %v5857_v39, %s6268_s18 }
0x219c   :  { %5858 = vtanh.f32 %v2215_v47  ;;  %v5444_v24 = vmul.f32 -1.442695, %v2215_v47 }
0x219e   :  { %5860 = vpow2.f32 %v5444_v24  ;;  %v231_v24 = vadd.f32 %v7079_v25, %v6512_v57 }
0x21a2   :  { %v5859_v26 = vpop.eup %5858 }
0x21a3   :  { %2238 = vrot.lane.b32.xlu1 %v5859_v26, %s6268_s18 }
0x21a4   :  { %v5861_v9 = vpop.eup %5860 }
0x21a5   :  { %v2219_v46 = vadd.f32 1.0, %v5861_v9 }
0x21a7   :  { %5862 = vrcp.f32 %v2219_v46  ;;  %v2231_v27 = vand.u32 2147483648, %v2219_v46  ;;  %vm2225_vm14 = vweird.f32 %v2219_v46  ;;  %v2229_v55 = vand.u32 2147483647, %v2219_v46 }
0x21a9   :  { %v2232_v5 = vor.u32 1.1754944e-38, %v2231_v27  ;;  %vm2230_vm0 = vcmp.eq.f32.partialorder %v2229_v55, 8.507059e+37 }
0x21ad   :  { %v5863_v30 = vpop.eup %5862 }
0x21ae   :  { %v2221_v33 = vmul.f32 %v5863_v30, %v2219_v46  ;;  %vm2226_vm13 = vweird.f32 %v5863_v30 }
0x21af   :  { %vm2227_vm15 = vmor %vm2225_vm14, %vm2226_vm13 }
0x21b0   :  { %v2222_v54 = vsub.f32 1.0, %v2221_v33 }
0x21b2   :  { %v2223_v42 = vmul.f32 %v5863_v30, %v2222_v54 }
0x21b4   :  { %v2224_v49 = vadd.f32 %v5863_v30, %v2223_v42 }
0x21b6   :  { %v2228_v0 = vsel %vm2227_vm15, %v5863_v30, %v2224_v49 }
0x21b7   :  { %v2233_v11 = vsel %vm2230_vm0, %v2232_v5, %v2228_v0 }
0x21b8   :  { %v2236_v51 = vmul.f32 %v2233_v11, %v7126_v36  ;;  %v6165_v36 = vld [vmem:[#allocation4 + $0x38] sm:$0xff] }
0x220d   :  { %v2316_v48 = vpop.permute.xlu0 %2315 }
0x220e   :  { %v2318_v56 = vmul.f32 %v2316_v48, %v2299_v40 }
0x2210   :  { %2320 = vrot.lane.b32.xlu2 %v2318_v56, %s6269_s21 }
0x2215   :  { %v2239_v43 = vpop.permute.xlu1 %2238 }
0x2216   :  { %v2241_v8 = vmul.f32 %v2239_v43, %v2233_v11 }
0x2218   :  { %2243 = vrot.lane.b32.xlu0 %v2241_v8, %s6269_s21 }
0x226a   :  { %v2321_v18 = vpop.permute.xlu2 %2320 }
0x226b   :  { %2323 = vst.msk [vmem:[#allocation5 + $0x8] sm:$0xff] %vm345_vm9, %v2321_v18  ;;  %5449 = vmatmul.msk.f32.vlgmr.msra.gmra.mxu3 %vm345_vm9, %v2321_v18  ;;  %v2494_v18 = vld [vmem:[%s8134_s7 + $0x30] sm:$0xff] }
0x226c   :  { %2557 = vmatpush.msrb.mxu0 %v2494_v18 }
0x2273   :  { %5499 = vmatmul.msk.f32.vlgmr.msrb.gmra.mxu3 %vm345_vm9, %v6158_v19  ;;  %v2764_v19 = vld [vmem:[%s8137_s10 + $0x30] sm:$0xff] }
0x2274   :  { %2779 = vmatpush.msrb.mxu2 %v2764_v19 }
0x227b   :  { %5500 = vmatmul.msk.f32.gmra.mxu3 %vm345_vm9, %v6159_v50  ;;  %v2493_v50 = vld [vmem:[%s8134_s7 + $0x28] sm:$0xff] }
0x227c   :  { %2558 = vmatpush.msrb.mxu0 %v2493_v50 }
0x2283   :  { %5501 = vmatmul.msk.f32.gmra.mxu3 %vm345_vm9, %v6160_v3  ;;  %v2763_v3 = vld [vmem:[%s8137_s10 + $0x28] sm:$0xff] }
0x2284   :  { %2780 = vmatpush.msrb.mxu2 %v2763_v3 }
0x228a   :  { %v2244_v16 = vpop.permute.xlu0 %2243 }
0x228b   :  { %v7169_v4 = vadd.f32 %v2244_v16, %v2236_v51  ;;  %5502 = vmatmul.msk.f32.gmra.mxu3 %vm345_vm9, %v6161_v28  ;;  %v2492_v51 = vld [vmem:[%s8134_s7 + $0x20] sm:$0xff] }
0x228c   :  { %v2762_v16 = vld [vmem:[%s8137_s10 + $0x20] sm:$0xff]  ;;  %2559 = vmatpush.msrb.mxu0 %v2492_v51 }
0x228d   :  { %5864 = vtanh.f32 %v7169_v4  ;;  %2781 = vmatpush.msrb.mxu2 %v2762_v16 }
0x2293   :  { %v5865_v58 = vpop.eup %5864  ;;  %5503 = vmatmul.msk.f32.gmra.mxu3 %vm345_vm9, %v6162_v15 }
0x2294   :  { %2249 = vrot.lane.b32.xlu1 %v5865_v58, %s6268_s18 }
0x229b   :  { %5504 = vmatmul.msk.f32.gmra.mxu3 %vm345_vm9, %v6163_v22 }
0x22a3   :  { %5505 = vmatmul.msk.f32.gmra.mxu3 %vm345_vm9, %v6164_v41 }
0x22ab   :  { %5506 = vmatmul.msk.f32.gmra.mxu3 %vm345_vm9, %v6165_v36  ;;  %v2473_v36 = vld [vmem:[#allocation5 + $0x8] sm:$0xff] }
0x22b3   :  { %5507 = vmatmul.msk.f32.gmra.mxu3 %vm345_vm9, %v6913_v60 }
0x22bb   :  { %5508 = vmatmul.msk.f32.gmra.mxu3 %vm345_vm9, %v6950_v12 }
0x22c3   :  { %5509 = vmatmul.msk.f32.gmra.mxu3 %vm345_vm9, %v7020_v10 }
0x22cb   :  { %5510 = vmatmul.msk.f32.gmra.mxu3 %vm345_vm9, %v7066_v13 }
0x22d3   :  { %5511 = vmatmul.msk.f32.gmra.mxu3 %vm345_vm9, %v7108_v53 }
0x22db   :  { %5512 = vmatmul.msk.f32.gmra.mxu3 %vm345_vm9, %v7136_v32 }
0x22ee   :  { %v2410_v37 = vpop.f32.mrf.mxu3 }
0x22ef   :  { %v2413_v60 = vadd.f32 %v2410_v37, %v273_v29  ;;  %v2474_v37 = vld [vmem:[#allocation5 + $0x10] sm:$0xff] }
0x22f1   :  { %5866 = vtanh.f32 %v2413_v60  ;;  %v5450_v13 = vmul.f32 -1.442695, %v2413_v60  ;;  %v2476_v60 = vld [vmem:[#allocation5 + $0x20] sm:$0xff] }
0x22f3   :  { %5868 = vpow2.f32 %v5450_v13  ;;  %v2480_v13 = vld [vmem:[#allocation5 + $0x40] sm:$0xff] }
0x22f7   :  { %v5867_v23 = vpop.eup %5866 }
0x22f8   :  { %2436 = vrot.lane.b32.xlu0 %v5867_v23, %s6268_s18  ;;  %v2477_v23 = vld [vmem:[#allocation5 + $0x28] sm:$0xff] }
0x22f9   :  { %v5869_v38 = vpop.eup %5868 }
0x22fa   :  { %v2417_v53 = vadd.f32 1.0, %v5869_v38  ;;  %v2481_v38 = vld [vmem:[#allocation5 + $0x48] sm:$0xff] }
0x22fc   :  { %5870 = vrcp.f32 %v2417_v53  ;;  %v2429_v62 = vand.u32 2147483648, %v2417_v53  ;;  %vm2423_vm2 = vweird.f32 %v2417_v53  ;;  %v2427_v40 = vand.u32 2147483647, %v2417_v53 }
0x22fe   :  { %v2430_v31 = vor.u32 1.1754944e-38, %v2429_v62  ;;  %vm2428_vm4 = vcmp.eq.f32.partialorder %v2427_v40, 8.507059e+37  ;;  %v7283_v62 = vld [vmem:[#allocation10 + $0x18] sm:$0xff] }
0x22ff   :  { %3017 = vmatpush.msra.mxu1 %v7283_v62  ;;  %3149 = vmatpush.msra.mxu3 %v7283_v62  ;;  %v2485_v40 = vld [vmem:[#allocation5 + $0x68] sm:$0xff] }
0x2302   :  { %v5871_v45 = vpop.eup %5870 }
0x2303   :  { %v2419_v32 = vmul.f32 %v5871_v45, %v2417_v53  ;;  %vm2424_vm1 = vweird.f32 %v5871_v45  ;;  %v2482_v53 = vld [vmem:[#allocation5 + $0x50] sm:$0xff] }
0x2304   :  { %vm2425_vm3 = vmor %vm2423_vm2, %vm2424_vm1 }
0x2305   :  { %v2420_v52 = vsub.f32 1.0, %v2419_v32  ;;  %v7261_v32 = vld [vmem:[#allocation8 + $0x18] sm:$0xff] }
0x2306   :  { %v2250_v12 = vpop.permute.xlu1 %2249  ;;  %2953 = vmatpush.msra.mxu0 %v7261_v32 }
0x2307   :  { %v2252_v10 = vmul.f32 %v2250_v12, %v2233_v11  ;;  %v2421_v1 = vmul.f32 %v5871_v45, %v2420_v52  ;;  %v2478_v12 = vld [vmem:[#allocation5 + $0x30] sm:$0xff]  ;;  %v7263_v52 = vld [vmem:[#allocation8 + $0x10] sm:$0xff] }
0x2308   :  { %2954 = vmatpush.msra.mxu0 %v7263_v52 }
0x2309   :  { %2254 = vrot.lane.b32.xlu2 %v2252_v10, %s6269_s21  ;;  %v2422_v7 = vadd.f32 %v5871_v45, %v2421_v1  ;;  %v2479_v10 = vld [vmem:[#allocation5 + $0x38] sm:$0xff] }
0x230a   :  { %v7269_v1 = vld [vmem:[#allocation8 + $0x8] sm:$0xff] }
0x230b   :  { %v2426_v20 = vsel %vm2425_vm3, %v5871_v45, %v2422_v7  ;;  %v2483_v45 = vld [vmem:[#allocation5 + $0x58] sm:$0xff]  ;;  %2955 = vmatpush.msra.mxu0 %v7269_v1  ;;  %v2484_v7 = vld [vmem:[#allocation5 + $0x60] sm:$0xff] }
0x230c   :  { %v2431_v2 = vsel %vm2428_vm4, %v2430_v31, %v2426_v20  ;;  %v2486_v20 = vld [vmem:[#allocation5 + $0x70] sm:$0xff]  ;;  %v2487_v31 = vld [vmem:[#allocation5 + $0x78] sm:$0xff] }
0x230d   :  { %v2434_v39 = vmul.f32 %v2431_v2, %v7142_v44 }
0x2363   :  { %v2255_v59 = vpop.permute.xlu2 %2254 }
0x2364   :  { %2257 = vst.msk [vmem:[#allocation4 + $0x70] sm:$0xff] %vm345_vm9, %v2255_v59  ;;  %5447 = vmatmul.msk.f32.vlgmr.msra.gmra.mxu2 %vm345_vm9, %v2255_v59  ;;  %v7273_v59 = vld [vmem:[#allocation8] sm:$0xff] }
0x2365   :  { %3083 = vmatpush.msra.mxu2 %v7261_v32  ;;  %2956 = vmatpush.msra.mxu0 %v7273_v59 }
0x2367   :  { %3084 = vmatpush.msra.mxu2 %v7263_v52 }
0x2369   :  { %3085 = vmatpush.msra.mxu2 %v7269_v1 }
0x236a   :  { %v2437_v63 = vpop.permute.xlu0 %2436 }
0x236b   :  { %v2439_v61 = vmul.f32 %v2437_v63, %v2431_v2  ;;  %v2470_v35 = vld [vmem:[#allocation4 + $0x70] sm:$0xff]  ;;  %3086 = vmatpush.msra.mxu2 %v7273_v59 }
0x236c   :  { %5481 = vmatmul.msk.f32.gmra.mxu1 %vm345_vm9, %v2470_v35  ;;  %5513 = vmatmul.msk.f32.gmra.mxu3 %vm345_vm9, %v2470_v35  ;;  %v7308_v35 = vld [vmem:[#allocation10 + $0x8] sm:$0xff] }
0x236d   :  { %2441 = vrot.lane.b32.xlu1 %v2439_v61, %s6269_s21  ;;  %v7302_v61 = vld [vmem:[#allocation10 + $0x10] sm:$0xff] }
0x236e   :  { %3018 = vmatpush.msra.mxu1 %v7302_v61  ;;  %3150 = vmatpush.msra.mxu3 %v7302_v61 }
0x2370   :  { %3019 = vmatpush.msra.mxu1 %v7308_v35  ;;  %3151 = vmatpush.msra.mxu3 %v7308_v35 }
0x23df   :  { %v2442_v47 = vpop.permute.xlu1 %2441 }
0x23e0   :  { %v2444_v26 = vadd.f32 %v2442_v47, %v2434_v39  ;;  %v7312_v39 = vld [vmem:[#allocation10] sm:$0xff] }
0x23e1   :  { %3020 = vmatpush.msra.mxu1 %v7312_v39  ;;  %3152 = vmatpush.msra.mxu3 %v7312_v39 }
0x23e2   :  { %5872 = vtanh.f32 %v2444_v26 }
0x23e3   :  { %3281 = vmatpush.msrb.mxu1 %v7283_v62  ;;  %3413 = vmatpush.msrb.mxu3 %v7283_v62 }
0x23e5   :  { %3282 = vmatpush.msrb.mxu1 %v7302_v61  ;;  %3414 = vmatpush.msrb.mxu3 %v7302_v61 }
0x23e7   :  { %v2344_v9 = vpop.f32.mrf.mxu2  ;;  %3283 = vmatpush.msrb.mxu1 %v7308_v35  ;;  %3415 = vmatpush.msrb.mxu3 %v7308_v35 }
0x23e8   :  { %v5873_v46 = vpop.eup %5872  ;;  %v2347_v30 = vadd.f32 %v2344_v9, %v231_v24  ;;  %v7328_v24 = vpop.f32.mrf.mxu3 }
0x23e9   :  { %2447 = vrot.lane.b32.xlu2 %v5873_v46, %s6268_s18  ;;  %3284 = vmatpush.msrb.mxu1 %v7312_v39  ;;  %8144 = vst [vmem:[#allocation14_spill] sm:$0xff] %v7328_v24 }
0x23ea   :  { %5874 = vtanh.f32 %v2347_v30  ;;  %v5448_v54 = vmul.f32 -1.442695, %v2347_v30  ;;  %3416 = vmatpush.msrb.mxu3 %v7312_v39 }
0x23ec   :  { %5876 = vpow2.f32 %v5448_v54 }
0x23f0   :  { %v5875_v33 = vpop.eup %5874 }
0x23f1   :  { %2370 = vrot.lane.b32.xlu0 %v5875_v33, %s6268_s18  ;;  %v7335_v33 = vpop.f32.mrf.mxu3 }
0x23f2   :  { %v5877_v42 = vpop.eup %5876  ;;  %8146 = vst [vmem:[#allocation16_spill] sm:$0xff] %v7335_v33 }
0x23f3   :  { %v2351_v48 = vadd.f32 1.0, %v5877_v42 }
0x23f5   :  { %5878 = vrcp.f32 %v2351_v48  ;;  %v2363_v0 = vand.u32 2147483648, %v2351_v48  ;;  %vm2357_vm6 = vweird.f32 %v2351_v48  ;;  %v2361_v5 = vand.u32 2147483647, %v2351_v48 }
0x23f7   :  { %v2364_v43 = vor.u32 1.1754944e-38, %v2363_v0  ;;  %vm2362_vm8 = vcmp.eq.f32.partialorder %v2361_v5, 8.507059e+37 }
0x23fb   :  { %v5879_v49 = vpop.eup %5878 }
0x23fc   :  { %v2353_v57 = vmul.f32 %v5879_v49, %v2351_v48  ;;  %vm2358_vm5 = vweird.f32 %v5879_v49 }
0x23fd   :  { %vm2359_vm7 = vmor %vm2357_vm6, %vm2358_vm5 }
0x23fe   :  { %v2354_v25 = vsub.f32 1.0, %v2353_v57 }
0x2400   :  { %v2355_v27 = vmul.f32 %v5879_v49, %v2354_v25 }
0x2402   :  { %v2356_v55 = vadd.f32 %v5879_v49, %v2355_v27 }
0x2404   :  { %v2360_v11 = vsel %vm2359_vm7, %v5879_v49, %v2356_v55 }
0x2405   :  { %v7205_v8 = vsel %vm2362_vm8, %v2364_v43, %v2360_v11 }
0x2406   :  { %v2368_v58 = vmul.f32 %v7205_v8, %v7169_v4  ;;  %v2475_v4 = vld [vmem:[#allocation5 + $0x18] sm:$0xff] }
0x2443   :  { %v2448_v44 = vpop.permute.xlu2 %2447 }
0x2444   :  { %v2450_v56 = vmul.f32 %v2448_v44, %v2431_v2  ;;  %v7343_v44 = vpop.f32.mrf.mxu1 }
0x2446   :  { %2452 = vrot.lane.b32.xlu1 %v2450_v56, %s6269_s21  ;;  %v7345_v56 = vpop.f32.mrf.mxu3 }
0x2447   :  { %8148 = vst [vmem:[#allocation18_spill] sm:$0xff] %v7345_v56 }
0x244c   :  { %v7354_v25 = vpop.f32.mrf.mxu1 }
0x244e   :  { %v7357_v27 = vpop.f32.mrf.mxu3 }
0x244f   :  { %8150 = vst [vmem:[#allocation20_spill] sm:$0xff] %v7357_v27 }
0x2454   :  { %v7362_v0 = vpop.f32.mrf.mxu1 }
0x2456   :  { %v7366_v5 = vpop.f32.mrf.mxu3 }
0x2457   :  { %8152 = vst [vmem:[#allocation22_spill] sm:$0xff] %v7366_v5 }
0x245c   :  { %v7368_v11 = vpop.f32.mrf.mxu1 }
0x2463   :  { %v2371_v6 = vpop.permute.xlu0 %2370 }
0x2464   :  { %v2373_v21 = vmul.f32 %v2371_v6, %v7205_v8  ;;  %v7374_v6 = vpop.f32.mrf.mxu3 }
0x2465   :  { %8154 = vst [vmem:[#allocation24_spill] sm:$0xff] %v7374_v6 }
0x2466   :  { %2375 = vrot.lane.b32.xlu2 %v2373_v21, %s6269_s21  ;;  %v7376_v21 = vpop.f32.mrf.mxu1 }
0x246c   :  { %v7384_v19 = vpop.f32.mrf.mxu3 }
0x246e   :  { %v7382_v18 = vpop.f32.mrf.mxu1 }
0x2474   :  { %v7392_v16 = vpop.f32.mrf.mxu3 }
0x2476   :  { %v7390_v51 = vpop.f32.mrf.mxu1 }
0x24b8   :  { %v2453_v28 = vpop.permute.xlu1 %2452 }
0x24b9   :  { %2455 = vst.msk [vmem:[#allocation5] sm:$0xff] %vm345_vm9, %v2453_v28 }
0x24c0   :  { %v2376_v15 = vpop.permute.xlu2 %2375  ;;  %v2472_v22 = vld [vmem:[#allocation5] sm:$0xff] }
0x24c1   :  { %v2378_v41 = vadd.f32 %v2376_v15, %v2368_v58  ;;  %5451 = vmatmul.msk.f32.vlgmr.msrb.gmra.mxu0 %vm345_vm9, %v2472_v22  ;;  %5483 = vmatmul.msk.f32.vlgmr.msrb.gmra.mxu2 %vm345_vm9, %v2472_v22  ;;  %v7396_v58 = vpop.f32.mrf.mxu1  ;;  %v7400_v22 = vpop.f32.mrf.mxu3 }
0x24c2   :  { %3215 = vmatpush.msrb.mxu0 %v7261_v32  ;;  %3347 = vmatpush.msrb.mxu2 %v7261_v32 }
0x24c3   :  { %5880 = vtanh.f32 %v2378_v41 }
0x24c4   :  { %3216 = vmatpush.msrb.mxu0 %v7263_v52  ;;  %3348 = vmatpush.msrb.mxu2 %v7263_v52 }
0x24c6   :  { %3217 = vmatpush.msrb.mxu0 %v7269_v1  ;;  %3349 = vmatpush.msrb.mxu2 %v7269_v1 }
0x24c8   :  { %3218 = vmatpush.msrb.mxu0 %v7273_v59  ;;  %3350 = vmatpush.msrb.mxu2 %v7273_v59 }
0x24c9   :  { %v5881_v29 = vpop.eup %5880  ;;  %5452 = vmatmul.msk.f32.gmra.mxu0 %vm345_vm9, %v2473_v36  ;;  %5484 = vmatmul.msk.f32.gmra.mxu2 %vm345_vm9, %v2473_v36  ;;  %v7402_v41 = vpop.f32.mrf.mxu1 }
0x24ca   :  { %2381 = vrot.lane.b32.xlu0 %v5881_v29, %s6268_s18 }
0x24d1   :  { %5453 = vmatmul.msk.f32.gmra.mxu0 %vm345_vm9, %v2474_v37  ;;  %5485 = vmatmul.msk.f32.gmra.mxu2 %vm345_vm9, %v2474_v37  ;;  %v7408_v37 = vpop.f32.mrf.mxu3 }
0x24d9   :  { %5454 = vmatmul.msk.f32.gmra.mxu0 %vm345_vm9, %v2475_v4  ;;  %5486 = vmatmul.msk.f32.gmra.mxu2 %vm345_vm9, %v2475_v4  ;;  %v7410_v4 = vpop.f32.mrf.mxu1 }
0x24da   :  { %8155 = vst [vmem:[#allocation25_spill] sm:$0xff] %v7410_v4 }
0x24e1   :  { %5455 = vmatmul.msk.f32.gmra.mxu0 %vm345_vm9, %v2476_v60  ;;  %5487 = vmatmul.msk.f32.gmra.mxu2 %vm345_vm9, %v2476_v60 }
0x24e9   :  { %5456 = vmatmul.msk.f32.gmra.mxu0 %vm345_vm9, %v2477_v23  ;;  %5488 = vmatmul.msk.f32.gmra.mxu2 %vm345_vm9, %v2477_v23 }
0x24f1   :  { %5457 = vmatmul.msk.f32.gmra.mxu0 %vm345_vm9, %v2478_v12  ;;  %5489 = vmatmul.msk.f32.gmra.mxu2 %vm345_vm9, %v2478_v12  ;;  %v7416_v12 = vpop.f32.mrf.mxu1 }
0x24f2   :  { %8157 = vst [vmem:[#allocation27_spill] sm:$0xff] %v7416_v12 }
0x24f9   :  { %5458 = vmatmul.msk.f32.gmra.mxu0 %vm345_vm9, %v2479_v10  ;;  %5490 = vmatmul.msk.f32.gmra.mxu2 %vm345_vm9, %v2479_v10  ;;  %v7418_v10 = vpop.f32.mrf.mxu3 }
0x2501   :  { %5459 = vmatmul.msk.f32.gmra.mxu0 %vm345_vm9, %v2480_v13  ;;  %5491 = vmatmul.msk.f32.gmra.mxu2 %vm345_vm9, %v2480_v13 }
0x2509   :  { %5460 = vmatmul.msk.f32.gmra.mxu0 %vm345_vm9, %v2481_v38  ;;  %5492 = vmatmul.msk.f32.gmra.mxu2 %vm345_vm9, %v2481_v38 }
0x2511   :  { %5461 = vmatmul.msk.f32.gmra.mxu0 %vm345_vm9, %v2482_v53  ;;  %5493 = vmatmul.msk.f32.gmra.mxu2 %vm345_vm9, %v2482_v53  ;;  %v7424_v53 = vpop.f32.mrf.mxu1 }
0x2512   :  { %8159 = vst [vmem:[#allocation29_spill] sm:$0xff] %v7424_v53 }
0x2519   :  { %5462 = vmatmul.msk.f32.gmra.mxu0 %vm345_vm9, %v2483_v45  ;;  %5494 = vmatmul.msk.f32.gmra.mxu2 %vm345_vm9, %v2483_v45  ;;  %v7426_v45 = vpop.f32.mrf.mxu3 }
0x2521   :  { %5463 = vmatmul.msk.f32.gmra.mxu0 %vm345_vm9, %v2484_v7  ;;  %5495 = vmatmul.msk.f32.gmra.mxu2 %vm345_vm9, %v2484_v7 }
0x2529   :  { %5464 = vmatmul.msk.f32.gmra.mxu0 %vm345_vm9, %v2485_v40  ;;  %5496 = vmatmul.msk.f32.gmra.mxu2 %vm345_vm9, %v2485_v40  ;;  %v7430_v40 = vpop.f32.mrf.mxu1 }
0x252a   :  { %8161 = vst [vmem:[#allocation31_spill] sm:$0xff] %v7430_v40 }
0x2531   :  { %5465 = vmatmul.msk.f32.gmra.mxu0 %vm345_vm9, %v2486_v20  ;;  %5497 = vmatmul.msk.f32.gmra.mxu2 %vm345_vm9, %v2486_v20 }
0x2539   :  { %5466 = vmatmul.msk.f32.gmra.mxu0 %vm345_vm9, %v2487_v31  ;;  %5498 = vmatmul.msk.f32.gmra.mxu2 %vm345_vm9, %v2487_v31  ;;  %v7434_v31 = vpop.f32.mrf.mxu3 }
0x253c   :  { %v2382_v2 = vpop.permute.xlu0 %2381 }
0x253d   :  { %v2384_v63 = vmul.f32 %v2382_v2, %v7205_v8  ;;  %v7436_v2 = vpop.f32.mrf.mxu1 }
0x253e   :  { %v7324_v47 = vpop.f32.mrf.mxu0  ;;  %8162 = vst [vmem:[#allocation32_spill] sm:$0xff] %v7436_v2 }
0x253f   :  { %2386 = vrot.lane.b32.xlu1 %v2384_v63, %s6269_s21 }
0x2541   :  { %2957 = vmatmul.f32.vlgmr.msra.gmra.mxu0 %v6267_v14 }
0x2542   :  { %3479 = vmatpush.msra.mxu0 %v7261_v32 }
0x2544   :  { %3480 = vmatpush.msra.mxu0 %v7263_v52  ;;  %v7326_v26 = vpop.f32.mrf.mxu2 }
0x2545   :  { %8143 = vst [vmem:[#allocation13_spill] sm:$0xff] %v7326_v26  ;;  %v7444_v24 = vpop.f32.mrf.mxu1 }
0x2546   :  { %3481 = vmatpush.msra.mxu0 %v7269_v1  ;;  %v7330_v9 = vpop.f32.mrf.mxu0  ;;  %8164 = vst [vmem:[#allocation34_spill] sm:$0xff] %v7444_v24 }
0x2548   :  { %3482 = vmatpush.msra.mxu0 %v7273_v59 }
0x254c   :  { %v7332_v46 = vpop.f32.mrf.mxu2 }
0x254d   :  { %8145 = vst [vmem:[#allocation15_spill] sm:$0xff] %v7332_v46 }
0x254e   :  { %v7337_v54 = vpop.f32.mrf.mxu0 }
0x2554   :  { %v7341_v48 = vpop.f32.mrf.mxu2 }
0x2555   :  { %8147 = vst [vmem:[#allocation17_spill] sm:$0xff] %v7341_v48 }
0x2556   :  { %v7348_v49 = vpop.f32.mrf.mxu0 }
0x255c   :  { %v7351_v57 = vpop.f32.mrf.mxu2 }
0x255d   :  { %8149 = vst [vmem:[#allocation19_spill] sm:$0xff] %v7351_v57 }
0x255e   :  { %v7360_v55 = vpop.f32.mrf.mxu0 }
0x2566   :  { %v7370_v43 = vpop.f32.mrf.mxu0 }
0x256e   :  { %v7378_v34 = vpop.f32.mrf.mxu0 }
0x2576   :  { %v7386_v50 = vpop.f32.mrf.mxu0 }
0x257e   :  { %v7394_v28 = vpop.f32.mrf.mxu0 }
0x2586   :  { %v7404_v36 = vpop.f32.mrf.mxu0 }
0x258e   :  { %v7412_v60 = vpop.f32.mrf.mxu0 }
0x258f   :  { %8156 = vst [vmem:[#allocation26_spill] sm:$0xff] %v7412_v60 }
0x2596   :  { %v7420_v13 = vpop.f32.mrf.mxu0 }
0x2597   :  { %8158 = vst [vmem:[#allocation28_spill] sm:$0xff] %v7420_v13 }
0x259e   :  { %v7428_v7 = vpop.f32.mrf.mxu0 }
0x259f   :  { %8160 = vst [vmem:[#allocation30_spill] sm:$0xff] %v7428_v7 }
0x25a6   :  { %v7438_v63 = vpop.f32.mrf.mxu0 }
0x25a7   :  { %8163 = vst [vmem:[#allocation33_spill] sm:$0xff] %v7438_v63  ;;  %v7459_v63 = vld [vmem:[%s8139_s12] ss:$0 sm:$0xff] }
0x25ae   :  { %v7446_v26 = vpop.f32.mrf.mxu0 }
0x25af   :  { %8165 = vst [vmem:[#allocation35_spill] sm:$0xff] %v7446_v26  ;;  %v2675_v26 = vadd.f32 %v7343_v44, %v7324_v47 }
0x25b1   :  { %v2387_v30 = vpop.permute.xlu1 %2386 }
0x25b2   :  { %2389 = vst.msk [vmem:[#allocation4 + $0x78] sm:$0xff] %vm345_vm9, %v2387_v30 }
0x25b6   :  { %v7454_v48 = vpop.f32.mrf.mxu0 }
0x25b7   :  { %8167 = vst [vmem:[#allocation37_spill] sm:$0xff] %v7454_v48 }
0x25b9   :  { %v2471_v42 = vld [vmem:[#allocation4 + $0x78] sm:$0xff] }
0x25ba   :  { %5482 = vmatmul.msk.f32.gmra.mxu1 %vm345_vm9, %v2471_v42  ;;  %5514 = vmatmul.msk.f32.gmra.mxu3 %vm345_vm9, %v2471_v42  ;;  %v7442_v42 = vpop.f32.mrf.mxu3 }
0x25be   :  { %v2958_v57 = vpop.f32.mrf.mxu0 }
0x25c2   :  { %3021 = vmatmul.f32.vlgmr.msra.gmra.mxu1 %v6267_v14  ;;  %v7364_v14 = vpop.f32.mrf.mxu2  ;;  %v7450_v46 = vpop.f32.mrf.mxu3 }
0x25c3   :  { %3545 = vmatpush.msra.mxu1 %v7283_v62  ;;  %8151 = vst [vmem:[#allocation21_spill] sm:$0xff] %v7364_v14 }
0x25c5   :  { %3546 = vmatpush.msra.mxu1 %v7302_v61 }
0x25c7   :  { %3547 = vmatpush.msra.mxu1 %v7308_v35 }
0x25c9   :  { %3548 = vmatpush.msra.mxu1 %v7312_v39 }
0x25ca   :  { %v7372_v8 = vpop.f32.mrf.mxu2 }
0x25cb   :  { %8153 = vst [vmem:[#allocation23_spill] sm:$0xff] %v7372_v8 }
0x25d2   :  { %v7380_v17 = vpop.f32.mrf.mxu2 }
0x25da   :  { %v7388_v3 = vpop.f32.mrf.mxu2 }
0x25e2   :  { %v7398_v15 = vpop.f32.mrf.mxu2 }
0x25ea   :  { %v7406_v29 = vpop.f32.mrf.mxu2 }
0x25f2   :  { %v7414_v23 = vpop.f32.mrf.mxu2 }
0x25fa   :  { %v7422_v38 = vpop.f32.mrf.mxu2 }
0x2602   :  { %v7432_v20 = vpop.f32.mrf.mxu2 }
0x260a   :  { %v7440_v30 = vpop.f32.mrf.mxu2 }
0x2612   :  { %v7448_v33 = vpop.f32.mrf.mxu2 }
0x261a   :  { %v2828_v40 = vpop.f32.mrf.mxu2 }
0x2637   :  { %v7452_v56 = vpop.f32.mrf.mxu1 }
0x2638   :  { %8166 = vst [vmem:[#allocation36_spill] sm:$0xff] %v7452_v56  ;;  %v7467_v56 = vld [vmem:[%s8136_s9] ss:$0 sm:$0xff] }
0x263d   :  { %v2893_v2 = vpop.f32.mrf.mxu3 }
0x263e   :  { %v2894_v7 = vadd.f32 %v2893_v2, %v2828_v40  ;;  %v2726_v40 = vadd.f32 %v7467_v56, %v2675_v26 }
0x263f   :  { %v3022_v27 = vpop.f32.mrf.mxu1 }
0x2640   :  { %v2915_v24 = vadd.f32 %v7459_v63, %v2894_v7  ;;  %v2961_v2 = vadd.f32 %v2958_v57, %v2726_v40 }
0x2642   :  { %v3025_v48 = vadd.f32 %v3022_v27, %v2915_v24 }
0x2644   :  { %5882 = vtanh.f32 %v3025_v48  ;;  %v5516_v7 = vmul.f32 -1.442695, %v3025_v48 }
0x2645   :  { %5884 = vtanh.f32 %v2961_v2 }
0x2646   :  { %5886 = vpow2.f32 %v5516_v7  ;;  %v5515_v7 = vmul.f32 -1.442695, %v2961_v2 }
0x264a   :  { %v5883_v53 = vpop.eup %5882 }
0x264b   :  { %3048 = vrot.lane.b32.xlu2 %v5883_v53, %s6268_s18  ;;  %v5885_v13 = vpop.eup %5884 }
0x264c   :  { %v5887_v47 = vpop.eup %5886 }
0x264d   :  { %v3029_v44 = vadd.f32 1.0, %v5887_v47 }
0x264f   :  { %5888 = vrcp.f32 %v3029_v44  ;;  %v3041_v26 = vand.u32 2147483648, %v3029_v44  ;;  %vm3035_vm11 = vweird.f32 %v3029_v44  ;;  %v3039_v57 = vand.u32 2147483647, %v3029_v44 }
0x2650   :  { %5890 = vpow2.f32 %v5515_v7 }
0x2651   :  { %v3042_v40 = vor.u32 1.1754944e-38, %v3041_v26  ;;  %vm3040_vm13 = vcmp.eq.f32.partialorder %v3039_v57, 8.507059e+37 }
0x2653   :  { %2984 = vrot.lane.b32.xlu2 %v5885_v13, %s6268_s18 }
0x2655   :  { %v5889_v5 = vpop.eup %5888 }
0x2656   :  { %v3031_v14 = vmul.f32 %v5889_v5, %v3029_v44  ;;  %vm3036_vm10 = vweird.f32 %v5889_v5  ;;  %v5891_v47 = vpop.eup %5890 }
0x2657   :  { %vm3037_vm12 = vmor %vm3035_vm11, %vm3036_vm10  ;;  %v2965_v6 = vadd.f32 1.0, %v5891_v47 }
0x2658   :  { %v3032_v24 = vsub.f32 1.0, %v3031_v14 }
0x2659   :  { %5892 = vrcp.f32 %v2965_v6  ;;  %v2977_v26 = vand.u32 2147483648, %v2965_v6  ;;  %vm2971_vm15 = vweird.f32 %v2965_v6  ;;  %v2975_v2 = vand.u32 2147483647, %v2965_v6 }
0x265a   :  { %v3033_v27 = vmul.f32 %v5889_v5, %v3032_v24 }
0x265b   :  { %vm2976_vm1 = vcmp.eq.f32.partialorder %v2975_v2, 8.507059e+37 }
0x265c   :  { %v3034_v12 = vadd.f32 %v5889_v5, %v3033_v27 }
0x265e   :  { %v3038_v53 = vsel %vm3037_vm12, %v5889_v5, %v3034_v12 }
0x265f   :  { %v3043_v13 = vsel %vm3040_vm13, %v3042_v40, %v3038_v53  ;;  %v5893_v14 = vpop.eup %5892  ;;  %v2978_v53 = vor.u32 1.1754944e-38, %v2977_v26 }
0x2660   :  { %v2967_v24 = vmul.f32 %v5893_v14, %v2965_v6  ;;  %v3046_v27 = vmul.f32 0.0, %v3043_v13  ;;  %vm2972_vm14 = vweird.f32 %v5893_v14 }
0x2661   :  { %vm2973_vm0 = vmor %vm2971_vm15, %vm2972_vm14 }
0x2662   :  { %v2968_v8 = vsub.f32 1.0, %v2967_v24 }
0x2664   :  { %v2969_v5 = vmul.f32 %v5893_v14, %v2968_v8 }
0x2666   :  { %v2970_v12 = vadd.f32 %v5893_v14, %v2969_v5 }
0x2668   :  { %v2974_v57 = vsel %vm2973_vm0, %v5893_v14, %v2970_v12 }
0x26a5   :  { %v3049_v60 = vpop.permute.xlu2 %3048 }
0x26a6   :  { %v3051_v48 = vmul.f32 %v3049_v60, %v3043_v13 }
0x26a8   :  { %3053 = vrot.lane.b32.xlu0 %v3051_v48, %s6269_s21  ;;  %v2979_v48 = vsel %vm2976_vm1, %v2978_v53, %v2974_v57 }
0x26a9   :  { %v2982_v8 = vmul.f32 0.0, %v2979_v48 }
0x26ad   :  { %v2985_v40 = vpop.permute.xlu2 %2984 }
0x26ae   :  { %v2987_v7 = vmul.f32 %v2985_v40, %v2979_v48 }
0x271a   :  { %v3054_v4 = vpop.permute.xlu0 %3053 }
0x271b   :  { %v7473_v44 = vadd.f32 %v3054_v4, %v3046_v27 }
0x271d   :  { %5894 = vtanh.f32 %v7473_v44 }
0x2723   :  { %v5895_v60 = vpop.eup %5894 }
0x2724   :  { %3059 = vrot.lane.b32.xlu1 %v5895_v60, %s6268_s18  ;;  %v2891_v60 = vadd.f32 %v7450_v46, %v7448_v33 }
0x2726   :  { %v2914_v26 = vadd.f32 %v7459_v63, %v2891_v60 }
0x272c   :  { %2989 = vrot.lane.b32.xlu1 %v2987_v7, %s6269_s21 }
0x2796   :  { %v3060_v4 = vpop.permute.xlu1 %3059 }
0x2797   :  { %v3062_v47 = vmul.f32 %v3060_v4, %v3043_v13 }
0x2799   :  { %3064 = vrot.lane.b32.xlu0 %v3062_v47, %s6269_s21  ;;  %v2678_v47 = vadd.f32 %v7354_v25, %v7330_v9 }
0x279b   :  { %v2727_v46 = vadd.f32 %v7467_v56, %v2678_v47 }
0x279e   :  { %v2990_v24 = vpop.permute.xlu1 %2989 }
0x279f   :  { %v7479_v27 = vadd.f32 %v2990_v24, %v2982_v8 }
0x27a1   :  { %5896 = vtanh.f32 %v7479_v27 }
0x27a7   :  { %v5897_v6 = vpop.eup %5896 }
0x27a8   :  { %2995 = vrot.lane.b32.xlu2 %v5897_v6, %s6268_s18 }
0x2802   :  { %v2996_v14 = vpop.permute.xlu2 %2995 }
0x2803   :  { %v2998_v5 = vmul.f32 %v2996_v14, %v2979_v48 }
0x2805   :  { %3000 = vrot.lane.b32.xlu0 %v2998_v5, %s6269_s21 }
0x280b   :  { %v3065_v12 = vpop.permute.xlu0 %3064 }
0x280c   :  { %3067 = vst.msk [vmem:[#allocation5 + $0x78] sm:$0xff] %vm345_vm9, %v3065_v12  ;;  %5519 = vmatmul.msk.f32.vlgmr.msra.gmra.mxu3 %vm345_vm9, %v3065_v12 }
0x280d   :  { %3677 = vmatpush.msra.mxu3 %v7283_v62 }
0x280f   :  { %3678 = vmatpush.msra.mxu3 %v7302_v61 }
0x2811   :  { %3679 = vmatpush.msra.mxu3 %v7308_v35 }
0x2813   :  { %3680 = vmatpush.msra.mxu3 %v7312_v39 }
0x2877   :  { %v3001_v13 = vpop.permute.xlu0 %3000 }
0x2878   :  { %3003 = vst.msk [vmem:[#allocation4] sm:$0xff] %vm345_vm9, %v3001_v13  ;;  %5517 = vmatmul.msk.f32.vlgmr.msra.gmra.mxu2 %vm345_vm9, %v3001_v13 }
0x2879   :  { %3611 = vmatpush.msra.mxu2 %v7261_v32 }
0x287b   :  { %3612 = vmatpush.msra.mxu2 %v7263_v52 }
0x287d   :  { %3613 = vmatpush.msra.mxu2 %v7269_v1 }
0x287f   :  { %3614 = vmatpush.msra.mxu2 %v7273_v59 }
0x288f   :  { %v3154_v2 = vpop.f32.mrf.mxu3 }
0x2890   :  { %v3157_v57 = vadd.f32 %v3154_v2, %v2914_v26 }
0x2892   :  { %5898 = vtanh.f32 %v3157_v57  ;;  %v5520_v40 = vmul.f32 -1.442695, %v3157_v57 }
0x2894   :  { %5900 = vpow2.f32 %v5520_v40 }
0x2898   :  { %v5899_v53 = vpop.eup %5898 }
0x2899   :  { %3180 = vrot.lane.b32.xlu1 %v5899_v53, %s6268_s18 }
0x289a   :  { %v5901_v48 = vpop.eup %5900 }
0x289b   :  { %v3161_v7 = vadd.f32 1.0, %v5901_v48 }
0x289d   :  { %5902 = vrcp.f32 %v3161_v7  ;;  %v3173_v13 = vand.u32 2147483648, %v3161_v7  ;;  %vm3167_vm3 = vweird.f32 %v3161_v7  ;;  %v3171_v60 = vand.u32 2147483647, %v3161_v7 }
0x289f   :  { %v3174_v2 = vor.u32 1.1754944e-38, %v3173_v13  ;;  %vm3172_vm5 = vcmp.eq.f32.partialorder %v3171_v60, 8.507059e+37 }
0x28a3   :  { %v5903_v4 = vpop.eup %5902 }
0x28a4   :  { %v3163_v8 = vmul.f32 %v5903_v4, %v3161_v7  ;;  %vm3168_vm2 = vweird.f32 %v5903_v4 }
0x28a5   :  { %vm3169_vm4 = vmor %vm3167_vm3, %vm3168_vm2 }
0x28a6   :  { %v3164_v6 = vsub.f32 1.0, %v3163_v8 }
0x28a8   :  { %v3165_v14 = vmul.f32 %v5903_v4, %v3164_v6 }
0x28aa   :  { %v3166_v12 = vadd.f32 %v5903_v4, %v3165_v14 }
0x28ac   :  { %v3170_v26 = vsel %vm3169_vm4, %v5903_v4, %v3166_v12 }
0x28ad   :  { %v3175_v9 = vsel %vm3172_vm5, %v3174_v2, %v3170_v26 }
0x28fb   :  { %v3088_v33 = vpop.f32.mrf.mxu2 }
0x28fc   :  { %v3091_v24 = vadd.f32 %v3088_v33, %v2727_v46  ;;  %v3178_v46 = vmul.f32 %v3175_v9, %v7473_v44 }
0x28fe   :  { %5904 = vtanh.f32 %v3091_v24  ;;  %v5518_v53 = vmul.f32 -1.442695, %v3091_v24 }
0x2900   :  { %5906 = vpow2.f32 %v5518_v53 }
0x2904   :  { %v5905_v5 = vpop.eup %5904 }
0x2905   :  { %3114 = vrot.lane.b32.xlu1 %v5905_v5, %s6268_s18 }
0x2906   :  { %v5907_v40 = vpop.eup %5906 }
0x2907   :  { %v3095_v48 = vadd.f32 1.0, %v5907_v40 }
0x2909   :  { %5908 = vrcp.f32 %v3095_v48  ;;  %v3107_v12 = vand.u32 2147483648, %v3095_v48  ;;  %vm3101_vm7 = vweird.f32 %v3095_v48  ;;  %v3105_v24 = vand.u32 2147483647, %v3095_v48 }
0x290b   :  { %v3181_v25 = vpop.permute.xlu1 %3180  ;;  %v3108_v60 = vor.u32 1.1754944e-38, %v3107_v12  ;;  %vm3106_vm10 = vcmp.eq.f32.partialorder %v3105_v24, 8.507059e+37 }
0x290c   :  { %v3183_v57 = vmul.f32 %v3181_v25, %v3175_v9 }
0x290e   :  { %3185 = vrot.lane.b32.xlu2 %v3183_v57, %s6269_s21 }
0x290f   :  { %v5909_v47 = vpop.eup %5908 }
0x2910   :  { %v3097_v8 = vmul.f32 %v5909_v47, %v3095_v48  ;;  %vm3102_vm6 = vweird.f32 %v5909_v47 }
0x2911   :  { %vm3103_vm8 = vmor %vm3101_vm7, %vm3102_vm6 }
0x2912   :  { %v3098_v7 = vsub.f32 1.0, %v3097_v8 }
0x2914   :  { %v3099_v4 = vmul.f32 %v5909_v47, %v3098_v7 }
0x2916   :  { %v3100_v14 = vadd.f32 %v5909_v47, %v3099_v4 }
0x2918   :  { %v3104_v13 = vsel %vm3103_vm8, %v5909_v47, %v3100_v14 }
0x2919   :  { %v3109_v44 = vsel %vm3106_vm10, %v3108_v60, %v3104_v13 }
0x291a   :  { %v3112_v53 = vmul.f32 %v3109_v44, %v7479_v27 }
0x2968   :  { %v3186_v33 = vpop.permute.xlu2 %3185 }
0x2969   :  { %v7506_v6 = vadd.f32 %v3186_v33, %v3178_v46  ;;  %v2888_v46 = vadd.f32 %v7442_v42, %v7440_v30 }
0x296b   :  { %5910 = vtanh.f32 %v7506_v6  ;;  %v2913_v33 = vadd.f32 %v7459_v63, %v2888_v46 }
0x2971   :  { %v5911_v5 = vpop.eup %5910 }
0x2972   :  { %3191 = vrot.lane.b32.xlu0 %v5911_v5, %s6268_s18 }
0x2977   :  { %v3115_v26 = vpop.permute.xlu1 %3114 }
0x2978   :  { %v3117_v2 = vmul.f32 %v3115_v26, %v3109_v44 }
0x297a   :  { %3119 = vrot.lane.b32.xlu0 %v3117_v2, %s6269_s21 }
0x29e4   :  { %v3192_v25 = vpop.permute.xlu0 %3191 }
0x29e5   :  { %v3194_v57 = vmul.f32 %v3192_v25, %v3175_v9 }
0x29e7   :  { %3196 = vrot.lane.b32.xlu2 %v3194_v57, %s6269_s21 }
0x29ec   :  { %v3120_v40 = vpop.permute.xlu0 %3119 }
0x29ed   :  { %v7513_v8 = vadd.f32 %v3120_v40, %v3112_v53 }
0x29ef   :  { %5912 = vtanh.f32 %v7513_v8 }
0x29f5   :  { %v5913_v48 = vpop.eup %5912 }
0x29f6   :  { %3125 = vrot.lane.b32.xlu1 %v5913_v48, %s6268_s18 }
0x2a41   :  { %v3197_v47 = vpop.permute.xlu2 %3196 }
0x2a42   :  { %3199 = vst.msk [vmem:[#allocation5 + $0x70] sm:$0xff] %vm345_vm9, %v3197_v47  ;;  %5523 = vmatmul.msk.f32.vlgmr.msrb.gmra.mxu1 %vm345_vm9, %v3197_v47 }
0x2a43   :  { %3809 = vmatpush.msrb.mxu1 %v7283_v62 }
0x2a45   :  { %3810 = vmatpush.msrb.mxu1 %v7302_v61 }
0x2a47   :  { %3811 = vmatpush.msrb.mxu1 %v7308_v35 }
0x2a49   :  { %3812 = vmatpush.msrb.mxu1 %v7312_v39 }
0x2a68   :  { %v3126_v27 = vpop.permute.xlu1 %3125 }
0x2a69   :  { %v3128_v9 = vmul.f32 %v3126_v27, %v3109_v44  ;;  %v2681_v27 = vadd.f32 %v7362_v0, %v7337_v54 }
0x2a6b   :  { %3130 = vrot.lane.b32.xlu2 %v3128_v9, %s6269_s21  ;;  %v2728_v9 = vadd.f32 %v7467_v56, %v2681_v27 }
0x2abf   :  { %v3286_v7 = vpop.f32.mrf.mxu1 }
0x2ac0   :  { %v3289_v4 = vadd.f32 %v3286_v7, %v2913_v33 }
0x2ac2   :  { %5914 = vtanh.f32 %v3289_v4  ;;  %v5524_v30 = vmul.f32 -1.442695, %v3289_v4 }
0x2ac4   :  { %5916 = vpow2.f32 %v5524_v30 }
0x2ac5   :  { %v3131_v14 = vpop.permute.xlu2 %3130 }
0x2ac6   :  { %3133 = vst.msk [vmem:[#allocation4 + $0x8] sm:$0xff] %vm345_vm9, %v3131_v14  ;;  %5521 = vmatmul.msk.f32.vlgmr.msrb.gmra.mxu0 %vm345_vm9, %v3131_v14 }
0x2ac7   :  { %3743 = vmatpush.msrb.mxu0 %v7261_v32 }
0x2ac8   :  { %v5915_v5 = vpop.eup %5914 }
0x2ac9   :  { %3312 = vrot.lane.b32.xlu0 %v5915_v5, %s6268_s18  ;;  %3744 = vmatpush.msrb.mxu0 %v7263_v52 }
0x2aca   :  { %v5917_v42 = vpop.eup %5916 }
0x2acb   :  { %3745 = vmatpush.msrb.mxu0 %v7269_v1  ;;  %v3293_v12 = vadd.f32 1.0, %v5917_v42 }
0x2acd   :  { %3746 = vmatpush.msrb.mxu0 %v7273_v59  ;;  %5918 = vrcp.f32 %v3293_v12  ;;  %v3305_v2 = vand.u32 2147483648, %v3293_v12  ;;  %vm3299_vm12 = vweird.f32 %v3293_v12  ;;  %v3303_v25 = vand.u32 2147483647, %v3293_v12 }
0x2acf   :  { %v3306_v53 = vor.u32 1.1754944e-38, %v3305_v2  ;;  %vm3304_vm14 = vcmp.eq.f32.partialorder %v3303_v25, 8.507059e+37 }
0x2ad3   :  { %v5919_v24 = vpop.eup %5918 }
0x2ad4   :  { %v3295_v13 = vmul.f32 %v5919_v24, %v3293_v12  ;;  %vm3300_vm11 = vweird.f32 %v5919_v24 }
0x2ad5   :  { %vm3301_vm13 = vmor %vm3299_vm12, %vm3300_vm11 }
0x2ad6   :  { %v3296_v60 = vsub.f32 1.0, %v3295_v13 }
0x2ad8   :  { %v3297_v44 = vmul.f32 %v5919_v24, %v3296_v60 }
0x2ada   :  { %v3298_v26 = vadd.f32 %v5919_v24, %v3297_v44 }
0x2adc   :  { %v3302_v57 = vsel %vm3301_vm13, %v5919_v24, %v3298_v26 }
0x2add   :  { %v3307_v40 = vsel %vm3304_vm14, %v3306_v53, %v3302_v57 }
0x2ade   :  { %v3310_v12 = vmul.f32 %v3307_v40, %v7506_v6 }
0x2b3b   :  { %v3313_v48 = vpop.permute.xlu0 %3312 }
0x2b3c   :  { %v3315_v47 = vmul.f32 %v3313_v48, %v3307_v40 }
0x2b3e   :  { %3317 = vrot.lane.b32.xlu1 %v3315_v47, %s6269_s21 }
0x2b43   :  { %v3220_v46 = vpop.f32.mrf.mxu0 }
0x2b44   :  { %v3223_v33 = vadd.f32 %v3220_v46, %v2728_v9 }
0x2b46   :  { %5920 = vtanh.f32 %v3223_v33  ;;  %v5522_v4 = vmul.f32 -1.442695, %v3223_v33 }
0x2b48   :  { %5922 = vpow2.f32 %v5522_v4 }
0x2b4c   :  { %v5921_v7 = vpop.eup %5920 }
0x2b4d   :  { %3246 = vrot.lane.b32.xlu0 %v5921_v7, %s6268_s18 }
0x2b4e   :  { %v5923_v14 = vpop.eup %5922 }
0x2b4f   :  { %v3227_v5 = vadd.f32 1.0, %v5923_v14  ;;  %v2885_v14 = vadd.f32 %v7434_v31, %v7432_v20 }
0x2b51   :  { %5924 = vrcp.f32 %v3227_v5  ;;  %v3239_v26 = vand.u32 2147483648, %v3227_v5  ;;  %vm3233_vm0 = vweird.f32 %v3227_v5  ;;  %v3237_v2 = vand.u32 2147483647, %v3227_v5 }
0x2b53   :  { %v3240_v57 = vor.u32 1.1754944e-38, %v3239_v26  ;;  %vm3238_vm2 = vcmp.eq.f32.partialorder %v3237_v2, 8.507059e+37 }
0x2b57   :  { %v5925_v30 = vpop.eup %5924 }
0x2b58   :  { %v3229_v42 = vmul.f32 %v5925_v30, %v3227_v5  ;;  %vm3234_vm15 = vweird.f32 %v5925_v30  ;;  %v2912_v5 = vadd.f32 %v7459_v63, %v2885_v14 }
0x2b59   :  { %vm3235_vm1 = vmor %vm3233_vm0, %vm3234_vm15 }
0x2b5a   :  { %v3230_v0 = vsub.f32 1.0, %v3229_v42 }
0x2b5c   :  { %v3231_v13 = vmul.f32 %v5925_v30, %v3230_v0 }
0x2b5e   :  { %v3232_v60 = vadd.f32 %v5925_v30, %v3231_v13 }
0x2b60   :  { %v3236_v25 = vsel %vm3235_vm1, %v5925_v30, %v3232_v60 }
0x2b61   :  { %v3241_v6 = vsel %vm3238_vm2, %v3240_v57, %v3236_v25 }
0x2b62   :  { %v3244_v9 = vmul.f32 %v3241_v6, %v7513_v8 }
0x2bb0   :  { %v3318_v54 = vpop.permute.xlu1 %3317 }
0x2bb1   :  { %v7540_v24 = vadd.f32 %v3318_v54, %v3310_v12 }
0x2bb3   :  { %5926 = vtanh.f32 %v7540_v24 }
0x2bb9   :  { %v5927_v44 = vpop.eup %5926 }
0x2bba   :  { %3323 = vrot.lane.b32.xlu2 %v5927_v44, %s6268_s18 }
0x2bbf   :  { %v3247_v53 = vpop.permute.xlu0 %3246 }
0x2bc0   :  { %v3249_v48 = vmul.f32 %v3247_v53, %v3241_v6 }
0x2bc2   :  { %3251 = vrot.lane.b32.xlu2 %v3249_v48, %s6269_s21 }
0x2c14   :  { %v3324_v47 = vpop.permute.xlu2 %3323 }
0x2c15   :  { %v3326_v27 = vmul.f32 %v3324_v47, %v3307_v40 }
0x2c17   :  { %3328 = vrot.lane.b32.xlu1 %v3326_v27, %s6269_s21 }
0x2c1c   :  { %v3252_v46 = vpop.permute.xlu2 %3251 }
0x2c1d   :  { %v7547_v33 = vadd.f32 %v3252_v46, %v3244_v9  ;;  %v2684_v9 = vadd.f32 %v7368_v11, %v7348_v49 }
0x2c1f   :  { %5928 = vtanh.f32 %v7547_v33  ;;  %v2729_v46 = vadd.f32 %v7467_v56, %v2684_v9 }
0x2c25   :  { %v5929_v7 = vpop.eup %5928 }
0x2c26   :  { %3257 = vrot.lane.b32.xlu0 %v5929_v7, %s6268_s18 }
0x2c89   :  { %v3329_v4 = vpop.permute.xlu1 %3328 }
0x2c8a   :  { %3331 = vst.msk [vmem:[#allocation5 + $0x68] sm:$0xff] %vm345_vm9, %v3329_v4  ;;  %5527 = vmatmul.msk.f32.vlgmr.msrb.gmra.mxu3 %vm345_vm9, %v3329_v4 }
0x2c8b   :  { %3941 = vmatpush.msrb.mxu3 %v7283_v62 }
0x2c8d   :  { %3942 = vmatpush.msrb.mxu3 %v7302_v61 }
0x2c8f   :  { %3943 = vmatpush.msrb.mxu3 %v7308_v35 }
0x2c91   :  { %3944 = vmatpush.msrb.mxu3 %v7312_v39 }
0x2c98   :  { %v3258_v8 = vpop.permute.xlu0 %3257 }
0x2c99   :  { %v3260_v40 = vmul.f32 %v3258_v8, %v3241_v6 }
0x2c9b   :  { %3262 = vrot.lane.b32.xlu1 %v3260_v40, %s6269_s21 }
0x2d0d   :  { %v3418_v30 = vpop.f32.mrf.mxu3  ;;  %v3263_v42 = vpop.permute.xlu1 %3262 }
0x2d0e   :  { %v3421_v12 = vadd.f32 %v3418_v30, %v2912_v5  ;;  %3265 = vst.msk [vmem:[#allocation4 + $0x10] sm:$0xff] %vm345_vm9, %v3263_v42  ;;  %5525 = vmatmul.msk.f32.vlgmr.msrb.gmra.mxu2 %vm345_vm9, %v3263_v42 }
0x2d0f   :  { %3875 = vmatpush.msrb.mxu2 %v7261_v32 }
0x2d10   :  { %5930 = vtanh.f32 %v3421_v12  ;;  %v5528_v20 = vmul.f32 -1.442695, %v3421_v12 }
0x2d11   :  { %3876 = vmatpush.msrb.mxu2 %v7263_v52 }
0x2d12   :  { %5932 = vpow2.f32 %v5528_v20 }
0x2d13   :  { %3877 = vmatpush.msrb.mxu2 %v7269_v1 }
0x2d15   :  { %3878 = vmatpush.msrb.mxu2 %v7273_v59 }
0x2d16   :  { %v5931_v54 = vpop.eup %5930 }
0x2d17   :  { %3444 = vrot.lane.b32.xlu2 %v5931_v54, %s6268_s18 }
0x2d18   :  { %v5933_v31 = vpop.eup %5932 }
0x2d19   :  { %v3425_v0 = vadd.f32 1.0, %v5933_v31 }
0x2d1b   :  { %5934 = vrcp.f32 %v3425_v0  ;;  %v3437_v25 = vand.u32 2147483648, %v3425_v0  ;;  %vm3431_vm4 = vweird.f32 %v3425_v0  ;;  %v3435_v57 = vand.u32 2147483647, %v3425_v0 }
0x2d1d   :  { %v3438_v53 = vor.u32 1.1754944e-38, %v3437_v25  ;;  %vm3436_vm6 = vcmp.eq.f32.partialorder %v3435_v57, 8.507059e+37 }
0x2d21   :  { %v5935_v13 = vpop.eup %5934 }
0x2d22   :  { %v3427_v60 = vmul.f32 %v5935_v13, %v3425_v0  ;;  %vm3432_vm3 = vweird.f32 %v5935_v13 }
0x2d23   :  { %vm3433_vm5 = vmor %vm3431_vm4, %vm3432_vm3 }
0x2d24   :  { %v3428_v44 = vsub.f32 1.0, %v3427_v60 }
0x2d26   :  { %v3429_v26 = vmul.f32 %v5935_v13, %v3428_v44 }
0x2d28   :  { %v3430_v2 = vadd.f32 %v5935_v13, %v3429_v26 }
0x2d2a   :  { %v3434_v6 = vsel %vm3433_vm5, %v5935_v13, %v3430_v2 }
0x2d2b   :  { %v3439_v48 = vsel %vm3436_vm6, %v3438_v53, %v3434_v6 }
0x2d2c   :  { %v3442_v12 = vmul.f32 %v3439_v48, %v7540_v24 }
0x2d71   :  { %v3445_v47 = vpop.permute.xlu2 %3444 }
0x2d72   :  { %v3447_v27 = vmul.f32 %v3445_v47, %v3439_v48 }
0x2d74   :  { %3449 = vrot.lane.b32.xlu0 %v3447_v27, %s6269_s21 }
0x2d91   :  { %v3352_v7 = vpop.f32.mrf.mxu2 }
0x2d92   :  { %v3355_v4 = vadd.f32 %v3352_v7, %v2729_v46 }
0x2d94   :  { %5936 = vtanh.f32 %v3355_v4  ;;  %v5526_v40 = vmul.f32 -1.442695, %v3355_v4 }
0x2d96   :  { %5938 = vpow2.f32 %v5526_v40 }
0x2d9a   :  { %v5937_v8 = vpop.eup %5936 }
0x2d9b   :  { %3378 = vrot.lane.b32.xlu2 %v5937_v8, %s6268_s18 }
0x2d9c   :  { %v5939_v14 = vpop.eup %5938 }
0x2d9d   :  { %v3359_v5 = vadd.f32 1.0, %v5939_v14 }
0x2d9f   :  { %5940 = vrcp.f32 %v3359_v5  ;;  %v3371_v13 = vand.u32 2147483648, %v3359_v5  ;;  %vm3365_vm8 = vweird.f32 %v3359_v5  ;;  %v3369_v60 = vand.u32 2147483647, %v3359_v5 }
0x2da1   :  { %v3372_v26 = vor.u32 1.1754944e-38, %v3371_v13  ;;  %vm3370_vm11 = vcmp.eq.f32.partialorder %v3369_v60, 8.507059e+37 }
0x2da5   :  { %v5941_v30 = vpop.eup %5940 }
0x2da6   :  { %v3361_v42 = vmul.f32 %v5941_v30, %v3359_v5  ;;  %vm3366_vm7 = vweird.f32 %v5941_v30 }
0x2da7   :  { %vm3367_vm10 = vmor %vm3365_vm8, %vm3366_vm7 }
0x2da8   :  { %v3362_v20 = vsub.f32 1.0, %v3361_v42 }
0x2daa   :  { %v3363_v11 = vmul.f32 %v5941_v30, %v3362_v20 }
0x2dac   :  { %v3364_v31 = vadd.f32 %v5941_v30, %v3363_v11 }
0x2dae   :  { %v3368_v44 = vsel %vm3367_vm10, %v5941_v30, %v3364_v31 }
0x2daf   :  { %v3373_v24 = vsel %vm3370_vm11, %v3372_v26, %v3368_v44 }
0x2db0   :  { %v3376_v53 = vmul.f32 %v3373_v24, %v7547_v33 }
0x2de6   :  { %v3450_v54 = vpop.permute.xlu0 %3449 }
0x2de7   :  { %v7574_v49 = vadd.f32 %v3450_v54, %v3442_v12 }
0x2de9   :  { %5942 = vtanh.f32 %v7574_v49 }
0x2def   :  { %v5943_v0 = vpop.eup %5942 }
0x2df0   :  { %3455 = vrot.lane.b32.xlu1 %v5943_v0, %s6268_s18 }
0x2df5   :  { %v3379_v2 = vpop.permute.xlu2 %3378 }
0x2df6   :  { %v3381_v25 = vmul.f32 %v3379_v2, %v3373_v24 }
0x2df8   :  { %3383 = vrot.lane.b32.xlu1 %v3381_v25, %s6269_s21 }
0x2e62   :  { %v3456_v57 = vpop.permute.xlu1 %3455 }
0x2e63   :  { %v3458_v6 = vmul.f32 %v3456_v57, %v3439_v48 }
0x2e65   :  { %3460 = vrot.lane.b32.xlu0 %v3458_v6, %s6269_s21 }
0x2e6a   :  { %v3384_v47 = vpop.permute.xlu1 %3383 }
0x2e6b   :  { %v7581_v27 = vadd.f32 %v3384_v47, %v3376_v53 }
0x2e6d   :  { %5944 = vtanh.f32 %v7581_v27 }
0x2e73   :  { %v5945_v9 = vpop.eup %5944 }
0x2e74   :  { %3389 = vrot.lane.b32.xlu2 %v5945_v9, %s6268_s18 }
0x2ece   :  { %v3390_v46 = vpop.permute.xlu2 %3389 }
0x2ecf   :  { %v3392_v7 = vmul.f32 %v3390_v46, %v3373_v24 }
0x2ed1   :  { %3394 = vrot.lane.b32.xlu0 %v3392_v7, %s6269_s21 }
0x2ed7   :  { %v3461_v4 = vpop.permute.xlu0 %3460 }
0x2ed8   :  { %3463 = vst.msk [vmem:[#allocation5 + $0x60] sm:$0xff] %vm345_vm9, %v3461_v4  ;;  %5531 = vmatmul.msk.f32.vlgmr.msra.gmra.mxu1 %vm345_vm9, %v3461_v4 }
0x2ed9   :  { %4073 = vmatpush.msra.mxu1 %v7283_v62  ;;  %v2882_v62 = vadd.f32 %v7426_v45, %v7422_v38 }
0x2edb   :  { %4074 = vmatpush.msra.mxu1 %v7302_v61  ;;  %v2911_v61 = vadd.f32 %v7459_v63, %v2882_v62 }
0x2edd   :  { %4075 = vmatpush.msra.mxu1 %v7308_v35 }
0x2edf   :  { %4076 = vmatpush.msra.mxu1 %v7312_v39 }
0x2f43   :  { %v3395_v33 = vpop.permute.xlu0 %3394 }
0x2f44   :  { %3397 = vst.msk [vmem:[#allocation4 + $0x18] sm:$0xff] %vm345_vm9, %v3395_v33  ;;  %5529 = vmatmul.msk.f32.vlgmr.msra.gmra.mxu0 %vm345_vm9, %v3395_v33 }
0x2f45   :  { %4007 = vmatpush.msra.mxu0 %v7261_v32 }
0x2f47   :  { %4008 = vmatpush.msra.mxu0 %v7263_v52 }
0x2f49   :  { %4009 = vmatpush.msra.mxu0 %v7269_v1  ;;  %v2687_v1 = vadd.f32 %v7376_v21, %v7360_v55 }
0x2f4b   :  { %4010 = vmatpush.msra.mxu0 %v7273_v59  ;;  %v2730_v38 = vadd.f32 %v7467_v56, %v2687_v1  ;;  %v7621_v1 = vld [vmem:[#allocation10 + $0x18] sm:$0xff] }
0x2f55   :  { %v3550_v35 = vpop.f32.mrf.mxu1 }
0x2f56   :  { %v3553_v39 = vadd.f32 %v3550_v35, %v2911_v61 }
0x2f58   :  { %5946 = vtanh.f32 %v3553_v39  ;;  %v5532_v8 = vmul.f32 -1.442695, %v3553_v39 }
0x2f5a   :  { %5948 = vpow2.f32 %v5532_v8 }
0x2f5e   :  { %v5947_v48 = vpop.eup %5946 }
0x2f5f   :  { %3576 = vrot.lane.b32.xlu1 %v5947_v48, %s6268_s18 }
0x2f60   :  { %v5949_v32 = vpop.eup %5948 }
0x2f61   :  { %v3557_v40 = vadd.f32 1.0, %v5949_v32 }
0x2f63   :  { %5950 = vrcp.f32 %v3557_v40  ;;  %v3569_v54 = vand.u32 2147483648, %v3557_v40  ;;  %vm3563_vm13 = vweird.f32 %v3557_v40  ;;  %v3567_v20 = vand.u32 2147483647, %v3557_v40 }
0x2f65   :  { %v3570_v31 = vor.u32 1.1754944e-38, %v3569_v54  ;;  %vm3568_vm15 = vcmp.eq.f32.partialorder %v3567_v20, 8.507059e+37  ;;  %v7639_v20 = vld [vmem:[#allocation8 + $0x18] sm:$0xff] }
0x2f69   :  { %v5951_v52 = vpop.eup %5950 }
0x2f6a   :  { %v3559_v59 = vmul.f32 %v5951_v52, %v3557_v40  ;;  %vm3564_vm12 = vweird.f32 %v5951_v52 }
0x2f6b   :  { %vm3565_vm14 = vmor %vm3563_vm13, %vm3564_vm12 }
0x2f6c   :  { %v3560_v5 = vsub.f32 1.0, %v3559_v59  ;;  %v7624_v59 = vld [vmem:[#allocation10 + $0x10] sm:$0xff] }
0x2f6e   :  { %v3561_v30 = vmul.f32 %v5951_v52, %v3560_v5  ;;  %v2879_v5 = vadd.f32 %v7418_v10, %v7414_v23  ;;  %v7648_v23 = vld [vmem:[#allocation8] sm:$0xff] }
0x2f70   :  { %v3562_v12 = vadd.f32 %v5951_v52, %v3561_v30  ;;  %v2910_v30 = vadd.f32 %v7459_v63, %v2879_v5 }
0x2f72   :  { %v3566_v11 = vsel %vm3565_vm14, %v5951_v52, %v3562_v12 }
0x2f73   :  { %v3571_v55 = vsel %vm3568_vm15, %v3570_v31, %v3566_v11  ;;  %v7642_v11 = vld [vmem:[#allocation8 + $0x10] sm:$0xff]  ;;  %v7645_v31 = vld [vmem:[#allocation8 + $0x8] sm:$0xff] }
0x2f74   :  { %v3574_v2 = vmul.f32 %v3571_v55, %v7574_v49 }
0x2fc1   :  { %v3484_v45 = vpop.f32.mrf.mxu0 }
0x2fc2   :  { %v3487_v14 = vadd.f32 %v3484_v45, %v2730_v38  ;;  %v7630_v38 = vld [vmem:[#allocation10] sm:$0xff] }
0x2fc4   :  { %5952 = vtanh.f32 %v3487_v14  ;;  %v5530_v13 = vmul.f32 -1.442695, %v3487_v14 }
0x2fc6   :  { %5954 = vpow2.f32 %v5530_v13 }
0x2fca   :  { %v5953_v42 = vpop.eup %5952 }
0x2fcb   :  { %3510 = vrot.lane.b32.xlu1 %v5953_v42, %s6268_s18 }
0x2fcc   :  { %v5955_v60 = vpop.eup %5954 }
0x2fcd   :  { %v3491_v44 = vadd.f32 1.0, %v5955_v60 }
0x2fcf   :  { %5956 = vrcp.f32 %v3491_v44  ;;  %v3503_v46 = vand.u32 2147483648, %v3491_v44  ;;  %vm3497_vm1 = vweird.f32 %v3491_v44  ;;  %v3501_v7 = vand.u32 2147483647, %v3491_v44 }
0x2fd1   :  { %v3577_v21 = vpop.permute.xlu1 %3576  ;;  %v3504_v33 = vor.u32 1.1754944e-38, %v3503_v46  ;;  %vm3502_vm3 = vcmp.eq.f32.partialorder %v3501_v7, 8.507059e+37  ;;  %v2690_v46 = vadd.f32 %v7382_v18, %v7370_v43 }
0x2fd2   :  { %v3579_v0 = vmul.f32 %v3577_v21, %v3571_v55 }
0x2fd3   :  { %v2731_v7 = vadd.f32 %v7467_v56, %v2690_v46 }
0x2fd4   :  { %3581 = vrot.lane.b32.xlu2 %v3579_v0, %s6269_s21 }
0x2fd5   :  { %v5957_v26 = vpop.eup %5956 }
0x2fd6   :  { %v3493_v24 = vmul.f32 %v5957_v26, %v3491_v44  ;;  %vm3498_vm0 = vweird.f32 %v5957_v26 }
0x2fd7   :  { %vm3499_vm2 = vmor %vm3497_vm1, %vm3498_vm0 }
0x2fd8   :  { %v3494_v57 = vsub.f32 1.0, %v3493_v24 }
0x2fda   :  { %v3495_v53 = vmul.f32 %v5957_v26, %v3494_v57 }
0x2fdc   :  { %v3496_v47 = vadd.f32 %v5957_v26, %v3495_v53 }
0x2fde   :  { %v3500_v4 = vsel %vm3499_vm2, %v5957_v26, %v3496_v47 }
0x2fdf   :  { %v3505_v49 = vsel %vm3502_vm3, %v3504_v33, %v3500_v4 }
0x2fe0   :  { %v3508_v48 = vmul.f32 %v3505_v49, %v7581_v27  ;;  %v7627_v27 = vld [vmem:[#allocation10 + $0x8] sm:$0xff] }
0x302e   :  { %v3582_v25 = vpop.permute.xlu2 %3581 }
0x302f   :  { %v7608_v6 = vadd.f32 %v3582_v25, %v3574_v2 }
0x3031   :  { %5958 = vtanh.f32 %v7608_v6 }
0x3037   :  { %v5959_v9 = vpop.eup %5958 }
0x3038   :  { %3587 = vrot.lane.b32.xlu0 %v5959_v9, %s6268_s18 }
0x303d   :  { %v3511_v62 = vpop.permute.xlu1 %3510 }
0x303e   :  { %v3513_v61 = vmul.f32 %v3511_v62, %v3505_v49 }
0x3040   :  { %3515 = vrot.lane.b32.xlu0 %v3513_v61, %s6269_s21 }
0x30aa   :  { %v3588_v35 = vpop.permute.xlu0 %3587 }
0x30ab   :  { %v3590_v39 = vmul.f32 %v3588_v35, %v3571_v55 }
0x30ad   :  { %3592 = vrot.lane.b32.xlu2 %v3590_v39, %s6269_s21 }
0x30b2   :  { %v3516_v8 = vpop.permute.xlu0 %3515 }
0x30b3   :  { %v7615_v32 = vadd.f32 %v3516_v8, %v3508_v48 }
0x30b5   :  { %5960 = vtanh.f32 %v7615_v32 }
0x30bb   :  { %v5961_v40 = vpop.eup %5960 }
0x30bc   :  { %3521 = vrot.lane.b32.xlu1 %v5961_v40, %s6268_s18 }
0x3107   :  { %v3593_v52 = vpop.permute.xlu2 %3592 }
0x3108   :  { %3595 = vst.msk [vmem:[#allocation5 + $0x58] sm:$0xff] %vm345_vm9, %v3593_v52  ;;  %5535 = vmatmul.msk.f32.vlgmr.msra.gmra.mxu3 %vm345_vm9, %v3593_v52 }
0x3109   :  { %4205 = vmatpush.msra.mxu3 %v7621_v1 }
0x310b   :  { %4206 = vmatpush.msra.mxu3 %v7624_v59 }
0x310d   :  { %4207 = vmatpush.msra.mxu3 %v7627_v27 }
0x310f   :  { %4208 = vmatpush.msra.mxu3 %v7630_v38 }
0x312e   :  { %v3522_v45 = vpop.permute.xlu1 %3521 }
0x312f   :  { %v3524_v14 = vmul.f32 %v3522_v45, %v3505_v49 }
0x3131   :  { %3526 = vrot.lane.b32.xlu2 %v3524_v14, %s6269_s21 }
0x318b   :  { %v3682_v42 = vpop.f32.mrf.mxu3  ;;  %v3527_v12 = vpop.permute.xlu2 %3526 }
0x318c   :  { %v3685_v54 = vadd.f32 %v3682_v42, %v2910_v30  ;;  %3529 = vst.msk [vmem:[#allocation4 + $0x20] sm:$0xff] %vm345_vm9, %v3527_v12  ;;  %5533 = vmatmul.msk.f32.vlgmr.msra.gmra.mxu2 %vm345_vm9, %v3527_v12 }
0x318d   :  { %4139 = vmatpush.msra.mxu2 %v7639_v20 }
0x318e   :  { %5962 = vtanh.f32 %v3685_v54  ;;  %v5536_v63 = vmul.f32 -1.442695, %v3685_v54 }
0x318f   :  { %4140 = vmatpush.msra.mxu2 %v7642_v11 }
0x3190   :  { %5964 = vpow2.f32 %v5536_v63 }
0x3191   :  { %4141 = vmatpush.msra.mxu2 %v7645_v31 }
0x3193   :  { %4142 = vmatpush.msra.mxu2 %v7648_v23 }
0x3194   :  { %v5963_v10 = vpop.eup %5962 }
0x3195   :  { %3708 = vrot.lane.b32.xlu0 %v5963_v10, %s6268_s18 }
0x3196   :  { %v5965_v55 = vpop.eup %5964 }
0x3197   :  { %v3689_v21 = vadd.f32 1.0, %v5965_v55 }
0x3199   :  { %5966 = vrcp.f32 %v3689_v21  ;;  %v3701_v24 = vand.u32 2147483648, %v3689_v21  ;;  %vm3695_vm5 = vweird.f32 %v3689_v21  ;;  %v3699_v2 = vand.u32 2147483647, %v3689_v21 }
0x319b   :  { %v3702_v57 = vor.u32 1.1754944e-38, %v3701_v24  ;;  %vm3700_vm7 = vcmp.eq.f32.partialorder %v3699_v2, 8.507059e+37  ;;  %v7681_v24 = vld [vmem:[%s8139_s12] ss:$0 sm:$0xff] }
0x319f   :  { %v5967_v0 = vpop.eup %5966 }
0x31a0   :  { %v3691_v13 = vmul.f32 %v5967_v0, %v3689_v21  ;;  %vm3696_vm4 = vweird.f32 %v5967_v0 }
0x31a1   :  { %vm3697_vm6 = vmor %vm3695_vm5, %vm3696_vm4 }
0x31a2   :  { %v3692_v60 = vsub.f32 1.0, %v3691_v13 }
0x31a4   :  { %v3693_v44 = vmul.f32 %v5967_v0, %v3692_v60 }
0x31a6   :  { %v3694_v26 = vadd.f32 %v5967_v0, %v3693_v44 }
0x31a8   :  { %v3698_v25 = vsel %vm3697_vm6, %v5967_v0, %v3694_v26  ;;  %v2876_v26 = vadd.f32 %v7408_v37, %v7406_v29 }
0x31a9   :  { %v3703_v53 = vsel %vm3700_vm7, %v3702_v57, %v3698_v25 }
0x31aa   :  { %v3706_v8 = vmul.f32 %v3703_v53, %v7608_v6  ;;  %v2909_v2 = vadd.f32 %v7681_v24, %v2876_v26 }
0x3207   :  { %v3709_v47 = vpop.permute.xlu0 %3708 }
0x3208   :  { %v3711_v9 = vmul.f32 %v3709_v47, %v3703_v53 }
0x320a   :  { %3713 = vrot.lane.b32.xlu1 %v3711_v9, %s6269_s21 }
0x320f   :  { %v3616_v4 = vpop.f32.mrf.mxu2 }
0x3210   :  { %v3619_v33 = vadd.f32 %v3616_v4, %v2731_v7 }
0x3212   :  { %5968 = vtanh.f32 %v3619_v33  ;;  %v5534_v62 = vmul.f32 -1.442695, %v3619_v33 }
0x3214   :  { %5970 = vpow2.f32 %v5534_v62 }
0x3218   :  { %v5969_v49 = vpop.eup %5968 }
0x3219   :  { %3642 = vrot.lane.b32.xlu0 %v5969_v49, %s6268_s18 }
0x321a   :  { %v5971_v61 = vpop.eup %5970 }
0x321b   :  { %v3623_v35 = vadd.f32 1.0, %v5971_v61 }
0x321d   :  { %5972 = vrcp.f32 %v3623_v35  ;;  %v3635_v14 = vand.u32 2147483648, %v3623_v35  ;;  %vm3629_vm10 = vweird.f32 %v3623_v35  ;;  %v3633_v5 = vand.u32 2147483647, %v3623_v35 }
0x321f   :  { %v3636_v42 = vor.u32 1.1754944e-38, %v3635_v14  ;;  %vm3634_vm12 = vcmp.eq.f32.partialorder %v3633_v5, 8.507059e+37 }
0x3223   :  { %v5973_v39 = vpop.eup %5972 }
0x3224   :  { %v3625_v48 = vmul.f32 %v5973_v39, %v3623_v35  ;;  %vm3630_vm8 = vweird.f32 %v5973_v39 }
0x3225   :  { %vm3631_vm11 = vmor %vm3629_vm10, %vm3630_vm8 }
0x3226   :  { %v3626_v18 = vsub.f32 1.0, %v3625_v48 }
0x3228   :  { %v3627_v56 = vmul.f32 %v5973_v39, %v3626_v18  ;;  %v2693_v18 = vadd.f32 %v7390_v51, %v7378_v34 }
0x322a   :  { %v3628_v52 = vadd.f32 %v5973_v39, %v3627_v56  ;;  %v7697_v56 = vld [vmem:[%s8136_s9] ss:$0 sm:$0xff] }
0x322c   :  { %v3632_v30 = vsel %vm3631_vm11, %v5973_v39, %v3628_v52  ;;  %v2732_v52 = vadd.f32 %v7697_v56, %v2693_v18  ;;  %v2696_v18 = vadd.f32 %v7396_v58, %v7386_v50 }
0x322d   :  { %v3637_v6 = vsel %vm3634_vm12, %v3636_v42, %v3632_v30 }
0x322e   :  { %v3640_v55 = vmul.f32 %v3637_v6, %v7615_v32 }
0x327c   :  { %v3714_v43 = vpop.permute.xlu1 %3713 }
0x327d   :  { %v7658_v40 = vadd.f32 %v3714_v43, %v3706_v8 }
0x327f   :  { %5974 = vtanh.f32 %v7658_v40 }
0x3285   :  { %v5975_v45 = vpop.eup %5974 }
0x3286   :  { %3719 = vrot.lane.b32.xlu2 %v5975_v45, %s6268_s18 }
0x328b   :  { %v3643_v12 = vpop.permute.xlu0 %3642 }
0x328c   :  { %v3645_v54 = vmul.f32 %v3643_v12, %v3637_v6 }
0x328e   :  { %3647 = vrot.lane.b32.xlu2 %v3645_v54, %s6269_s21 }
0x32e0   :  { %v3720_v10 = vpop.permute.xlu2 %3719 }
0x32e1   :  { %v3722_v63 = vmul.f32 %v3720_v10, %v3703_v53 }
0x32e3   :  { %3724 = vrot.lane.b32.xlu1 %v3722_v63, %s6269_s21 }
0x32e8   :  { %v3648_v21 = vpop.permute.xlu2 %3647 }
0x32e9   :  { %v7665_v0 = vadd.f32 %v3648_v21, %v3640_v55 }
0x32eb   :  { %5976 = vtanh.f32 %v7665_v0 }
0x32f1   :  { %v5977_v13 = vpop.eup %5976 }
0x32f2   :  { %3653 = vrot.lane.b32.xlu0 %v5977_v13, %s6268_s18 }
0x3355   :  { %v3725_v60 = vpop.permute.xlu1 %3724 }
0x3356   :  { %3727 = vst.msk [vmem:[#allocation5 + $0x50] sm:$0xff] %vm345_vm9, %v3725_v60  ;;  %5539 = vmatmul.msk.f32.vlgmr.msrb.gmra.mxu1 %vm345_vm9, %v3725_v60 }
0x3357   :  { %4337 = vmatpush.msrb.mxu1 %v7621_v1 }
0x3359   :  { %4338 = vmatpush.msrb.mxu1 %v7624_v59 }
0x335b   :  { %4339 = vmatpush.msrb.mxu1 %v7627_v27 }
0x335d   :  { %4340 = vmatpush.msrb.mxu1 %v7630_v38 }
0x3364   :  { %v3654_v32 = vpop.permute.xlu0 %3653 }
0x3365   :  { %v3656_v44 = vmul.f32 %v3654_v32, %v3637_v6 }
0x3367   :  { %3658 = vrot.lane.b32.xlu1 %v3656_v44, %s6269_s21 }
0x33d3   :  { %v3814_v25 = vpop.f32.mrf.mxu1 }
0x33d4   :  { %v3817_v57 = vadd.f32 %v3814_v25, %v2909_v2 }
0x33d6   :  { %5978 = vtanh.f32 %v3817_v57  ;;  %v5540_v29 = vmul.f32 -1.442695, %v3817_v57 }
0x33d8   :  { %5980 = vpow2.f32 %v5540_v29 }
0x33d9   :  { %v3659_v53 = vpop.permute.xlu1 %3658 }
0x33da   :  { %3661 = vst.msk [vmem:[#allocation4 + $0x28] sm:$0xff] %vm345_vm9, %v3659_v53  ;;  %5537 = vmatmul.msk.f32.vlgmr.msrb.gmra.mxu0 %vm345_vm9, %v3659_v53 }
0x33db   :  { %4271 = vmatpush.msrb.mxu0 %v7639_v20 }
0x33dc   :  { %v5979_v47 = vpop.eup %5978 }
0x33dd   :  { %3840 = vrot.lane.b32.xlu2 %v5979_v47, %s6268_s18  ;;  %4272 = vmatpush.msrb.mxu0 %v7642_v11 }
0x33de   :  { %v5981_v37 = vpop.eup %5980 }
0x33df   :  { %4273 = vmatpush.msrb.mxu0 %v7645_v31  ;;  %v3821_v9 = vadd.f32 1.0, %v5981_v37 }
0x33e1   :  { %4274 = vmatpush.msrb.mxu0 %v7648_v23  ;;  %5982 = vrcp.f32 %v3821_v9  ;;  %v3833_v62 = vand.u32 2147483648, %v3821_v9  ;;  %vm3827_vm14 = vweird.f32 %v3821_v9  ;;  %v3831_v61 = vand.u32 2147483647, %v3821_v9 }
0x33e3   :  { %v3834_v39 = vor.u32 1.1754944e-38, %v3833_v62  ;;  %vm3832_vm0 = vcmp.eq.f32.partialorder %v3831_v61, 8.507059e+37 }
0x33e7   :  { %v5983_v46 = vpop.eup %5982 }
0x33e8   :  { %v3823_v7 = vmul.f32 %v5983_v46, %v3821_v9  ;;  %vm3828_vm13 = vweird.f32 %v5983_v46 }
0x33e9   :  { %vm3829_vm15 = vmor %vm3827_vm14, %vm3828_vm13 }
0x33ea   :  { %v3824_v4 = vsub.f32 1.0, %v3823_v7 }
0x33ec   :  { %v3825_v33 = vmul.f32 %v5983_v46, %v3824_v4 }
0x33ee   :  { %v3826_v49 = vadd.f32 %v5983_v46, %v3825_v33  ;;  %v2873_v33 = vadd.f32 %v7400_v22, %v7398_v15  ;;  %v2733_v15 = vadd.f32 %v7697_v56, %v2696_v18 }
0x33f0   :  { %v3830_v35 = vsel %vm3829_vm15, %v5983_v46, %v3826_v49  ;;  %v2908_v49 = vadd.f32 %v7681_v24, %v2873_v33 }
0x33f1   :  { %v3835_v48 = vsel %vm3832_vm0, %v3834_v39, %v3830_v35 }
0x33f2   :  { %v3838_v51 = vmul.f32 %v3835_v48, %v7658_v40 }
0x3437   :  { %v3841_v8 = vpop.permute.xlu2 %3840 }
0x3438   :  { %v3843_v43 = vmul.f32 %v3841_v8, %v3835_v48 }
0x343a   :  { %3845 = vrot.lane.b32.xlu0 %v3843_v43, %s6269_s21 }
0x3457   :  { %v3748_v45 = vpop.f32.mrf.mxu0 }
0x3458   :  { %v3751_v14 = vadd.f32 %v3748_v45, %v2732_v52 }
0x345a   :  { %5984 = vtanh.f32 %v3751_v14  ;;  %v5538_v30 = vmul.f32 -1.442695, %v3751_v14 }
0x345c   :  { %5986 = vpow2.f32 %v5538_v30 }
0x3460   :  { %v5985_v5 = vpop.eup %5984 }
0x3461   :  { %3774 = vrot.lane.b32.xlu2 %v5985_v5, %s6268_s18 }
0x3462   :  { %v5987_v42 = vpop.eup %5986 }
0x3463   :  { %v3755_v6 = vadd.f32 1.0, %v5987_v42 }
0x3465   :  { %5988 = vrcp.f32 %v3755_v6  ;;  %v3767_v60 = vand.u32 2147483648, %v3755_v6  ;;  %vm3761_vm2 = vweird.f32 %v3755_v6  ;;  %v3765_v32 = vand.u32 2147483647, %v3755_v6 }
0x3467   :  { %v3768_v26 = vor.u32 1.1754944e-38, %v3767_v60  ;;  %vm3766_vm4 = vcmp.eq.f32.partialorder %v3765_v32, 8.507059e+37 }
0x346b   :  { %v5989_v12 = vpop.eup %5988 }
0x346c   :  { %v3757_v34 = vmul.f32 %v5989_v12, %v3755_v6  ;;  %vm3762_vm1 = vweird.f32 %v5989_v12 }
0x346d   :  { %vm3763_vm3 = vmor %vm3761_vm2, %vm3762_vm1 }
0x346e   :  { %v3758_v10 = vsub.f32 1.0, %v3757_v34 }
0x3470   :  { %v3759_v55 = vmul.f32 %v5989_v12, %v3758_v10 }
0x3472   :  { %v3760_v21 = vadd.f32 %v5989_v12, %v3759_v55 }
0x3474   :  { %v3764_v44 = vsel %vm3763_vm3, %v5989_v12, %v3760_v21 }
0x3475   :  { %v3769_v40 = vsel %vm3766_vm4, %v3768_v26, %v3764_v44 }
0x3476   :  { %v3772_v47 = vmul.f32 %v3769_v40, %v7665_v0 }
0x34ac   :  { %v3846_v54 = vpop.permute.xlu0 %3845 }
0x34ad   :  { %v7702_v63 = vadd.f32 %v3846_v54, %v3838_v51 }
0x34af   :  { %5990 = vtanh.f32 %v7702_v63 }
0x34b5   :  { %v5991_v13 = vpop.eup %5990 }
0x34b6   :  { %3851 = vrot.lane.b32.xlu1 %v5991_v13, %s6268_s18 }
0x34bb   :  { %v3775_v2 = vpop.permute.xlu2 %3774 }
0x34bc   :  { %v3777_v25 = vmul.f32 %v3775_v2, %v3769_v40 }
0x34be   :  { %3779 = vrot.lane.b32.xlu1 %v3777_v25, %s6269_s21 }
0x3528   :  { %v3852_v57 = vpop.permute.xlu1 %3851 }
0x3529   :  { %v3854_v53 = vmul.f32 %v3852_v57, %v3835_v48 }
0x352b   :  { %3856 = vrot.lane.b32.xlu0 %v3854_v53, %s6269_s21 }
0x3530   :  { %v3780_v29 = vpop.permute.xlu1 %3779 }
0x3531   :  { %v7709_v37 = vadd.f32 %v3780_v29, %v3772_v47 }
0x3533   :  { %5992 = vtanh.f32 %v7709_v37 }
0x3539   :  { %v5993_v9 = vpop.eup %5992 }
0x353a   :  { %3785 = vrot.lane.b32.xlu2 %v5993_v9, %s6268_s18 }
0x3594   :  { %v3786_v46 = vpop.permute.xlu2 %3785 }
0x3595   :  { %v3788_v7 = vmul.f32 %v3786_v46, %v3769_v40 }
0x3597   :  { %3790 = vrot.lane.b32.xlu0 %v3788_v7, %s6269_s21 }
0x359d   :  { %v3857_v4 = vpop.permute.xlu0 %3856 }
0x359e   :  { %3859 = vst.msk [vmem:[#allocation5 + $0x48] sm:$0xff] %vm345_vm9, %v3857_v4  ;;  %5543 = vmatmul.msk.f32.vlgmr.msrb.gmra.mxu3 %vm345_vm9, %v3857_v4 }
0x359f   :  { %4469 = vmatpush.msrb.mxu3 %v7621_v1 }
0x35a1   :  { %4470 = vmatpush.msrb.mxu3 %v7624_v59 }
0x35a3   :  { %4471 = vmatpush.msrb.mxu3 %v7627_v27 }
0x35a5   :  { %4472 = vmatpush.msrb.mxu3 %v7630_v38 }
0x3609   :  { %v3791_v0 = vpop.permute.xlu0 %3790 }
0x360a   :  { %3793 = vst.msk [vmem:[#allocation4 + $0x30] sm:$0xff] %vm345_vm9, %v3791_v0  ;;  %5541 = vmatmul.msk.f32.vlgmr.msrb.gmra.mxu2 %vm345_vm9, %v3791_v0 }
0x360b   :  { %4403 = vmatpush.msrb.mxu2 %v7639_v20 }
0x360d   :  { %4404 = vmatpush.msrb.mxu2 %v7642_v11 }
0x360f   :  { %4405 = vmatpush.msrb.mxu2 %v7645_v31 }
0x3611   :  { %4406 = vmatpush.msrb.mxu2 %v7648_v23 }
0x3621   :  { %v3946_v62 = vpop.f32.mrf.mxu3 }
0x3622   :  { %v3949_v61 = vadd.f32 %v3946_v62, %v2908_v49 }
0x3624   :  { %5994 = vtanh.f32 %v3949_v61  ;;  %v5544_v39 = vmul.f32 -1.442695, %v3949_v61 }
0x3626   :  { %5996 = vpow2.f32 %v5544_v39 }
0x362a   :  { %v5995_v35 = vpop.eup %5994 }
0x362b   :  { %3972 = vrot.lane.b32.xlu1 %v5995_v35, %s6268_s18 }
0x362c   :  { %v5997_v48 = vpop.eup %5996 }
0x362d   :  { %v3953_v8 = vadd.f32 1.0, %v5997_v48  ;;  %v2870_v48 = vadd.f32 %v7392_v16, %v7388_v3 }
0x362f   :  { %5998 = vrcp.f32 %v3953_v8  ;;  %v3965_v6 = vand.u32 2147483648, %v3953_v8  ;;  %vm3959_vm6 = vweird.f32 %v3953_v8  ;;  %v3963_v12 = vand.u32 2147483647, %v3953_v8 }
0x3631   :  { %v3966_v51 = vor.u32 1.1754944e-38, %v3965_v6  ;;  %vm3964_vm8 = vcmp.eq.f32.partialorder %v3963_v12, 8.507059e+37 }
0x3635   :  { %v5999_v43 = vpop.eup %5998 }
0x3636   :  { %v3955_v52 = vmul.f32 %v5999_v43, %v3953_v8  ;;  %vm3960_vm5 = vweird.f32 %v5999_v43  ;;  %v2907_v8 = vadd.f32 %v7681_v24, %v2870_v48 }
0x3637   :  { %vm3961_vm7 = vmor %vm3959_vm6, %vm3960_vm5 }
0x3638   :  { %v3956_v14 = vsub.f32 1.0, %v3955_v52 }
0x363a   :  { %v3957_v5 = vmul.f32 %v5999_v43, %v3956_v14 }
0x363c   :  { %v3958_v42 = vadd.f32 %v5999_v43, %v3957_v5 }
0x363e   :  { %v3962_v34 = vsel %vm3961_vm7, %v5999_v43, %v3958_v42 }
0x363f   :  { %v3967_v50 = vsel %vm3964_vm8, %v3966_v51, %v3962_v34 }
0x3640   :  { %v3970_v32 = vmul.f32 %v3967_v50, %v7702_v63 }
0x368d   :  { %v3880_v22 = vpop.f32.mrf.mxu2 }
0x368e   :  { %v3883_v45 = vadd.f32 %v3880_v22, %v2733_v15 }
0x3690   :  { %6000 = vtanh.f32 %v3883_v45  ;;  %v5542_v10 = vmul.f32 -1.442695, %v3883_v45 }
0x3692   :  { %6002 = vpow2.f32 %v5542_v10  ;;  %v2699_v10 = vadd.f32 %v7402_v41, %v7394_v28 }
0x3696   :  { %v6001_v30 = vpop.eup %6000 }
0x3697   :  { %3906 = vrot.lane.b32.xlu1 %v6001_v30, %s6268_s18 }
0x3698   :  { %v6003_v55 = vpop.eup %6002 }
0x3699   :  { %v3887_v21 = vadd.f32 1.0, %v6003_v55  ;;  %v2734_v55 = vadd.f32 %v7697_v56, %v2699_v10 }
0x369b   :  { %6004 = vrcp.f32 %v3887_v21  ;;  %v3899_v53 = vand.u32 2147483648, %v3887_v21  ;;  %vm3893_vm11 = vweird.f32 %v3887_v21  ;;  %v3897_v47 = vand.u32 2147483647, %v3887_v21 }
0x369d   :  { %v3973_v58 = vpop.permute.xlu1 %3972  ;;  %v3900_v9 = vor.u32 1.1754944e-38, %v3899_v53  ;;  %vm3898_vm13 = vcmp.eq.f32.partialorder %v3897_v47, 8.507059e+37 }
0x369e   :  { %v3975_v54 = vmul.f32 %v3973_v58, %v3967_v50 }
0x36a0   :  { %3977 = vrot.lane.b32.xlu2 %v3975_v54, %s6269_s21 }
0x36a1   :  { %v6005_v13 = vpop.eup %6004 }
0x36a2   :  { %v3889_v60 = vmul.f32 %v6005_v13, %v3887_v21  ;;  %vm3894_vm10 = vweird.f32 %v6005_v13 }
0x36a3   :  { %vm3895_vm12 = vmor %vm3893_vm11, %vm3894_vm10 }
0x36a4   :  { %v3890_v26 = vsub.f32 1.0, %v3889_v60 }
0x36a6   :  { %v3891_v2 = vmul.f32 %v6005_v13, %v3890_v26 }
0x36a8   :  { %v3892_v25 = vadd.f32 %v6005_v13, %v3891_v2 }
0x36aa   :  { %v3896_v29 = vsel %vm3895_vm12, %v6005_v13, %v3892_v25 }
0x36ab   :  { %v3901_v63 = vsel %vm3898_vm13, %v3900_v9, %v3896_v29 }
0x36ac   :  { %v3904_v33 = vmul.f32 %v3901_v63, %v7709_v37 }
0x36fa   :  { %v3978_v44 = vpop.permute.xlu2 %3977 }
0x36fb   :  { %v7736_v40 = vadd.f32 %v3978_v44, %v3970_v32 }
0x36fd   :  { %6006 = vtanh.f32 %v7736_v40 }
0x3703   :  { %v6007_v57 = vpop.eup %6006 }
0x3704   :  { %3983 = vrot.lane.b32.xlu0 %v6007_v57, %s6268_s18 }
0x3709   :  { %v3907_v46 = vpop.permute.xlu1 %3906 }
0x370a   :  { %v3909_v7 = vmul.f32 %v3907_v46, %v3901_v63 }
0x370c   :  { %3911 = vrot.lane.b32.xlu0 %v3909_v7, %s6269_s21 }
0x3776   :  { %v3984_v4 = vpop.permute.xlu0 %3983 }
0x3777   :  { %v3986_v0 = vmul.f32 %v3984_v4, %v3967_v50 }
0x3779   :  { %3988 = vrot.lane.b32.xlu2 %v3986_v0, %s6269_s21 }
0x377e   :  { %v3912_v49 = vpop.permute.xlu0 %3911 }
0x377f   :  { %v7743_v62 = vadd.f32 %v3912_v49, %v3904_v33 }
0x3781   :  { %6008 = vtanh.f32 %v7743_v62 }
0x3787   :  { %v6009_v61 = vpop.eup %6008 }
0x3788   :  { %3917 = vrot.lane.b32.xlu1 %v6009_v61, %s6268_s18 }
0x37d3   :  { %v3989_v35 = vpop.permute.xlu2 %3988 }
0x37d4   :  { %3991 = vst.msk [vmem:[#allocation5 + $0x40] sm:$0xff] %vm345_vm9, %v3989_v35  ;;  %5547 = vmatmul.msk.f32.vlgmr.msra.gmra.mxu1 %vm345_vm9, %v3989_v35 }
0x37d5   :  { %4601 = vmatpush.msra.mxu1 %v7621_v1 }
0x37d7   :  { %4602 = vmatpush.msra.mxu1 %v7624_v59 }
0x37d9   :  { %4603 = vmatpush.msra.mxu1 %v7627_v27 }
0x37db   :  { %4604 = vmatpush.msra.mxu1 %v7630_v38 }
0x37fa   :  { %v3918_v37 = vpop.permute.xlu1 %3917 }
0x37fb   :  { %v3920_v39 = vmul.f32 %v3918_v37, %v3901_v63 }
0x37fd   :  { %3922 = vrot.lane.b32.xlu2 %v3920_v39, %s6269_s21 }
0x3851   :  { %v4078_v43 = vpop.f32.mrf.mxu1 }
0x3852   :  { %v4081_v18 = vadd.f32 %v4078_v43, %v2907_v8 }
0x3854   :  { %6010 = vtanh.f32 %v4081_v18  ;;  %v5548_v3 = vmul.f32 -1.442695, %v4081_v18  ;;  %v2867_v18 = vadd.f32 %v7384_v19, %v7380_v17 }
0x3856   :  { %6012 = vpow2.f32 %v5548_v3 }
0x3857   :  { %v3923_v52 = vpop.permute.xlu2 %3922 }
0x3858   :  { %3925 = vst.msk [vmem:[#allocation4 + $0x38] sm:$0xff] %vm345_vm9, %v3923_v52  ;;  %5545 = vmatmul.msk.f32.vlgmr.msra.gmra.mxu0 %vm345_vm9, %v3923_v52  ;;  %v2906_v52 = vadd.f32 %v7681_v24, %v2867_v18 }
0x3859   :  { %4535 = vmatpush.msra.mxu0 %v7639_v20 }
0x385a   :  { %v6011_v15 = vpop.eup %6010 }
0x385b   :  { %4104 = vrot.lane.b32.xlu0 %v6011_v15, %s6268_s18  ;;  %4536 = vmatpush.msra.mxu0 %v7642_v11 }
0x385c   :  { %v6013_v16 = vpop.eup %6012 }
0x385d   :  { %4537 = vmatpush.msra.mxu0 %v7645_v31  ;;  %v4085_v22 = vadd.f32 1.0, %v6013_v16 }
0x385f   :  { %4538 = vmatpush.msra.mxu0 %v7648_v23  ;;  %6014 = vrcp.f32 %v4085_v22  ;;  %v4097_v6 = vand.u32 2147483648, %v4085_v22  ;;  %vm4091_vm15 = vweird.f32 %v4085_v22  ;;  %v4095_v12 = vand.u32 2147483647, %v4085_v22 }
0x3861   :  { %v4098_v51 = vor.u32 1.1754944e-38, %v4097_v6  ;;  %vm4096_vm1 = vcmp.eq.f32.partialorder %v4095_v12, 8.507059e+37 }
0x3865   :  { %v6015_v45 = vpop.eup %6014 }
0x3866   :  { %v4087_v14 = vmul.f32 %v6015_v45, %v4085_v22  ;;  %vm4092_vm14 = vweird.f32 %v6015_v45 }
0x3867   :  { %vm4093_vm0 = vmor %vm4091_vm15, %vm4092_vm14 }
0x3868   :  { %v4088_v5 = vsub.f32 1.0, %v4087_v14 }
0x386a   :  { %v4089_v30 = vmul.f32 %v6015_v45, %v4088_v5 }
0x386c   :  { %v4090_v42 = vadd.f32 %v6015_v45, %v4089_v30 }
0x386e   :  { %v4094_v34 = vsel %vm4093_vm0, %v6015_v45, %v4090_v42 }
0x386f   :  { %v4099_v50 = vsel %vm4096_vm1, %v4098_v51, %v4094_v34 }
0x3870   :  { %v4102_v57 = vmul.f32 %v4099_v50, %v7736_v40 }
0x38cd   :  { %v4105_v58 = vpop.permute.xlu0 %4104 }
0x38ce   :  { %v4107_v54 = vmul.f32 %v4105_v58, %v4099_v50 }
0x38d0   :  { %4109 = vrot.lane.b32.xlu1 %v4107_v54, %s6269_s21 }
0x38d5   :  { %v4012_v21 = vpop.f32.mrf.mxu0 }
0x38d6   :  { %v4015_v13 = vadd.f32 %v4012_v21, %v2734_v55  ;;  %v8168_v55 = vld [vmem:[#allocation25_spill] sm:$0xff] }
0x38d7   :  { %v2702_v21 = vadd.f32 %v8168_v55, %v7404_v36 }
0x38d8   :  { %6016 = vtanh.f32 %v4015_v13  ;;  %v5546_v32 = vmul.f32 -1.442695, %v4015_v13 }
0x38d9   :  { %v2735_v13 = vadd.f32 %v7697_v56, %v2702_v21 }
0x38da   :  { %6018 = vpow2.f32 %v5546_v32 }
0x38de   :  { %v6017_v60 = vpop.eup %6016 }
0x38df   :  { %4038 = vrot.lane.b32.xlu0 %v6017_v60, %s6268_s18 }
0x38e0   :  { %v6019_v44 = vpop.eup %6018 }
0x38e1   :  { %v4019_v26 = vadd.f32 1.0, %v6019_v44 }
0x38e3   :  { %6020 = vrcp.f32 %v4019_v26  ;;  %v4031_v63 = vand.u32 2147483648, %v4019_v26  ;;  %vm4025_vm3 = vweird.f32 %v4019_v26  ;;  %v4029_v46 = vand.u32 2147483647, %v4019_v26 }
0x38e5   :  { %v4032_v4 = vor.u32 1.1754944e-38, %v4031_v63  ;;  %vm4030_vm5 = vcmp.eq.f32.partialorder %v4029_v46, 8.507059e+37 }
0x38e9   :  { %v6021_v2 = vpop.eup %6020 }
0x38ea   :  { %v4021_v25 = vmul.f32 %v6021_v2, %v4019_v26  ;;  %vm4026_vm2 = vweird.f32 %v6021_v2 }
0x38eb   :  { %vm4027_vm4 = vmor %vm4025_vm3, %vm4026_vm2 }
0x38ec   :  { %v4022_v41 = vsub.f32 1.0, %v4021_v25 }
0x38ee   :  { %v4023_v47 = vmul.f32 %v6021_v2, %v4022_v41 }
0x38f0   :  { %v4024_v29 = vadd.f32 %v6021_v2, %v4023_v47 }
0x38f2   :  { %v4028_v7 = vsel %vm4027_vm4, %v6021_v2, %v4024_v29 }
0x38f3   :  { %v4033_v40 = vsel %vm4030_vm5, %v4032_v4, %v4028_v7 }
0x38f4   :  { %v4036_v35 = vmul.f32 %v4033_v40, %v7743_v62 }
0x3942   :  { %v4110_v28 = vpop.permute.xlu1 %4109 }
0x3943   :  { %v7770_v53 = vadd.f32 %v4110_v28, %v4102_v57 }
0x3945   :  { %6022 = vtanh.f32 %v7770_v53 }
0x394b   :  { %v6023_v9 = vpop.eup %6022 }
0x394c   :  { %4115 = vrot.lane.b32.xlu2 %v6023_v9, %s6268_s18 }
0x3951   :  { %v4039_v0 = vpop.permute.xlu0 %4038 }
0x3952   :  { %v4041_v33 = vmul.f32 %v4039_v0, %v4033_v40 }
0x3954   :  { %4043 = vrot.lane.b32.xlu2 %v4041_v33, %s6269_s21 }
0x39a6   :  { %v4116_v49 = vpop.permute.xlu2 %4115 }
0x39a7   :  { %v4118_v61 = vmul.f32 %v4116_v49, %v4099_v50 }
0x39a9   :  { %4120 = vrot.lane.b32.xlu1 %v4118_v61, %s6269_s21 }
0x39ae   :  { %v4044_v37 = vpop.permute.xlu2 %4043 }
0x39af   :  { %v7777_v39 = vadd.f32 %v4044_v37, %v4036_v35 }
0x39b1   :  { %6024 = vtanh.f32 %v7777_v39 }
0x39b7   :  { %v6025_v48 = vpop.eup %6024 }
0x39b8   :  { %4049 = vrot.lane.b32.xlu0 %v6025_v48, %s6268_s18 }
0x3a1b   :  { %v4121_v8 = vpop.permute.xlu1 %4120 }
0x3a1c   :  { %4123 = vst.msk [vmem:[#allocation5 + $0x38] sm:$0xff] %vm345_vm9, %v4121_v8  ;;  %5551 = vmatmul.msk.f32.vlgmr.msra.gmra.mxu3 %vm345_vm9, %v4121_v8 }
0x3a1d   :  { %4733 = vmatpush.msra.mxu3 %v7621_v1 }
0x3a1f   :  { %4734 = vmatpush.msra.mxu3 %v7624_v59 }
0x3a21   :  { %4735 = vmatpush.msra.mxu3 %v7627_v27 }
0x3a23   :  { %4736 = vmatpush.msra.mxu3 %v7630_v38 }
0x3a2a   :  { %v4050_v62 = vpop.permute.xlu0 %4049 }
0x3a2b   :  { %v4052_v43 = vmul.f32 %v4050_v62, %v4033_v40 }
0x3a2d   :  { %4054 = vrot.lane.b32.xlu1 %v4052_v43, %s6269_s21 }
0x3a9f   :  { %v4210_v15 = vpop.f32.mrf.mxu3  ;;  %v4055_v3 = vpop.permute.xlu1 %4054 }
0x3aa0   :  { %v4213_v16 = vadd.f32 %v4210_v15, %v2906_v52  ;;  %4057 = vst.msk [vmem:[#allocation4 + $0x40] sm:$0xff] %vm345_vm9, %v4055_v3  ;;  %5549 = vmatmul.msk.f32.vlgmr.msra.gmra.mxu2 %vm345_vm9, %v4055_v3  ;;  %v8170_v15 = vld [vmem:[#allocation24_spill] sm:$0xff] }
0x3aa1   :  { %4667 = vmatpush.msra.mxu2 %v7639_v20 }
0x3aa2   :  { %6026 = vtanh.f32 %v4213_v16  ;;  %v5552_v17 = vmul.f32 -1.442695, %v4213_v16 }
0x3aa3   :  { %4668 = vmatpush.msra.mxu2 %v7642_v11 }
0x3aa4   :  { %6028 = vpow2.f32 %v5552_v17 }
0x3aa5   :  { %4669 = vmatpush.msra.mxu2 %v7645_v31 }
0x3aa7   :  { %4670 = vmatpush.msra.mxu2 %v7648_v23 }
0x3aa8   :  { %v6027_v22 = vpop.eup %6026 }
0x3aa9   :  { %4236 = vrot.lane.b32.xlu2 %v6027_v22, %s6268_s18 }
0x3aaa   :  { %v6029_v19 = vpop.eup %6028 }
0x3aab   :  { %v4217_v45 = vadd.f32 1.0, %v6029_v19  ;;  %v8172_v19 = vld [vmem:[#allocation27_spill] sm:$0xff] }
0x3aad   :  { %6030 = vrcp.f32 %v4217_v45  ;;  %v4229_v12 = vand.u32 2147483648, %v4217_v45  ;;  %vm4223_vm7 = vweird.f32 %v4217_v45  ;;  %v4227_v34 = vand.u32 2147483647, %v4217_v45 }
0x3aaf   :  { %v4230_v50 = vor.u32 1.1754944e-38, %v4229_v12  ;;  %vm4228_vm10 = vcmp.eq.f32.partialorder %v4227_v34, 8.507059e+37 }
0x3ab3   :  { %v6031_v14 = vpop.eup %6030 }
0x3ab4   :  { %v4219_v5 = vmul.f32 %v6031_v14, %v4217_v45  ;;  %vm4224_vm6 = vweird.f32 %v6031_v14 }
0x3ab5   :  { %vm4225_vm8 = vmor %vm4223_vm7, %vm4224_vm6 }
0x3ab6   :  { %v4220_v30 = vsub.f32 1.0, %v4219_v5 }
0x3ab8   :  { %v4221_v42 = vmul.f32 %v6031_v14, %v4220_v30 }
0x3aba   :  { %v4222_v6 = vadd.f32 %v6031_v14, %v4221_v42 }
0x3abc   :  { %v4226_v51 = vsel %vm4225_vm8, %v6031_v14, %v4222_v6 }
0x3abd   :  { %v4231_v58 = vsel %vm4228_vm10, %v4230_v50, %v4226_v51 }
0x3abe   :  { %v4234_v41 = vmul.f32 %v4231_v58, %v7770_v53 }
0x3b03   :  { %v4237_v54 = vpop.permute.xlu2 %4236 }
0x3b04   :  { %v4239_v10 = vmul.f32 %v4237_v54, %v4231_v58 }
0x3b06   :  { %4241 = vrot.lane.b32.xlu0 %v4239_v10, %s6269_s21 }
0x3b23   :  { %v4144_v60 = vpop.f32.mrf.mxu2 }
0x3b24   :  { %v4147_v32 = vadd.f32 %v4144_v60, %v2735_v13 }
0x3b26   :  { %6032 = vtanh.f32 %v4147_v32  ;;  %v5550_v26 = vmul.f32 -1.442695, %v4147_v32 }
0x3b28   :  { %6034 = vpow2.f32 %v5550_v26 }
0x3b2c   :  { %v6033_v44 = vpop.eup %6032 }
0x3b2d   :  { %4170 = vrot.lane.b32.xlu2 %v6033_v44, %s6268_s18 }
0x3b2e   :  { %v6035_v2 = vpop.eup %6034 }
0x3b2f   :  { %v4151_v25 = vadd.f32 1.0, %v6035_v2 }
0x3b31   :  { %6036 = vrcp.f32 %v4151_v25  ;;  %v4163_v7 = vand.u32 2147483648, %v4151_v25  ;;  %vm4157_vm12 = vweird.f32 %v4151_v25  ;;  %v4161_v4 = vand.u32 2147483647, %v4151_v25 }
0x3b33   :  { %v4164_v0 = vor.u32 1.1754944e-38, %v4163_v7  ;;  %vm4162_vm14 = vcmp.eq.f32.partialorder %v4161_v4, 8.507059e+37 }
0x3b37   :  { %v6037_v57 = vpop.eup %6036 }
0x3b38   :  { %v4153_v28 = vmul.f32 %v6037_v57, %v4151_v25  ;;  %vm4158_vm11 = vweird.f32 %v6037_v57 }
0x3b39   :  { %vm4159_vm13 = vmor %vm4157_vm12, %vm4158_vm11 }
0x3b3a   :  { %v4154_v29 = vsub.f32 1.0, %v4153_v28 }
0x3b3c   :  { %v4155_v9 = vmul.f32 %v6037_v57, %v4154_v29 }
0x3b3e   :  { %v4156_v63 = vadd.f32 %v6037_v57, %v4155_v9 }
0x3b40   :  { %v4160_v40 = vsel %vm4159_vm13, %v6037_v57, %v4156_v63 }
0x3b41   :  { %v4165_v53 = vsel %vm4162_vm14, %v4164_v0, %v4160_v40 }
0x3b42   :  { %v4168_v37 = vmul.f32 %v4165_v53, %v7777_v39 }
0x3b78   :  { %v4242_v47 = vpop.permute.xlu0 %4241 }
0x3b79   :  { %v7804_v36 = vadd.f32 %v4242_v47, %v4234_v41 }
0x3b7b   :  { %6038 = vtanh.f32 %v7804_v36 }
0x3b81   :  { %v6039_v46 = vpop.eup %6038 }
0x3b82   :  { %4247 = vrot.lane.b32.xlu1 %v6039_v46, %s6268_s18 }
0x3b87   :  { %v4171_v33 = vpop.permute.xlu2 %4170 }
0x3b88   :  { %v4173_v49 = vmul.f32 %v4171_v33, %v4165_v53 }
0x3b8a   :  { %4175 = vrot.lane.b32.xlu1 %v4173_v49, %s6269_s21 }
0x3bf4   :  { %v4248_v61 = vpop.permute.xlu1 %4247 }
0x3bf5   :  { %v4250_v35 = vmul.f32 %v4248_v61, %v4231_v58 }
0x3bf7   :  { %4252 = vrot.lane.b32.xlu0 %v4250_v35, %s6269_s21 }
0x3bfc   :  { %v4176_v48 = vpop.permute.xlu1 %4175 }
0x3bfd   :  { %v7811_v8 = vadd.f32 %v4176_v48, %v4168_v37  ;;  %v6176_v48 = vld [vmem:[#allocation10 + $0x18] sm:$0xff] }
0x3bff   :  { %6040 = vtanh.f32 %v7811_v8 }
0x3c05   :  { %v6041_v62 = vpop.eup %6040 }
0x3c06   :  { %4181 = vrot.lane.b32.xlu2 %v6041_v62, %s6268_s18  ;;  %v6177_v62 = vld [vmem:[#allocation10 + $0x10] sm:$0xff] }
0x3c60   :  { %v4182_v43 = vpop.permute.xlu2 %4181 }
0x3c61   :  { %v4184_v18 = vmul.f32 %v4182_v43, %v4165_v53  ;;  %v6178_v43 = vld [vmem:[#allocation10 + $0x8] sm:$0xff] }
0x3c63   :  { %4186 = vrot.lane.b32.xlu0 %v4184_v18, %s6269_s21 }
0x3c69   :  { %v4253_v52 = vpop.permute.xlu0 %4252 }
0x3c6a   :  { %4255 = vst.msk [vmem:[#allocation5 + $0x30] sm:$0xff] %vm345_vm9, %v4253_v52  ;;  %5555 = vmatmul.msk.f32.vlgmr.msrb.gmra.mxu1 %vm345_vm9, %v4253_v52 }
0x3c6b   :  { %4865 = vmatpush.msrb.mxu1 %v7621_v1  ;;  %v8169_v1 = vld [vmem:[#allocation23_spill] sm:$0xff] }
0x3c6d   :  { %4866 = vmatpush.msrb.mxu1 %v7624_v59  ;;  %v2864_v59 = vadd.f32 %v8170_v15, %v8169_v1  ;;  %v8174_v1 = vld [vmem:[#allocation22_spill] sm:$0xff] }
0x3c6f   :  { %4867 = vmatpush.msrb.mxu1 %v7627_v27  ;;  %v2905_v27 = vadd.f32 %v7681_v24, %v2864_v59 }
0x3c71   :  { %4868 = vmatpush.msrb.mxu1 %v7630_v38 }
0x3cd5   :  { %v4187_v39 = vpop.permute.xlu0 %4186 }
0x3cd6   :  { %4189 = vst.msk [vmem:[#allocation4 + $0x48] sm:$0xff] %vm345_vm9, %v4187_v39  ;;  %5553 = vmatmul.msk.f32.vlgmr.msrb.gmra.mxu0 %vm345_vm9, %v4187_v39  ;;  %v8173_v39 = vld [vmem:[#allocation21_spill] sm:$0xff] }
0x3cd7   :  { %4799 = vmatpush.msrb.mxu0 %v7639_v20  ;;  %v2861_v15 = vadd.f32 %v8174_v1, %v8173_v39  ;;  %v8178_v39 = vld [vmem:[#allocation20_spill] sm:$0xff]  ;;  %v7883_v1 = vld [vmem:[%s8139_s12] ss:$0 sm:$0xff] }
0x3cd9   :  { %4800 = vmatpush.msrb.mxu0 %v7642_v11  ;;  %v2904_v59 = vadd.f32 %v7681_v24, %v2861_v15 }
0x3cdb   :  { %4801 = vmatpush.msrb.mxu0 %v7645_v31  ;;  %v8171_v31 = vld [vmem:[#allocation26_spill] sm:$0xff] }
0x3cdd   :  { %4802 = vmatpush.msrb.mxu0 %v7648_v23  ;;  %v2705_v23 = vadd.f32 %v8172_v19, %v8171_v31 }
0x3cdf   :  { %v2736_v14 = vadd.f32 %v7697_v56, %v2705_v23 }
0x3ce7   :  { %v4342_v3 = vpop.f32.mrf.mxu1 }
0x3ce8   :  { %v4345_v38 = vadd.f32 %v4342_v3, %v2905_v27 }
0x3cea   :  { %6042 = vtanh.f32 %v4345_v38  ;;  %v5556_v22 = vmul.f32 -1.442695, %v4345_v38 }
0x3cec   :  { %6044 = vpow2.f32 %v5556_v22  ;;  %v6181_v22 = vld [vmem:[#allocation8 + $0x10] sm:$0xff] }
0x3cf0   :  { %v6043_v16 = vpop.eup %6042 }
0x3cf1   :  { %4368 = vrot.lane.b32.xlu1 %v6043_v16, %s6268_s18  ;;  %v6180_v16 = vld [vmem:[#allocation8 + $0x18] sm:$0xff] }
0x3cf2   :  { %v6045_v20 = vpop.eup %6044 }
0x3cf3   :  { %v4349_v17 = vadd.f32 1.0, %v6045_v20  ;;  %v6182_v20 = vld [vmem:[#allocation8 + $0x8] sm:$0xff] }
0x3cf5   :  { %6046 = vrcp.f32 %v4349_v17  ;;  %v4361_v51 = vand.u32 2147483648, %v4349_v17  ;;  %vm4355_vm0 = vweird.f32 %v4349_v17  ;;  %v4359_v50 = vand.u32 2147483647, %v4349_v17 }
0x3cf7   :  { %v4362_v54 = vor.u32 1.1754944e-38, %v4361_v51  ;;  %vm4360_vm2 = vcmp.eq.f32.partialorder %v4359_v50, 8.507059e+37 }
0x3cfb   :  { %v6047_v11 = vpop.eup %6046 }
0x3cfc   :  { %v4351_v45 = vmul.f32 %v6047_v11, %v4349_v17  ;;  %vm4356_vm15 = vweird.f32 %v6047_v11  ;;  %v6183_v17 = vld [vmem:[#allocation8] sm:$0xff] }
0x3cfd   :  { %vm4357_vm1 = vmor %vm4355_vm0, %vm4356_vm15 }
0x3cfe   :  { %v4352_v42 = vsub.f32 1.0, %v4351_v45 }
0x3d00   :  { %v4353_v6 = vmul.f32 %v6047_v11, %v4352_v42 }
0x3d02   :  { %v4354_v34 = vadd.f32 %v6047_v11, %v4353_v6 }
0x3d04   :  { %v4358_v58 = vsel %vm4357_vm1, %v6047_v11, %v4354_v34 }
0x3d05   :  { %v4363_v10 = vsel %vm4360_vm2, %v4362_v54, %v4358_v58  ;;  %v8175_v54 = vld [vmem:[#allocation28_spill] sm:$0xff] }
0x3d06   :  { %v4366_v2 = vmul.f32 %v4363_v10, %v7804_v36 }
0x3d53   :  { %v4276_v5 = vpop.f32.mrf.mxu0 }
0x3d54   :  { %v4279_v30 = vadd.f32 %v4276_v5, %v2736_v14 }
0x3d56   :  { %6048 = vtanh.f32 %v4279_v30  ;;  %v5554_v13 = vmul.f32 -1.442695, %v4279_v30 }
0x3d58   :  { %6050 = vpow2.f32 %v5554_v13 }
0x3d5c   :  { %v6049_v12 = vpop.eup %6048 }
0x3d5d   :  { %4302 = vrot.lane.b32.xlu1 %v6049_v12, %s6268_s18 }
0x3d5e   :  { %v6051_v60 = vpop.eup %6050 }
0x3d5f   :  { %v4283_v32 = vadd.f32 1.0, %v6051_v60 }
0x3d61   :  { %6052 = vrcp.f32 %v4283_v32  ;;  %v4295_v9 = vand.u32 2147483648, %v4283_v32  ;;  %vm4289_vm4 = vweird.f32 %v4283_v32  ;;  %v4293_v63 = vand.u32 2147483647, %v4283_v32 }
0x3d63   :  { %v4369_v55 = vpop.permute.xlu1 %4368  ;;  %v4296_v7 = vor.u32 1.1754944e-38, %v4295_v9  ;;  %vm4294_vm6 = vcmp.eq.f32.partialorder %v4293_v63, 8.507059e+37 }
0x3d64   :  { %v4371_v21 = vmul.f32 %v4369_v55, %v4363_v10 }
0x3d66   :  { %4373 = vrot.lane.b32.xlu2 %v4371_v21, %s6269_s21 }
0x3d67   :  { %v6053_v44 = vpop.eup %6052 }
0x3d68   :  { %v4285_v26 = vmul.f32 %v6053_v44, %v4283_v32  ;;  %vm4290_vm3 = vweird.f32 %v6053_v44 }
0x3d69   :  { %vm4291_vm5 = vmor %vm4289_vm4, %vm4290_vm3 }
0x3d6a   :  { %v4286_v57 = vsub.f32 1.0, %v4285_v26 }
0x3d6c   :  { %v4287_v41 = vmul.f32 %v6053_v44, %v4286_v57 }
0x3d6e   :  { %v4288_v47 = vadd.f32 %v6053_v44, %v4287_v41 }
0x3d70   :  { %v4292_v46 = vsel %vm4291_vm5, %v6053_v44, %v4288_v47 }
0x3d71   :  { %v4297_v36 = vsel %vm4294_vm6, %v4296_v7, %v4292_v46 }
0x3d72   :  { %v4300_v33 = vmul.f32 %v4297_v36, %v7811_v8  ;;  %v6179_v8 = vld [vmem:[#allocation10] sm:$0xff] }
0x3dc0   :  { %v4374_v25 = vpop.permute.xlu2 %4373 }
0x3dc1   :  { %v7838_v28 = vadd.f32 %v4374_v25, %v4366_v2 }
0x3dc3   :  { %6054 = vtanh.f32 %v7838_v28 }
0x3dc9   :  { %v6055_v29 = vpop.eup %6054 }
0x3dca   :  { %4379 = vrot.lane.b32.xlu0 %v6055_v29, %s6268_s18 }
0x3dcf   :  { %v4303_v4 = vpop.permute.xlu1 %4302 }
0x3dd0   :  { %v4305_v40 = vmul.f32 %v4303_v4, %v4297_v36 }
0x3dd2   :  { %4307 = vrot.lane.b32.xlu0 %v4305_v40, %s6269_s21 }
0x3e3c   :  { %v4380_v0 = vpop.permute.xlu0 %4379 }
0x3e3d   :  { %v4382_v53 = vmul.f32 %v4380_v0, %v4363_v10  ;;  %v8176_v10 = vld [vmem:[#allocation29_spill] sm:$0xff] }
0x3e3e   :  { %v2708_v55 = vadd.f32 %v8176_v10, %v8175_v54 }
0x3e3f   :  { %4384 = vrot.lane.b32.xlu2 %v4382_v53, %s6269_s21 }
0x3e40   :  { %v2737_v21 = vadd.f32 %v7697_v56, %v2708_v55 }
0x3e44   :  { %v4308_v49 = vpop.permute.xlu0 %4307 }
0x3e45   :  { %v7845_v61 = vadd.f32 %v4308_v49, %v4300_v33 }
0x3e47   :  { %6056 = vtanh.f32 %v7845_v61 }
0x3e4d   :  { %v6057_v35 = vpop.eup %6056 }
0x3e4e   :  { %4313 = vrot.lane.b32.xlu1 %v6057_v35, %s6268_s18 }
0x3e99   :  { %v4385_v37 = vpop.permute.xlu2 %4384 }
0x3e9a   :  { %4387 = vst.msk [vmem:[#allocation5 + $0x28] sm:$0xff] %vm345_vm9, %v4385_v37  ;;  %5559 = vmatmul.msk.f32.vlgmr.msrb.gmra.mxu3 %vm345_vm9, %v4385_v37 }
0x3e9b   :  { %4997 = vmatpush.msrb.mxu3 %v6176_v48 }
0x3e9d   :  { %4998 = vmatpush.msrb.mxu3 %v6177_v62 }
0x3e9f   :  { %4999 = vmatpush.msrb.mxu3 %v6178_v43 }
0x3ea1   :  { %5000 = vmatpush.msrb.mxu3 %v6179_v8 }
0x3ec0   :  { %v4314_v18 = vpop.permute.xlu1 %4313 }
0x3ec1   :  { %v4316_v52 = vmul.f32 %v4314_v18, %v4297_v36 }
0x3ec3   :  { %4318 = vrot.lane.b32.xlu2 %v4316_v52, %s6269_s21  ;;  %v8177_v52 = vld [vmem:[#allocation19_spill] sm:$0xff] }
0x3f1d   :  { %v4474_v27 = vpop.f32.mrf.mxu3  ;;  %v4319_v3 = vpop.permute.xlu2 %4318 }
0x3f1e   :  { %v4477_v38 = vadd.f32 %v4474_v27, %v2904_v59  ;;  %4321 = vst.msk [vmem:[#allocation4 + $0x50] sm:$0xff] %vm345_vm9, %v4319_v3  ;;  %5557 = vmatmul.msk.f32.vlgmr.msrb.gmra.mxu2 %vm345_vm9, %v4319_v3 }
0x3f1f   :  { %4931 = vmatpush.msrb.mxu2 %v6180_v16 }
0x3f20   :  { %6058 = vtanh.f32 %v4477_v38  ;;  %v5560_v24 = vmul.f32 -1.442695, %v4477_v38 }
0x3f21   :  { %4932 = vmatpush.msrb.mxu2 %v6181_v22 }
0x3f22   :  { %6060 = vpow2.f32 %v5560_v24 }
0x3f23   :  { %4933 = vmatpush.msrb.mxu2 %v6182_v20 }
0x3f25   :  { %4934 = vmatpush.msrb.mxu2 %v6183_v17 }
0x3f26   :  { %v6059_v11 = vpop.eup %6058 }
0x3f27   :  { %4500 = vrot.lane.b32.xlu0 %v6059_v11, %s6268_s18 }
0x3f28   :  { %v6061_v31 = vpop.eup %6060 }
0x3f29   :  { %v4481_v19 = vadd.f32 1.0, %v6061_v31 }
0x3f2b   :  { %6062 = vrcp.f32 %v4481_v19  ;;  %v4493_v42 = vand.u32 2147483648, %v4481_v19  ;;  %vm4487_vm8 = vweird.f32 %v4481_v19  ;;  %v4491_v6 = vand.u32 2147483647, %v4481_v19 }
0x3f2d   :  { %v4494_v34 = vor.u32 1.1754944e-38, %v4493_v42  ;;  %vm4492_vm11 = vcmp.eq.f32.partialorder %v4491_v6, 8.507059e+37 }
0x3f31   :  { %v6063_v23 = vpop.eup %6062 }
0x3f32   :  { %v4483_v45 = vmul.f32 %v6063_v23, %v4481_v19  ;;  %vm4488_vm7 = vweird.f32 %v6063_v23 }
0x3f33   :  { %vm4489_vm10 = vmor %vm4487_vm8, %vm4488_vm7 }
0x3f34   :  { %v4484_v14 = vsub.f32 1.0, %v4483_v45 }
0x3f36   :  { %v4485_v5 = vmul.f32 %v6063_v23, %v4484_v14 }
0x3f38   :  { %v4486_v30 = vadd.f32 %v6063_v23, %v4485_v5 }
0x3f3a   :  { %v4490_v12 = vsel %vm4489_vm10, %v6063_v23, %v4486_v30 }
0x3f3b   :  { %v4495_v51 = vsel %vm4492_vm11, %v4494_v34, %v4490_v12  ;;  %v8179_v12 = vld [vmem:[#allocation30_spill] sm:$0xff]  ;;  %v8180_v34 = vld [vmem:[#allocation31_spill] sm:$0xff] }
0x3f3c   :  { %v4498_v41 = vmul.f32 %v4495_v51, %v7838_v28 }
0x3f99   :  { %v4501_v50 = vpop.permute.xlu0 %4500 }
0x3f9a   :  { %v4503_v58 = vmul.f32 %v4501_v50, %v4495_v51  ;;  %v7895_v50 = vld [vmem:[%s8136_s9] ss:$0 sm:$0xff] }
0x3f9c   :  { %4505 = vrot.lane.b32.xlu1 %v4503_v58, %s6269_s21 }
0x3fa1   :  { %v4408_v13 = vpop.f32.mrf.mxu2 }
0x3fa2   :  { %v4411_v60 = vadd.f32 %v4408_v13, %v2737_v21 }
0x3fa4   :  { %6064 = vtanh.f32 %v4411_v60  ;;  %v5558_v44 = vmul.f32 -1.442695, %v4411_v60 }
0x3fa6   :  { %6066 = vpow2.f32 %v5558_v44 }
0x3faa   :  { %v6065_v32 = vpop.eup %6064 }
0x3fab   :  { %4434 = vrot.lane.b32.xlu0 %v6065_v32, %s6268_s18 }
0x3fac   :  { %v6067_v26 = vpop.eup %6066 }
0x3fad   :  { %v4415_v2 = vadd.f32 1.0, %v6067_v26 }
0x3faf   :  { %6068 = vrcp.f32 %v4415_v2  ;;  %v4427_v7 = vand.u32 2147483648, %v4415_v2  ;;  %vm4421_vm13 = vweird.f32 %v4415_v2  ;;  %v4425_v36 = vand.u32 2147483647, %v4415_v2 }
0x3fb1   :  { %v4428_v40 = vor.u32 1.1754944e-38, %v4427_v7  ;;  %vm4426_vm15 = vcmp.eq.f32.partialorder %v4425_v36, 8.507059e+37 }
0x3fb5   :  { %v6069_v25 = vpop.eup %6068 }
0x3fb6   :  { %v4417_v57 = vmul.f32 %v6069_v25, %v4415_v2  ;;  %vm4422_vm12 = vweird.f32 %v6069_v25 }
0x3fb7   :  { %vm4423_vm14 = vmor %vm4421_vm13, %vm4422_vm12 }
0x3fb8   :  { %v4418_v29 = vsub.f32 1.0, %v4417_v57 }
0x3fba   :  { %v4419_v56 = vmul.f32 %v6069_v25, %v4418_v29 }
0x3fbc   :  { %v4420_v63 = vadd.f32 %v6069_v25, %v4419_v56 }
0x3fbe   :  { %v4424_v4 = vsel %vm4423_vm14, %v6069_v25, %v4420_v63 }
0x3fbf   :  { %v4429_v28 = vsel %vm4426_vm15, %v4428_v40, %v4424_v4 }
0x3fc0   :  { %v4432_v35 = vmul.f32 %v4429_v28, %v7845_v61  ;;  %v2858_v61 = vadd.f32 %v8178_v39, %v8177_v52 }
0x3fc2   :  { %v2903_v15 = vadd.f32 %v7883_v1, %v2858_v61 }
0x400e   :  { %v4506_v47 = vpop.permute.xlu1 %4505 }
0x400f   :  { %v7864_v9 = vadd.f32 %v4506_v47, %v4498_v41 }
0x4011   :  { %6070 = vtanh.f32 %v7864_v9 }
0x4017   :  { %v6071_v46 = vpop.eup %6070 }
0x4018   :  { %4511 = vrot.lane.b32.xlu2 %v6071_v46, %s6268_s18 }
0x401d   :  { %v4435_v0 = vpop.permute.xlu0 %4434 }
0x401e   :  { %v4437_v53 = vmul.f32 %v4435_v0, %v4429_v28 }
0x4020   :  { %4439 = vrot.lane.b32.xlu2 %v4437_v53, %s6269_s21 }
0x4072   :  { %v4512_v33 = vpop.permute.xlu2 %4511 }
0x4073   :  { %v4514_v49 = vmul.f32 %v4512_v33, %v4495_v51  ;;  %v2711_v51 = vadd.f32 %v8180_v34, %v8179_v12 }
0x4075   :  { %4516 = vrot.lane.b32.xlu1 %v4514_v49, %s6269_s21  ;;  %v2738_v58 = vadd.f32 %v7895_v50, %v2711_v51 }
0x407a   :  { %v4440_v37 = vpop.permute.xlu2 %4439 }
0x407b   :  { %v7871_v48 = vadd.f32 %v4440_v37, %v4432_v35 }
0x407d   :  { %6072 = vtanh.f32 %v7871_v48 }
0x4083   :  { %v6073_v62 = vpop.eup %6072 }
0x4084   :  { %4445 = vrot.lane.b32.xlu0 %v6073_v62, %s6268_s18 }
0x40e7   :  { %v4517_v43 = vpop.permute.xlu1 %4516 }
0x40e8   :  { %4519 = vst.msk [vmem:[#allocation5 + $0x20] sm:$0xff] %vm345_vm9, %v4517_v43  ;;  %5563 = vmatmul.msk.f32.vlgmr.msra.gmra.mxu1 %vm345_vm9, %v4517_v43 }
0x40f6   :  { %v4446_v8 = vpop.permute.xlu0 %4445 }
0x40f7   :  { %v4448_v18 = vmul.f32 %v4446_v8, %v4429_v28  ;;  %v8182_v8 = vld [vmem:[#allocation18_spill] sm:$0xff] }
0x40f9   :  { %4450 = vrot.lane.b32.xlu1 %v4448_v18, %s6269_s21 }
0x4165   :  { %v4606_v59 = vpop.f32.mrf.mxu1 }
0x4166   :  { %v4609_v27 = vadd.f32 %v4606_v59, %v2903_v15 }
0x4168   :  { %6074 = vtanh.f32 %v4609_v27  ;;  %v5564_v16 = vmul.f32 -1.442695, %v4609_v27 }
0x416a   :  { %6076 = vpow2.f32 %v5564_v16  ;;  %v8183_v16 = vld [vmem:[#allocation33_spill] sm:$0xff] }
0x416b   :  { %v4451_v3 = vpop.permute.xlu1 %4450 }
0x416c   :  { %4453 = vst.msk [vmem:[#allocation4 + $0x58] sm:$0xff] %vm345_vm9, %v4451_v3  ;;  %5561 = vmatmul.msk.f32.vlgmr.msra.gmra.mxu0 %vm345_vm9, %v4451_v3 }
0x416e   :  { %v6075_v38 = vpop.eup %6074 }
0x416f   :  { %4632 = vrot.lane.b32.xlu2 %v6075_v38, %s6268_s18 }
0x4170   :  { %v6077_v22 = vpop.eup %6076 }
0x4171   :  { %v4613_v20 = vadd.f32 1.0, %v6077_v22  ;;  %v8184_v22 = vld [vmem:[#allocation32_spill] sm:$0xff] }
0x4173   :  { %6078 = vrcp.f32 %v4613_v20  ;;  %v4625_v23 = vand.u32 2147483648, %v4613_v20  ;;  %vm4619_vm1 = vweird.f32 %v4613_v20  ;;  %v4623_v45 = vand.u32 2147483647, %v4613_v20 }
0x4175   :  { %v4626_v5 = vor.u32 1.1754944e-38, %v4625_v23  ;;  %vm4624_vm3 = vcmp.eq.f32.partialorder %v4623_v45, 8.507059e+37 }
0x4179   :  { %v6079_v17 = vpop.eup %6078 }
0x417a   :  { %v4615_v11 = vmul.f32 %v6079_v17, %v4613_v20  ;;  %vm4620_vm0 = vweird.f32 %v6079_v17  ;;  %v2714_v20 = vadd.f32 %v8184_v22, %v8183_v16  ;;  %v8185_v22 = vld [vmem:[#allocation15_spill] sm:$0xff] }
0x417b   :  { %vm4621_vm2 = vmor %vm4619_vm1, %vm4620_vm0 }
0x417c   :  { %v4616_v24 = vsub.f32 1.0, %v4615_v11  ;;  %v2739_v11 = vadd.f32 %v7895_v50, %v2714_v20  ;;  %v8186_v20 = vld [vmem:[#allocation16_spill] sm:$0xff] }
0x417e   :  { %v4617_v31 = vmul.f32 %v6079_v17, %v4616_v24 }
0x4180   :  { %v4618_v19 = vadd.f32 %v6079_v17, %v4617_v31 }
0x4182   :  { %v4622_v14 = vsel %vm4621_vm2, %v6079_v17, %v4618_v19 }
0x4183   :  { %v4627_v30 = vsel %vm4624_vm3, %v4626_v5, %v4622_v14 }
0x4184   :  { %v4630_v26 = vmul.f32 %v4627_v30, %v7864_v9 }
0x41c9   :  { %v4633_v42 = vpop.permute.xlu2 %4632 }
0x41ca   :  { %v4635_v6 = vmul.f32 %v4633_v42, %v4627_v30 }
0x41cc   :  { %4637 = vrot.lane.b32.xlu0 %v4635_v6, %s6269_s21 }
0x41e9   :  { %v4540_v54 = vpop.f32.mrf.mxu0 }
0x41ea   :  { %v4543_v10 = vadd.f32 %v4540_v54, %v2738_v58 }
0x41ec   :  { %6080 = vtanh.f32 %v4543_v10  ;;  %v5562_v21 = vmul.f32 -1.442695, %v4543_v10 }
0x41ee   :  { %6082 = vpow2.f32 %v5562_v21 }
0x41f2   :  { %v6081_v55 = vpop.eup %6080 }
0x41f3   :  { %4566 = vrot.lane.b32.xlu2 %v6081_v55, %s6268_s18 }
0x41f4   :  { %v6083_v13 = vpop.eup %6082 }
0x41f5   :  { %v4547_v60 = vadd.f32 1.0, %v6083_v13 }
0x41f7   :  { %6084 = vrcp.f32 %v4547_v60  ;;  %v4559_v56 = vand.u32 2147483648, %v4547_v60  ;;  %vm4553_vm5 = vweird.f32 %v4547_v60  ;;  %v4557_v63 = vand.u32 2147483647, %v4547_v60 }
0x41f9   :  { %v4560_v7 = vor.u32 1.1754944e-38, %v4559_v56  ;;  %vm4558_vm7 = vcmp.eq.f32.partialorder %v4557_v63, 8.507059e+37 }
0x41fd   :  { %v6085_v32 = vpop.eup %6084 }
0x41fe   :  { %v4549_v44 = vmul.f32 %v6085_v32, %v4547_v60  ;;  %vm4554_vm4 = vweird.f32 %v6085_v32 }
0x41ff   :  { %vm4555_vm6 = vmor %vm4553_vm5, %vm4554_vm4 }
0x4200   :  { %v4550_v25 = vsub.f32 1.0, %v4549_v44 }
0x4202   :  { %v4551_v41 = vmul.f32 %v6085_v32, %v4550_v25 }
0x4204   :  { %v4552_v47 = vadd.f32 %v6085_v32, %v4551_v41 }
0x4206   :  { %v4556_v46 = vsel %vm4555_vm6, %v6085_v32, %v4552_v47 }
0x4207   :  { %v4561_v9 = vsel %vm4558_vm7, %v4560_v7, %v4556_v46 }
0x4208   :  { %v4564_v0 = vmul.f32 %v4561_v9, %v7871_v48  ;;  %v8181_v48 = vld [vmem:[#allocation17_spill] sm:$0xff] }
0x4209   :  { %v2855_v18 = vadd.f32 %v8182_v8, %v8181_v48  ;;  %v5051_v48 = vld [vmem:[#allocation4 + $0x18] sm:$0xff] }
0x420b   :  { %v2902_v52 = vadd.f32 %v7883_v1, %v2855_v18 }
0x423e   :  { %v4638_v2 = vpop.permute.xlu0 %4637 }
0x423f   :  { %v7900_v57 = vadd.f32 %v4638_v2, %v4630_v26 }
0x4241   :  { %6086 = vtanh.f32 %v7900_v57 }
0x4247   :  { %v6087_v29 = vpop.eup %6086 }
0x4248   :  { %4643 = vrot.lane.b32.xlu1 %v6087_v29, %s6268_s18 }
0x424d   :  { %v4567_v36 = vpop.permute.xlu2 %4566 }
0x424e   :  { %v4569_v4 = vmul.f32 %v4567_v36, %v4561_v9 }
0x4250   :  { %4571 = vrot.lane.b32.xlu1 %v4569_v4, %s6269_s21 }
0x42ba   :  { %v4644_v40 = vpop.permute.xlu1 %4643 }
0x42bb   :  { %v4646_v28 = vmul.f32 %v4644_v40, %v4627_v30 }
0x42bd   :  { %4648 = vrot.lane.b32.xlu0 %v4646_v28, %s6269_s21 }
0x42c2   :  { %v4572_v53 = vpop.permute.xlu1 %4571 }
0x42c3   :  { %v7907_v33 = vadd.f32 %v4572_v53, %v4564_v0  ;;  %v5067_v0 = vld [vmem:[%s8140_s13 + $0x18] sm:$0xff]  ;;  %v5066_v53 = vld [vmem:[%s8140_s13 + $0x10] sm:$0xff] }
0x42c4   :  { %5261 = vmatpush.msra.mxu1 %v5067_v0 }
0x42c5   :  { %6088 = vtanh.f32 %v7907_v33 }
0x42c6   :  { %5262 = vmatpush.msra.mxu1 %v5066_v53 }
0x42cb   :  { %v6089_v49 = vpop.eup %6088 }
0x42cc   :  { %4577 = vrot.lane.b32.xlu2 %v6089_v49, %s6268_s18  ;;  %v5064_v49 = vld [vmem:[%s8140_s13] sm:$0xff] }
0x4326   :  { %v4578_v35 = vpop.permute.xlu2 %4577 }
0x4327   :  { %v4580_v37 = vmul.f32 %v4578_v35, %v4561_v9 }
0x4329   :  { %4582 = vrot.lane.b32.xlu0 %v4580_v37, %s6269_s21  ;;  %v5048_v37 = vld [vmem:[#allocation4] sm:$0xff] }
0x432f   :  { %v4649_v62 = vpop.permute.xlu0 %4648 }
0x4330   :  { %4651 = vst.msk [vmem:[#allocation5 + $0x18] sm:$0xff] %vm345_vm9, %v4649_v62  ;;  %5567 = vmatmul.msk.f32.vlgmr.msra.gmra.mxu3 %vm345_vm9, %v4649_v62  ;;  %v5049_v62 = vld [vmem:[#allocation4 + $0x8] sm:$0xff] }
0x439b   :  { %v4583_v43 = vpop.permute.xlu0 %4582 }
0x439c   :  { %4585 = vst.msk [vmem:[#allocation4 + $0x60] sm:$0xff] %vm345_vm9, %v4583_v43  ;;  %5565 = vmatmul.msk.f32.vlgmr.msra.gmra.mxu2 %vm345_vm9, %v4583_v43  ;;  %v5050_v43 = vld [vmem:[#allocation4 + $0x10] sm:$0xff] }
0x43a3   :  { %v5060_v16 = vld [vmem:[#allocation4 + $0x60] sm:$0xff] }
0x43b3   :  { %v4738_v39 = vpop.f32.mrf.mxu3 }
0x43b4   :  { %v4741_v61 = vadd.f32 %v4738_v39, %v2902_v52  ;;  %v5052_v52 = vld [vmem:[#allocation4 + $0x20] sm:$0xff]  ;;  %v5053_v39 = vld [vmem:[#allocation4 + $0x28] sm:$0xff] }
0x43b6   :  { %6090 = vtanh.f32 %v4741_v61  ;;  %v5568_v59 = vmul.f32 -1.442695, %v4741_v61  ;;  %v5054_v61 = vld [vmem:[#allocation4 + $0x30] sm:$0xff] }
0x43b8   :  { %6092 = vpow2.f32 %v5568_v59  ;;  %v5056_v59 = vld [vmem:[#allocation4 + $0x40] sm:$0xff] }
0x43bc   :  { %v6091_v15 = vpop.eup %6090 }
0x43bd   :  { %4764 = vrot.lane.b32.xlu1 %v6091_v15, %s6268_s18  ;;  %v5055_v15 = vld [vmem:[#allocation4 + $0x38] sm:$0xff] }
0x43be   :  { %v6093_v27 = vpop.eup %6092 }
0x43bf   :  { %v4745_v3 = vadd.f32 1.0, %v6093_v27  ;;  %v5057_v27 = vld [vmem:[#allocation4 + $0x48] sm:$0xff] }
0x43c1   :  { %6094 = vrcp.f32 %v4745_v3  ;;  %v4757_v5 = vand.u32 2147483648, %v4745_v3  ;;  %vm4751_vm10 = vweird.f32 %v4745_v3  ;;  %v4755_v30 = vand.u32 2147483647, %v4745_v3 }
0x43c3   :  { %v4758_v6 = vor.u32 1.1754944e-38, %v4757_v5  ;;  %vm4756_vm12 = vcmp.eq.f32.partialorder %v4755_v30, 8.507059e+37 }
0x43c7   :  { %v6095_v38 = vpop.eup %6094 }
0x43c8   :  { %v4747_v17 = vmul.f32 %v6095_v38, %v4745_v3  ;;  %vm4752_vm8 = vweird.f32 %v6095_v38  ;;  %v5058_v3 = vld [vmem:[#allocation4 + $0x50] sm:$0xff] }
0x43c9   :  { %vm4753_vm11 = vmor %vm4751_vm10, %vm4752_vm8 }
0x43ca   :  { %v4748_v19 = vsub.f32 1.0, %v4747_v17  ;;  %v2852_v17 = vadd.f32 %v8186_v20, %v8185_v22 }
0x43cc   :  { %v4749_v23 = vmul.f32 %v6095_v38, %v4748_v19 }
0x43ce   :  { %v4750_v14 = vadd.f32 %v6095_v38, %v4749_v23 }
0x43d0   :  { %v4754_v42 = vsel %vm4753_vm11, %v6095_v38, %v4750_v14  ;;  %v5059_v38 = vld [vmem:[#allocation4 + $0x58] sm:$0xff] }
0x43d1   :  { %v4759_v12 = vsel %vm4756_vm12, %v4758_v6, %v4754_v42 }
0x43d2   :  { %v4762_v13 = vmul.f32 %v4759_v12, %v7900_v57 }
0x441f   :  { %v4672_v24 = vpop.f32.mrf.mxu2 }
0x4420   :  { %v4675_v31 = vadd.f32 %v4672_v24, %v2739_v11  ;;  %v2901_v11 = vadd.f32 %v7883_v1, %v2852_v17 }
0x4422   :  { %6096 = vtanh.f32 %v4675_v31  ;;  %v5566_v58 = vmul.f32 -1.442695, %v4675_v31 }
0x4424   :  { %6098 = vpow2.f32 %v5566_v58 }
0x4428   :  { %v6097_v45 = vpop.eup %6096 }
0x4429   :  { %4698 = vrot.lane.b32.xlu1 %v6097_v45, %s6268_s18 }
0x442a   :  { %v6099_v54 = vpop.eup %6098 }
0x442b   :  { %v4679_v10 = vadd.f32 1.0, %v6099_v54 }
0x442d   :  { %6100 = vrcp.f32 %v4679_v10  ;;  %v4691_v41 = vand.u32 2147483648, %v4679_v10  ;;  %vm4685_vm14 = vweird.f32 %v4679_v10  ;;  %v4689_v47 = vand.u32 2147483647, %v4679_v10 }
0x442f   :  { %v4765_v34 = vpop.permute.xlu1 %4764  ;;  %v4692_v56 = vor.u32 1.1754944e-38, %v4691_v41  ;;  %vm4690_vm0 = vcmp.eq.f32.partialorder %v4689_v47, 8.507059e+37 }
0x4430   :  { %v4767_v51 = vmul.f32 %v4765_v34, %v4759_v12 }
0x4432   :  { %4769 = vrot.lane.b32.xlu2 %v4767_v51, %s6269_s21 }
0x4433   :  { %v6101_v55 = vpop.eup %6100 }
0x4434   :  { %v4681_v21 = vmul.f32 %v6101_v55, %v4679_v10  ;;  %vm4686_vm13 = vweird.f32 %v6101_v55 }
0x4435   :  { %vm4687_vm15 = vmor %vm4685_vm14, %vm4686_vm13 }
0x4436   :  { %v4682_v32 = vsub.f32 1.0, %v4681_v21 }
0x4438   :  { %v4683_v26 = vmul.f32 %v6101_v55, %v4682_v32  ;;  %v8187_v32 = vld [vmem:[#allocation35_spill] sm:$0xff] }
0x443a   :  { %v4684_v2 = vadd.f32 %v6101_v55, %v4683_v26  ;;  %v8188_v26 = vld [vmem:[#allocation34_spill] sm:$0xff] }
0x443c   :  { %v4688_v29 = vsel %vm4687_vm15, %v6101_v55, %v4684_v2  ;;  %v2717_v2 = vadd.f32 %v8188_v26, %v8187_v32 }
0x443d   :  { %v4693_v57 = vsel %vm4690_vm0, %v4692_v56, %v4688_v29 }
0x443e   :  { %v4696_v36 = vmul.f32 %v4693_v57, %v7907_v33  ;;  %v5065_v33 = vld [vmem:[%s8140_s13 + $0x8] sm:$0xff] }
0x443f   :  { %5263 = vmatpush.msra.mxu1 %v5065_v33 }
0x4441   :  { %5264 = vmatpush.msra.mxu1 %v5064_v49 }
0x448c   :  { %v4770_v60 = vpop.permute.xlu2 %4769 }
0x448d   :  { %v7926_v44 = vadd.f32 %v4770_v60, %v4762_v13 }
0x448f   :  { %6102 = vtanh.f32 %v7926_v44 }
0x4495   :  { %v6103_v25 = vpop.eup %6102 }
0x4496   :  { %4775 = vrot.lane.b32.xlu0 %v6103_v25, %s6268_s18  ;;  %v2740_v25 = vadd.f32 %v7895_v50, %v2717_v2 }
0x449b   :  { %v4699_v63 = vpop.permute.xlu1 %4698 }
0x449c   :  { %v4701_v46 = vmul.f32 %v4699_v63, %v4693_v57 }
0x449e   :  { %4703 = vrot.lane.b32.xlu0 %v4701_v46, %s6269_s21 }
0x4508   :  { %v4776_v7 = vpop.permute.xlu0 %4775 }
0x4509   :  { %v4778_v9 = vmul.f32 %v4776_v7, %v4759_v12 }
0x450b   :  { %4780 = vrot.lane.b32.xlu2 %v4778_v9, %s6269_s21 }
0x4510   :  { %v4704_v4 = vpop.permute.xlu0 %4703 }
0x4511   :  { %v7933_v40 = vadd.f32 %v4704_v4, %v4696_v36 }
0x4513   :  { %6104 = vtanh.f32 %v7933_v40 }
0x4519   :  { %v6105_v28 = vpop.eup %6104 }
0x451a   :  { %4709 = vrot.lane.b32.xlu1 %v6105_v28, %s6268_s18 }
0x4565   :  { %v4781_v35 = vpop.permute.xlu2 %4780 }
0x4566   :  { %4783 = vst.msk [vmem:[#allocation5 + $0x10] sm:$0xff] %vm345_vm9, %v4781_v35  ;;  %5571 = vmatmul.msk.f32.vlgmr.msrb.gmra.mxu1 %vm345_vm9, %v4781_v35 }
0x456e   :  { %5593 = vmatmul.msk.f32.vlgmr.msra.gmra.mxu1 %vm345_vm9, %v5048_v37 }
0x4576   :  { %5594 = vmatmul.msk.f32.gmra.mxu1 %vm345_vm9, %v5049_v62 }
0x457e   :  { %5595 = vmatmul.msk.f32.gmra.mxu1 %vm345_vm9, %v5050_v43 }
0x4586   :  { %5596 = vmatmul.msk.f32.gmra.mxu1 %vm345_vm9, %v5051_v48 }
0x458c   :  { %v4710_v8 = vpop.permute.xlu1 %4709 }
0x458d   :  { %v4712_v18 = vmul.f32 %v4710_v8, %v4693_v57 }
0x458e   :  { %5597 = vmatmul.msk.f32.gmra.mxu1 %vm345_vm9, %v5052_v52 }
0x458f   :  { %4714 = vrot.lane.b32.xlu2 %v4712_v18, %s6269_s21 }
0x4596   :  { %5598 = vmatmul.msk.f32.gmra.mxu1 %vm345_vm9, %v5053_v39 }
0x459e   :  { %5599 = vmatmul.msk.f32.gmra.mxu1 %vm345_vm9, %v5054_v61 }
0x45a6   :  { %5600 = vmatmul.msk.f32.gmra.mxu1 %vm345_vm9, %v5055_v15 }
0x45ae   :  { %5601 = vmatmul.msk.f32.gmra.mxu1 %vm345_vm9, %v5056_v59 }
0x45b6   :  { %5602 = vmatmul.msk.f32.gmra.mxu1 %vm345_vm9, %v5057_v27 }
0x45be   :  { %5603 = vmatmul.msk.f32.gmra.mxu1 %vm345_vm9, %v5058_v3 }
0x45c6   :  { %5604 = vmatmul.msk.f32.gmra.mxu1 %vm345_vm9, %v5059_v38  ;;  %v8189_v38 = vld [vmem:[#allocation13_spill] sm:$0xff] }
0x45ce   :  { %5605 = vmatmul.msk.f32.gmra.mxu1 %vm345_vm9, %v5060_v16  ;;  %v8190_v16 = vld [vmem:[#allocation14_spill] sm:$0xff] }
0x45e3   :  { %v4870_v24 = vpop.f32.mrf.mxu1 }
0x45e4   :  { %v4873_v31 = vadd.f32 %v4870_v24, %v2901_v11 }
0x45e6   :  { %6106 = vtanh.f32 %v4873_v31  ;;  %v5572_v14 = vmul.f32 -1.442695, %v4873_v31 }
0x45e8   :  { %6108 = vpow2.f32 %v5572_v14 }
0x45e9   :  { %v4715_v19 = vpop.permute.xlu2 %4714 }
0x45ea   :  { %4717 = vst.msk [vmem:[#allocation4 + $0x68] sm:$0xff] %vm345_vm9, %v4715_v19  ;;  %5569 = vmatmul.msk.f32.vlgmr.msrb.gmra.mxu0 %vm345_vm9, %v4715_v19 }
0x45ec   :  { %v6107_v23 = vpop.eup %6106 }
0x45ed   :  { %4896 = vrot.lane.b32.xlu0 %v6107_v23, %s6268_s18 }
0x45ee   :  { %v6109_v5 = vpop.eup %6108 }
0x45ef   :  { %v4877_v30 = vadd.f32 1.0, %v6109_v5 }
0x45f1   :  { %v5061_v45 = vld [vmem:[#allocation4 + $0x68] sm:$0xff]  ;;  %6110 = vrcp.f32 %v4877_v30  ;;  %v4889_v58 = vand.u32 2147483648, %v4877_v30  ;;  %vm4883_vm2 = vweird.f32 %v4877_v30  ;;  %v4887_v54 = vand.u32 2147483647, %v4877_v30 }
0x45f2   :  { %5606 = vmatmul.msk.f32.gmra.mxu1 %vm345_vm9, %v5061_v45 }
0x45f3   :  { %v4890_v55 = vor.u32 1.1754944e-38, %v4889_v58  ;;  %vm4888_vm4 = vcmp.eq.f32.partialorder %v4887_v54, 8.507059e+37 }
0x45f7   :  { %v6111_v42 = vpop.eup %6110 }
0x45f8   :  { %v4879_v6 = vmul.f32 %v6111_v42, %v4877_v30  ;;  %vm4884_vm1 = vweird.f32 %v6111_v42 }
0x45f9   :  { %vm4885_vm3 = vmor %vm4883_vm2, %vm4884_vm1  ;;  %vm5334_vm2 = vcmask 80896  }
0x45fa   :  { %v4880_v12 = vsub.f32 1.0, %v4879_v6 }
0x45fc   :  { %v4881_v34 = vmul.f32 %v6111_v42, %v4880_v12 }
0x45fe   :  { %v4882_v51 = vadd.f32 %v6111_v42, %v4881_v34 }
0x4600   :  { %v4886_v10 = vsel %vm4885_vm3, %v6111_v42, %v4882_v51 }
0x4601   :  { %v4891_v21 = vsel %vm4888_vm4, %v4890_v55, %v4886_v10  ;;  %v8191_v55 = vld [vmem:[#allocation37_spill] sm:$0xff] }
0x4602   :  { %v4894_v9 = vmul.f32 %v4891_v21, %v7926_v44 }
0x465f   :  { %v4897_v13 = vpop.permute.xlu0 %4896 }
0x4660   :  { %v4899_v60 = vmul.f32 %v4897_v13, %v4891_v21 }
0x4662   :  { %4901 = vrot.lane.b32.xlu1 %v4899_v60, %s6269_s21 }
0x4667   :  { %v4804_v41 = vpop.f32.mrf.mxu0 }
0x4668   :  { %v4807_v47 = vadd.f32 %v4804_v41, %v2740_v25 }
0x466a   :  { %6112 = vtanh.f32 %v4807_v47  ;;  %v5570_v56 = vmul.f32 -1.442695, %v4807_v47 }
0x466c   :  { %6114 = vpow2.f32 %v5570_v56 }
0x4670   :  { %v6113_v29 = vpop.eup %6112 }
0x4671   :  { %4830 = vrot.lane.b32.xlu0 %v6113_v29, %s6268_s18 }
0x4672   :  { %v6115_v57 = vpop.eup %6114 }
0x4673   :  { %v4811_v63 = vadd.f32 1.0, %v6115_v57 }
0x4675   :  { %6116 = vrcp.f32 %v4811_v63  ;;  %v4823_v49 = vand.u32 2147483648, %v4811_v63  ;;  %vm4817_vm6 = vweird.f32 %v4811_v63  ;;  %v4821_v35 = vand.u32 2147483647, %v4811_v63 }
0x4677   :  { %v4824_v62 = vor.u32 1.1754944e-38, %v4823_v49  ;;  %vm4822_vm8 = vcmp.eq.f32.partialorder %v4821_v35, 8.507059e+37 }
0x467b   :  { %v6117_v46 = vpop.eup %6116 }
0x467c   :  { %v4813_v7 = vmul.f32 %v6117_v46, %v4811_v63  ;;  %vm4818_vm5 = vweird.f32 %v6117_v46 }
0x467d   :  { %vm4819_vm7 = vmor %vm4817_vm6, %vm4818_vm5 }
0x467e   :  { %v4814_v4 = vsub.f32 1.0, %v4813_v7 }
0x4680   :  { %v4815_v0 = vmul.f32 %v6117_v46, %v4814_v4 }
0x4682   :  { %v4816_v53 = vadd.f32 %v6117_v46, %v4815_v0 }
0x4684   :  { %v4820_v37 = vsel %vm4819_vm7, %v6117_v46, %v4816_v53 }
0x4685   :  { %v4825_v44 = vsel %vm4822_vm8, %v4824_v62, %v4820_v37 }
0x4686   :  { %v4828_v52 = vmul.f32 %v4825_v44, %v7933_v40  ;;  %v2849_v40 = vadd.f32 %v8190_v16, %v8189_v38  ;;  %v5070_v16 = vld [vmem:[#allocation5 + $0x10] sm:$0xff] }
0x4688   :  { %v2900_v22 = vadd.f32 %v7883_v1, %v2849_v40  ;;  %v5071_v40 = vld [vmem:[#allocation5 + $0x18] sm:$0xff] }
0x46d4   :  { %v4902_v36 = vpop.permute.xlu1 %4901 }
0x46d5   :  { %v7978_v28 = vadd.f32 %v4902_v36, %v4894_v9 }
0x46d7   :  { %6118 = vtanh.f32 %v7978_v28 }
0x46dd   :  { %v6119_v33 = vpop.eup %6118 }
0x46de   :  { %4907 = vrot.lane.b32.xlu2 %v6119_v33, %s6268_s18 }
0x46e3   :  { %v4831_v43 = vpop.permute.xlu0 %4830 }
0x46e4   :  { %v4833_v48 = vmul.f32 %v4831_v43, %v4825_v44 }
0x46e6   :  { %4835 = vrot.lane.b32.xlu2 %v4833_v48, %s6269_s21 }
0x4738   :  { %v4908_v8 = vpop.permute.xlu2 %4907 }
0x4739   :  { %v4910_v18 = vmul.f32 %v4908_v8, %v4891_v21  ;;  %v8192_v21 = vld [vmem:[#allocation36_spill] sm:$0xff] }
0x473a   :  { %v2720_v13 = vadd.f32 %v8192_v21, %v8191_v55 }
0x473b   :  { %4912 = vrot.lane.b32.xlu1 %v4910_v18, %s6269_s21  ;;  %v5087_v18 = vld [vmem:[%s8140_s13 + $0x38] sm:$0xff] }
0x473c   :  { %v2741_v60 = vadd.f32 %v7895_v50, %v2720_v13  ;;  %5148 = vmatpush.msra.mxu0 %v5087_v18 }
0x4740   :  { %v4836_v39 = vpop.permute.xlu2 %4835 }
0x4741   :  { %v7985_v61 = vadd.f32 %v4836_v39, %v4828_v52  ;;  %v5086_v52 = vld [vmem:[%s8140_s13 + $0x30] sm:$0xff]  ;;  %v5085_v39 = vld [vmem:[%s8140_s13 + $0x28] sm:$0xff] }
0x4742   :  { %5149 = vmatpush.msra.mxu0 %v5086_v52 }
0x4743   :  { %6120 = vtanh.f32 %v7985_v61 }
0x4744   :  { %5150 = vmatpush.msra.mxu0 %v5085_v39 }
0x4749   :  { %v6121_v15 = vpop.eup %6120 }
0x474a   :  { %4841 = vrot.lane.b32.xlu0 %v6121_v15, %s6268_s18 }
0x47ad   :  { %v4913_v59 = vpop.permute.xlu1 %4912 }
0x47ae   :  { %4915 = vst.msk [vmem:[#allocation5 + $0x8] sm:$0xff] %vm345_vm9, %v4913_v59  ;;  %5575 = vmatmul.msk.f32.vlgmr.msrb.gmra.mxu3 %vm345_vm9, %v4913_v59 }
0x47b5   :  { %v5069_v38 = vld [vmem:[#allocation5 + $0x8] sm:$0xff] }
0x47bc   :  { %v4842_v27 = vpop.permute.xlu0 %4841 }
0x47bd   :  { %v4844_v3 = vmul.f32 %v4842_v27, %v4825_v44 }
0x47bf   :  { %4846 = vrot.lane.b32.xlu1 %v4844_v3, %s6269_s21 }
0x4831   :  { %v5002_v20 = vpop.f32.mrf.mxu3  ;;  %v4847_v17 = vpop.permute.xlu1 %4846 }
0x4832   :  { %v5005_v11 = vadd.f32 %v5002_v20, %v2900_v22  ;;  %4849 = vst.msk [vmem:[#allocation4 + $0x70] sm:$0xff] %vm345_vm9, %v4847_v17  ;;  %5573 = vmatmul.msk.f32.vlgmr.msrb.gmra.mxu2 %vm345_vm9, %v4847_v17  ;;  %v5072_v22 = vld [vmem:[#allocation5 + $0x20] sm:$0xff]  ;;  %v5073_v20 = vld [vmem:[#allocation5 + $0x28] sm:$0xff]  ;;  %v5074_v17 = vld [vmem:[#allocation5 + $0x30] sm:$0xff] }
0x4834   :  { %6122 = vtanh.f32 %v5005_v11  ;;  %v5576_v19 = vmul.f32 -1.442695, %v5005_v11  ;;  %v5075_v11 = vld [vmem:[#allocation5 + $0x38] sm:$0xff] }
0x4836   :  { %6124 = vpow2.f32 %v5576_v19  ;;  %v5078_v19 = vld [vmem:[#allocation5 + $0x50] sm:$0xff] }
0x4839   :  { %v5062_v24 = vld [vmem:[#allocation4 + $0x70] sm:$0xff] }
0x483a   :  { %v6123_v31 = vpop.eup %6122  ;;  %5607 = vmatmul.msk.f32.gmra.mxu1 %vm345_vm9, %v5062_v24  ;;  %v5076_v24 = vld [vmem:[#allocation5 + $0x40] sm:$0xff] }
0x483b   :  { %5028 = vrot.lane.b32.xlu2 %v6123_v31, %s6268_s18  ;;  %v5077_v31 = vld [vmem:[#allocation5 + $0x48] sm:$0xff] }
0x483c   :  { %v6125_v23 = vpop.eup %6124 }
0x483d   :  { %v5009_v45 = vadd.f32 1.0, %v6125_v23  ;;  %v5079_v23 = vld [vmem:[#allocation5 + $0x58] sm:$0xff] }
0x483f   :  { %6126 = vrcp.f32 %v5009_v45  ;;  %v5021_v6 = vand.u32 2147483648, %v5009_v45  ;;  %vm5015_vm11 = vweird.f32 %v5009_v45  ;;  %v5019_v12 = vand.u32 2147483647, %v5009_v45 }
0x4841   :  { %v5022_v51 = vor.u32 1.1754944e-38, %v5021_v6  ;;  %vm5020_vm13 = vcmp.eq.f32.partialorder %v5019_v12, 8.507059e+37  ;;  %v5082_v6 = vld [vmem:[#allocation5 + $0x70] sm:$0xff]  ;;  %v5083_v12 = vld [vmem:[#allocation5 + $0x78] sm:$0xff] }
0x4845   :  { %v6127_v1 = vpop.eup %6126 }
0x4846   :  { %v5011_v14 = vmul.f32 %v6127_v1, %v5009_v45  ;;  %vm5016_vm10 = vweird.f32 %v6127_v1  ;;  %v5080_v45 = vld [vmem:[#allocation5 + $0x60] sm:$0xff] }
0x4847   :  { %vm5017_vm12 = vmor %vm5015_vm11, %vm5016_vm10 }
0x4848   :  { %v5012_v5 = vsub.f32 1.0, %v5011_v14  ;;  %v5266_v14 = vpop.f32.mrf.mxu1 }
0x484a   :  { %v5013_v30 = vmul.f32 %v6127_v1, %v5012_v5  ;;  %v5081_v5 = vld [vmem:[#allocation5 + $0x68] sm:$0xff] }
0x484c   :  { %v5014_v42 = vadd.f32 %v6127_v1, %v5013_v30 }
0x484e   :  { %v5018_v34 = vsel %vm5017_vm12, %v6127_v1, %v5014_v42 }
0x484f   :  { %v5023_v58 = vsel %vm5020_vm13, %v5022_v51, %v5018_v34  ;;  %v8045_v51 = vld [vmem:[%s8141_s14] ss:$0 sm:$0xff] }
0x4850   :  { %v5026_v57 = vmul.f32 %v5023_v58, %v7978_v28  ;;  %v5269_v42 = vpop.f32.mrf.mxu1 }
0x4858   :  { %v5272_v34 = vpop.f32.mrf.mxu1 }
0x4860   :  { %v5275_v55 = vpop.f32.mrf.mxu1 }
0x4895   :  { %v5029_v54 = vpop.permute.xlu2 %5028 }
0x4896   :  { %v5031_v10 = vmul.f32 %v5029_v54, %v5023_v58 }
0x4898   :  { %5033 = vrot.lane.b32.xlu0 %v5031_v10, %s6269_s21 }
0x48b5   :  { %v4936_v32 = vpop.f32.mrf.mxu2 }
0x48b6   :  { %v4939_v26 = vadd.f32 %v4936_v32, %v2741_v60  ;;  %v5278_v32 = vpop.f32.mrf.mxu1 }
0x48b8   :  { %6128 = vtanh.f32 %v4939_v26  ;;  %v5574_v25 = vmul.f32 -1.442695, %v4939_v26 }
0x48ba   :  { %6130 = vpow2.f32 %v5574_v25 }
0x48be   :  { %v6129_v2 = vpop.eup %6128 }
0x48bf   :  { %4962 = vrot.lane.b32.xlu2 %v6129_v2, %s6268_s18 }
0x48c0   :  { %v6131_v41 = vpop.eup %6130 }
0x48c1   :  { %v4943_v47 = vadd.f32 1.0, %v6131_v41 }
0x48c3   :  { %6132 = vrcp.f32 %v4943_v47  ;;  %v4955_v4 = vand.u32 2147483648, %v4943_v47  ;;  %vm4949_vm15 = vweird.f32 %v4943_v47  ;;  %v4953_v0 = vand.u32 2147483647, %v4943_v47 }
0x48c5   :  { %v4956_v33 = vor.u32 1.1754944e-38, %v4955_v4  ;;  %vm4954_vm1 = vcmp.eq.f32.partialorder %v4953_v0, 8.507059e+37 }
0x48c9   :  { %v6133_v29 = vpop.eup %6132 }
0x48ca   :  { %v4945_v56 = vmul.f32 %v6133_v29, %v4943_v47  ;;  %vm4950_vm14 = vweird.f32 %v6133_v29 }
0x48cb   :  { %vm4951_vm0 = vmor %vm4949_vm15, %vm4950_vm14 }
0x48cc   :  { %v4946_v46 = vsub.f32 1.0, %v4945_v56 }
0x48ce   :  { %v4947_v50 = vmul.f32 %v6133_v29, %v4946_v46 }
0x48d0   :  { %v4948_v9 = vadd.f32 %v6133_v29, %v4947_v50 }
0x48d2   :  { %v4952_v53 = vsel %vm4951_vm0, %v6133_v29, %v4948_v9  ;;  %v5281_v29 = vpop.f32.mrf.mxu1 }
0x48d3   :  { %v4957_v35 = vsel %vm4954_vm1, %v4956_v33, %v4952_v53 }
0x48d4   :  { %v4960_v44 = vmul.f32 %v4957_v35, %v7985_v61  ;;  %v5084_v61 = vld [vmem:[%s8140_s13 + $0x20] sm:$0xff] }
0x48d5   :  { %5151 = vmatpush.msra.mxu0 %v5084_v61 }
0x490a   :  { %v5034_v63 = vpop.permute.xlu0 %5033 }
0x490b   :  { %v5036_v7 = vadd.f32 %v5034_v63, %v5026_v57 }
0x490d   :  { %6134 = vtanh.f32 %v5036_v7  ;;  %v5284_v7 = vpop.f32.mrf.mxu1 }
0x4913   :  { %v6135_v36 = vpop.eup %6134 }
0x4914   :  { %5039 = vrot.lane.b32.xlu1 %v6135_v36, %s6268_s18 }
0x4915   :  { %v5287_v4 = vpop.f32.mrf.mxu1 }
0x4919   :  { %v4963_v49 = vpop.permute.xlu2 %4962 }
0x491a   :  { %v4965_v28 = vmul.f32 %v4963_v49, %v4957_v35 }
0x491c   :  { %4967 = vrot.lane.b32.xlu1 %v4965_v28, %s6269_s21 }
0x491d   :  { %v5290_v49 = vpop.f32.mrf.mxu1 }
0x4986   :  { %v5040_v37 = vpop.permute.xlu1 %5039 }
0x4987   :  { %v5042_v62 = vmul.f32 %v5040_v37, %v5023_v58 }
0x4989   :  { %5044 = vrot.lane.b32.xlu0 %v5042_v62, %s6269_s21 }
0x498e   :  { %v4968_v43 = vpop.permute.xlu1 %4967 }
0x498f   :  { %v4970_v48 = vadd.f32 %v4968_v43, %v4960_v44  ;;  %v5293_v43 = vpop.f32.mrf.mxu1 }
0x4991   :  { %6136 = vtanh.f32 %v4970_v48 }
0x4997   :  { %v6137_v8 = vpop.eup %6136  ;;  %v5296_v39 = vpop.f32.mrf.mxu1 }
0x4998   :  { %4973 = vrot.lane.b32.xlu2 %v6137_v8, %s6268_s18 }
0x49f2   :  { %v4974_v15 = vpop.permute.xlu2 %4973 }
0x49f3   :  { %v4976_v59 = vmul.f32 %v4974_v15, %v4957_v35 }
0x49f5   :  { %4978 = vrot.lane.b32.xlu0 %v4976_v59, %s6269_s21 }
0x49fb   :  { %v5045_v27 = vpop.permute.xlu0 %5044 }
0x49fc   :  { %5047 = vst.msk [vmem:[#allocation5] sm:$0xff] %vm345_vm9, %v5045_v27  ;;  %v5299_v27 = vpop.f32.mrf.mxu1 }
0x4a03   :  { %v5068_v3 = vld [vmem:[#allocation5] sm:$0xff] }
0x4a04   :  { %5577 = vmatmul.msk.f32.vlgmr.msra.gmra.mxu0 %vm345_vm9, %v5068_v3 }
0x4a0c   :  { %5578 = vmatmul.msk.f32.gmra.mxu0 %vm345_vm9, %v5069_v38 }
0x4a14   :  { %5579 = vmatmul.msk.f32.gmra.mxu0 %vm345_vm9, %v5070_v16 }
0x4a1c   :  { %5580 = vmatmul.msk.f32.gmra.mxu0 %vm345_vm9, %v5071_v40  ;;  %v5302_v40 = vpop.f32.mrf.mxu1 }
0x4a24   :  { %5581 = vmatmul.msk.f32.gmra.mxu0 %vm345_vm9, %v5072_v22 }
0x4a2c   :  { %5582 = vmatmul.msk.f32.gmra.mxu0 %vm345_vm9, %v5073_v20 }
0x4a34   :  { %5583 = vmatmul.msk.f32.gmra.mxu0 %vm345_vm9, %v5074_v17 }
0x4a3c   :  { %5584 = vmatmul.msk.f32.gmra.mxu0 %vm345_vm9, %v5075_v11  ;;  %v5305_v11 = vpop.f32.mrf.mxu1 }
0x4a44   :  { %5585 = vmatmul.msk.f32.gmra.mxu0 %vm345_vm9, %v5076_v24 }
0x4a4c   :  { %5586 = vmatmul.msk.f32.gmra.mxu0 %vm345_vm9, %v5077_v31 }
0x4a54   :  { %5587 = vmatmul.msk.f32.gmra.mxu0 %vm345_vm9, %v5078_v19 }
0x4a5c   :  { %5588 = vmatmul.msk.f32.gmra.mxu0 %vm345_vm9, %v5079_v23  ;;  %v5308_v23 = vpop.f32.mrf.mxu1 }
0x4a64   :  { %5589 = vmatmul.msk.f32.gmra.mxu0 %vm345_vm9, %v5080_v45 }
0x4a67   :  { %v4979_v1 = vpop.permute.xlu0 %4978 }
0x4a68   :  { %4981 = vst.msk [vmem:[#allocation4 + $0x78] sm:$0xff] %vm345_vm9, %v4979_v1 }
0x4a6c   :  { %5590 = vmatmul.msk.f32.gmra.mxu0 %vm345_vm9, %v5081_v5 }
0x4a6f   :  { %v5063_v30 = vld [vmem:[#allocation4 + $0x78] sm:$0xff] }
0x4a70   :  { %5608 = vmatmul.msk.f32.gmra.mxu1 %vm345_vm9, %v5063_v30 }
0x4a74   :  { %5591 = vmatmul.msk.f32.gmra.mxu0 %vm345_vm9, %v5082_v6 }
0x4a7c   :  { %5592 = vmatmul.msk.f32.gmra.mxu0 %vm345_vm9, %v5083_v12 }
0x4a81   :  { %v5153_v58 = vpop.f32.mrf.mxu0 }
0x4a82   :  { %v5267_v54 = vadd.f32 %v5266_v14, %v5153_v58 }
0x4a84   :  { %v5318_v10 = vadd.f32 %v8045_v51, %v5267_v54 }
0x4a86   :  { %5335 = vst.msk [vmem:[%s8142_s15] sm:$0xff] %vm5334_vm2, %v5318_v10 }
0x4a89   :  { %v5156_v21 = vpop.f32.mrf.mxu0 }
0x4a8a   :  { %v5270_v13 = vadd.f32 %v5269_v42, %v5156_v21 }
0x4a8c   :  { %v5319_v60 = vadd.f32 %v8045_v51, %v5270_v13 }
0x4a8e   :  { %5336 = vst.msk [vmem:[%s8142_s15 + $0x8] sm:$0xff] %vm5334_vm2, %v5319_v60 }
0x4a91   :  { %v5159_v26 = vpop.f32.mrf.mxu0 }
0x4a92   :  { %v5273_v2 = vadd.f32 %v5272_v34, %v5159_v26 }
0x4a94   :  { %v5320_v25 = vadd.f32 %v8045_v51, %v5273_v2 }
0x4a96   :  { %5337 = vst.msk [vmem:[%s8142_s15 + $0x10] sm:$0xff] %vm5334_vm2, %v5320_v25 }
0x4a99   :  { %v5162_v41 = vpop.f32.mrf.mxu0 }
0x4a9a   :  { %v5276_v47 = vadd.f32 %v5275_v55, %v5162_v41 }
0x4a9c   :  { %v5321_v56 = vadd.f32 %v8045_v51, %v5276_v47 }
0x4a9e   :  { %5338 = vst.msk [vmem:[%s8142_s15 + $0x18] sm:$0xff] %vm5334_vm2, %v5321_v56 }
0x4aa1   :  { %v5165_v57 = vpop.f32.mrf.mxu0 }
0x4aa2   :  { %v5279_v63 = vadd.f32 %v5278_v32, %v5165_v57 }
0x4aa4   :  { %v5322_v46 = vadd.f32 %v8045_v51, %v5279_v63 }
0x4aa6   :  { %5339 = vst.msk [vmem:[%s8142_s15 + $0x20] sm:$0xff] %vm5334_vm2, %v5322_v46 }
0x4aa9   :  { %v5168_v50 = vpop.f32.mrf.mxu0 }
0x4aaa   :  { %v5282_v9 = vadd.f32 %v5281_v29, %v5168_v50 }
0x4aac   :  { %v5323_v36 = vadd.f32 %v8045_v51, %v5282_v9 }
0x4aae   :  { %5340 = vst.msk [vmem:[%s8142_s15 + $0x28] sm:$0xff] %vm5334_vm2, %v5323_v36 }
0x4ab1   :  { %v5171_v0 = vpop.f32.mrf.mxu0 }
0x4ab2   :  { %v5285_v53 = vadd.f32 %v5284_v7, %v5171_v0 }
0x4ab4   :  { %v5324_v33 = vadd.f32 %v8045_v51, %v5285_v53 }
0x4ab6   :  { %5341 = vst.msk [vmem:[%s8142_s15 + $0x30] sm:$0xff] %vm5334_vm2, %v5324_v33 }
0x4ab9   :  { %v5174_v35 = vpop.f32.mrf.mxu0 }
0x4aba   :  { %v5288_v28 = vadd.f32 %v5287_v4, %v5174_v35 }
0x4abc   :  { %v5325_v37 = vadd.f32 %v8045_v51, %v5288_v28 }
0x4abe   :  { %5342 = vst.msk [vmem:[%s8142_s15 + $0x38] sm:$0xff] %vm5334_vm2, %v5325_v37 }
0x4ac1   :  { %v5177_v62 = vpop.f32.mrf.mxu0 }
0x4ac2   :  { %v5291_v44 = vadd.f32 %v5290_v49, %v5177_v62 }
0x4ac4   :  { %v5326_v48 = vadd.f32 %v8045_v51, %v5291_v44 }
0x4ac6   :  { %5343 = vst.msk [vmem:[%s8142_s15 + $0x40] sm:$0xff] %vm5334_vm2, %v5326_v48 }
0x4ac9   :  { %v5180_v8 = vpop.f32.mrf.mxu0 }
0x4aca   :  { %v5294_v18 = vadd.f32 %v5293_v43, %v5180_v8 }
0x4acc   :  { %v5327_v52 = vadd.f32 %v8045_v51, %v5294_v18 }
0x4ace   :  { %5344 = vst.msk [vmem:[%s8142_s15 + $0x48] sm:$0xff] %vm5334_vm2, %v5327_v52 }
0x4ad1   :  { %v5183_v61 = vpop.f32.mrf.mxu0 }
0x4ad2   :  { %v5297_v15 = vadd.f32 %v5296_v39, %v5183_v61 }
0x4ad4   :  { %v5328_v59 = vadd.f32 %v8045_v51, %v5297_v15 }
0x4ad6   :  { %5345 = vst.msk [vmem:[%s8142_s15 + $0x50] sm:$0xff] %vm5334_vm2, %v5328_v59 }
0x4ad9   :  { %v5186_v3 = vpop.f32.mrf.mxu0 }
0x4ada   :  { %v5300_v38 = vadd.f32 %v5299_v27, %v5186_v3 }
0x4adc   :  { %v5329_v16 = vadd.f32 %v8045_v51, %v5300_v38 }
0x4ade   :  { %5346 = vst.msk [vmem:[%s8142_s15 + $0x58] sm:$0xff] %vm5334_vm2, %v5329_v16 }
0x4ae1   :  { %v5189_v22 = vpop.f32.mrf.mxu0 }
0x4ae2   :  { %v5303_v20 = vadd.f32 %v5302_v40, %v5189_v22 }
0x4ae4   :  { %v5330_v17 = vadd.f32 %v8045_v51, %v5303_v20 }
0x4ae6   :  { %5347 = vst.msk [vmem:[%s8142_s15 + $0x60] sm:$0xff] %vm5334_vm2, %v5330_v17 }
0x4ae9   :  { %v5192_v24 = vpop.f32.mrf.mxu0 }
0x4aea   :  { %v5306_v31 = vadd.f32 %v5305_v11, %v5192_v24 }
0x4aec   :  { %v5331_v19 = vadd.f32 %v8045_v51, %v5306_v31 }
0x4aed   :  { %v5311_v5 = vpop.f32.mrf.mxu1 }
0x4aee   :  { %5348 = vst.msk [vmem:[%s8142_s15 + $0x68] sm:$0xff] %vm5334_vm2, %v5331_v19 }
0x4af1   :  { %v5195_v45 = vpop.f32.mrf.mxu0 }
0x4af2   :  { %v5309_v1 = vadd.f32 %v5308_v23, %v5195_v45 }
0x4af4   :  { %v5332_v14 = vadd.f32 %v8045_v51, %v5309_v1 }
0x4af6   :  { %5349 = vst.msk [vmem:[%s8142_s15 + $0x70] sm:$0xff] %vm5334_vm2, %v5332_v14 }
0x4af9   :  { %v5198_v30 = vpop.f32.mrf.mxu0 }
0x4afa   :  { %v5312_v42 = vadd.f32 %v5311_v5, %v5198_v30 }
0x4afc   :  { %v5333_v6 = vadd.f32 %v8045_v51, %v5312_v42 }
0x4afe   :  { %5350 = vst.msk [vmem:[%s8142_s15 + $0x78] sm:$0xff] %vm5334_vm2, %v5333_v6 }
0x4aff   :  { %5355 = vsyncpa [#allocation7], 1 }
0x4b00   :  { %5356 = vsyncpa [#allocation9], 1 }

</bundles_post_ra>
